<compile_context>
chip_gen: v7x
topology: tpu7x:2x2x1
jax: 0.10.0
libtpu: 0.0.40
codegen_flags: <defaults>
</compile_context>

<pallas_src>
import functools
import math

import jax
import jax.numpy as jnp
from jax import lax
from jax.experimental import pallas as pl
from jax.experimental.pallas import tpu as pltpu

# ---------------- configuration (small shapes consistent with the module) ----
PATCH = 4
IMG_C, IMG_H, IMG_W = 4, 16, 16
NUM_PATCHES = (IMG_H // PATCH) * (IMG_W // PATCH)      # 16
D_MODEL = NUM_PATCHES                                  # block model dim = 16
SEQLEN = PATCH * PATCH * IMG_C                         # 64 tokens per sequence
NUM_BLOCKS = 2
BATCH = 2

D_STATE = 16
D_CONV = 4
EXPAND = 2
HEADDIM = 8
NGROUPS = 1
D_INNER = EXPAND * D_MODEL                             # 32
NHEADS = D_INNER // HEADDIM                            # 4
CONV_DIM = D_INNER + 2 * NGROUPS * D_STATE             # 64
D_IN_PROJ = 2 * D_INNER + 2 * NGROUPS * D_STATE + NHEADS   # 100
D_IN_PROJ_PAD = 128                                    # zero-padded, lane-dense
RMS_EPS = 1e-5

BL = BATCH * SEQLEN                                    # 128 rows when fused


# ------------------------------ in-kernel helpers -----------------------------
def _silu(x):
    # x * sigmoid(x); reciprocal goes to the EUP approximate slot (nearly free).
    return x * pl.reciprocal(1.0 + jnp.exp(-x), approx=True)


def _softplus(x):
    return jnp.maximum(x, 0.0) + jnp.log(1.0 + jnp.exp(-jnp.abs(x)))


# -------------------------------- fused kernel --------------------------------
def mamba_model_kernel(u_ref, tmask_ref, rollmask_ref, colmask_ref,
                       in_w_ref, conv_w_ref, conv_b_ref, head_ref,
                       d_rep_ref, norm_w_ref, out_w_ref, o_ref):
    u = u_ref[0]                                               # (rows, D_MODEL)

    for layer in range(NUM_BLOCKS):
        is_last = layer == NUM_BLOCKS - 1

        # ---- in_proj: columns packed as [xBC | z | dt | pad], xBC at lane 0 --
        zxbcdt = jnp.dot(u, in_w_ref[layer],
                         preferred_element_type=jnp.float32)  # (rows, 128)
        xBC = zxbcdt[:, :CONV_DIM]                             # (rows, 64)
        z = zxbcdt[:, CONV_DIM:CONV_DIM + D_INNER]             # (rows, 32)
        dt_raw = zxbcdt[:, CONV_DIM + D_INNER:CONV_DIM + D_INNER + NHEADS]

        hp = head_ref[layer:layer + 1, :]                      # (1, 2*NHEADS)
        dt = _softplus(dt_raw + hp[:, :NHEADS])                # (rows, NHEADS)
        A = hp[:, NHEADS:2 * NHEADS]                           # = -exp(A_log)

        # ---- causal depthwise conv1d + SiLU: XLU roll + boundary mask --------
        wk = conv_w_ref[layer]                                 # (D_CONV, CONV_DIM)
        conv_out = conv_b_ref[layer:layer + 1, :] + xBC * wk[D_CONV - 1:D_CONV, :]
        for s in range(1, D_CONV):                             # taps needing shift s
            tap = xBC * wk[D_CONV - 1 - s:D_CONV - s, :]
            conv_out = conv_out + (pltpu.roll(tap, s, 0)
                                   * rollmask_ref[:, s - 1:s])
        xBC_act = _silu(conv_out)                              # (rows, CONV_DIM)

        x = xBC_act[:, :D_INNER]                               # (rows, 32)
        Bm = xBC_act[:, D_INNER:D_INNER + D_STATE]             # (rows, 16)
        Cm = xBC_act[:, D_INNER + D_STATE:]                    # (rows, 16)

        # ---- SSD scan (exact quadratic causal form of chunk_scan_combined) ---
        tmask = tmask_ref[...]                                 # (rows, rows)
        dA = dt * A                                            # (rows, NHEADS), <= 0
        cs = jnp.dot(tmask, dA,
                     preferred_element_type=jnp.float32)       # inclusive cumsum
        cs_t = lax.dot_general(dA, tmask, (((0,), (1,)), ((), ())),
                               preferred_element_type=jnp.float32)  # (NHEADS, rows)
        CBm = lax.dot_general(Cm, Bm, (((1,), (1,)), ((), ())),
                              preferred_element_type=jnp.float32) * tmask

        # D-skip term, then accumulate each head's contribution in registers
        # (column-masked RHS keeps all writes lane-dense; no scratch stores).
        y = x * d_rep_ref[layer:layer + 1, :]                  # (rows, D_INNER)
        for h in range(NHEADS):
            scores = CBm * jnp.exp(
                jnp.minimum(cs[:, h:h + 1] - cs_t[h:h + 1, :], 0.0))
            xdt_h = x * (dt[:, h:h + 1] * colmask_ref[h:h + 1, :])
            y = y + jnp.dot(scores, xdt_h, preferred_element_type=jnp.float32)

        # ---- gated RMSNorm (norm_before_gate=False) ---------------------------
        yg = y * _silu(z)
        var = jnp.mean(yg * yg, axis=-1, keepdims=True)
        yn = yg * lax.rsqrt(var + RMS_EPS) * norm_w_ref[layer:layer + 1, :]

        # ---- out_proj ----------------------------------------------------------
        W_out = out_w_ref[layer]                               # (D_MODEL, D_INNER)
        if is_last:
            # transposed product (D_MODEL, rows): lane-dense store, folds the
            # model's final permute(0, 2, 1) into the kernel.
            o_ref[0, :, :] = lax.dot_general(
                W_out, yn, (((1,), (1,)), ((), ())),
                preferred_element_type=jnp.float32)
        else:
            u = lax.dot_general(yn, W_out, (((1,), (1,)), ((), ())),
                                preferred_element_type=jnp.float32)


# -------------------------------- wrapper --------------------------------------
def _const_spec(shape):
    zeros = (0,) * len(shape)
    return pl.BlockSpec(shape, lambda i, _z=zeros: _z)


def patchify(x):
    # 'b c (h p1) (w p2) -> b (h w) (p1 p2 c)' then permute(0, 2, 1)
    B, C, H, W = x.shape
    hP, wP = H // PATCH, W // PATCH
    x = x.reshape(B, C, hP, PATCH, wP, PATCH)
    x = jnp.transpose(x, (0, 2, 4, 3, 5, 1))          # b h w p1 p2 c
    x = x.reshape(B, hP * wP, PATCH * PATCH * C)      # (B, num_patches, patch_dim)
    return jnp.transpose(x, (0, 2, 1))                # (B, seqlen, d_model)


def mamba_model_forward(x, params, masks, *, split):
    seq = patchify(x)                                 # (BATCH, SEQLEN, D_MODEL)
    if split:
        u, nprog, rows = seq, BATCH, SEQLEN           # one sequence per TensorCore (v7x)
    else:
        u, nprog, rows = seq.reshape(1, BL, D_MODEL), 1, BL

    out = pl.pallas_call(
        mamba_model_kernel,
        out_shape=jax.ShapeDtypeStruct((nprog, D_MODEL, rows), jnp.float32),
        grid=(nprog,),
        in_specs=[
            pl.BlockSpec((1, rows, D_MODEL), lambda i: (i, 0, 0)),   # tokens
            _const_spec((rows, rows)),                               # causal mask
            _const_spec((rows, D_CONV - 1)),                         # roll boundary mask
            _const_spec((NHEADS, D_INNER)),                          # head column mask
            _const_spec((NUM_BLOCKS, D_MODEL, D_IN_PROJ_PAD)),       # in_proj^T (packed)
            _const_spec((NUM_BLOCKS, D_CONV, CONV_DIM)),             # conv taps
            _const_spec((NUM_BLOCKS, CONV_DIM)),                     # conv bias
            _const_spec((NUM_BLOCKS, 2 * NHEADS)),                   # [dt_bias | -exp(A_log)]
            _const_spec((NUM_BLOCKS, D_INNER)),                      # D expanded per channel
            _const_spec((NUM_BLOCKS, D_INNER)),                      # norm weight
            _const_spec((NUM_BLOCKS, D_MODEL, D_INNER)),             # out_proj
        ],
        out_specs=pl.BlockSpec((1, D_MODEL, rows), lambda i: (i, 0, 0)),
        compiler_params=pltpu.CompilerParams(
            dimension_semantics=("parallel",)),
    )(u, masks["tmask"], masks["rollmask"], masks["colmask"],
      params["in_w"], params["conv_w"], params["conv_b"], params["head"],
      params["d_rep"], params["norm_w"], params["out_w"])

    if split:
        return out                                    # already (B, num_patches, patch_dim)
    return out[0].reshape(D_MODEL, BATCH, SEQLEN).transpose(1, 0, 2)


def build_masks(rows):
    r = jnp.arange(rows, dtype=jnp.int32)
    same_seq = (r[:, None] // SEQLEN) == (r[None, :] // SEQLEN)
    tmask = ((r[:, None] >= r[None, :]) & same_seq).astype(jnp.float32)
    tpos = r % SEQLEN
    rollmask = jnp.stack([(tpos >= s) for s in range(1, D_CONV)],
                         axis=1).astype(jnp.float32)            # (rows, D_CONV-1)
    head_id = jnp.arange(D_INNER, dtype=jnp.int32) // HEADDIM
    colmask = (head_id[None, :] ==
               jnp.arange(NHEADS, dtype=jnp.int32)[:, None]).astype(jnp.float32)
    return dict(tmask=tmask, rollmask=rollmask, colmask=colmask)


def init_params(key):
    packed = {k: [] for k in ("in_w", "conv_w", "conv_b", "head",
                              "d_rep", "norm_w", "out_w")}
    raw = []
    for i in range(NUM_BLOCKS):
        ks = jax.random.split(jax.random.fold_in(key, i), 6)
        in_w = jax.random.normal(ks[0], (D_IN_PROJ, D_MODEL), jnp.float32) / math.sqrt(D_MODEL)
        conv_w = jax.random.normal(ks[1], (CONV_DIM, D_CONV), jnp.float32) / math.sqrt(D_CONV)
        conv_b = jax.random.normal(ks[2], (CONV_DIM,), jnp.float32) * 0.05
        u01 = jax.random.uniform(ks[3], (NHEADS,), jnp.float32)
        dt = jnp.exp(u01 * (math.log(0.1) - math.log(0.001)) + math.log(0.001))
        dt = jnp.maximum(dt, 1e-4)
        dt_bias = dt + jnp.log(-jnp.expm1(-dt))
        A_log = jnp.log(jax.random.uniform(ks[4], (NHEADS,), jnp.float32,
                                           minval=1.0, maxval=16.0))
        Dp = jnp.ones((NHEADS,), jnp.float32)
        norm_w = jnp.ones((D_INNER,), jnp.float32)
        out_w = jax.random.normal(ks[5], (D_MODEL, D_INNER), jnp.float32) / math.sqrt(D_INNER)
        raw.append(dict(in_w=in_w, conv_w=conv_w, conv_b=conv_b, dt_bias=dt_bias,
                        A_log=A_log, D=Dp, norm_w=norm_w, out_w=out_w))

        # --- pack for the kernel: columns [xBC(64) | z(32) | dt(4) | pad(28)] ---
        in_w_t = in_w.T                                        # (D_MODEL, 100), torch order [z|xBC|dt]
        in_w_packed = jnp.zeros((D_MODEL, D_IN_PROJ_PAD), jnp.float32)
        in_w_packed = in_w_packed.at[:, :CONV_DIM].set(
            in_w_t[:, D_INNER:D_INNER + CONV_DIM])
        in_w_packed = in_w_packed.at[:, CONV_DIM:CONV_DIM + D_INNER].set(
            in_w_t[:, :D_INNER])
        in_w_packed = in_w_packed.at[:, CONV_DIM + D_INNER:CONV_DIM + D_INNER + NHEADS].set(
            in_w_t[:, D_INNER + CONV_DIM:])
        packed["in_w"].append(in_w_packed)
        packed["conv_w"].append(conv_w.T)                      # (D_CONV, CONV_DIM)
        packed["conv_b"].append(conv_b)
        packed["head"].append(jnp.concatenate([dt_bias, -jnp.exp(A_log)]))
        packed["d_rep"].append(jnp.repeat(Dp, HEADDIM))        # D per inner channel
        packed["norm_w"].append(norm_w)
        packed["out_w"].append(out_w)
    packed = {k: jnp.stack(v, 0) for k, v in packed.items()}
    return packed, raw


# ---------------------- pure-JAX reference (for self-check) --------------------
def ref_forward(x, raw_params):
    u = patchify(x)                                            # (B, L, D_MODEL)
    B, L, _ = u.shape
    mask = jnp.tril(jnp.ones((L, L), jnp.float32))
    for p in raw_params:
        zxbcdt = u @ p["in_w"].T
        z = zxbcdt[..., :D_INNER]
        xBC = zxbcdt[..., D_INNER:D_INNER + CONV_DIM]
        dt = jax.nn.softplus(zxbcdt[..., D_INNER + CONV_DIM:] + p["dt_bias"])
        xpad = jnp.pad(xBC, ((0, 0), (D_CONV - 1, 0), (0, 0)))
        conv = p["conv_b"] + sum(xpad[:, k:k + L, :] * p["conv_w"][:, k]
                                 for k in range(D_CONV))
        xBC_a = jax.nn.silu(conv)
        xh = xBC_a[..., :D_INNER].reshape(B, L, NHEADS, HEADDIM)
        Bm = xBC_a[..., D_INNER:D_INNER + D_STATE]
        Cm = xBC_a[..., D_INNER + D_STATE:]
        dA = dt * (-jnp.exp(p["A_log"]))
        cs = jnp.cumsum(dA, axis=1)
        diff = cs[:, :, None, :] - cs[:, None, :, :]           # (B, t, s, H)
        CB = jnp.einsum("btn,bsn->bts", Cm, Bm)
        scores = (CB[..., None] * jnp.exp(jnp.minimum(diff, 0.0))
                  * mask[None, :, :, None])
        y = (jnp.einsum("btsh,bsh,bshp->bthp", scores, dt, xh)
             + p["D"][None, None, :, None] * xh).reshape(B, L, D_INNER)
        yg = y * jax.nn.silu(z)
        yn = yg * lax.rsqrt(jnp.mean(yg * yg, axis=-1, keepdims=True) + RMS_EPS) * p["norm_w"]
        u = yn @ p["out_w"].T
    return jnp.transpose(u, (0, 2, 1))                         # (B, num_patches, patch_dim)


def _use_batch_split():
    # v7x has two TensorCores per chip: give each one a full 64-token sequence.
    try:
        kind = jax.devices()[0].device_kind.lower()
    except Exception:
        return False
    return ("v7" in kind) or ("7x" in kind)


if __name__ == "__main__":
    key = jax.random.PRNGKey(0)
    xkey, pkey = jax.random.split(key)
    x = jax.random.normal(xkey, (BATCH, IMG_C, IMG_H, IMG_W), jnp.float32)
    params, raw_params = init_params(pkey)

    split = _use_batch_split() and BATCH > 1
    masks = build_masks(SEQLEN if split else BL)

    forward = jax.jit(functools.partial(mamba_model_forward, split=split))
    out = forward(x, params, masks)
    jax.block_until_ready(out)
    assert out.shape == (BATCH, NUM_PATCHES, SEQLEN)

    # numerical self-check against a plain-JAX reference of the same module
    ref = jax.jit(ref_forward)(x, raw_params)
    jax.block_until_ready(ref)
    err = float(jnp.max(jnp.abs(out - ref)))
    scale = float(jnp.max(jnp.abs(ref)))
    assert err <= 5e-2 * (1.0 + scale), f"kernel/reference mismatch: {err} (scale {scale})"

    print("KERNEL_OK")
</pallas_src>

<mosaic_0001>
module attributes {stable_mosaic.version = 11 : i64} {
  func.func @mamba_model_kernel(%arg0: i32, %arg1: memref<1x128x16xf32, #tpu.memory_space<vmem>>, %arg2: memref<128x128xf32, #tpu.memory_space<vmem>>, %arg3: memref<128x3xf32, #tpu.memory_space<vmem>>, %arg4: memref<4x32xf32, #tpu.memory_space<vmem>>, %arg5: memref<2x16x128xf32, #tpu.memory_space<vmem>>, %arg6: memref<2x4x64xf32, #tpu.memory_space<vmem>>, %arg7: memref<2x64xf32, #tpu.memory_space<vmem>>, %arg8: memref<2x8xf32, #tpu.memory_space<vmem>>, %arg9: memref<2x32xf32, #tpu.memory_space<vmem>>, %arg10: memref<2x32xf32, #tpu.memory_space<vmem>>, %arg11: memref<2x16x32xf32, #tpu.memory_space<vmem>>, %arg12: memref<1x16x128xf32, #tpu.memory_space<vmem>>) attributes {dimension_semantics = [#tpu.dimension_semantics<parallel>], iteration_bounds = array<i64: 1>, scalar_prefetch = 0 : i64, scratch_operands = 0 : i64, tpu.core_type = #tpu.core_type<tc>, window_params = [{transform_indices = @transform_0, window_bounds = array<i64: 1, 128, 16>}, {pipeline_mode = #tpu.pipeline_mode<synchronous>, transform_indices = @transform_1, window_bounds = array<i64: 128, 128>}, {pipeline_mode = #tpu.pipeline_mode<synchronous>, transform_indices = @transform_2, window_bounds = array<i64: 128, 3>}, {pipeline_mode = #tpu.pipeline_mode<synchronous>, transform_indices = @transform_3, window_bounds = array<i64: 4, 32>}, {pipeline_mode = #tpu.pipeline_mode<synchronous>, transform_indices = @transform_4, window_bounds = array<i64: 2, 16, 128>}, {pipeline_mode = #tpu.pipeline_mode<synchronous>, transform_indices = @transform_5, window_bounds = array<i64: 2, 4, 64>}, {pipeline_mode = #tpu.pipeline_mode<synchronous>, transform_indices = @transform_6, window_bounds = array<i64: 2, 64>}, {pipeline_mode = #tpu.pipeline_mode<synchronous>, transform_indices = @transform_7, window_bounds = array<i64: 2, 8>}, {pipeline_mode = #tpu.pipeline_mode<synchronous>, transform_indices = @transform_8, window_bounds = array<i64: 2, 32>}, {pipeline_mode = #tpu.pipeline_mode<synchronous>, transform_indices = @transform_9, window_bounds = array<i64: 2, 32>}, {pipeline_mode = #tpu.pipeline_mode<synchronous>, transform_indices = @transform_10, window_bounds = array<i64: 2, 16, 32>}, {transform_indices = @transform_11, window_bounds = array<i64: 1, 16, 128>}]} {
    %c0 = arith.constant 0 : index
    %c0_0 = arith.constant 0 : index
    %c0_1 = arith.constant 0 : index
    %0 = vector.load %arg1[%c0, %c0_0, %c0_1] : memref<1x128x16xf32, #tpu.memory_space<vmem>>, vector<1x128x16xf32>
    %1 = vector.shape_cast %0 : vector<1x128x16xf32> to vector<128x16xf32>
    %c0_2 = arith.constant 0 : index
    %c0_3 = arith.constant 0 : index
    %c0_4 = arith.constant 0 : index
    %2 = vector.load %arg5[%c0_2, %c0_3, %c0_4] : memref<2x16x128xf32, #tpu.memory_space<vmem>>, vector<1x16x128xf32>
    %3 = vector.shape_cast %2 : vector<1x16x128xf32> to vector<16x128xf32>
    %cst = arith.constant dense<0.000000e+00> : vector<128x128xf32>
    %4 = tpu.matmul %1, %3, %cst {dimension_numbers = #tpu.dot_dimension_numbers<[1], [0], [0], [1], [0, 0, 1, 1], [], []>} : vector<128x16xf32>, vector<16x128xf32>, vector<128x128xf32> -> vector<128x128xf32>
    %5 = vector.extract_strided_slice %4 {offsets = [0, 0], sizes = [128, 64], strides = [1, 1]} : vector<128x128xf32> to vector<128x64xf32>
    %6 = vector.extract_strided_slice %4 {offsets = [0, 64], sizes = [128, 32], strides = [1, 1]} : vector<128x128xf32> to vector<128x32xf32>
    %7 = vector.extract_strided_slice %4 {offsets = [0, 96], sizes = [128, 4], strides = [1, 1]} : vector<128x128xf32> to vector<128x4xf32>
    %c0_5 = arith.constant 0 : index
    %c0_6 = arith.constant 0 : index
    %8 = vector.load %arg8[%c0_5, %c0_6] : memref<2x8xf32, #tpu.memory_space<vmem>>, vector<1x8xf32>
    %9 = vector.extract_strided_slice %8 {offsets = [0, 0], sizes = [1, 4], strides = [1, 1]} : vector<1x8xf32> to vector<1x4xf32>
    %10 = vector.broadcast %9 : vector<1x4xf32> to vector<128x4xf32>
    %11 = arith.addf %7, %10 : vector<128x4xf32>
    %cst_7 = arith.constant 0.000000e+00 : f32
    %12 = vector.broadcast %cst_7 : f32 to vector<128x4xf32>
    %13 = arith.maximumf %11, %12 : vector<128x4xf32>
    %14 = math.absf %11 : vector<128x4xf32>
    %cst_8 = arith.constant 0.000000e+00 : f32
    %15 = vector.broadcast %cst_8 : f32 to vector<128x4xf32>
    %16 = arith.subf %15, %14 : vector<128x4xf32>
    %17 = math.exp %16 : vector<128x4xf32>
    %cst_9 = arith.constant 1.000000e+00 : f32
    %18 = vector.broadcast %cst_9 : f32 to vector<128x4xf32>
    %19 = arith.addf %18, %17 : vector<128x4xf32>
    %20 = math.log %19 : vector<128x4xf32>
    %21 = arith.addf %13, %20 : vector<128x4xf32>
    %22 = vector.extract_strided_slice %8 {offsets = [0, 4], sizes = [1, 4], strides = [1, 1]} : vector<1x8xf32> to vector<1x4xf32>
    %c0_10 = arith.constant 0 : index
    %c0_11 = arith.constant 0 : index
    %c0_12 = arith.constant 0 : index
    %23 = vector.load %arg6[%c0_10, %c0_11, %c0_12] : memref<2x4x64xf32, #tpu.memory_space<vmem>>, vector<1x4x64xf32>
    %24 = vector.shape_cast %23 : vector<1x4x64xf32> to vector<4x64xf32>
    %c0_13 = arith.constant 0 : index
    %c0_14 = arith.constant 0 : index
    %25 = vector.load %arg7[%c0_13, %c0_14] : memref<2x64xf32, #tpu.memory_space<vmem>>, vector<1x64xf32>
    %26 = vector.extract_strided_slice %24 {offsets = [3, 0], sizes = [1, 64], strides = [1, 1]} : vector<4x64xf32> to vector<1x64xf32>
    %27 = vector.broadcast %26 : vector<1x64xf32> to vector<128x64xf32>
    %28 = arith.mulf %5, %27 : vector<128x64xf32>
    %29 = vector.broadcast %25 : vector<1x64xf32> to vector<128x64xf32>
    %30 = arith.addf %29, %28 : vector<128x64xf32>
    %31 = vector.extract_strided_slice %24 {offsets = [2, 0], sizes = [1, 64], strides = [1, 1]} : vector<4x64xf32> to vector<1x64xf32>
    %32 = vector.broadcast %31 : vector<1x64xf32> to vector<128x64xf32>
    %33 = arith.mulf %5, %32 : vector<128x64xf32>
    %c1_i32 = arith.constant 1 : i32
    %34 = tpu.dynamic_rotate %33 by %c1_i32 dim 0 : vector<128x64xf32>, i32 -> vector<128x64xf32>
    %c0_15 = arith.constant 0 : index
    %c0_16 = arith.constant 0 : index
    %35 = vector.load %arg3[%c0_15, %c0_16] : memref<128x3xf32, #tpu.memory_space<vmem>>, vector<128x1xf32>
    %36 = vector.broadcast %35 : vector<128x1xf32> to vector<128x64xf32>
    %37 = arith.mulf %34, %36 : vector<128x64xf32>
    %38 = arith.addf %30, %37 : vector<128x64xf32>
    %39 = vector.extract_strided_slice %24 {offsets = [1, 0], sizes = [1, 64], strides = [1, 1]} : vector<4x64xf32> to vector<1x64xf32>
    %40 = vector.broadcast %39 : vector<1x64xf32> to vector<128x64xf32>
    %41 = arith.mulf %5, %40 : vector<128x64xf32>
    %c2_i32 = arith.constant 2 : i32
    %42 = tpu.dynamic_rotate %41 by %c2_i32 dim 0 : vector<128x64xf32>, i32 -> vector<128x64xf32>
    %c0_17 = arith.constant 0 : index
    %c1 = arith.constant 1 : index
    %43 = vector.load %arg3[%c0_17, %c1] : memref<128x3xf32, #tpu.memory_space<vmem>>, vector<128x1xf32>
    %44 = vector.broadcast %43 : vector<128x1xf32> to vector<128x64xf32>
    %45 = arith.mulf %42, %44 : vector<128x64xf32>
    %46 = arith.addf %38, %45 : vector<128x64xf32>
    %47 = vector.extract_strided_slice %24 {offsets = [0, 0], sizes = [1, 64], strides = [1, 1]} : vector<4x64xf32> to vector<1x64xf32>
    %48 = vector.broadcast %47 : vector<1x64xf32> to vector<128x64xf32>
    %49 = arith.mulf %5, %48 : vector<128x64xf32>
    %c3_i32 = arith.constant 3 : i32
    %50 = tpu.dynamic_rotate %49 by %c3_i32 dim 0 : vector<128x64xf32>, i32 -> vector<128x64xf32>
    %c0_18 = arith.constant 0 : index
    %c2 = arith.constant 2 : index
    %51 = vector.load %arg3[%c0_18, %c2] : memref<128x3xf32, #tpu.memory_space<vmem>>, vector<128x1xf32>
    %52 = vector.broadcast %51 : vector<128x1xf32> to vector<128x64xf32>
    %53 = arith.mulf %50, %52 : vector<128x64xf32>
    %54 = arith.addf %46, %53 : vector<128x64xf32>
    %cst_19 = arith.constant 0.000000e+00 : f32
    %55 = vector.broadcast %cst_19 : f32 to vector<128x64xf32>
    %56 = arith.subf %55, %54 : vector<128x64xf32>
    %57 = math.exp %56 : vector<128x64xf32>
    %cst_20 = arith.constant 1.000000e+00 : f32
    %58 = vector.broadcast %cst_20 : f32 to vector<128x64xf32>
    %59 = arith.addf %58, %57 : vector<128x64xf32>
    %60 = tpu.reciprocal %59 {approx = true} : vector<128x64xf32> -> vector<128x64xf32>
    %61 = arith.mulf %54, %60 : vector<128x64xf32>
    %62 = vector.extract_strided_slice %61 {offsets = [0, 0], sizes = [128, 32], strides = [1, 1]} : vector<128x64xf32> to vector<128x32xf32>
    %63 = vector.extract_strided_slice %61 {offsets = [0, 32], sizes = [128, 16], strides = [1, 1]} : vector<128x64xf32> to vector<128x16xf32>
    %64 = vector.extract_strided_slice %61 {offsets = [0, 48], sizes = [128, 16], strides = [1, 1]} : vector<128x64xf32> to vector<128x16xf32>
    %c0_21 = arith.constant 0 : index
    %c0_22 = arith.constant 0 : index
    %65 = vector.load %arg2[%c0_21, %c0_22] : memref<128x128xf32, #tpu.memory_space<vmem>>, vector<128x128xf32>
    %66 = vector.broadcast %22 : vector<1x4xf32> to vector<128x4xf32>
    %67 = arith.mulf %21, %66 : vector<128x4xf32>
    %cst_23 = arith.constant dense<0.000000e+00> : vector<128x4xf32>
    %68 = tpu.matmul %65, %67, %cst_23 {dimension_numbers = #tpu.dot_dimension_numbers<[1], [0], [0], [1], [0, 0, 1, 1], [], []>} : vector<128x128xf32>, vector<128x4xf32>, vector<128x4xf32> -> vector<128x4xf32>
    %cst_24 = arith.constant dense<0.000000e+00> : vector<4x128xf32>
    %69 = tpu.matmul %67, %65, %cst_24 {dimension_numbers = #tpu.dot_dimension_numbers<[0], [1], [1], [0], [0, 1, 1, 0], [], []>} : vector<128x4xf32>, vector<128x128xf32>, vector<4x128xf32> -> vector<4x128xf32>
    %cst_25 = arith.constant dense<0.000000e+00> : vector<128x128xf32>
    %70 = tpu.matmul %64, %63, %cst_25 {dimension_numbers = #tpu.dot_dimension_numbers<[1], [1], [0], [0], [0, 0, 1, 0], [], []>} : vector<128x16xf32>, vector<128x16xf32>, vector<128x128xf32> -> vector<128x128xf32>
    %71 = arith.mulf %70, %65 : vector<128x128xf32>
    %c0_26 = arith.constant 0 : index
    %c0_27 = arith.constant 0 : index
    %72 = vector.load %arg9[%c0_26, %c0_27] : memref<2x32xf32, #tpu.memory_space<vmem>>, vector<1x32xf32>
    %73 = vector.broadcast %72 : vector<1x32xf32> to vector<128x32xf32>
    %74 = arith.mulf %62, %73 : vector<128x32xf32>
    %75 = vector.extract_strided_slice %68 {offsets = [0, 0], sizes = [128, 1], strides = [1, 1]} : vector<128x4xf32> to vector<128x1xf32>
    %76 = vector.extract_strided_slice %69 {offsets = [0, 0], sizes = [1, 128], strides = [1, 1]} : vector<4x128xf32> to vector<1x128xf32>
    %77 = vector.broadcast %75 : vector<128x1xf32> to vector<128x128xf32>
    %78 = vector.broadcast %76 : vector<1x128xf32> to vector<128x128xf32>
    %79 = arith.subf %77, %78 : vector<128x128xf32>
    %cst_28 = arith.constant 0.000000e+00 : f32
    %80 = vector.broadcast %cst_28 : f32 to vector<128x128xf32>
    %81 = arith.minimumf %79, %80 : vector<128x128xf32>
    %82 = math.exp %81 : vector<128x128xf32>
    %83 = arith.mulf %71, %82 : vector<128x128xf32>
    %84 = vector.extract_strided_slice %21 {offsets = [0, 0], sizes = [128, 1], strides = [1, 1]} : vector<128x4xf32> to vector<128x1xf32>
    %c0_29 = arith.constant 0 : index
    %c0_30 = arith.constant 0 : index
    %85 = vector.load %arg4[%c0_29, %c0_30] : memref<4x32xf32, #tpu.memory_space<vmem>>, vector<1x32xf32>
    %86 = vector.broadcast %84 : vector<128x1xf32> to vector<128x32xf32>
    %87 = vector.broadcast %85 : vector<1x32xf32> to vector<128x32xf32>
    %88 = arith.mulf %86, %87 : vector<128x32xf32>
    %89 = arith.mulf %62, %88 : vector<128x32xf32>
    %cst_31 = arith.constant dense<0.000000e+00> : vector<128x32xf32>
    %90 = tpu.matmul %83, %89, %cst_31 {dimension_numbers = #tpu.dot_dimension_numbers<[1], [0], [0], [1], [0, 0, 1, 1], [], []>} : vector<128x128xf32>, vector<128x32xf32>, vector<128x32xf32> -> vector<128x32xf32>
    %91 = arith.addf %74, %90 : vector<128x32xf32>
    %92 = vector.extract_strided_slice %68 {offsets = [0, 1], sizes = [128, 1], strides = [1, 1]} : vector<128x4xf32> to vector<128x1xf32>
    %93 = vector.extract_strided_slice %69 {offsets = [1, 0], sizes = [1, 128], strides = [1, 1]} : vector<4x128xf32> to vector<1x128xf32>
    %94 = vector.broadcast %92 : vector<128x1xf32> to vector<128x128xf32>
    %95 = vector.broadcast %93 : vector<1x128xf32> to vector<128x128xf32>
    %96 = arith.subf %94, %95 : vector<128x128xf32>
    %cst_32 = arith.constant 0.000000e+00 : f32
    %97 = vector.broadcast %cst_32 : f32 to vector<128x128xf32>
    %98 = arith.minimumf %96, %97 : vector<128x128xf32>
    %99 = math.exp %98 : vector<128x128xf32>
    %100 = arith.mulf %71, %99 : vector<128x128xf32>
    %101 = vector.extract_strided_slice %21 {offsets = [0, 1], sizes = [128, 1], strides = [1, 1]} : vector<128x4xf32> to vector<128x1xf32>
    %c1_33 = arith.constant 1 : index
    %c0_34 = arith.constant 0 : index
    %102 = vector.load %arg4[%c1_33, %c0_34] : memref<4x32xf32, #tpu.memory_space<vmem>>, vector<1x32xf32>
    %103 = vector.broadcast %101 : vector<128x1xf32> to vector<128x32xf32>
    %104 = vector.broadcast %102 : vector<1x32xf32> to vector<128x32xf32>
    %105 = arith.mulf %103, %104 : vector<128x32xf32>
    %106 = arith.mulf %62, %105 : vector<128x32xf32>
    %cst_35 = arith.constant dense<0.000000e+00> : vector<128x32xf32>
    %107 = tpu.matmul %100, %106, %cst_35 {dimension_numbers = #tpu.dot_dimension_numbers<[1], [0], [0], [1], [0, 0, 1, 1], [], []>} : vector<128x128xf32>, vector<128x32xf32>, vector<128x32xf32> -> vector<128x32xf32>
    %108 = arith.addf %91, %107 : vector<128x32xf32>
    %109 = vector.extract_strided_slice %68 {offsets = [0, 2], sizes = [128, 1], strides = [1, 1]} : vector<128x4xf32> to vector<128x1xf32>
    %110 = vector.extract_strided_slice %69 {offsets = [2, 0], sizes = [1, 128], strides = [1, 1]} : vector<4x128xf32> to vector<1x128xf32>
    %111 = vector.broadcast %109 : vector<128x1xf32> to vector<128x128xf32>
    %112 = vector.broadcast %110 : vector<1x128xf32> to vector<128x128xf32>
    %113 = arith.subf %111, %112 : vector<128x128xf32>
    %cst_36 = arith.constant 0.000000e+00 : f32
    %114 = vector.broadcast %cst_36 : f32 to vector<128x128xf32>
    %115 = arith.minimumf %113, %114 : vector<128x128xf32>
    %116 = math.exp %115 : vector<128x128xf32>
    %117 = arith.mulf %71, %116 : vector<128x128xf32>
    %118 = vector.extract_strided_slice %21 {offsets = [0, 2], sizes = [128, 1], strides = [1, 1]} : vector<128x4xf32> to vector<128x1xf32>
    %c2_37 = arith.constant 2 : index
    %c0_38 = arith.constant 0 : index
    %119 = vector.load %arg4[%c2_37, %c0_38] : memref<4x32xf32, #tpu.memory_space<vmem>>, vector<1x32xf32>
    %120 = vector.broadcast %118 : vector<128x1xf32> to vector<128x32xf32>
    %121 = vector.broadcast %119 : vector<1x32xf32> to vector<128x32xf32>
    %122 = arith.mulf %120, %121 : vector<128x32xf32>
    %123 = arith.mulf %62, %122 : vector<128x32xf32>
    %cst_39 = arith.constant dense<0.000000e+00> : vector<128x32xf32>
    %124 = tpu.matmul %117, %123, %cst_39 {dimension_numbers = #tpu.dot_dimension_numbers<[1], [0], [0], [1], [0, 0, 1, 1], [], []>} : vector<128x128xf32>, vector<128x32xf32>, vector<128x32xf32> -> vector<128x32xf32>
    %125 = arith.addf %108, %124 : vector<128x32xf32>
    %126 = vector.extract_strided_slice %68 {offsets = [0, 3], sizes = [128, 1], strides = [1, 1]} : vector<128x4xf32> to vector<128x1xf32>
    %127 = vector.extract_strided_slice %69 {offsets = [3, 0], sizes = [1, 128], strides = [1, 1]} : vector<4x128xf32> to vector<1x128xf32>
    %128 = vector.broadcast %126 : vector<128x1xf32> to vector<128x128xf32>
    %129 = vector.broadcast %127 : vector<1x128xf32> to vector<128x128xf32>
    %130 = arith.subf %128, %129 : vector<128x128xf32>
    %cst_40 = arith.constant 0.000000e+00 : f32
    %131 = vector.broadcast %cst_40 : f32 to vector<128x128xf32>
    %132 = arith.minimumf %130, %131 : vector<128x128xf32>
    %133 = math.exp %132 : vector<128x128xf32>
    %134 = arith.mulf %71, %133 : vector<128x128xf32>
    %135 = vector.extract_strided_slice %21 {offsets = [0, 3], sizes = [128, 1], strides = [1, 1]} : vector<128x4xf32> to vector<128x1xf32>
    %c3 = arith.constant 3 : index
    %c0_41 = arith.constant 0 : index
    %136 = vector.load %arg4[%c3, %c0_41] : memref<4x32xf32, #tpu.memory_space<vmem>>, vector<1x32xf32>
    %137 = vector.broadcast %135 : vector<128x1xf32> to vector<128x32xf32>
    %138 = vector.broadcast %136 : vector<1x32xf32> to vector<128x32xf32>
    %139 = arith.mulf %137, %138 : vector<128x32xf32>
    %140 = arith.mulf %62, %139 : vector<128x32xf32>
    %cst_42 = arith.constant dense<0.000000e+00> : vector<128x32xf32>
    %141 = tpu.matmul %134, %140, %cst_42 {dimension_numbers = #tpu.dot_dimension_numbers<[1], [0], [0], [1], [0, 0, 1, 1], [], []>} : vector<128x128xf32>, vector<128x32xf32>, vector<128x32xf32> -> vector<128x32xf32>
    %142 = arith.addf %125, %141 : vector<128x32xf32>
    %cst_43 = arith.constant 0.000000e+00 : f32
    %143 = vector.broadcast %cst_43 : f32 to vector<128x32xf32>
    %144 = arith.subf %143, %6 : vector<128x32xf32>
    %145 = math.exp %144 : vector<128x32xf32>
    %cst_44 = arith.constant 1.000000e+00 : f32
    %146 = vector.broadcast %cst_44 : f32 to vector<128x32xf32>
    %147 = arith.addf %146, %145 : vector<128x32xf32>
    %148 = tpu.reciprocal %147 {approx = true} : vector<128x32xf32> -> vector<128x32xf32>
    %149 = arith.mulf %6, %148 : vector<128x32xf32>
    %150 = arith.mulf %142, %149 : vector<128x32xf32>
    %151 = arith.mulf %150, %150 : vector<128x32xf32>
    %cst_45 = arith.constant dense<0.000000e+00> : vector<128xf32>
    %152 = vector.multi_reduction <add>, %151, %cst_45 [1] : vector<128x32xf32> to vector<128xf32>
    %153 = vector.shape_cast %152 : vector<128xf32> to vector<128x1xf32>
    %cst_46 = arith.constant 3.200000e+01 : f32
    %154 = vector.broadcast %cst_46 : f32 to vector<128x1xf32>
    %155 = arith.divf %153, %154 : vector<128x1xf32>
    %cst_47 = arith.constant 9.99999974E-6 : f32
    %156 = vector.broadcast %cst_47 : f32 to vector<128x1xf32>
    %157 = arith.addf %155, %156 : vector<128x1xf32>
    %158 = math.rsqrt %157 : vector<128x1xf32>
    %159 = vector.broadcast %158 : vector<128x1xf32> to vector<128x32xf32>
    %160 = arith.mulf %150, %159 : vector<128x32xf32>
    %c0_48 = arith.constant 0 : index
    %c0_49 = arith.constant 0 : index
    %161 = vector.load %arg10[%c0_48, %c0_49] : memref<2x32xf32, #tpu.memory_space<vmem>>, vector<1x32xf32>
    %162 = vector.broadcast %161 : vector<1x32xf32> to vector<128x32xf32>
    %163 = arith.mulf %160, %162 : vector<128x32xf32>
    %c0_50 = arith.constant 0 : index
    %c0_51 = arith.constant 0 : index
    %c0_52 = arith.constant 0 : index
    %164 = vector.load %arg11[%c0_50, %c0_51, %c0_52] : memref<2x16x32xf32, #tpu.memory_space<vmem>>, vector<1x16x32xf32>
    %165 = vector.shape_cast %164 : vector<1x16x32xf32> to vector<16x32xf32>
    %cst_53 = arith.constant dense<0.000000e+00> : vector<128x16xf32>
    %166 = tpu.matmul %163, %165, %cst_53 {dimension_numbers = #tpu.dot_dimension_numbers<[1], [1], [0], [0], [0, 0, 1, 0], [], []>} : vector<128x32xf32>, vector<16x32xf32>, vector<128x16xf32> -> vector<128x16xf32>
    %c1_54 = arith.constant 1 : index
    %c0_55 = arith.constant 0 : index
    %c0_56 = arith.constant 0 : index
    %167 = vector.load %arg5[%c1_54, %c0_55, %c0_56] : memref<2x16x128xf32, #tpu.memory_space<vmem>>, vector<1x16x128xf32>
    %168 = vector.shape_cast %167 : vector<1x16x128xf32> to vector<16x128xf32>
    %cst_57 = arith.constant dense<0.000000e+00> : vector<128x128xf32>
    %169 = tpu.matmul %166, %168, %cst_57 {dimension_numbers = #tpu.dot_dimension_numbers<[1], [0], [0], [1], [0, 0, 1, 1], [], []>} : vector<128x16xf32>, vector<16x128xf32>, vector<128x128xf32> -> vector<128x128xf32>
    %170 = vector.extract_strided_slice %169 {offsets = [0, 0], sizes = [128, 64], strides = [1, 1]} : vector<128x128xf32> to vector<128x64xf32>
    %171 = vector.extract_strided_slice %169 {offsets = [0, 64], sizes = [128, 32], strides = [1, 1]} : vector<128x128xf32> to vector<128x32xf32>
    %172 = vector.extract_strided_slice %169 {offsets = [0, 96], sizes = [128, 4], strides = [1, 1]} : vector<128x128xf32> to vector<128x4xf32>
    %c1_58 = arith.constant 1 : index
    %c0_59 = arith.constant 0 : index
    %173 = vector.load %arg8[%c1_58, %c0_59] : memref<2x8xf32, #tpu.memory_space<vmem>>, vector<1x8xf32>
    %174 = vector.extract_strided_slice %173 {offsets = [0, 0], sizes = [1, 4], strides = [1, 1]} : vector<1x8xf32> to vector<1x4xf32>
    %175 = vector.broadcast %174 : vector<1x4xf32> to vector<128x4xf32>
    %176 = arith.addf %172, %175 : vector<128x4xf32>
    %cst_60 = arith.constant 0.000000e+00 : f32
    %177 = vector.broadcast %cst_60 : f32 to vector<128x4xf32>
    %178 = arith.maximumf %176, %177 : vector<128x4xf32>
    %179 = math.absf %176 : vector<128x4xf32>
    %cst_61 = arith.constant 0.000000e+00 : f32
    %180 = vector.broadcast %cst_61 : f32 to vector<128x4xf32>
    %181 = arith.subf %180, %179 : vector<128x4xf32>
    %182 = math.exp %181 : vector<128x4xf32>
    %cst_62 = arith.constant 1.000000e+00 : f32
    %183 = vector.broadcast %cst_62 : f32 to vector<128x4xf32>
    %184 = arith.addf %183, %182 : vector<128x4xf32>
    %185 = math.log %184 : vector<128x4xf32>
    %186 = arith.addf %178, %185 : vector<128x4xf32>
    %187 = vector.extract_strided_slice %173 {offsets = [0, 4], sizes = [1, 4], strides = [1, 1]} : vector<1x8xf32> to vector<1x4xf32>
    %c1_63 = arith.constant 1 : index
    %c0_64 = arith.constant 0 : index
    %c0_65 = arith.constant 0 : index
    %188 = vector.load %arg6[%c1_63, %c0_64, %c0_65] : memref<2x4x64xf32, #tpu.memory_space<vmem>>, vector<1x4x64xf32>
    %189 = vector.shape_cast %188 : vector<1x4x64xf32> to vector<4x64xf32>
    %c1_66 = arith.constant 1 : index
    %c0_67 = arith.constant 0 : index
    %190 = vector.load %arg7[%c1_66, %c0_67] : memref<2x64xf32, #tpu.memory_space<vmem>>, vector<1x64xf32>
    %191 = vector.extract_strided_slice %189 {offsets = [3, 0], sizes = [1, 64], strides = [1, 1]} : vector<4x64xf32> to vector<1x64xf32>
    %192 = vector.broadcast %191 : vector<1x64xf32> to vector<128x64xf32>
    %193 = arith.mulf %170, %192 : vector<128x64xf32>
    %194 = vector.broadcast %190 : vector<1x64xf32> to vector<128x64xf32>
    %195 = arith.addf %194, %193 : vector<128x64xf32>
    %196 = vector.extract_strided_slice %189 {offsets = [2, 0], sizes = [1, 64], strides = [1, 1]} : vector<4x64xf32> to vector<1x64xf32>
    %197 = vector.broadcast %196 : vector<1x64xf32> to vector<128x64xf32>
    %198 = arith.mulf %170, %197 : vector<128x64xf32>
    %c1_i32_68 = arith.constant 1 : i32
    %199 = tpu.dynamic_rotate %198 by %c1_i32_68 dim 0 : vector<128x64xf32>, i32 -> vector<128x64xf32>
    %c0_69 = arith.constant 0 : index
    %c0_70 = arith.constant 0 : index
    %200 = vector.load %arg3[%c0_69, %c0_70] : memref<128x3xf32, #tpu.memory_space<vmem>>, vector<128x1xf32>
    %201 = vector.broadcast %200 : vector<128x1xf32> to vector<128x64xf32>
    %202 = arith.mulf %199, %201 : vector<128x64xf32>
    %203 = arith.addf %195, %202 : vector<128x64xf32>
    %204 = vector.extract_strided_slice %189 {offsets = [1, 0], sizes = [1, 64], strides = [1, 1]} : vector<4x64xf32> to vector<1x64xf32>
    %205 = vector.broadcast %204 : vector<1x64xf32> to vector<128x64xf32>
    %206 = arith.mulf %170, %205 : vector<128x64xf32>
    %c2_i32_71 = arith.constant 2 : i32
    %207 = tpu.dynamic_rotate %206 by %c2_i32_71 dim 0 : vector<128x64xf32>, i32 -> vector<128x64xf32>
    %c0_72 = arith.constant 0 : index
    %c1_73 = arith.constant 1 : index
    %208 = vector.load %arg3[%c0_72, %c1_73] : memref<128x3xf32, #tpu.memory_space<vmem>>, vector<128x1xf32>
    %209 = vector.broadcast %208 : vector<128x1xf32> to vector<128x64xf32>
    %210 = arith.mulf %207, %209 : vector<128x64xf32>
    %211 = arith.addf %203, %210 : vector<128x64xf32>
    %212 = vector.extract_strided_slice %189 {offsets = [0, 0], sizes = [1, 64], strides = [1, 1]} : vector<4x64xf32> to vector<1x64xf32>
    %213 = vector.broadcast %212 : vector<1x64xf32> to vector<128x64xf32>
    %214 = arith.mulf %170, %213 : vector<128x64xf32>
    %c3_i32_74 = arith.constant 3 : i32
    %215 = tpu.dynamic_rotate %214 by %c3_i32_74 dim 0 : vector<128x64xf32>, i32 -> vector<128x64xf32>
    %c0_75 = arith.constant 0 : index
    %c2_76 = arith.constant 2 : index
    %216 = vector.load %arg3[%c0_75, %c2_76] : memref<128x3xf32, #tpu.memory_space<vmem>>, vector<128x1xf32>
    %217 = vector.broadcast %216 : vector<128x1xf32> to vector<128x64xf32>
    %218 = arith.mulf %215, %217 : vector<128x64xf32>
    %219 = arith.addf %211, %218 : vector<128x64xf32>
    %cst_77 = arith.constant 0.000000e+00 : f32
    %220 = vector.broadcast %cst_77 : f32 to vector<128x64xf32>
    %221 = arith.subf %220, %219 : vector<128x64xf32>
    %222 = math.exp %221 : vector<128x64xf32>
    %cst_78 = arith.constant 1.000000e+00 : f32
    %223 = vector.broadcast %cst_78 : f32 to vector<128x64xf32>
    %224 = arith.addf %223, %222 : vector<128x64xf32>
    %225 = tpu.reciprocal %224 {approx = true} : vector<128x64xf32> -> vector<128x64xf32>
    %226 = arith.mulf %219, %225 : vector<128x64xf32>
    %227 = vector.extract_strided_slice %226 {offsets = [0, 0], sizes = [128, 32], strides = [1, 1]} : vector<128x64xf32> to vector<128x32xf32>
    %228 = vector.extract_strided_slice %226 {offsets = [0, 32], sizes = [128, 16], strides = [1, 1]} : vector<128x64xf32> to vector<128x16xf32>
    %229 = vector.extract_strided_slice %226 {offsets = [0, 48], sizes = [128, 16], strides = [1, 1]} : vector<128x64xf32> to vector<128x16xf32>
    %c0_79 = arith.constant 0 : index
    %c0_80 = arith.constant 0 : index
    %230 = vector.load %arg2[%c0_79, %c0_80] : memref<128x128xf32, #tpu.memory_space<vmem>>, vector<128x128xf32>
    %231 = vector.broadcast %187 : vector<1x4xf32> to vector<128x4xf32>
    %232 = arith.mulf %186, %231 : vector<128x4xf32>
    %cst_81 = arith.constant dense<0.000000e+00> : vector<128x4xf32>
    %233 = tpu.matmul %230, %232, %cst_81 {dimension_numbers = #tpu.dot_dimension_numbers<[1], [0], [0], [1], [0, 0, 1, 1], [], []>} : vector<128x128xf32>, vector<128x4xf32>, vector<128x4xf32> -> vector<128x4xf32>
    %cst_82 = arith.constant dense<0.000000e+00> : vector<4x128xf32>
    %234 = tpu.matmul %232, %230, %cst_82 {dimension_numbers = #tpu.dot_dimension_numbers<[0], [1], [1], [0], [0, 1, 1, 0], [], []>} : vector<128x4xf32>, vector<128x128xf32>, vector<4x128xf32> -> vector<4x128xf32>
    %cst_83 = arith.constant dense<0.000000e+00> : vector<128x128xf32>
    %235 = tpu.matmul %229, %228, %cst_83 {dimension_numbers = #tpu.dot_dimension_numbers<[1], [1], [0], [0], [0, 0, 1, 0], [], []>} : vector<128x16xf32>, vector<128x16xf32>, vector<128x128xf32> -> vector<128x128xf32>
    %236 = arith.mulf %235, %230 : vector<128x128xf32>
    %c1_84 = arith.constant 1 : index
    %c0_85 = arith.constant 0 : index
    %237 = vector.load %arg9[%c1_84, %c0_85] : memref<2x32xf32, #tpu.memory_space<vmem>>, vector<1x32xf32>
    %238 = vector.broadcast %237 : vector<1x32xf32> to vector<128x32xf32>
    %239 = arith.mulf %227, %238 : vector<128x32xf32>
    %240 = vector.extract_strided_slice %233 {offsets = [0, 0], sizes = [128, 1], strides = [1, 1]} : vector<128x4xf32> to vector<128x1xf32>
    %241 = vector.extract_strided_slice %234 {offsets = [0, 0], sizes = [1, 128], strides = [1, 1]} : vector<4x128xf32> to vector<1x128xf32>
    %242 = vector.broadcast %240 : vector<128x1xf32> to vector<128x128xf32>
    %243 = vector.broadcast %241 : vector<1x128xf32> to vector<128x128xf32>
    %244 = arith.subf %242, %243 : vector<128x128xf32>
    %cst_86 = arith.constant 0.000000e+00 : f32
    %245 = vector.broadcast %cst_86 : f32 to vector<128x128xf32>
    %246 = arith.minimumf %244, %245 : vector<128x128xf32>
    %247 = math.exp %246 : vector<128x128xf32>
    %248 = arith.mulf %236, %247 : vector<128x128xf32>
    %249 = vector.extract_strided_slice %186 {offsets = [0, 0], sizes = [128, 1], strides = [1, 1]} : vector<128x4xf32> to vector<128x1xf32>
    %c0_87 = arith.constant 0 : index
    %c0_88 = arith.constant 0 : index
    %250 = vector.load %arg4[%c0_87, %c0_88] : memref<4x32xf32, #tpu.memory_space<vmem>>, vector<1x32xf32>
    %251 = vector.broadcast %249 : vector<128x1xf32> to vector<128x32xf32>
    %252 = vector.broadcast %250 : vector<1x32xf32> to vector<128x32xf32>
    %253 = arith.mulf %251, %252 : vector<128x32xf32>
    %254 = arith.mulf %227, %253 : vector<128x32xf32>
    %cst_89 = arith.constant dense<0.000000e+00> : vector<128x32xf32>
    %255 = tpu.matmul %248, %254, %cst_89 {dimension_numbers = #tpu.dot_dimension_numbers<[1], [0], [0], [1], [0, 0, 1, 1], [], []>} : vector<128x128xf32>, vector<128x32xf32>, vector<128x32xf32> -> vector<128x32xf32>
    %256 = arith.addf %239, %255 : vector<128x32xf32>
    %257 = vector.extract_strided_slice %233 {offsets = [0, 1], sizes = [128, 1], strides = [1, 1]} : vector<128x4xf32> to vector<128x1xf32>
    %258 = vector.extract_strided_slice %234 {offsets = [1, 0], sizes = [1, 128], strides = [1, 1]} : vector<4x128xf32> to vector<1x128xf32>
    %259 = vector.broadcast %257 : vector<128x1xf32> to vector<128x128xf32>
    %260 = vector.broadcast %258 : vector<1x128xf32> to vector<128x128xf32>
    %261 = arith.subf %259, %260 : vector<128x128xf32>
    %cst_90 = arith.constant 0.000000e+00 : f32
    %262 = vector.broadcast %cst_90 : f32 to vector<128x128xf32>
    %263 = arith.minimumf %261, %262 : vector<128x128xf32>
    %264 = math.exp %263 : vector<128x128xf32>
    %265 = arith.mulf %236, %264 : vector<128x128xf32>
    %266 = vector.extract_strided_slice %186 {offsets = [0, 1], sizes = [128, 1], strides = [1, 1]} : vector<128x4xf32> to vector<128x1xf32>
    %c1_91 = arith.constant 1 : index
    %c0_92 = arith.constant 0 : index
    %267 = vector.load %arg4[%c1_91, %c0_92] : memref<4x32xf32, #tpu.memory_space<vmem>>, vector<1x32xf32>
    %268 = vector.broadcast %266 : vector<128x1xf32> to vector<128x32xf32>
    %269 = vector.broadcast %267 : vector<1x32xf32> to vector<128x32xf32>
    %270 = arith.mulf %268, %269 : vector<128x32xf32>
    %271 = arith.mulf %227, %270 : vector<128x32xf32>
    %cst_93 = arith.constant dense<0.000000e+00> : vector<128x32xf32>
    %272 = tpu.matmul %265, %271, %cst_93 {dimension_numbers = #tpu.dot_dimension_numbers<[1], [0], [0], [1], [0, 0, 1, 1], [], []>} : vector<128x128xf32>, vector<128x32xf32>, vector<128x32xf32> -> vector<128x32xf32>
    %273 = arith.addf %256, %272 : vector<128x32xf32>
    %274 = vector.extract_strided_slice %233 {offsets = [0, 2], sizes = [128, 1], strides = [1, 1]} : vector<128x4xf32> to vector<128x1xf32>
    %275 = vector.extract_strided_slice %234 {offsets = [2, 0], sizes = [1, 128], strides = [1, 1]} : vector<4x128xf32> to vector<1x128xf32>
    %276 = vector.broadcast %274 : vector<128x1xf32> to vector<128x128xf32>
    %277 = vector.broadcast %275 : vector<1x128xf32> to vector<128x128xf32>
    %278 = arith.subf %276, %277 : vector<128x128xf32>
    %cst_94 = arith.constant 0.000000e+00 : f32
    %279 = vector.broadcast %cst_94 : f32 to vector<128x128xf32>
    %280 = arith.minimumf %278, %279 : vector<128x128xf32>
    %281 = math.exp %280 : vector<128x128xf32>
    %282 = arith.mulf %236, %281 : vector<128x128xf32>
    %283 = vector.extract_strided_slice %186 {offsets = [0, 2], sizes = [128, 1], strides = [1, 1]} : vector<128x4xf32> to vector<128x1xf32>
    %c2_95 = arith.constant 2 : index
    %c0_96 = arith.constant 0 : index
    %284 = vector.load %arg4[%c2_95, %c0_96] : memref<4x32xf32, #tpu.memory_space<vmem>>, vector<1x32xf32>
    %285 = vector.broadcast %283 : vector<128x1xf32> to vector<128x32xf32>
    %286 = vector.broadcast %284 : vector<1x32xf32> to vector<128x32xf32>
    %287 = arith.mulf %285, %286 : vector<128x32xf32>
    %288 = arith.mulf %227, %287 : vector<128x32xf32>
    %cst_97 = arith.constant dense<0.000000e+00> : vector<128x32xf32>
    %289 = tpu.matmul %282, %288, %cst_97 {dimension_numbers = #tpu.dot_dimension_numbers<[1], [0], [0], [1], [0, 0, 1, 1], [], []>} : vector<128x128xf32>, vector<128x32xf32>, vector<128x32xf32> -> vector<128x32xf32>
    %290 = arith.addf %273, %289 : vector<128x32xf32>
    %291 = vector.extract_strided_slice %233 {offsets = [0, 3], sizes = [128, 1], strides = [1, 1]} : vector<128x4xf32> to vector<128x1xf32>
    %292 = vector.extract_strided_slice %234 {offsets = [3, 0], sizes = [1, 128], strides = [1, 1]} : vector<4x128xf32> to vector<1x128xf32>
    %293 = vector.broadcast %291 : vector<128x1xf32> to vector<128x128xf32>
    %294 = vector.broadcast %292 : vector<1x128xf32> to vector<128x128xf32>
    %295 = arith.subf %293, %294 : vector<128x128xf32>
    %cst_98 = arith.constant 0.000000e+00 : f32
    %296 = vector.broadcast %cst_98 : f32 to vector<128x128xf32>
    %297 = arith.minimumf %295, %296 : vector<128x128xf32>
    %298 = math.exp %297 : vector<128x128xf32>
    %299 = arith.mulf %236, %298 : vector<128x128xf32>
    %300 = vector.extract_strided_slice %186 {offsets = [0, 3], sizes = [128, 1], strides = [1, 1]} : vector<128x4xf32> to vector<128x1xf32>
    %c3_99 = arith.constant 3 : index
    %c0_100 = arith.constant 0 : index
    %301 = vector.load %arg4[%c3_99, %c0_100] : memref<4x32xf32, #tpu.memory_space<vmem>>, vector<1x32xf32>
    %302 = vector.broadcast %300 : vector<128x1xf32> to vector<128x32xf32>
    %303 = vector.broadcast %301 : vector<1x32xf32> to vector<128x32xf32>
    %304 = arith.mulf %302, %303 : vector<128x32xf32>
    %305 = arith.mulf %227, %304 : vector<128x32xf32>
    %cst_101 = arith.constant dense<0.000000e+00> : vector<128x32xf32>
    %306 = tpu.matmul %299, %305, %cst_101 {dimension_numbers = #tpu.dot_dimension_numbers<[1], [0], [0], [1], [0, 0, 1, 1], [], []>} : vector<128x128xf32>, vector<128x32xf32>, vector<128x32xf32> -> vector<128x32xf32>
    %307 = arith.addf %290, %306 : vector<128x32xf32>
    %cst_102 = arith.constant 0.000000e+00 : f32
    %308 = vector.broadcast %cst_102 : f32 to vector<128x32xf32>
    %309 = arith.subf %308, %171 : vector<128x32xf32>
    %310 = math.exp %309 : vector<128x32xf32>
    %cst_103 = arith.constant 1.000000e+00 : f32
    %311 = vector.broadcast %cst_103 : f32 to vector<128x32xf32>
    %312 = arith.addf %311, %310 : vector<128x32xf32>
    %313 = tpu.reciprocal %312 {approx = true} : vector<128x32xf32> -> vector<128x32xf32>
    %314 = arith.mulf %171, %313 : vector<128x32xf32>
    %315 = arith.mulf %307, %314 : vector<128x32xf32>
    %316 = arith.mulf %315, %315 : vector<128x32xf32>
    %cst_104 = arith.constant dense<0.000000e+00> : vector<128xf32>
    %317 = vector.multi_reduction <add>, %316, %cst_104 [1] : vector<128x32xf32> to vector<128xf32>
    %318 = vector.shape_cast %317 : vector<128xf32> to vector<128x1xf32>
    %cst_105 = arith.constant 3.200000e+01 : f32
    %319 = vector.broadcast %cst_105 : f32 to vector<128x1xf32>
    %320 = arith.divf %318, %319 : vector<128x1xf32>
    %cst_106 = arith.constant 9.99999974E-6 : f32
    %321 = vector.broadcast %cst_106 : f32 to vector<128x1xf32>
    %322 = arith.addf %320, %321 : vector<128x1xf32>
    %323 = math.rsqrt %322 : vector<128x1xf32>
    %324 = vector.broadcast %323 : vector<128x1xf32> to vector<128x32xf32>
    %325 = arith.mulf %315, %324 : vector<128x32xf32>
    %c1_107 = arith.constant 1 : index
    %c0_108 = arith.constant 0 : index
    %326 = vector.load %arg10[%c1_107, %c0_108] : memref<2x32xf32, #tpu.memory_space<vmem>>, vector<1x32xf32>
    %327 = vector.broadcast %326 : vector<1x32xf32> to vector<128x32xf32>
    %328 = arith.mulf %325, %327 : vector<128x32xf32>
    %c1_109 = arith.constant 1 : index
    %c0_110 = arith.constant 0 : index
    %c0_111 = arith.constant 0 : index
    %329 = vector.load %arg11[%c1_109, %c0_110, %c0_111] : memref<2x16x32xf32, #tpu.memory_space<vmem>>, vector<1x16x32xf32>
    %330 = vector.shape_cast %329 : vector<1x16x32xf32> to vector<16x32xf32>
    %cst_112 = arith.constant dense<0.000000e+00> : vector<16x128xf32>
    %331 = tpu.matmul %330, %328, %cst_112 {dimension_numbers = #tpu.dot_dimension_numbers<[1], [1], [0], [0], [0, 0, 1, 0], [], []>} : vector<16x32xf32>, vector<128x32xf32>, vector<16x128xf32> -> vector<16x128xf32>
    %c0_113 = arith.constant 0 : index
    %c0_114 = arith.constant 0 : index
    %c0_115 = arith.constant 0 : index
    %332 = vector.load %arg12[%c0_113, %c0_114, %c0_115] : memref<1x16x128xf32, #tpu.memory_space<vmem>>, vector<1x16x128xf32>
    %333 = vector.shape_cast %332 : vector<1x16x128xf32> to vector<16x128xf32>
    %334 = vector.shape_cast %331 : vector<16x128xf32> to vector<1x16x128xf32>
    tpu.vector_store %arg12[%c0_113, %c0_114, %c0_115], %334 {strides = array<i32>} : memref<1x16x128xf32, #tpu.memory_space<vmem>>, vector<1x16x128xf32>,
    return
  }
  func.func @transform_0(%arg0: i32) -> (i32, i32, i32) {
    %c0_i32 = arith.constant 0 : i32
    %c0_i32_0 = arith.constant 0 : i32
    %c0_i32_1 = arith.constant 0 : i32
    return %arg0, %c0_i32, %c0_i32_0 : i32, i32, i32
  }
  func.func @transform_1(%arg0: i32) -> (i32, i32) {
    %c0_i32 = arith.constant 0 : i32
    %c0_i32_0 = arith.constant 0 : i32
    %c0_i32_1 = arith.constant 0 : i32
    return %c0_i32, %c0_i32_0 : i32, i32
  }
  func.func @transform_2(%arg0: i32) -> (i32, i32) {
    %c0_i32 = arith.constant 0 : i32
    %c0_i32_0 = arith.constant 0 : i32
    %c0_i32_1 = arith.constant 0 : i32
    return %c0_i32, %c0_i32_0 : i32, i32
  }
  func.func @transform_3(%arg0: i32) -> (i32, i32) {
    %c0_i32 = arith.constant 0 : i32
    %c0_i32_0 = arith.constant 0 : i32
    %c0_i32_1 = arith.constant 0 : i32
    return %c0_i32, %c0_i32_0 : i32, i32
  }
  func.func @transform_4(%arg0: i32) -> (i32, i32, i32) {
    %c0_i32 = arith.constant 0 : i32
    %c0_i32_0 = arith.constant 0 : i32
    %c0_i32_1 = arith.constant 0 : i32
    %c0_i32_2 = arith.constant 0 : i32
    return %c0_i32, %c0_i32_0, %c0_i32_1 : i32, i32, i32
  }
  func.func @transform_5(%arg0: i32) -> (i32, i32, i32) {
    %c0_i32 = arith.constant 0 : i32
    %c0_i32_0 = arith.constant 0 : i32
    %c0_i32_1 = arith.constant 0 : i32
    %c0_i32_2 = arith.constant 0 : i32
    return %c0_i32, %c0_i32_0, %c0_i32_1 : i32, i32, i32
  }
  func.func @transform_6(%arg0: i32) -> (i32, i32) {
    %c0_i32 = arith.constant 0 : i32
    %c0_i32_0 = arith.constant 0 : i32
    %c0_i32_1 = arith.constant 0 : i32
    return %c0_i32, %c0_i32_0 : i32, i32
  }
  func.func @transform_7(%arg0: i32) -> (i32, i32) {
    %c0_i32 = arith.constant 0 : i32
    %c0_i32_0 = arith.constant 0 : i32
    %c0_i32_1 = arith.constant 0 : i32
    return %c0_i32, %c0_i32_0 : i32, i32
  }
  func.func @transform_8(%arg0: i32) -> (i32, i32) {
    %c0_i32 = arith.constant 0 : i32
    %c0_i32_0 = arith.constant 0 : i32
    %c0_i32_1 = arith.constant 0 : i32
    return %c0_i32, %c0_i32_0 : i32, i32
  }
  func.func @transform_9(%arg0: i32) -> (i32, i32) {
    %c0_i32 = arith.constant 0 : i32
    %c0_i32_0 = arith.constant 0 : i32
    %c0_i32_1 = arith.constant 0 : i32
    return %c0_i32, %c0_i32_0 : i32, i32
  }
  func.func @transform_10(%arg0: i32) -> (i32, i32, i32) {
    %c0_i32 = arith.constant 0 : i32
    %c0_i32_0 = arith.constant 0 : i32
    %c0_i32_1 = arith.constant 0 : i32
    %c0_i32_2 = arith.constant 0 : i32
    return %c0_i32, %c0_i32_0, %c0_i32_1 : i32, i32, i32
  }
  func.func @transform_11(%arg0: i32) -> (i32, i32, i32) {
    %c0_i32 = arith.constant 0 : i32
    %c0_i32_0 = arith.constant 0 : i32
    %c0_i32_1 = arith.constant 0 : i32
    return %arg0, %c0_i32, %c0_i32_0 : i32, i32, i32
  }
}

</mosaic_0001>

<bundles_post_ra>
// kernel: squeeze.1
= control target key start
LH: loop header
LB: loop body
LE: loop exit
PB: predicated region body
PF: predicated region fallthrough
CT: control target
= control target key end

     0   :  { %vm3_vm0 = vcmask 523264   ;;  %s222_s0 = inlined_call_operand.vmem [shape: f32[1,16,128], index: 0, kind: input, shape index: {}]   ;;  %s223_s1 = inlined_call_operand.vmem [shape: f32[16,2,64], index: 1, kind: output, shape index: {}]  }
   0x1   :  { %v13_v0 = vld [vmem:[%s222_s0] sm:$0xff]   ;;  %v140_v1 = vld [vmem:[%s222_s0 + $0x8] sm:$0xff]   ;;  %s157_s0 = smov 64  }
   0x2   :  { %14 = vrot.lane.b32.xlu0 %v13_v0, %s157_s0  ;;  %4 = vst.msk [vmem:[#allocation0] ss:$8 sm:$0xf] %vm3_vm0, %v13_v0   ;;  %5 = vst.msk [vmem:[#allocation0] ss:$8 sm:$0xf0] %vm3_vm0, %v13_v0  }
   0x3   :  { %10 = vst.msk [vmem:[#allocation0 + $0x40] ss:$8 sm:$0xf] %vm3_vm0, %v140_v1   ;;  %12 = vst.msk [vmem:[#allocation0 + $0x40] ss:$8 sm:$0xf0] %vm3_vm0, %v140_v1  }
   0x6   :  { %23 = vrot.lane.b32.xlu0 %v140_v1, %s157_s0 }
  0x74   :  { %v15_v2 = vpop.permute.xlu0 %14  }
  0x75   :  { %18 = vst.msk [vmem:[#allocation0 + $0x1] ss:$8 sm:$0xf] %vm3_vm0, %v15_v2   ;;  %20 = vst.msk [vmem:[#allocation0 + $0x1] ss:$8 sm:$0xf0] %vm3_vm0, %v15_v2  }
  0x78   :  { %v24_v3 = vpop.permute.xlu0 %23  }
  0x79   :  { %27 = vst.msk [vmem:[#allocation0 + $0x41] ss:$8 sm:$0xf] %vm3_vm0, %v24_v3   ;;  %29 = vst.msk [vmem:[#allocation0 + $0x41] ss:$8 sm:$0xf0] %vm3_vm0, %v24_v3  }
  0x7c   :  { %v33_v4 = vld [vmem:[#allocation0] sm:$0x3]  ;;  %v37_v5 = vld [vmem:[#allocation0 + $0x8] sm:$0x3]  ;;  %v42_v6 = vld [vmem:[#allocation0 + $0x10] sm:$0x3] }
  0x7d   :  { %35 = vst [vmem:[%s223_s1] sm:$0x3] %v33_v4  ;;  %141 = vst [vmem:[%s223_s1 + $0x2] sm:$0x3] %v37_v5  ;;  %v48_v7 = vld [vmem:[#allocation0 + $0x18] sm:$0x3] }
  0x7e   :  { %142 = vst [vmem:[%s223_s1 + $0x4] sm:$0x3] %v42_v6  ;;  %v54_v8 = vld [vmem:[#allocation0 + $0x20] sm:$0x3]  ;;  %v60_v9 = vld [vmem:[#allocation0 + $0x28] sm:$0x3] }
  0x7f   :  { %143 = vst [vmem:[%s223_s1 + $0x6] sm:$0x3] %v48_v7  ;;  %144 = vst [vmem:[%s223_s1 + $0x8] sm:$0x3] %v54_v8  ;;  %v66_v10 = vld [vmem:[#allocation0 + $0x30] sm:$0x3] }
  0x80   :  { %145 = vst [vmem:[%s223_s1 + $0xa] sm:$0x3] %v60_v9  ;;  %v72_v11 = vld [vmem:[#allocation0 + $0x38] sm:$0x3]  ;;  %146 = vst [vmem:[%s223_s1 + $0xc] sm:$0x3] %v66_v10 }
  0x81   :  { %147 = vst [vmem:[%s223_s1 + $0xe] sm:$0x3] %v72_v11  ;;  %v78_v12 = vld [vmem:[#allocation0 + $0x40] sm:$0x3]  ;;  %v84_v13 = vld [vmem:[#allocation0 + $0x48] sm:$0x3] }
  0x82   :  { %v90_v14 = vld [vmem:[#allocation0 + $0x50] sm:$0x3]  ;;  %148 = vst [vmem:[%s223_s1 + $0x10] sm:$0x3] %v78_v12  ;;  %149 = vst [vmem:[%s223_s1 + $0x12] sm:$0x3] %v84_v13 }
  0x83   :  { %150 = vst [vmem:[%s223_s1 + $0x14] sm:$0x3] %v90_v14  ;;  %v96_v15 = vld [vmem:[#allocation0 + $0x58] sm:$0x3]  ;;  %v102_v16 = vld [vmem:[#allocation0 + $0x60] sm:$0x3] }
  0x84   :  { %v108_v17 = vld [vmem:[#allocation0 + $0x68] sm:$0x3]  ;;  %151 = vst [vmem:[%s223_s1 + $0x16] sm:$0x3] %v96_v15  ;;  %152 = vst [vmem:[%s223_s1 + $0x18] sm:$0x3] %v102_v16 }
  0x85   :  { %153 = vst [vmem:[%s223_s1 + $0x1a] sm:$0x3] %v108_v17  ;;  %v114_v18 = vld [vmem:[#allocation0 + $0x70] sm:$0x3]  ;;  %v120_v19 = vld [vmem:[#allocation0 + $0x78] sm:$0x3] }
  0x86   :  { %154 = vst [vmem:[%s223_s1 + $0x1c] sm:$0x3] %v114_v18  ;;  %155 = vst [vmem:[%s223_s1 + $0x1e] sm:$0x3] %v120_v19 }

// kernel: mamba_model_forward.1
= control target key start
LH: loop header
LB: loop body
LE: loop exit
PB: predicated region body
PF: predicated region fallthrough
CT: control target
= control target key end

     0   :  { %vm56_vm0 = vcmask 130048   ;;  %v15525_v0 = vmov 0   ;;  %v15523_v4 = vmov 2   ;;  %v15527_v12 = vmov 1   ;;  %s10654_s18 = smov 96   ;;  %s10655_s23 = smov 92   ;;  %s15511_s2 = inlined_call_operand.vmem [shape: f32[128,3], index: 2, kind: input, shape index: {}]   ;;  %s15512_s4 = inlined_call_operand.vmem [shape: f32[2,16,128], index: 4, kind: input, shape index: {}]   ;;  %s15513_s0 = inlined_call_operand.vmem [shape: f32[1,128,16], index: 0, kind: input, shape index: {}]   ;;  %s15514_s7 = inlined_call_operand.vmem [shape: f32[2,8], index: 7, kind: input, shape index: {}]   ;;  %s15515_s5 = inlined_call_operand.vmem [shape: f32[2,4,64], index: 5, kind: input, shape index: {}]   ;;  %s15516_s6 = inlined_call_operand.vmem [shape: f32[2,64], index: 6, kind: input, shape index: {}]   ;;  %s15517_s1 = inlined_call_operand.vmem [shape: f32[128,128], index: 1, kind: input, shape index: {}]   ;;  %s15518_s3 = inlined_call_operand.vmem [shape: f32[4,32], index: 3, kind: input, shape index: {}]   ;;  %s15519_s10 = inlined_call_operand.vmem [shape: f32[2,16,32], index: 10, kind: input, shape index: {}]   ;;  %s15520_s8 = inlined_call_operand.vmem [shape: f32[2,32], index: 8, kind: input, shape index: {}]   ;;  %s15521_s9 = inlined_call_operand.vmem [shape: f32[2,32], index: 9, kind: input, shape index: {}]   ;;  %s15522_s11 = inlined_call_operand.vmem [shape: f32[1,16,128], index: 11, kind: output, shape index: {}]  }
   0x1   :  { %9607 = vset.pattern.permute.xlu1 %v15525_v0  ;;  %v516_v1 = vld [vmem:[%s15511_s2] sm:$0xff]  ;;  %v55_v3 = vld [vmem:[%s15512_s4 + $0x8] sm:$0xff]  ;;  %9610 = vset.pattern.permute.xlu0 %v15523_v4  ;;  %v40_v9 = vld [vmem:[%s15513_s0 + $0x10] sm:$0xff]  ;;  %v421_v48 = vlaneseq  ;;  %s10656_s19 = smov 32   ;;  %s10658_s25 = smov 80   ;;  %vm10662_vm5 = vmmov 0  }
   0x2   :  { %v54_v2 = vld [vmem:[%s15512_s4] sm:$0xff]  ;;  %534 = vperm.xlu1 %9607, %v516_v1   ;;  %v517_v7 = vld [vmem:[%s15511_s2 + $0x8] sm:$0xff]  ;;  %v41_v10 = vld [vmem:[%s15513_s0 + $0x18] sm:$0xff]  ;;  %s10666_s26 = smov 64   ;;  %vm3574_vm6 = vcmask 261120  }
   0x3   :  { %v8937_v5 = vpack.c.bf16 %v55_v3, %v54_v2  ;;  %v38_v6 = vld [vmem:[%s15513_s0] sm:$0xff]  ;;  %v39_v8 = vld [vmem:[%s15513_s0 + $0x8] sm:$0xff]  ;;  %v44_v15 = vld [vmem:[%s15513_s0 + $0x30] sm:$0xff]  ;;  %v10902_v51 = vshrl.u32 %v421_v48, 7 }
   0x4   :  { %8080 = vmatprep.mubr.msk.f32.mxu0 %vm56_vm0, %v38_v6  ;;  %v7453_v11 = vld [vmem:[%s15514_s7] ss:$0 sm:$0xff]  ;;  %v43_v14 = vld [vmem:[%s15513_s0 + $0x28] sm:$0xff]  ;;  %v45_v16 = vld [vmem:[%s15513_s0 + $0x38] sm:$0xff] }
   0x5   :  { %8938 = vmatprep.subr.bf16.mxu0 %v8937_v5  ;;  %v42_v13 = vld [vmem:[%s15513_s0 + $0x20] sm:$0xff]  ;;  %256 = vrot.lane.b32.xlu0 %v7453_v11, %s10654_s18  ;;  %v518_v17 = vld [vmem:[%s15511_s2 + $0x10] sm:$0xff]  ;;  %v47_v19 = vld [vmem:[%s15513_s0 + $0x48] sm:$0xff]  ;;  %15825 = vst [vmem:[#allocation12_spill] sm:$0xff] %v10902_v51  ;;  %v10907_v53 = vsub.s32 2, %v10902_v51  ;;  %v10915_v56 = vsub.s32 1, %v10902_v51 }
   0x6   :  { %8940 = vmatpush3.bf16.msra.mxu0 %v8937_v5  ;;  %539 = vperm.xlu1 %9607, %v517_v7   ;;  %v46_v18 = vld [vmem:[%s15513_s0 + $0x40] sm:$0xff]  ;;  %v519_v20 = vld [vmem:[%s15511_s2 + $0x18] sm:$0xff]  ;;  %v48_v21 = vld [vmem:[%s15513_s0 + $0x50] sm:$0xff]  ;;  %v10918_v57 = vsub.s32 0, %v10902_v51  ;;  %v10921_v58 = vsub.s32 3, %v10902_v51  ;;  %vm499_vm1 = vcmp.lt.s32.totalorder %v10902_v51, 1 }
   0x7   :  { %v49_v22 = vld [vmem:[%s15513_s0 + $0x58] sm:$0xff]  ;;  %v50_v23 = vld [vmem:[%s15513_s0 + $0x60] sm:$0xff]  ;;  %v51_v24 = vld [vmem:[%s15513_s0 + $0x68] sm:$0xff]  ;;  %15827 = vst [vmem:[#allocation14_spill] sm:$0xff] %v10907_v53  ;;  %vm680_vm2 = vcmp.lt.s32.totalorder %v10902_v51, 2  ;;  %vm829_vm3 = vcmp.lt.s32.totalorder %v10902_v51, 3 }
   0x8   :  { %v52_v25 = vld [vmem:[%s15513_s0 + $0x70] sm:$0xff]  ;;  %v520_v26 = vld [vmem:[%s15511_s2 + $0x20] sm:$0xff]  ;;  %v53_v27 = vld [vmem:[%s15513_s0 + $0x78] sm:$0xff]  ;;  %15829 = vst [vmem:[#allocation16_spill] sm:$0xff] %v10915_v56 }
   0x9   :  { %8081 = vmatmul.mubr.msk.f32.vlgmr.msra.gmra.mrb[0].mxu0 %vm56_vm0, %v39_v8  ;;  %1054 = vrot.lane.b32.xlu0 %v7453_v11, %s10655_s23  ;;  %v522_v28 = vld [vmem:[%s15511_s2 + $0x30] sm:$0xff]  ;;  %v524_v29 = vld [vmem:[%s15511_s2 + $0x40] sm:$0xff]  ;;  %v521_v31 = vld [vmem:[%s15511_s2 + $0x28] sm:$0xff]  ;;  %15830 = vst [vmem:[#allocation17_spill] sm:$0xff] %v10918_v57 }
   0xa   :  { %8083 = vmatprep.mubr.msk.f32.mxu0 %vm56_vm0, %v40_v9  ;;  %9608 = vset.pattern.permute.xlu1 %v15527_v12  ;;  %v526_v30 = vld [vmem:[%s15511_s2 + $0x50] sm:$0xff]  ;;  %v523_v32 = vld [vmem:[%s15511_s2 + $0x38] sm:$0xff]  ;;  %v525_v33 = vld [vmem:[%s15511_s2 + $0x48] sm:$0xff]  ;;  %15831 = vst [vmem:[#allocation18_spill] sm:$0xff] %v10921_v58 }
   0xb   :  { %702 = vperm.xlu1 %9608, %v517_v7   ;;  %v527_v34 = vld [vmem:[%s15511_s2 + $0x58] sm:$0xff]  ;;  %v528_v35 = vld [vmem:[%s15511_s2 + $0x60] sm:$0xff]  ;;  %v530_v36 = vld [vmem:[%s15511_s2 + $0x70] sm:$0xff] }
   0xc   :  { %v531_v37 = vld [vmem:[%s15511_s2 + $0x78] sm:$0xff]  ;;  %v529_v38 = vld [vmem:[%s15511_s2 + $0x68] sm:$0xff]  ;;  %v419_v55 = vld [vmem:[%s15515_s5] sm:$0xf] }
   0xd   :  { %8084 = vmatmul.mubr.msk.f32.gmra.mrb[2].mxu0 %vm56_vm0, %v41_v10  ;;  %851 = vperm.xlu0 %9610, %v517_v7   ;;  %v10924_v59 = vrot.slane %v419_v55, %v10907_v53  ;;  %v10927_v60 = vrot.slane %v419_v55, %v10915_v56  ;;  %v10930_v61 = vrot.slane %v419_v55, %v10918_v57  ;;  %vm12044_vm4 = vmpackc.low %vm56_vm0, %vm56_vm0 }
   0xe   :  { %8086 = vmatprep.mubr.msk.f32.mxu0 %vm56_vm0, %v42_v13  ;;  %v10939_v2 = vrot.slane %v419_v55, %v10921_v58  ;;  %vm13102_vm7 = vmpackc.low %vm3574_vm6, %vm3574_vm6 }
   0xf   :  { %9609 = vset.pattern.permute.xlu1 %v15523_v4 }
  0x10   :  { %847 = vperm.xlu1 %9609, %v516_v1  }
  0x11   :  { %8087 = vmatmul.mubr.msk.f32.gmra.mrb[4].mxu0 %vm56_vm0, %v43_v14  ;;  %9611 = vset.pattern.permute.xlu0 %v15527_v12 }
  0x12   :  { %8089 = vmatprep.mubr.msk.f32.mxu0 %vm56_vm0, %v44_v15  ;;  %698 = vperm.xlu0 %9611, %v516_v1  }
  0x14   :  { %9612 = vset.pattern.permute.xlu1 %v15525_v0 }
  0x15   :  { %8090 = vmatmul.mubr.msk.f32.gmra.mrb[6].mxu0 %vm56_vm0, %v45_v16  ;;  %544 = vperm.xlu1 %9612, %v518_v17  }
  0x16   :  { %8092 = vmatprep.mubr.msk.f32.mxu0 %vm56_vm0, %v46_v18  ;;  %706 = vperm.xlu0 %9611, %v518_v17  }
  0x19   :  { %8093 = vmatmul.mubr.msk.f32.gmra.mrb[8].mxu0 %vm56_vm0, %v47_v19  ;;  %549 = vperm.xlu1 %9612, %v519_v20  }
  0x1a   :  { %8095 = vmatprep.mubr.msk.f32.mxu0 %vm56_vm0, %v48_v21  ;;  %714 = vperm.xlu0 %9611, %v520_v26  }
  0x1d   :  { %8096 = vmatmul.mubr.msk.f32.gmra.mrb[10].mxu0 %vm56_vm0, %v49_v22  ;;  %9613 = vset.pattern.permute.xlu1 %v15527_v12 }
  0x1e   :  { %8098 = vmatprep.mubr.msk.f32.mxu0 %vm56_vm0, %v50_v23  ;;  %710 = vperm.xlu1 %9613, %v519_v20  }
  0x1f   :  { %722 = vperm.xlu0 %9611, %v522_v28  }
  0x21   :  { %8099 = vmatmul.mubr.msk.f32.gmra.mrb[12].mxu0 %vm56_vm0, %v51_v24 }
  0x22   :  { %8101 = vmatprep.mubr.msk.f32.mxu0 %vm56_vm0, %v52_v25  ;;  %9614 = vset.pattern.permute.xlu1 %v15523_v4 }
  0x23   :  { %855 = vperm.xlu1 %9614, %v518_v17   ;;  %730 = vperm.xlu0 %9611, %v524_v29  }
  0x25   :  { %8102 = vmatmul.mubr.msk.f32.gmra.mrb[14].mxu0 %vm56_vm0, %v53_v27 }
  0x27   :  { %9615 = vset.pattern.permute.xlu1 %v15525_v0  ;;  %738 = vperm.xlu0 %9611, %v526_v30  }
  0x28   :  { %554 = vperm.xlu1 %9615, %v520_v26  }
  0x2b   :  { %9625 = vset.pattern.permute.xlu0 %v15523_v4 }
  0x2c   :  { %559 = vperm.xlu1 %9615, %v521_v31   ;;  %859 = vperm.xlu0 %9625, %v519_v20   ;;  %v10984_v20 = vld [vmem:[%s15516_s6] ss:$0 sm:$0xff] }
  0x30   :  { %9616 = vset.pattern.permute.xlu1 %v15527_v12  ;;  %867 = vperm.xlu0 %9625, %v521_v31  }
  0x31   :  { %718 = vperm.xlu1 %9616, %v521_v31  }
  0x34   :  { %875 = vperm.xlu0 %9625, %v523_v32  }
  0x35   :  { %9617 = vset.pattern.permute.xlu1 %v15523_v4 }
  0x36   :  { %863 = vperm.xlu1 %9617, %v520_v26  }
  0x38   :  { %883 = vperm.xlu0 %9625, %v525_v33  }
  0x3a   :  { %9618 = vset.pattern.permute.xlu1 %v15525_v0 }
  0x3b   :  { %564 = vperm.xlu1 %9618, %v522_v28  }
  0x3c   :  { %891 = vperm.xlu0 %9625, %v527_v34  }
  0x3f   :  { %569 = vperm.xlu1 %9618, %v523_v32  }
  0x40   :  { %895 = vperm.xlu0 %9625, %v528_v35  }
  0x43   :  { %9619 = vset.pattern.permute.xlu1 %v15527_v12 }
  0x44   :  { %726 = vperm.xlu1 %9619, %v523_v32   ;;  %9631 = vset.pattern.permute.xlu0 %v15525_v0 }
  0x45   :  { %604 = vperm.xlu0 %9631, %v530_v36  }
  0x48   :  { %9620 = vset.pattern.permute.xlu1 %v15523_v4 }
  0x49   :  { %871 = vperm.xlu1 %9620, %v522_v28   ;;  %9632 = vset.pattern.permute.xlu0 %v15527_v12 }
  0x4a   :  { %746 = vperm.xlu0 %9632, %v528_v35  }
  0x4d   :  { %9621 = vset.pattern.permute.xlu1 %v15525_v0 }
  0x4e   :  { %574 = vperm.xlu1 %9621, %v524_v29   ;;  %758 = vperm.xlu0 %9632, %v531_v37  }
  0x52   :  { %579 = vperm.xlu1 %9621, %v525_v33   ;;  %9636 = vset.pattern.permute.xlu0 %v15523_v4 }
  0x53   :  { %907 = vperm.xlu0 %9636, %v531_v37  }
  0x56   :  { %9622 = vset.pattern.permute.xlu1 %v15527_v12 }
  0x57   :  { %734 = vperm.xlu1 %9622, %v525_v33  }
  0x5b   :  { %9623 = vset.pattern.permute.xlu1 %v15523_v4 }
  0x5c   :  { %879 = vperm.xlu1 %9623, %v524_v29  }
  0x60   :  { %9624 = vset.pattern.permute.xlu1 %v15525_v0 }
  0x61   :  { %584 = vperm.xlu1 %9624, %v526_v30  }
  0x65   :  { %589 = vperm.xlu1 %9624, %v527_v34  }
  0x69   :  { %9626 = vset.pattern.permute.xlu1 %v15527_v12 }
  0x6a   :  { %742 = vperm.xlu1 %9626, %v527_v34  }
  0x6e   :  { %9627 = vset.pattern.permute.xlu1 %v15523_v4 }
  0x6f   :  { %887 = vperm.xlu1 %9627, %v526_v30  }
  0x73   :  { %9628 = vset.pattern.permute.xlu1 %v15525_v0 }
  0x74   :  { %594 = vperm.xlu1 %9628, %v528_v35  }
  0x77   :  { %v10888_v43 = vpop.permute.xlu0 %256 }
  0x78   :  { %599 = vperm.xlu1 %9628, %v529_v38  }
  0x7b   :  { %v10892_v45 = vpop.permute.xlu0 %1054 }
  0x7c   :  { %9629 = vset.pattern.permute.xlu1 %v15527_v12  ;;  %15820 = vst [vmem:[#allocation7_spill] sm:$0xff] %v10892_v45 }
  0x7d   :  { %750 = vperm.xlu1 %9629, %v529_v38  }
  0x81   :  { %9630 = vset.pattern.permute.xlu1 %v15523_v4  ;;  %v10880_v39 = vpop.permute.xlu1 %534 }
  0x82   :  { %899 = vperm.xlu1 %9630, %v529_v38   ;;  %15815 = vst [vmem:[#allocation2_spill] sm:$0xff] %v10880_v39 }
  0x85   :  { %v10882_v40 = vpop.permute.xlu1 %539 }
  0x86   :  { %9633 = vset.pattern.permute.xlu1 %v15525_v0  ;;  %15816 = vst [vmem:[#allocation3_spill] sm:$0xff] %v10882_v40 }
  0x87   :  { %609 = vperm.xlu1 %9633, %v531_v37  }
  0x8a   :  { %v10884_v41 = vpop.permute.xlu1 %702 }
  0x8b   :  { %9634 = vset.pattern.permute.xlu1 %v15527_v12  ;;  %15817 = vst [vmem:[#allocation4_spill] sm:$0xff] %v10884_v41 }
  0x8c   :  { %754 = vperm.xlu1 %9634, %v530_v36   ;;  %v10896_v47 = vpop.permute.xlu0 %851 }
  0x8d   :  { %15822 = vst [vmem:[#allocation9_spill] sm:$0xff] %v10896_v47 }
  0x8f   :  { %v10886_v42 = vpop.permute.xlu1 %847 }
  0x90   :  { %9635 = vset.pattern.permute.xlu1 %v15523_v4  ;;  %15818 = vst [vmem:[#allocation5_spill] sm:$0xff] %v10886_v42 }
  0x91   :  { %903 = vperm.xlu1 %9635, %v530_v36   ;;  %v10900_v50 = vpop.permute.xlu0 %698 }
  0x92   :  { %15824 = vst [vmem:[#allocation11_spill] sm:$0xff] %v10900_v50 }
  0x94   :  { %v10890_v44 = vpop.permute.xlu1 %544 }
  0x95   :  { %15819 = vst [vmem:[#allocation6_spill] sm:$0xff] %v10890_v44  ;;  %v10909_v54 = vpop.permute.xlu0 %706 }
  0x96   :  { %15828 = vst [vmem:[#allocation15_spill] sm:$0xff] %v10909_v54 }
  0x98   :  { %v10894_v46 = vpop.permute.xlu1 %549 }
  0x99   :  { %15821 = vst [vmem:[#allocation8_spill] sm:$0xff] %v10894_v46  ;;  %v10934_v63 = vpop.permute.xlu0 %714 }
  0x9a   :  { %15833 = vst [vmem:[#allocation20_spill] sm:$0xff] %v10934_v63 }
  0x9d   :  { %v10898_v49 = vpop.permute.xlu1 %710 }
  0x9e   :  { %15823 = vst [vmem:[#allocation10_spill] sm:$0xff] %v10898_v49  ;;  %v10969_v15 = vpop.permute.xlu0 %722 }
  0x9f   :  { %15840 = vst [vmem:[#allocation27_spill] sm:$0xff] %v10969_v15 }
  0xa2   :  { %v10904_v52 = vpop.permute.xlu1 %855  ;;  %v11017_v33 = vpop.permute.xlu0 %730 }
  0xa3   :  { %15826 = vst [vmem:[#allocation13_spill] sm:$0xff] %v10904_v52  ;;  %15846 = vst [vmem:[#allocation33_spill] sm:$0xff] %v11017_v33 }
  0xa6   :  { %v11060_v12 = vpop.permute.xlu0 %738 }
  0xa7   :  { %v10932_v62 = vpop.permute.xlu1 %554  ;;  %15853 = vst [vmem:[#allocation40_spill] sm:$0xff] %v11060_v12 }
  0xa8   :  { %15832 = vst [vmem:[#allocation19_spill] sm:$0xff] %v10932_v62 }
  0xab   :  { %v10957_v9 = vpop.permute.xlu1 %559 }
  0xac   :  { %15837 = vst [vmem:[#allocation24_spill] sm:$0xff] %v10957_v9 }
  0xb0   :  { %v11011_v31 = vpop.permute.xlu1 %718 }
  0xb1   :  { %15845 = vst [vmem:[#allocation32_spill] sm:$0xff] %v11011_v31 }
  0xdc   :  { %v10936_v1 = vpop.f32.mrb[0].mxu0 }
  0xdd   :  { %15834 = vst [vmem:[#allocation21_spill] sm:$0xff] %v10936_v1  ;;  %v10943_v3 = vmul.f32 %v10936_v1, %v10924_v59  ;;  %v10945_v5 = vpop.f32.mrb[1].mxu0  ;;  %v10949_v6 = vmul.f32 %v10936_v1, %v10927_v60  ;;  %v10953_v7 = vmul.f32 %v10936_v1, %v10930_v61  ;;  %v426_v10 = vmul.f32 %v10936_v1, %v10939_v2 }
  0xde   :  { %15835 = vst [vmem:[#allocation22_spill] sm:$0xff] %v10945_v5  ;;  %v10964_v13 = vmul.f32 %v10924_v59, %v10945_v5  ;;  %v10975_v18 = vmul.f32 %v10927_v60, %v10945_v5  ;;  %v10979_v19 = vmul.f32 %v10930_v61, %v10945_v5  ;;  %v11015_v32 = vadd.f32 %v10936_v1, %v10888_v43 }
  0xdf   :  { %v482_v11 = vrot.slane %v10943_v3, 7  ;;  %v665_v16 = vrot.slane %v10949_v6, 6  ;;  %v15532_v17 = vrot.slane %v10953_v7, 5  ;;  %v446_v27 = vadd.f32 %v10984_v20, %v426_v10 }
  0xe0   :  { %v10955_v8 = vpop.f32.mrb[2].mxu0  ;;  %15838 = vst [vmem:[#allocation25_spill] sm:$0xff] %v10964_v13  ;;  %15841 = vst [vmem:[#allocation28_spill] sm:$0xff] %v10975_v18  ;;  %v15529_v21 = vrot.slane %v10964_v13, 7  ;;  %v15531_v22 = vrot.slane %v10975_v18, 6  ;;  %v15530_v23 = vrot.slane %v10979_v19, 5  ;;  %v11036_v10 = vadd.f32 %v10888_v43, %v10945_v5 }
  0xe1   :  { %15836 = vst [vmem:[#allocation23_spill] sm:$0xff] %v10955_v8  ;;  %v10967_v14 = vpop.f32.mrb[3].mxu0  ;;  %15842 = vst [vmem:[#allocation29_spill] sm:$0xff] %v10979_v19  ;;  %v11022_v36 = vmul.f32 %v10955_v8, %v10924_v59  ;;  %v11028_v38 = vmul.f32 %v10955_v8, %v10927_v60  ;;  %v292_v6 = vand.u32 2147483647, %v11015_v32 }
  0xe2   :  { %15839 = vst [vmem:[#allocation26_spill] sm:$0xff] %v10967_v14  ;;  %v514_v25 = vsel %vm499_vm1, %v15529_v21, %v482_v11  ;;  %v695_v29 = vsel %vm680_vm2, %v15531_v22, %v665_v16  ;;  %v844_v30 = vsel %vm829_vm3, %v15530_v23, %v15532_v17  ;;  %v650_v0 = vmul.f32 %v10927_v60, %v10967_v14 }
  0xe3   :  { %v613_v28 = vmul.f32 %v10882_v40, %v514_v25  ;;  %v762_v35 = vmul.f32 %v10884_v41, %v695_v29  ;;  %v911_v3 = vmul.f32 %v10896_v47, %v844_v30  ;;  %v11040_v25 = vmul.f32 %v10955_v8, %v10930_v61 }
  0xe4   :  { %v10991_v24 = vpop.f32.mrb[4].mxu0  ;;  %v467_v30 = vmul.f32 %v10924_v59, %v10967_v14  ;;  %v427_v21 = vmul.f32 %v10939_v2, %v10967_v14  ;;  %v666_v17 = vrot.slane %v650_v0, 6  ;;  %v308_v47 = vsub.f32 0.0, %v292_v6 }
  0xe5   :  { %15843 = vst [vmem:[#allocation30_spill] sm:$0xff] %v10991_v24  ;;  %v10997_v26 = vpop.f32.mrb[5].mxu0  ;;  %v629_v34 = vadd.f32 %v613_v28, %v446_v27  ;;  %v428_v28 = vmul.f32 %v10955_v8, %v10939_v2  ;;  %v291_v4 = vand.u32 2147483647, %v11036_v10  ;;  %v15854_v40 = vrot.slane %v11022_v36, 7 }
  0xe6   :  { %15844 = vst [vmem:[#allocation31_spill] sm:$0xff] %v10997_v26  ;;  %v483_v23 = vrot.slane %v467_v30, 7  ;;  %v15856_v0 = vrot.slane %v11028_v38, 6  ;;  %v447_v22 = vadd.f32 %v10984_v20, %v427_v21 }
  0xe7   :  { %v778_v55 = vadd.f32 %v762_v35, %v629_v34  ;;  %v11051_v35 = vpop.permute.xlu1 %863  ;;  %v448_v41 = vadd.f32 %v10984_v20, %v428_v28  ;;  %v694_v28 = vsel %vm680_vm2, %v665_v16, %v666_v17 }
  0xe8   :  { %v11024_v37 = vpop.f32.mrb[6].mxu0  ;;  %15851 = vst [vmem:[#allocation38_spill] sm:$0xff] %v11051_v35  ;;  %v512_v1 = vsel %vm499_vm1, %v483_v23, %v15854_v40  ;;  %v513_v53 = vsel %vm499_vm1, %v482_v11, %v483_v23  ;;  %v693_v6 = vsel %vm680_vm2, %v666_v17, %v15856_v0  ;;  %v11093_v0 = vpop.permute.xlu0 %859  ;;  %v763_v16 = vmul.f32 %v10909_v54, %v694_v28 }
  0xe9   :  { %15847 = vst [vmem:[#allocation34_spill] sm:$0xff] %v11024_v37  ;;  %v11030_v48 = vpop.f32.mrb[7].mxu0  ;;  %v11042_v27 = vadd.f32 %v911_v3, %v778_v55  ;;  %v799_v55 = vmul.f32 %v10930_v61, %v10967_v14  ;;  %v615_v30 = vmul.f32 %v10894_v46, %v512_v1  ;;  %v614_v40 = vmul.f32 %v10890_v44, %v513_v53 }
  0xea   :  { %15848 = vst [vmem:[#allocation35_spill] sm:$0xff] %v11030_v48  ;;  %v764_v11 = vmul.f32 %v10898_v49, %v693_v6  ;;  %v15859_v1 = vrot.slane %v11040_v25, 5  ;;  %15860 = vst [vmem:[#allocation44_spill] sm:$0xff] %v11093_v0  ;;  %v15861_v17 = vrot.slane %v10953_v7, 5  ;;  %v11112_v7 = vadd.f32 %v10888_v43, %v10967_v14 }
  0xeb   :  { %15849 = vst [vmem:[#allocation36_spill] sm:$0xff] %v11042_v27  ;;  %v815_v29 = vrot.slane %v799_v55, 5  ;;  %v11086_v56 = vpop.permute.xlu1 %564  ;;  %v631_v57 = vadd.f32 %v615_v30, %v448_v41  ;;  %v630_v46 = vadd.f32 %v614_v40, %v447_v22  ;;  %v325_v41 = vmul.f32 1.442695, %v308_v47 }
  0xec   :  { %v11049_v34 = vpop.f32.mrb[8].mxu0  ;;  %15858 = vst [vmem:[#allocation43_spill] sm:$0xff] %v11086_v56  ;;  %v307_v30 = vsub.f32 0.0, %v291_v4  ;;  %v11120_v4 = vmul.f32 %v10991_v24, %v10924_v59 }
  0xed   :  { %15850 = vst [vmem:[#allocation37_spill] sm:$0xff] %v11049_v34  ;;  %v11058_v3 = vpop.f32.mrb[9].mxu0  ;;  %v842_v23 = vsel %vm829_vm3, %v815_v29, %v15859_v1  ;;  %v843_v53 = vsel %vm829_vm3, %v15861_v17, %v815_v29  ;;  %v780_v6 = vadd.f32 %v764_v11, %v631_v57  ;;  %v11107_v1 = vadd.f32 %v10955_v8, %v10888_v43 }
  0xee   :  { %15852 = vst [vmem:[#allocation39_spill] sm:$0xff] %v11058_v3  ;;  %v913_v49 = vmul.f32 %v11093_v0, %v842_v23  ;;  %v779_v22 = vadd.f32 %v763_v16, %v630_v46  ;;  %v912_v28 = vmul.f32 %v10904_v52, %v843_v53  ;;  %9896 = vpow2.f32 %v325_v41 }
  0xef   :  { %v11124_v40 = vpop.permute.xlu1 %569  ;;  %v323_v46 = vmul.f32 1.442695, %v307_v30  ;;  %v11128_v11 = vmul.f32 %v10991_v24, %v10927_v60  ;;  %v11135_v16 = vadd.f32 %v10991_v24, %v10888_v43  ;;  %v293_v17 = vand.u32 2147483647, %v11112_v7 }
  0xf0   :  { %v11071_v58 = vpop.f32.mrb[10].mxu0  ;;  %v11114_v29 = vadd.f32 %v913_v49, %v780_v6  ;;  %v11116_v47 = vadd.f32 %v912_v28, %v779_v22  ;;  %15867 = vst [vmem:[#allocation50_spill] sm:$0xff] %v11124_v40  ;;  %v294_v49 = vand.u32 2147483647, %v11107_v1  ;;  %v469_v53 = vmul.f32 %v10924_v59, %v10997_v26 }
  0xf1   :  { %15855 = vst [vmem:[#allocation41_spill] sm:$0xff] %v11071_v58  ;;  %v11082_v55 = vpop.f32.mrb[11].mxu0  ;;  %v430_v41 = vmul.f32 %v10991_v24, %v10939_v2  ;;  %v11145_v6 = vmul.f32 %v10991_v24, %v10930_v61  ;;  %v652_v22 = vmul.f32 %v10927_v60, %v10997_v26  ;;  %9898 = vpow2.f32 %v323_v46 }
  0xf2   :  { %15857 = vst [vmem:[#allocation42_spill] sm:$0xff] %v11082_v55  ;;  %15864 = vst [vmem:[#allocation47_spill] sm:$0xff] %v11114_v29  ;;  %v429_v0 = vmul.f32 %v10939_v2, %v10997_v26  ;;  %v310_v52 = vsub.f32 0.0, %v294_v49  ;;  %v296_v54 = vand.u32 2147483647, %v11135_v16  ;;  %v485_v8 = vrot.slane %v469_v53, 7 }
  0xf3   :  { %15865 = vst [vmem:[#allocation48_spill] sm:$0xff] %v11116_v47  ;;  %v668_v14 = vrot.slane %v652_v22, 6  ;;  %v11153_v39 = vpop.permute.xlu1 %726  ;;  %v309_v30 = vsub.f32 0.0, %v293_v17  ;;  %v801_v24 = vmul.f32 %v10930_v61, %v10997_v26  ;;  %v450_v13 = vadd.f32 %v10984_v20, %v430_v41 }
  0xf4   :  { %v11100_v21 = vpop.f32.mrb[12].mxu0  ;;  %15868 = vst [vmem:[#allocation51_spill] sm:$0xff] %v11153_v39  ;;  %v15869_v28 = vrot.slane %v11120_v4, 7  ;;  %v15870_v49 = vrot.slane %v11022_v36, 7  ;;  %v449_v22 = vadd.f32 %v10984_v20, %v429_v0  ;;  %v15871_v41 = vrot.slane %v11128_v11, 6 }
  0xf5   :  { %15862 = vst [vmem:[#allocation45_spill] sm:$0xff] %v11100_v21  ;;  %v11103_v44 = vpop.f32.mrb[13].mxu0  ;;  %v329_v50 = vmul.f32 1.442695, %v310_v52  ;;  %v312_v19 = vsub.f32 0.0, %v296_v54  ;;  %v817_v18 = vrot.slane %v801_v24, 5 }
  0xf6   :  { %15863 = vst [vmem:[#allocation46_spill] sm:$0xff] %v11103_v44  ;;  %v510_v42 = vsel %vm499_vm1, %v485_v8, %v15869_v28  ;;  %v511_v53 = vsel %vm499_vm1, %v15870_v49, %v485_v8  ;;  %v691_v46 = vsel %vm680_vm2, %v668_v14, %v15871_v41  ;;  %v15872_v28 = vrot.slane %v11028_v38, 6 }
  0xf7   :  { %v616_v17 = vmul.f32 %v10932_v62, %v511_v53  ;;  %v617_v45 = vmul.f32 %v10957_v9, %v510_v42  ;;  %v766_v42 = vmul.f32 %v11011_v31, %v691_v46  ;;  %v11180_v62 = vpop.permute.xlu0 %867  ;;  %v327_v9 = vmul.f32 1.442695, %v309_v30 }
  0xf8   :  { %v11122_v57 = vpop.f32.mrb[14].mxu0  ;;  %v692_v36 = vsel %vm680_vm2, %v15872_v28, %v668_v14  ;;  %v9897_v8 = vpop.eup %9896  ;;  %15873 = vst [vmem:[#allocation52_spill] sm:$0xff] %v11180_v62  ;;  %v945_v41 = vsub.f32 0.0, %v11114_v29  ;;  %v15874_v52 = vrot.slane %v11145_v6, 5  ;;  %v15875_v14 = vrot.slane %v11040_v25, 5 }
  0xf9   :  { %15866 = vst [vmem:[#allocation49_spill] sm:$0xff] %v11122_v57  ;;  %v11130_v23 = vpop.f32.mrb[15].mxu0  ;;  %v632_v49 = vadd.f32 %v616_v17, %v449_v22  ;;  %v633_v0 = vadd.f32 %v617_v45, %v450_v13  ;;  %v765_v53 = vmul.f32 %v10934_v63, %v692_v36  ;;  %v11191_v45 = vpop.permute.xlu1 %871  ;;  %v356_v22 = vadd.f32 1.0, %v9897_v8 }
  0xfa   :  { %v840_v54 = vsel %vm829_vm3, %v817_v18, %v15874_v52  ;;  %v841_v24 = vsel %vm829_vm3, %v15875_v14, %v817_v18  ;;  %15876 = vst [vmem:[#allocation53_spill] sm:$0xff] %v11191_v45  ;;  %v943_v17 = vsub.f32 0.0, %v11042_v27  ;;  %9900 = vpow2.f32 %v329_v50 }
  0xfb   :  { %v781_v13 = vadd.f32 %v765_v53, %v632_v49  ;;  %v782_v38 = vadd.f32 %v766_v42, %v633_v0  ;;  %v914_v46 = vmul.f32 %v11051_v35, %v841_v24  ;;  %v915_v30 = vmul.f32 %v11180_v62, %v840_v54  ;;  %v9899_v28 = vpop.eup %9898 }
  0xfc   :  { %v333_v36 = vmul.f32 1.442695, %v312_v19  ;;  %9902 = vpow2.f32 %v327_v9  ;;  %v964_v18 = vmul.f32 1.442695, %v945_v41  ;;  %v11202_v49 = vmul.f32 %v11024_v37, %v10924_v59 }
  0xfd   :  { %v11196_v52 = vadd.f32 %v914_v46, %v781_v13  ;;  %v11198_v25 = vadd.f32 %v915_v30, %v782_v38  ;;  %9904 = vlog2.f32 %v356_v22  ;;  %v960_v0 = vmul.f32 1.442695, %v943_v17  ;;  %v11208_v53 = vpop.permute.xlu1 %574 }
  0xfe   :  { %v11206_v8 = vmul.f32 %v11024_v37, %v10927_v60  ;;  %15879 = vst [vmem:[#allocation56_spill] sm:$0xff] %v11208_v53  ;;  %v355_v50 = vadd.f32 1.0, %v9899_v28  ;;  %9906 = vpow2.f32 %v333_v36  ;;  %v11212_v19 = vadd.f32 %v10888_v43, %v10997_v26 }
  0xff   :  { %15877 = vst [vmem:[#allocation54_spill] sm:$0xff] %v11196_v52  ;;  %15878 = vst [vmem:[#allocation55_spill] sm:$0xff] %v11198_v25  ;;  %9908 = vpow2.f32 %v964_v18  ;;  %v11216_v9 = vadd.f32 %v11024_v37, %v10888_v43  ;;  %v432_v42 = vmul.f32 %v11024_v37, %v10939_v2  ;;  %v11223_v54 = vmul.f32 %v11024_v37, %v10930_v61 }
 0x100   :  { %v431_v14 = vmul.f32 %v10939_v2, %v11030_v48  ;;  %v471_v24 = vmul.f32 %v10924_v59, %v11030_v48  ;;  %v654_v13 = vmul.f32 %v10927_v60, %v11030_v48  ;;  %9910 = vpow2.f32 %v960_v0 }
 0x101   :  { %9912 = vlog2.f32 %v355_v50  ;;  %v944_v46 = vsub.f32 0.0, %v11116_v47  ;;  %v295_v30 = vand.u32 2147483647, %v11212_v19  ;;  %v298_v28 = vand.u32 2147483647, %v11216_v9  ;;  %v11238_v35 = vpop.permute.xlu1 %579 }
 0x102   :  { %v487_v22 = vrot.slane %v471_v24, 7  ;;  %v452_v36 = vadd.f32 %v10984_v20, %v432_v42  ;;  %v670_v18 = vrot.slane %v654_v13, 6  ;;  %v803_v41 = vmul.f32 %v10930_v61, %v11030_v48  ;;  %15880 = vst [vmem:[#allocation57_spill] sm:$0xff] %v11238_v35 }
 0x103   :  { %v451_v50 = vadd.f32 %v10984_v20, %v431_v14  ;;  %v15881_v38 = vrot.slane %v11202_v49, 7  ;;  %v15882_v62 = vrot.slane %v11120_v4, 7  ;;  %v15883_v37 = vrot.slane %v11206_v8, 6 }
 0x104   :  { %v9901_v17 = vpop.eup %9900  ;;  %v15884_v0 = vrot.slane %v11128_v11, 6  ;;  %v311_v4 = vsub.f32 0.0, %v295_v30  ;;  %v962_v29 = vmul.f32 1.442695, %v944_v46 }
 0x105   :  { %v508_v24 = vsel %vm499_vm1, %v487_v22, %v15881_v38  ;;  %v509_v42 = vsel %vm499_vm1, %v15882_v62, %v487_v22  ;;  %v689_v14 = vsel %vm680_vm2, %v670_v18, %v15883_v37  ;;  %v358_v26 = vadd.f32 1.0, %v9901_v17 }
 0x106   :  { %v9903_v13 = vpop.eup %9902  ;;  %v618_v31 = vmul.f32 %v11086_v56, %v509_v42  ;;  %v619_v63 = vmul.f32 %v11124_v40, %v508_v24  ;;  %v690_v38 = vsel %vm680_vm2, %v15884_v0, %v670_v18  ;;  %v11262_v62 = vadd.f32 %v10888_v43, %v11030_v48 }
 0x107   :  { %v819_v22 = vrot.slane %v803_v41, 5  ;;  %v11264_v42 = vpop.eup %9904  ;;  %v767_v56 = vmul.f32 %v10969_v15, %v690_v38  ;;  %v768_v37 = vmul.f32 %v11153_v39, %v689_v14  ;;  %v357_v11 = vadd.f32 1.0, %v9903_v13  ;;  %v11279_v13 = vpop.permute.xlu1 %734 }
 0x108   :  { %v634_v24 = vadd.f32 %v618_v31, %v451_v50  ;;  %v635_v40 = vadd.f32 %v619_v63, %v452_v36  ;;  %v9907_v27 = vpop.eup %9906  ;;  %v15885_v18 = vrot.slane %v11223_v54, 5  ;;  %v15886_v17 = vrot.slane %v11145_v6, 5  ;;  %v11276_v31 = vpop.permute.xlu0 %875  ;;  %15888 = vst [vmem:[#allocation59_spill] sm:$0xff] %v11279_v13 }
 0x109   :  { %v9909_v0 = vpop.eup %9908  ;;  %15887 = vst [vmem:[#allocation58_spill] sm:$0xff] %v11276_v31  ;;  %v314_v63 = vsub.f32 0.0, %v298_v28  ;;  %v331_v46 = vmul.f32 1.442695, %v311_v4  ;;  %v946_v38 = vsub.f32 0.0, %v11196_v52  ;;  %9914 = vlog2.f32 %v358_v26 }
 0x10a   :  { %v838_v30 = vsel %vm829_vm3, %v819_v22, %v15885_v18  ;;  %v839_v41 = vsel %vm829_vm3, %v15886_v17, %v819_v22  ;;  %v783_v36 = vadd.f32 %v767_v56, %v634_v24  ;;  %v784_v50 = vadd.f32 %v768_v37, %v635_v40  ;;  %v11284_v39 = vpop.eup %9910 }
 0x10b   :  { %v916_v14 = vmul.f32 %v11191_v45, %v839_v41  ;;  %v297_v18 = vand.u32 2147483647, %v11262_v62  ;;  %v917_v6 = vmul.f32 %v11276_v31, %v838_v30  ;;  %15889 = vst [vmem:[#allocation60_spill] sm:$0xff] %v11284_v39  ;;  %v360_v22 = vadd.f32 1.0, %v9907_v27  ;;  %v11288_v28 = vpop.eup %9912 }
 0x10c   :  { %9916 = vpow2.f32 %v962_v29  ;;  %v993_v56 = vadd.f32 1.0, %v9909_v0  ;;  %v337_v4 = vmul.f32 1.442695, %v314_v63  ;;  %v11294_v24 = vmul.f32 %v11049_v34, %v10924_v59  ;;  %v11310_v0 = vpop.permute.xlu1 %879 }
 0x10d   :  { %v11286_v17 = vadd.f32 %v916_v14, %v783_v36  ;;  %v11290_v40 = vadd.f32 %v917_v6, %v784_v50  ;;  %9918 = vlog2.f32 %v357_v11  ;;  %v947_v37 = vsub.f32 0.0, %v11198_v25  ;;  %15893 = vst [vmem:[#allocation64_spill] sm:$0xff] %v11310_v0 }
 0x10e   :  { %9920 = vpow2.f32 %v331_v46  ;;  %v966_v30 = vmul.f32 1.442695, %v946_v38  ;;  %v313_v26 = vsub.f32 0.0, %v297_v18  ;;  %v11299_v27 = vadd.f32 %v11049_v34, %v10888_v43 }
 0x10f   :  { %15890 = vst [vmem:[#allocation61_spill] sm:$0xff] %v11286_v17  ;;  %15891 = vst [vmem:[#allocation62_spill] sm:$0xff] %v11290_v40  ;;  %9922 = vlog2.f32 %v360_v22  ;;  %v11303_v29 = vmul.f32 %v11049_v34, %v10927_v60  ;;  %v11308_v41 = vmul.f32 %v10939_v2, %v10945_v5  ;;  %v434_v63 = vmul.f32 %v11049_v34, %v10939_v2 }
 0x110   :  { %15892 = vst [vmem:[#allocation63_spill] sm:$0xff] %v11299_v27  ;;  %9924 = vrcp.f32 %v993_v56  ;;  %v11317_v50 = vmul.f32 %v11049_v34, %v10930_v61  ;;  %v473_v14 = vmul.f32 %v10924_v59, %v11058_v3  ;;  %v968_v46 = vmul.f32 1.442695, %v947_v37 }
 0x111   :  { %9926 = vpow2.f32 %v337_v4  ;;  %v335_v38 = vmul.f32 1.442695, %v313_v26  ;;  %v433_v18 = vmul.f32 %v10939_v2, %v11058_v3  ;;  %v300_v6 = vand.u32 2147483647, %v11299_v27 }
 0x112   :  { %9928 = vpow2.f32 %v966_v30  ;;  %v489_v56 = vrot.slane %v473_v14, 7  ;;  %v656_v4 = vmul.f32 %v10927_v60, %v11058_v3  ;;  %v948_v11 = vsub.f32 0.0, %v11286_v17 }
 0x113   :  { %v949_v36 = vsub.f32 0.0, %v11290_v40  ;;  %v454_v31 = vadd.f32 %v10984_v20, %v434_v63  ;;  %v805_v37 = vmul.f32 %v10930_v61, %v11058_v3  ;;  %v11332_v30 = vpop.eup %9914  ;;  %v15894_v45 = vrot.slane %v11294_v24, 7  ;;  %v11343_v63 = vpop.permute.xlu1 %584 }
 0x114   :  { %v15895_v22 = vrot.slane %v11202_v49, 7  ;;  %v672_v34 = vrot.slane %v656_v4, 6  ;;  %15896 = vst [vmem:[#allocation65_spill] sm:$0xff] %v11343_v63  ;;  %v453_v5 = vadd.f32 %v10984_v20, %v433_v18  ;;  %9930 = vpow2.f32 %v968_v46 }
 0x115   :  { %v506_v14 = vsel %vm499_vm1, %v489_v56, %v15894_v45  ;;  %v821_v17 = vrot.slane %v805_v37, 5  ;;  %v316_v45 = vsub.f32 0.0, %v300_v6  ;;  %v15897_v49 = vrot.slane %v11303_v29, 6 }
 0x116   :  { %v507_v15 = vsel %vm499_vm1, %v15895_v22, %v489_v56  ;;  %v9917_v48 = vpop.eup %9916  ;;  %v621_v26 = vmul.f32 %v11238_v35, %v506_v14  ;;  %v15898_v56 = vrot.slane %v11206_v8, 6  ;;  %v970_v39 = vmul.f32 1.442695, %v948_v11 }
 0x117   :  { %v620_v40 = vmul.f32 %v11208_v53, %v507_v15  ;;  %v11348_v47 = vpop.eup %9918  ;;  %v687_v22 = vsel %vm680_vm2, %v672_v34, %v15897_v49  ;;  %v11360_v15 = vadd.f32 %v10888_v43, %v11058_v3  ;;  %v15899_v49 = vrot.slane %v11317_v50, 5 }
 0x118   :  { %v688_v4 = vsel %vm680_vm2, %v15898_v56, %v672_v34  ;;  %v9921_v18 = vpop.eup %9920  ;;  %v637_v14 = vadd.f32 %v621_v26, %v454_v31  ;;  %v770_v35 = vmul.f32 %v11279_v13, %v687_v22  ;;  %v11372_v34 = vadd.f32 %v11071_v58, %v10888_v43 }
 0x119   :  { %v636_v37 = vadd.f32 %v620_v40, %v453_v5  ;;  %v11362_v46 = vpop.eup %9922  ;;  %v769_v6 = vmul.f32 %v11017_v33, %v688_v4  ;;  %v836_v8 = vsel %vm829_vm3, %v821_v17, %v15899_v49  ;;  %v992_v56 = vadd.f32 1.0, %v9917_v48  ;;  %v11376_v5 = vpop.permute.xlu0 %883 }
 0x11a   :  { %15900 = vst [vmem:[#allocation66_spill] sm:$0xff] %v11372_v34  ;;  %v11374_v11 = vpop.eup %9924  ;;  %15902 = vst [vmem:[#allocation68_spill] sm:$0xff] %v11376_v5  ;;  %9932 = vpow2.f32 %v335_v38  ;;  %v972_v31 = vmul.f32 1.442695, %v949_v36  ;;  %v15903_v40 = vrot.slane %v11223_v54, 5  ;;  %v786_v13 = vadd.f32 %v770_v35, %v637_v14  ;;  %v11385_v48 = vpop.permute.xlu1 %589 }
 0x11b   :  { %15901 = vst [vmem:[#allocation67_spill] sm:$0xff] %v11374_v11  ;;  %v9927_v22 = vpop.eup %9926  ;;  %v785_v4 = vadd.f32 %v769_v6, %v636_v37  ;;  %v919_v33 = vmul.f32 %v11376_v5, %v836_v8  ;;  %15904 = vst [vmem:[#allocation69_spill] sm:$0xff] %v11385_v48  ;;  %9934 = vpow2.f32 %v970_v39  ;;  %v341_v38 = vmul.f32 1.442695, %v316_v45 }
 0x11c   :  { %v837_v26 = vsel %vm829_vm3, %v15903_v40, %v821_v17  ;;  %v9929_v53 = vpop.eup %9928  ;;  %v299_v36 = vand.u32 2147483647, %v11360_v15  ;;  %v359_v54 = vadd.f32 1.0, %v9921_v18  ;;  %v302_v35 = vand.u32 2147483647, %v11372_v34 }
 0x11d   :  { %v918_v49 = vmul.f32 %v11310_v0, %v837_v26  ;;  %v11390_v17 = vadd.f32 %v919_v33, %v786_v13  ;;  %v11395_v37 = vadd.f32 %v10984_v20, %v11308_v41  ;;  %9936 = vrcp.f32 %v992_v56  ;;  %v11427_v18 = vpop.permute.xlu0 %891 }
 0x11e   :  { %v11400_v39 = vadd.f32 %v10888_v43, %v11082_v55  ;;  %9938 = vpow2.f32 %v972_v31  ;;  %v362_v6 = vadd.f32 1.0, %v9927_v22  ;;  %v315_v41 = vsub.f32 0.0, %v299_v36  ;;  %v9931_v8 = vpop.eup %9930  ;;  %15908 = vst [vmem:[#allocation73_spill] sm:$0xff] %v11427_v18 }
 0x11f   :  { %v11388_v11 = vadd.f32 %v918_v49, %v785_v4  ;;  %15906 = vst [vmem:[#allocation71_spill] sm:$0xff] %v11390_v17  ;;  %9940 = vpow2.f32 %v341_v38  ;;  %v318_v40 = vsub.f32 0.0, %v302_v35  ;;  %v11409_v26 = vmul.f32 %v10924_v59, %v11082_v55  ;;  %v11412_v49 = vpop.permute.xlu1 %742 }
 0x120   :  { %9942 = vlog2.f32 %v359_v54  ;;  %15907 = vst [vmem:[#allocation72_spill] sm:$0xff] %v11412_v49  ;;  %v301_v31 = vand.u32 2147483647, %v11400_v39  ;;  %v435_v22 = vmul.f32 %v10939_v2, %v11082_v55  ;;  %v11419_v38 = vmul.f32 %v10927_v60, %v11082_v55 }
 0x121   :  { %15905 = vst [vmem:[#allocation70_spill] sm:$0xff] %v11388_v11  ;;  %v994_v36 = vadd.f32 1.0, %v9929_v53  ;;  %v950_v54 = vsub.f32 0.0, %v11388_v11  ;;  %v15602_v35 = vrot.slane %v11409_v26, 7  ;;  %v11425_v13 = vmul.f32 %v10930_v61, %v11082_v55 }
 0x122   :  { %v995_v56 = vadd.f32 1.0, %v9931_v8  ;;  %9944 = vlog2.f32 %v362_v6  ;;  %v339_v33 = vmul.f32 1.442695, %v315_v41  ;;  %v345_v45 = vmul.f32 1.442695, %v318_v40 }
 0x123   :  { %v15909_v53 = vrot.slane %v11294_v24, 7  ;;  %v15605_v5 = vrot.slane %v11425_v13, 5  ;;  %v11439_v0 = vadd.f32 %v11100_v21, %v10888_v43  ;;  %v317_v8 = vsub.f32 0.0, %v301_v31 }
 0x124   :  { %v9933_v4 = vpop.eup %9932  ;;  %v455_v41 = vadd.f32 %v10984_v20, %v435_v22  ;;  %v15910_v40 = vrot.slane %v11419_v38, 6  ;;  %v15911_v55 = vrot.slane %v11303_v29, 6  ;;  %9946 = vrcp.f32 %v994_v36 }
 0x125   :  { %v505_v3 = vsel %vm499_vm1, %v15909_v53, %v15602_v35  ;;  %v9935_v6 = vpop.eup %9934  ;;  %v974_v53 = vmul.f32 1.442695, %v950_v54  ;;  %v15912_v35 = vrot.slane %v11317_v50, 5  ;;  %v304_v22 = vand.u32 2147483647, %v11439_v0 }
 0x126   :  { %v622_v14 = vmul.f32 %v11343_v63, %v505_v3  ;;  %v686_v24 = vsel %vm680_vm2, %v15911_v55, %v15910_v40  ;;  %9948 = vrcp.f32 %v995_v56  ;;  %v361_v3 = vadd.f32 1.0, %v9933_v4  ;;  %v11458_v63 = vpop.permute.xlu1 %887 }
 0x127   :  { %v835_v31 = vsel %vm829_vm3, %v15912_v35, %v15605_v5  ;;  %v11456_v11 = vpop.eup %9936  ;;  %15914 = vst [vmem:[#allocation75_spill] sm:$0xff] %v11458_v63  ;;  %v771_v55 = vmul.f32 %v11060_v12, %v686_v24  ;;  %v996_v54 = vadd.f32 1.0, %v9935_v6  ;;  %9950 = vpow2.f32 %v339_v33  ;;  %v11465_v5 = vpop.permute.xlu0 %895 }
 0x128   :  { %15913 = vst [vmem:[#allocation74_spill] sm:$0xff] %v11456_v11  ;;  %v638_v29 = vadd.f32 %v622_v14, %v455_v41  ;;  %v9939_v36 = vpop.eup %9938  ;;  %v320_v40 = vsub.f32 0.0, %v304_v22  ;;  %v11463_v50 = vadd.f32 %v10888_v43, %v11103_v44  ;;  %15915 = vst [vmem:[#allocation76_spill] sm:$0xff] %v11465_v5  ;;  %9952 = vpow2.f32 %v345_v45 }
 0x129   :  { %v9941_v35 = vpop.eup %9940  ;;  %v343_v11 = vmul.f32 1.442695, %v317_v8  ;;  %v920_v4 = vmul.f32 %v11458_v63, %v835_v31  ;;  %9954 = vpow2.f32 %v974_v53  ;;  %v476_v33 = vmul.f32 %v11071_v58, %v10924_v59 }
 0x12a   :  { %v787_v56 = vadd.f32 %v771_v55, %v638_v29  ;;  %v11468_v25 = vpop.eup %9942  ;;  %v349_v14 = vmul.f32 1.442695, %v320_v40  ;;  %v303_v6 = vand.u32 2147483647, %v11463_v50  ;;  %9956 = vlog2.f32 %v361_v3  ;;  %v11484_v55 = vpop.permute.xlu1 %594 }
 0x12b   :  { %v997_v41 = vadd.f32 1.0, %v9939_v36  ;;  %v436_v24 = vmul.f32 %v11071_v58, %v10939_v2  ;;  %9958 = vrcp.f32 %v996_v54  ;;  %v364_v45 = vadd.f32 1.0, %v9941_v35  ;;  %15917 = vst [vmem:[#allocation78_spill] sm:$0xff] %v11484_v55 }
 0x12c   :  { %v11475_v22 = vadd.f32 %v920_v4, %v787_v56  ;;  %v319_v8 = vsub.f32 0.0, %v303_v6  ;;  %v11479_v31 = vmul.f32 %v10924_v59, %v11103_v44  ;;  %v11481_v53 = vpop.eup %9944  ;;  %9960 = vpow2.f32 %v343_v11  ;;  %v11491_v56 = vpop.permute.xlu0 %604 }
 0x12d   :  { %v437_v3 = vmul.f32 %v10939_v2, %v11103_v44  ;;  %v492_v36 = vrot.slane %v476_v33, 7  ;;  %v951_v40 = vsub.f32 0.0, %v11390_v17  ;;  %9962 = vpow2.f32 %v349_v14  ;;  %15918 = vst [vmem:[#allocation79_spill] sm:$0xff] %v11491_v56 }
 0x12e   :  { %15916 = vst [vmem:[#allocation77_spill] sm:$0xff] %v11475_v22  ;;  %v15610_v35 = vrot.slane %v11479_v31, 7  ;;  %9964 = vrcp.f32 %v997_v41  ;;  %v347_v4 = vmul.f32 1.442695, %v319_v8  ;;  %v15919_v6 = vrot.slane %v11409_v26, 7  ;;  %v11499_v33 = vpop.eup %9946 }
 0x12f   :  { %v659_v29 = vmul.f32 %v11071_v58, %v10927_v60  ;;  %15920 = vst [vmem:[#allocation80_spill] sm:$0xff] %v11499_v33  ;;  %9966 = vlog2.f32 %v364_v45  ;;  %v456_v54 = vadd.f32 %v10984_v20, %v436_v24  ;;  %v457_v26 = vadd.f32 %v10984_v20, %v437_v3 }
 0x130   :  { %v504_v11 = vsel %vm499_vm1, %v15919_v6, %v492_v36  ;;  %v503_v14 = vsel %vm499_vm1, %v492_v36, %v15610_v35  ;;  %v11507_v8 = vpop.eup %9948  ;;  %v11513_v63 = vmul.f32 %v10927_v60, %v11103_v44  ;;  %v976_v24 = vmul.f32 1.442695, %v951_v40 }
 0x131   :  { %v623_v41 = vmul.f32 %v11385_v48, %v504_v11  ;;  %15921 = vst [vmem:[#allocation81_spill] sm:$0xff] %v11507_v8  ;;  %v624_v6 = vmul.f32 %v11484_v55, %v503_v14  ;;  %v675_v45 = vrot.slane %v659_v29, 6  ;;  %v9951_v12 = vpop.eup %9950  ;;  %v808_v33 = vmul.f32 %v11071_v58, %v10930_v61  ;;  %v11526_v55 = vpop.permute.xlu1 %599 }
 0x132   :  { %v11519_v36 = vmul.f32 %v10930_v61, %v11103_v44  ;;  %v9953_v11 = vpop.eup %9952  ;;  %9968 = vpow2.f32 %v347_v4  ;;  %v15619_v14 = vrot.slane %v11513_v63, 6  ;;  %v15922_v35 = vrot.slane %v11419_v38, 6  ;;  %15923 = vst [vmem:[#allocation82_spill] sm:$0xff] %v11526_v55 }
 0x133   :  { %v639_v17 = vadd.f32 %v623_v41, %v456_v54  ;;  %v640_v3 = vadd.f32 %v624_v6, %v457_v26  ;;  %v9955_v40 = vpop.eup %9954  ;;  %v824_v41 = vrot.slane %v808_v33, 5  ;;  %v11532_v58 = vadd.f32 %v11122_v57, %v10888_v43  ;;  %v11537_v6 = vpop.permute.xlu0 %746 }
 0x134   :  { %v685_v29 = vsel %vm680_vm2, %v15922_v35, %v675_v45  ;;  %v11534_v4 = vpop.eup %9956  ;;  %v363_v26 = vadd.f32 1.0, %v9951_v12  ;;  %v952_v38 = vsub.f32 0.0, %v11475_v22  ;;  %15924 = vst [vmem:[#allocation83_spill] sm:$0xff] %v11537_v6  ;;  %v684_v35 = vsel %vm680_vm2, %v675_v45, %v15619_v14 }
 0x135   :  { %v772_v54 = vmul.f32 %v11412_v49, %v685_v29  ;;  %v11545_v33 = vmul.f32 %v11100_v21, %v10924_v59  ;;  %v11547_v29 = vpop.eup %9958  ;;  %v773_v48 = vmul.f32 %v11537_v6, %v684_v35  ;;  %v15926_v12 = vrot.slane %v11519_v36, 5 }
 0x136   :  { %15925 = vst [vmem:[#allocation84_spill] sm:$0xff] %v11547_v29  ;;  %v15927_v22 = vrot.slane %v11425_v13, 5  ;;  %v9961_v45 = vpop.eup %9960  ;;  %9970 = vpow2.f32 %v976_v24  ;;  %v998_v14 = vadd.f32 1.0, %v9955_v40  ;;  %v366_v52 = vadd.f32 1.0, %v9953_v11 }
 0x137   :  { %v788_v49 = vadd.f32 %v772_v54, %v639_v17  ;;  %v833_v44 = vsel %vm829_vm3, %v824_v41, %v15926_v12  ;;  %v9963_v29 = vpop.eup %9962  ;;  %v789_v27 = vadd.f32 %v773_v48, %v640_v3  ;;  %v306_v54 = vand.u32 2147483647, %v11532_v58 }
 0x138   :  { %v834_v8 = vsel %vm829_vm3, %v15927_v22, %v824_v41  ;;  %v922_v17 = vmul.f32 %v11465_v5, %v833_v44  ;;  %v438_v35 = vmul.f32 %v11100_v21, %v10939_v2  ;;  %v11563_v12 = vpop.eup %9964  ;;  %v978_v13 = vmul.f32 1.442695, %v952_v38 }
 0x139   :  { %v921_v34 = vmul.f32 %v11427_v18, %v834_v8  ;;  %v15624_v22 = vrot.slane %v11545_v33, 7  ;;  %v11570_v24 = vadd.f32 %v10888_v43, %v11130_v23  ;;  %v11572_v8 = vpop.permute.xlu1 %750  ;;  %v11574_v48 = vpop.eup %9966  ;;  %9972 = vlog2.f32 %v363_v26 }
 0x13a   :  { %15928 = vst [vmem:[#allocation85_spill] sm:$0xff] %v11572_v8  ;;  %v365_v44 = vadd.f32 1.0, %v9961_v45  ;;  %v11576_v11 = vadd.f32 %v922_v17, %v789_v27  ;;  %v322_v3 = vsub.f32 0.0, %v306_v54  ;;  %9974 = vlog2.f32 %v366_v52 }
 0x13b   :  { %v11565_v6 = vadd.f32 %v921_v34, %v788_v49  ;;  %v368_v40 = vadd.f32 1.0, %v9963_v29  ;;  %v15930_v49 = vrot.slane %v11479_v31, 7  ;;  %9976 = vrcp.f32 %v998_v14  ;;  %v11616_v31 = vpop.permute.xlu0 %758 }
 0x13c   :  { %15929 = vst [vmem:[#allocation86_spill] sm:$0xff] %v11576_v11  ;;  %v458_v26 = vadd.f32 %v10984_v20, %v438_v35  ;;  %v9969_v38 = vpop.eup %9968  ;;  %9978 = vpow2.f32 %v978_v13  ;;  %v954_v52 = vsub.f32 0.0, %v11576_v11  ;;  %v305_v29 = vand.u32 2147483647, %v11570_v24  ;;  %15932 = vst [vmem:[#allocation88_spill] sm:$0xff] %v11616_v31 }
 0x13d   :  { %v953_v34 = vsub.f32 0.0, %v11565_v6  ;;  %v502_v43 = vsel %vm499_vm1, %v15930_v49, %v15624_v22  ;;  %v11592_v45 = vmul.f32 %v10927_v60, %v11130_v23  ;;  %9980 = vlog2.f32 %v365_v44  ;;  %v11597_v13 = vpop.permute.xlu1 %899 }
 0x13e   :  { %v625_v27 = vmul.f32 %v11526_v55, %v502_v43  ;;  %v353_v14 = vmul.f32 1.442695, %v322_v3  ;;  %9982 = vlog2.f32 %v368_v40  ;;  %v321_v20 = vsub.f32 0.0, %v305_v29  ;;  %15931 = vst [vmem:[#allocation87_spill] sm:$0xff] %v11597_v13 }
 0x13f   :  { %v980_v54 = vmul.f32 1.442695, %v953_v34  ;;  %v663_v35 = vmul.f32 %v11122_v57, %v10927_v60  ;;  %v367_v49 = vadd.f32 1.0, %v9969_v38  ;;  %v15626_v43 = vrot.slane %v11592_v45, 6  ;;  %v11683_v11 = vpop.permute.xlu0 %907 }
 0x140   :  { %v641_v17 = vadd.f32 %v625_v27, %v458_v26  ;;  %v11602_v41 = vmul.f32 %v11100_v21, %v10927_v60  ;;  %v11606_v44 = vmul.f32 %v10930_v61, %v11130_v23  ;;  %v9971_v3 = vpop.eup %9970  ;;  %v982_v40 = vmul.f32 1.442695, %v954_v52  ;;  %15947 = vst [vmem:[#allocation90_spill] sm:$0xff] %v11683_v11 }
 0x141   :  { %v351_v34 = vmul.f32 1.442695, %v321_v20  ;;  %v679_v26 = vrot.slane %v663_v35, 6  ;;  %v812_v27 = vmul.f32 %v11122_v57, %v10930_v61  ;;  %9984 = vpow2.f32 %v353_v14  ;;  %v15933_v20 = vld [vmem:[#allocation28_spill] sm:$0xff] }
 0x142   :  { %v11614_v60 = vmul.f32 %v11100_v21, %v10930_v61  ;;  %v15934_v35 = vrot.slane %v15933_v20, 6  ;;  %v11628_v29 = vadd.f32 1.0, %v9971_v3  ;;  %v15936_v5 = vrot.slane %v11513_v63, 6  ;;  %v11649_v63 = vpop.permute.xlu1 %609 }
 0x143   :  { %9986 = vpow2.f32 %v351_v34  ;;  %v681_v52 = vsel %vm680_vm2, %v15626_v43, %v679_v26  ;;  %v828_v22 = vrot.slane %v812_v27, 5  ;;  %v11626_v38 = vpop.eup %9972  ;;  %v15935_v34 = vrot.slane %v11602_v41, 6  ;;  %v15938_v27 = vld [vmem:[#allocation29_spill] sm:$0xff]  ;;  %15940 = vst [vmem:[#allocation28_spill] sm:$0xff] %v11649_v63 }
 0x144   :  { %v696_v14 = vsel %vm680_vm2, %v679_v26, %v15934_v35  ;;  %9988 = vpow2.f32 %v980_v54  ;;  %v11637_v55 = vpop.eup %9974  ;;  %v15937_v26 = vrot.slane %v11606_v44, 5  ;;  %v15939_v35 = vrot.slane %v15938_v27, 5 }
 0x145   :  { %v683_v43 = vsel %vm680_vm2, %v15936_v5, %v15935_v34  ;;  %v15630_v61 = vrot.slane %v11614_v60, 5  ;;  %v11651_v18 = vpop.eup %9976  ;;  %9990 = vlog2.f32 %v367_v49  ;;  %v374_v34 = vmul.f32 0.6931472, %v11264_v42 }
 0x146   :  { %v774_v20 = vmul.f32 %v11572_v8, %v683_v43  ;;  %v830_v3 = vsel %vm829_vm3, %v15937_v26, %v828_v22  ;;  %v845_v54 = vsel %vm829_vm3, %v828_v22, %v15939_v35  ;;  %v372_v43 = vmul.f32 0.6931472, %v11288_v28  ;;  %v11656_v8 = vpop.eup %9978 }
 0x147   :  { %9992 = vpow2.f32 %v982_v40  ;;  %v15941_v22 = vrot.slane %v11519_v36, 5  ;;  %v479_v49 = vmul.f32 %v10924_v59, %v11130_v23  ;;  %v11666_v35 = vpop.eup %9980  ;;  %v15942_v42 = vmax.f32 %v11036_v10, 0.0 }
 0x148   :  { %v790_v26 = vadd.f32 %v774_v20, %v641_v17  ;;  %v15944_v17 = vmax.f32 %v11015_v32, 0.0  ;;  %v480_v36 = vmul.f32 %v11122_v57, %v10924_v59  ;;  %v11679_v20 = vpop.eup %9982  ;;  %v776_v21 = vmul.f32 %v11616_v31, %v681_v52  ;;  %v15948_v32 = vld [vmem:[#allocation7_spill] sm:$0xff] }
 0x149   :  { %v832_v27 = vsel %vm829_vm3, %v15941_v22, %v15630_v61  ;;  %v11671_v5 = vadd.f32 %v372_v43, %v15942_v42  ;;  %v15946_v22 = vld [vmem:[#allocation11_spill] sm:$0xff]  ;;  %v376_v10 = vmul.f32 0.6931472, %v11348_v47  ;;  %v440_v59 = vmul.f32 %v11122_v57, %v10939_v2  ;;  %v11700_v47 = vpop.permute.xlu1 %754 }
 0x14a   :  { %v923_v28 = vmul.f32 %v11597_v13, %v832_v27  ;;  %v11675_v40 = vadd.f32 %v374_v34, %v15944_v17  ;;  %v761_v61 = vmul.f32 %v15946_v22, %v696_v14  ;;  %v495_v27 = vrot.slane %v479_v49, 7  ;;  %v15949_v17 = vld [vmem:[#allocation5_spill] sm:$0xff]  ;;  %15951 = vst [vmem:[#allocation7_spill] sm:$0xff] %v11700_v47 }
 0x14b   :  { %15943 = vst [vmem:[#allocation29_spill] sm:$0xff] %v11671_v5  ;;  %v1057_v34 = vmul.f32 %v15948_v32, %v11671_v5  ;;  %v910_v14 = vmul.f32 %v15949_v17, %v845_v54  ;;  %v496_v22 = vrot.slane %v480_v36, 7  ;;  %v378_v52 = vmul.f32 0.6931472, %v11332_v30  ;;  %v15952_v36 = vld [vmem:[#allocation25_spill] sm:$0xff] }
 0x14c   :  { %15945 = vst [vmem:[#allocation89_spill] sm:$0xff] %v11675_v40  ;;  %v11686_v43 = vadd.f32 %v923_v28, %v790_v26  ;;  %v1058_v42 = vmul.f32 %v15948_v32, %v11675_v40  ;;  %v15950_v49 = vmax.f32 %v11112_v7, 0.0  ;;  %v9985_v26 = vpop.eup %9984  ;;  %v925_v28 = vmul.f32 %v11683_v11, %v830_v3 }
 0x14d   :  { %v439_v57 = vmul.f32 %v10939_v2, %v11130_v23  ;;  %v9987_v5 = vpop.eup %9986  ;;  %v370_v54 = vadd.f32 1.0, %v9985_v26  ;;  %v500_v30 = vsel %vm499_vm1, %v495_v27, %v496_v22  ;;  %v15953_v7 = vrot.slane %v15952_v36, 7  ;;  %v10600_v2 = vld [vmem:[%s15516_s6] ss:$0 sm:$0xff] }
 0x14e   :  { %v11698_v31 = vadd.f32 %v376_v10, %v15950_v49  ;;  %v955_v13 = vsub.f32 0.0, %v11686_v43  ;;  %v9637_v40 = vpack.i.bf16 %v1058_v42, %v1057_v34  ;;  %v15954_v49 = vmax.f32 %v11107_v1, 0.0  ;;  %v11716_v3 = vpop.eup %9988  ;;  %v15955_v36 = vld [vmem:[#allocation2_spill] sm:$0xff] }
 0x14f   :  { %v515_v10 = vsel %vm499_vm1, %v496_v22, %v15953_v7  ;;  %v369_v34 = vadd.f32 1.0, %v9987_v5  ;;  %v460_v26 = vadd.f32 %v10600_v2, %v440_v59  ;;  %9994 = vlog2.f32 %v370_v54 }
 0x150   :  { %v11714_v17 = vadd.f32 %v378_v52, %v15954_v49  ;;  %v984_v42 = vmul.f32 1.442695, %v955_v13  ;;  %9638 = vrot.lane.b32.xlu1 %v9637_v40, %s10656_s19  ;;  %v612_v11 = vmul.f32 %v15955_v36, %v515_v10  ;;  %v627_v22 = vmul.f32 %v11649_v63, %v500_v30  ;;  %v11728_v13 = vpop.eup %9990  ;;  %v11738_v63 = vpop.permute.xlu1 %903 }
 0x151   :  { %v1059_v1 = vmul.f32 %v15948_v32, %v11698_v31  ;;  %9996 = vlog2.f32 %v369_v34  ;;  %v459_v52 = vadd.f32 %v10600_v2, %v439_v57  ;;  %v15956_v7 = vrot.slane %v11545_v33, 7  ;;  %v11735_v54 = vpop.eup %9992  ;;  %15957 = vst [vmem:[#allocation25_spill] sm:$0xff] %v11738_v63 }
 0x152   :  { %v1060_v5 = vmul.f32 %v15948_v32, %v11714_v17  ;;  %v628_v40 = vadd.f32 %v612_v11, %v11395_v37  ;;  %9998 = vpow2.f32 %v984_v42  ;;  %v643_v30 = vadd.f32 %v627_v22, %v460_v26 }
 0x153   :  { %v501_v59 = vsel %vm499_vm1, %v15956_v7, %v495_v27  ;;  %v15958_v34 = vrot.slane %v11592_v45, 6  ;;  %v15959_v37 = vrot.slane %v11602_v41, 6  ;;  %v380_v33 = vmul.f32 0.6931472, %v11468_v25 }
 0x154   :  { %v9642_v10 = vpack.i.bf16 %v1060_v5, %v1059_v1  ;;  %v626_v49 = vmul.f32 %v11491_v56, %v501_v59  ;;  %v777_v36 = vadd.f32 %v761_v61, %v628_v40  ;;  %v382_v11 = vmul.f32 0.6931472, %v11362_v46 }
 0x155   :  { %v682_v57 = vsel %vm680_vm2, %v15959_v37, %v15958_v34  ;;  %v792_v27 = vadd.f32 %v776_v21, %v643_v30  ;;  %v15960_v26 = vrot.slane %v11606_v44, 5  ;;  %v15961_v61 = vrot.slane %v11614_v60, 5 }
 0x156   :  { %9643 = vrot.lane.b32.xlu1 %v9642_v10, %s10656_s19  ;;  %v642_v42 = vadd.f32 %v626_v49, %v459_v52  ;;  %v775_v2 = vmul.f32 %v11700_v47, %v682_v57  ;;  %v11756_v45 = vadd.f32 %v910_v14, %v777_v36  ;;  %v15962_v22 = vmax.f32 %v11212_v19, 0.0  ;;  %v1053_v47 = vld [vmem:[%s15517_s1 + $0x78] sm:$0xff] }
 0x157   :  { %v831_v41 = vsel %vm829_vm3, %v15961_v61, %v15960_v26  ;;  %v15963_v21 = vmax.f32 %v11135_v16, 0.0  ;;  %v11767_v5 = vadd.f32 %v925_v28, %v792_v27  ;;  %v384_v60 = vmul.f32 0.6931472, %v11534_v4 }
 0x158   :  { %v11760_v25 = vadd.f32 %v380_v33, %v15962_v22  ;;  %v924_v1 = vmul.f32 %v11738_v63, %v831_v41  ;;  %v791_v44 = vadd.f32 %v775_v2, %v642_v42  ;;  %v386_v40 = vmul.f32 0.6931472, %v11481_v53 }
 0x159   :  { %v11764_v46 = vadd.f32 %v382_v11, %v15963_v21  ;;  %v942_v14 = vsub.f32 0.0, %v11756_v45  ;;  %v388_v16 = vmul.f32 0.6931472, %v11626_v38  ;;  %v289_v52 = vmax.f32 %v11570_v24, 0.0  ;;  %v9995_v37 = vpop.eup %9994 }
 0x15a   :  { %v1061_v19 = vmul.f32 %v15948_v32, %v11760_v25  ;;  %v957_v28 = vsub.f32 0.0, %v11767_v5  ;;  %v11779_v7 = vadd.f32 %v924_v1, %v791_v44  ;;  %v15964_v4 = vmax.f32 %v11262_v62, 0.0 }
 0x15b   :  { %v1062_v36 = vmul.f32 %v15948_v32, %v11764_v46  ;;  %v958_v53 = vmul.f32 1.442695, %v942_v14  ;;  %v15965_v10 = vmax.f32 %v11216_v9, 0.0  ;;  %v390_v34 = vmul.f32 0.6931472, %v11574_v48  ;;  %v9997_v62 = vpop.eup %9996  ;;  %v15967_v48 = vld [vmem:[#allocation63_spill] sm:$0xff] }
 0x15c   :  { %v11783_v59 = vadd.f32 %v384_v60, %v15964_v4  ;;  %v1000_v38 = vadd.f32 1.0, %v11656_v8  ;;  %v988_v24 = vmul.f32 1.442695, %v957_v28  ;;  %v956_v57 = vsub.f32 0.0, %v11779_v7  ;;  %v9999_v2 = vpop.eup %9998 }
 0x15d   :  { %v9647_v30 = vpack.i.bf16 %v1062_v36, %v1061_v19  ;;  %v11787_v49 = vadd.f32 %v386_v40, %v15965_v10  ;;  %10000 = vpow2.f32 %v958_v53  ;;  %v15966_v11 = vmax.f32 %v11360_v15, 0.0 }
 0x15e   :  { %v1063_v33 = vmul.f32 %v15948_v32, %v11783_v59  ;;  %v15968_v42 = vmax.f32 %v15967_v48, 0.0  ;;  %10002 = vrcp.f32 %v11628_v29  ;;  %v986_v26 = vmul.f32 1.442695, %v956_v57  ;;  %v15970_v29 = vld [vmem:[#allocation66_spill] sm:$0xff] }
 0x15f   :  { %9648 = vrot.lane.b32.xlu1 %v9647_v30, %s10656_s19  ;;  %v1064_v9 = vmul.f32 %v15948_v32, %v11787_v49  ;;  %v11799_v27 = vadd.f32 %v388_v16, %v15966_v11  ;;  %v392_v61 = vmul.f32 0.6931472, %v11666_v35  ;;  %v394_v41 = vmul.f32 0.6931472, %v11637_v55  ;;  %v15975_v57 = vld [vmem:[#allocation54_spill] sm:$0xff] }
 0x160   :  { %v11803_v8 = vadd.f32 %v390_v34, %v15968_v42  ;;  %v1001_v22 = vadd.f32 1.0, %v11716_v3  ;;  %10004 = vpow2.f32 %v986_v26  ;;  %v15969_v44 = vmax.f32 %v11400_v39, 0.0  ;;  %v15979_v26 = vld [vmem:[#allocation60_spill] sm:$0xff] }
 0x161   :  { %v9652_v21 = vpack.i.bf16 %v1064_v9, %v1063_v33  ;;  %v1065_v15 = vmul.f32 %v15948_v32, %v11799_v27  ;;  %v15971_v40 = vmax.f32 %v15970_v29, 0.0  ;;  %v396_v55 = vmul.f32 0.6931472, %v11728_v13  ;;  %v15976_v33 = vld [vmem:[#allocation80_spill] sm:$0xff]  ;;  %v15978_v9 = vld [vmem:[#allocation81_spill] sm:$0xff] }
 0x162   :  { %v1066_v1 = vmul.f32 %v15948_v32, %v11803_v8  ;;  %v11815_v60 = vadd.f32 %v392_v61, %v15969_v44  ;;  %v1003_v35 = vadd.f32 1.0, %v9999_v2  ;;  %10006 = vpow2.f32 %v988_v24  ;;  %v15983_v44 = vld [vmem:[#allocation67_spill] sm:$0xff] }
 0x163   :  { %v11819_v14 = vadd.f32 %v394_v41, %v15971_v40  ;;  %9653 = vrot.lane.b32.xlu1 %v9652_v21, %s10656_s19  ;;  %v398_v19 = vmul.f32 0.6931472, %v11679_v20  ;;  %v15972_v16 = vmax.f32 %v11463_v50, 0.0  ;;  %v400_v4 = vmul.f32 0.6931472, %v9997_v62  ;;  %v15977_v62 = vld [vmem:[#allocation55_spill] sm:$0xff] }
 0x164   :  { %v9657_v3 = vpack.i.bf16 %v1066_v1, %v1065_v15  ;;  %v1067_v36 = vmul.f32 %v15948_v32, %v11815_v60  ;;  %10008 = vrcp.f32 %v1000_v38  ;;  %v1002_v13 = vadd.f32 1.0, %v11735_v54  ;;  %v15981_v21 = vld [vmem:[#allocation74_spill] sm:$0xff]  ;;  %v15982_v1 = vld [vmem:[#allocation47_spill] sm:$0xff] }
 0x165   :  { %v1068_v39 = vmul.f32 %v15948_v32, %v11819_v14  ;;  %v11830_v28 = vadd.f32 %v396_v55, %v15972_v16  ;;  %v15973_v53 = vmax.f32 %v11439_v0, 0.0  ;;  %v402_v10 = vmul.f32 0.6931472, %v9995_v37  ;;  %v11875_v55 = vld [vmem:[%s15517_s1] sm:$0xff] }
 0x166   :  { %10010 = vrcp.f32 %v1001_v22  ;;  %v11839_v24 = vadd.f32 %v400_v4, %v289_v52  ;;  %v15974_v38 = vmax.f32 %v11532_v58, 0.0  ;;  %v11853_v52 = vmul.f32 %v15976_v33, %v15975_v57  ;;  %v15980_v22 = vld [vmem:[#allocation48_spill] sm:$0xff]  ;;  %8136 = vmatprep.mubr.f32.mxu0 %v11875_v55  ;;  %v15992_v33 = vld [vmem:[#allocation77_spill] sm:$0xff] }
 0x167   :  { %v11835_v30 = vadd.f32 %v398_v19, %v15973_v53  ;;  %v9662_v20 = vpack.i.bf16 %v1068_v39, %v1067_v36  ;;  %v1069_v34 = vmul.f32 %v15948_v32, %v11830_v28  ;;  %9658 = vrot.lane.b32.xlu1 %v9657_v3, %s10656_s19  ;;  %10012 = vrcp.f32 %v1003_v35  ;;  %v10001_v37 = vpop.eup %10000  ;;  %v15984_v3 = vld [vmem:[#allocation70_spill] sm:$0xff]  ;;  %v15986_v36 = vld [vmem:[#allocation71_spill] sm:$0xff]  ;;  %v15988_v53 = vld [vmem:[#allocation61_spill] sm:$0xff] }
 0x168   :  { %v11846_v54 = vadd.f32 %v402_v10, %v15974_v38  ;;  %v1071_v0 = vmul.f32 %v15948_v32, %v11839_v24  ;;  %v11857_v11 = vmul.f32 %v15978_v9, %v15977_v62  ;;  %v15646_v42 = vmov 96   ;;  %v10003_v2 = vpop.eup %10002  ;;  %v15989_v10 = vld [vmem:[#allocation84_spill] sm:$0xff] }
 0x169   :  { %v1070_v50 = vmul.f32 %v15948_v32, %v11835_v30  ;;  %9663 = vrot.lane.b32.xlu0 %v9662_v20, %s10656_s19  ;;  %v991_v61 = vadd.f32 1.0, %v15979_v26  ;;  %10014 = vrcp.f32 %v1002_v13  ;;  %v990_v41 = vadd.f32 1.0, %v10001_v37  ;;  %v15996_v26 = vld [vmem:[#allocation86_spill] sm:$0xff] }
 0x16a   :  { %v1072_v58 = vmul.f32 %v15948_v32, %v11846_v54  ;;  %9717 = vset.pattern.permute.xlu0 %v15646_v42  ;;  %v11865_v15 = vmul.f32 %v15981_v21, %v15980_v22  ;;  %v11869_v29 = vmul.f32 %v15983_v44, %v15982_v1  ;;  %v10005_v32 = vpop.eup %10004  ;;  %v11879_v19 = vmul.f32 %v11651_v18, %v15984_v3  ;;  %v15999_v21 = vld [vmem:[#allocation36_spill] sm:$0xff] }
 0x16b   :  { %v9667_v48 = vpack.i.bf16 %v1070_v50, %v1069_v34  ;;  %10016 = vrcp.f32 %v990_v41  ;;  %v11882_v39 = vmul.f32 %v10003_v2, %v15986_v36  ;;  %v9682_v16 = vpack.i.bf16 %v11857_v11, %v11853_v52  ;;  %v15991_v34 = vld [vmem:[#allocation62_spill] sm:$0xff] }
 0x16c   :  { %v9672_v40 = vpack.i.bf16 %v1072_v58, %v1071_v0  ;;  %v10007_v35 = vpop.eup %10006  ;;  %15985 = vst [vmem:[#allocation63_spill] sm:$0xff] %v11879_v19  ;;  %10018 = vrcp.f32 %v991_v61  ;;  %v1004_v4 = vadd.f32 1.0, %v10005_v32  ;;  %v11890_v20 = vmul.f32 %v15989_v10, %v15988_v53 }
 0x16d   :  { %9668 = vrot.lane.b32.xlu1 %v9667_v48, %s10656_s19  ;;  %15987 = vst [vmem:[#allocation66_spill] sm:$0xff] %v11882_v39  ;;  %v11894_v18 = vmul.f32 %v11563_v12, %v15991_v34  ;;  %v9677_v50 = vpack.i.bf16 %v11869_v29, %v11865_v15  ;;  %v1005_v0 = vadd.f32 1.0, %v10007_v35  ;;  %v9692_v37 = vpack.i.bf16 %v11882_v39, %v11879_v19 }
 0x16e   :  { %9673 = vrot.lane.b32.xlu0 %v9672_v40, %s10656_s19  ;;  %v10009_v13 = vpop.eup %10008  ;;  %15990 = vst [vmem:[#allocation54_spill] sm:$0xff] %v11890_v20  ;;  %10020 = vrcp.f32 %v1004_v4  ;;  %v16017_v56 = vmov 1  }
 0x16f   :  { %v11903_v62 = vmul.f32 %v10009_v13, %v15992_v33  ;;  %v9687_v9 = vpack.i.bf16 %v11894_v18, %v11890_v20  ;;  %10022 = vrcp.f32 %v1005_v0 }
 0x170   :  { %v10011_v38 = vpop.eup %10010 }
 0x171   :  { %9683 = vrot.lane.b32.xlu1 %v9682_v16, %s10654_s18  ;;  %v10013_v57 = vpop.eup %10012  ;;  %15993 = vst [vmem:[#allocation80_spill] sm:$0xff] %v11903_v62  ;;  %v11906_v12 = vmul.f32 %v10011_v38, %v11565_v6 }
 0x172   :  { %9678 = vrot.lane.b32.xlu0 %v9677_v50, %s10654_s18  ;;  %v11912_v58 = vmul.f32 %v10013_v57, %v11686_v43 }
 0x173   :  { %15994 = vst [vmem:[#allocation55_spill] sm:$0xff] %v11906_v12  ;;  %v10015_v48 = vpop.eup %10014  ;;  %v9697_v6 = vpack.i.bf16 %v11906_v12, %v11903_v62 }
 0x174   :  { %15995 = vst [vmem:[#allocation81_spill] sm:$0xff] %v11912_v58  ;;  %v11916_v61 = vmul.f32 %v10015_v48, %v15996_v26 }
 0x175   :  { %9693 = vrot.lane.b32.xlu1 %v9692_v37, %s10654_s18  ;;  %v10017_v2 = vpop.eup %10016 }
 0x176   :  { %9688 = vrot.lane.b32.xlu0 %v9687_v9, %s10654_s18  ;;  %15997 = vst [vmem:[#allocation60_spill] sm:$0xff] %v11916_v61  ;;  %v10019_v41 = vpop.eup %10018  ;;  %v11923_v22 = vmul.f32 %v10017_v2, %v11756_v45  ;;  %v9702_v43 = vpack.i.bf16 %v11912_v58, %v11916_v61 }
 0x177   :  { %v11929_v1 = vmul.f32 %v10019_v41, %v15999_v21 }
 0x178   :  { %15998 = vst [vmem:[#allocation48_spill] sm:$0xff] %v11923_v22  ;;  %v10021_v44 = vpop.eup %10020 }
 0x179   :  { %1404 = vrot.lane.b32.xlu1 %v11865_v15, %s10658_s25  ;;  %16000 = vst [vmem:[#allocation74_spill] sm:$0xff] %v11929_v1  ;;  %v9707_v40 = vpack.i.bf16 %v11929_v1, %v11923_v22  ;;  %v10023_v32 = vpop.eup %10022  ;;  %v11937_v45 = vmul.f32 %v10021_v44, %v11779_v7  ;;  %v16004_v7 = vld [vmem:[#allocation89_spill] sm:$0xff] }
 0x17a   :  { %9698 = vrot.lane.b32.xlu0 %v9697_v6, %s10654_s18  ;;  %v11941_v35 = vmul.f32 %v10023_v32, %v11767_v5  ;;  %v16003_v5 = vld [vmem:[#allocation29_spill] sm:$0xff] }
 0x17b   :  { %16001 = vst [vmem:[#allocation47_spill] sm:$0xff] %v11937_v45 }
 0x17c   :  { %16002 = vst [vmem:[#allocation67_spill] sm:$0xff] %v11941_v35  ;;  %v9712_v3 = vpack.i.bf16 %v11941_v35, %v11937_v45 }
 0x17d   :  { %9703 = vrot.lane.b32.xlu1 %v9702_v43, %s10654_s18 }
 0x17e   :  { %1402 = vrot.lane.b32.xlu0 %v11929_v1, %s10658_s25 }
 0x181   :  { %9708 = vrot.lane.b32.xlu1 %v9707_v40, %s10654_s18 }
 0x182   :  { %1406 = vrot.lane.b32.xlu0 %v11869_v29, %s10658_s25 }
 0x185   :  { %1400 = vrot.lane.b32.xlu1 %v11923_v22, %s10658_s25 }
 0x186   :  { %9713 = vrot.lane.b32.xlu0 %v9712_v3, %s10654_s18 }
 0x18a   :  { %1408 = vrot.lane.b32.xlu0 %v11853_v52, %s10658_s25 }
 0x18e   :  { %1410 = vrot.lane.b32.xlu0 %v11857_v11, %s10658_s25 }
 0x192   :  { %1412 = vrot.lane.b32.xlu0 %v11890_v20, %s10658_s25 }
 0x196   :  { %1414 = vrot.lane.b32.xlu0 %v11894_v18, %s10658_s25 }
 0x19a   :  { %1416 = vrot.lane.b32.xlu0 %v11879_v19, %s10658_s25 }
 0x19e   :  { %1418 = vrot.lane.b32.xlu0 %v11882_v39, %s10658_s25 }
 0x1a2   :  { %1420 = vrot.lane.b32.xlu0 %v11903_v62, %s10658_s25 }
 0x1a6   :  { %1422 = vrot.lane.b32.xlu0 %v11906_v12, %s10658_s25 }
 0x1aa   :  { %1424 = vrot.lane.b32.xlu0 %v11916_v61, %s10658_s25 }
 0x1ae   :  { %1426 = vrot.lane.b32.xlu0 %v11912_v58, %s10658_s25 }
 0x1b2   :  { %1428 = vrot.lane.b32.xlu0 %v11937_v45, %s10658_s25 }
 0x1b6   :  { %1430 = vrot.lane.b32.xlu0 %v11941_v35, %s10658_s25 }
 0x1ba   :  { %1877 = vperm.xlu0 %9717, %v16003_v5  }
 0x1be   :  { %1882 = vperm.xlu0 %9717, %v16004_v7  }
 0x1c2   :  { %1887 = vperm.xlu0 %9717, %v11698_v31   ;;  %v9639_v36 = vpop.permute.xlu1 %9638 }
 0x1c3   :  { %v9641_v16 = vunpack.i.h.bf16 %v9639_v36  ;;  %v9640_v4 = vunpack.i.l.bf16 %v9639_v36 }
 0x1c5   :  { %1282 = vxpose.xlu1.b32.start [1/16] (narrow) %v9640_v4, 8  ;;  %v8941_v13 = vpack.c.bf16 %v9641_v16, %v9640_v4 }
 0x1c6   :  { %1892 = vperm.xlu0 %9717, %v11714_v17  }
 0x1c7   :  { %8942 = vmatprep.subr.bf16.mxu0 %v8941_v13 }
 0x1c8   :  { %v9644_v53 = vpop.permute.xlu1 %9643  ;;  %8944 = vmatpush3.bf16.msra.mxu0 %v8941_v13 }
 0x1c9   :  { %v9646_v10 = vunpack.i.h.bf16 %v9644_v53  ;;  %v9645_v34 = vunpack.i.l.bf16 %v9644_v53  ;;  %1283 = vxpose.xlu1.b32.cont [2/16] (narrow) %v9641_v16, 8 }
 0x1ca   :  { %1897 = vperm.xlu0 %9717, %v11760_v25  }
 0x1cb   :  { %v8945_v50 = vpack.c.bf16 %v9646_v10, %v9645_v34 }
 0x1cd   :  { %8946 = vmatprep.subr.bf16.mxu0 %v8945_v50  ;;  %1284 = vxpose.xlu1.b32.cont [3/16] (narrow) %v9645_v34, 8 }
 0x1ce   :  { %1902 = vperm.xlu0 %9717, %v11764_v46   ;;  %8948 = vmatpush3.bf16.msra.mxu0 %v8945_v50 }
 0x1d1   :  { %v9649_v38 = vpop.permute.xlu1 %9648  ;;  %1285 = vxpose.xlu1.b32.cont [4/16] (narrow) %v9646_v10, 8 }
 0x1d2   :  { %1907 = vperm.xlu0 %9717, %v11783_v59   ;;  %v9651_v0 = vunpack.i.h.bf16 %v9649_v38  ;;  %v9650_v37 = vunpack.i.l.bf16 %v9649_v38 }
 0x1d4   :  { %v8949_v57 = vpack.c.bf16 %v9651_v0, %v9650_v37 }
 0x1d5   :  { %v9654_v33 = vpop.permute.xlu1 %9653  ;;  %1286 = vxpose.xlu1.b32.cont [5/16] (narrow) %v9650_v37, 8 }
 0x1d6   :  { %1912 = vperm.xlu0 %9717, %v11787_v49   ;;  %v9656_v9 = vunpack.i.h.bf16 %v9654_v33  ;;  %v9655_v48 = vunpack.i.l.bf16 %v9654_v33  ;;  %8950 = vmatprep.subr.bf16.mxu0 %v8949_v57  ;;  %v12014_v33 = vld [vmem:[%s15517_s1 + $0x8] sm:$0xff] }
 0x1d7   :  { %8952 = vmatpush3.bf16.msra.mxu0 %v8949_v57 }
 0x1d8   :  { %v8953_v2 = vpack.c.bf16 %v9656_v9, %v9655_v48 }
 0x1d9   :  { %v9659_v26 = vpop.permute.xlu1 %9658  ;;  %1287 = vxpose.xlu1.b32.cont [6/16] (narrow) %v9651_v0, 8 }
 0x1da   :  { %1917 = vperm.xlu0 %9717, %v11799_v27   ;;  %v9661_v6 = vunpack.i.h.bf16 %v9659_v26  ;;  %v9660_v41 = vunpack.i.l.bf16 %v9659_v26  ;;  %8954 = vmatprep.subr.bf16.mxu0 %v8953_v2 }
 0x1db   :  { %v9664_v43 = vpop.permute.xlu0 %9663  ;;  %8956 = vmatpush3.bf16.msra.mxu0 %v8953_v2  ;;  %v15655_v2 = vmov 0.0|0.0  }
 0x1dc   :  { %v9666_v21 = vunpack.i.h.bf16 %v9664_v43  ;;  %v9665_v44 = vunpack.i.l.bf16 %v9664_v43  ;;  %v8957_v40 = vpack.c.bf16 %v9661_v6, %v9660_v41 }
 0x1dd   :  { %1288 = vxpose.xlu1.b32.cont [7/16] (narrow) %v9655_v48, 8  ;;  %v1040_v48 = vld [vmem:[%s15517_s1 + $0x10] sm:$0xff] }
 0x1de   :  { %v8961_v3 = vpack.c.bf16 %v9666_v21, %v9665_v44  ;;  %1922 = vperm.xlu0 %9717, %v11803_v8   ;;  %8958 = vmatprep.subr.bf16.mxu0 %v8957_v40 }
 0x1df   :  { %v11983_v32 = vpop.permute.xlu1 %9668  ;;  %8960 = vmatpush3.bf16.msra.mxu0 %v8957_v40  ;;  %v1042_v40 = vld [vmem:[%s15517_s1 + $0x20] sm:$0xff] }
 0x1e0   :  { %v15650_v36 = vunpack.i.h.bf16 %v11983_v32  ;;  %v9670_v16 = vunpack.i.l.bf16 %v11983_v32  ;;  %v11988_v4 = vpop.permute.xlu0 %9673  ;;  %8962 = vmatprep.subr.bf16.mxu0 %v8961_v3 }
 0x1e1   :  { %v15648_v13 = vunpack.i.h.bf16 %v11988_v4  ;;  %v15649_v53 = vunpack.i.l.bf16 %v11988_v4  ;;  %1289 = vxpose.xlu1.b32.cont [8/16] (narrow) %v9656_v9, 8 }
 0x1e2   :  { %v8965_v10 = vpack.c.bf16 %v15650_v36, %v9670_v16  ;;  %1927 = vperm.xlu0 %9717, %v11815_v60  }
 0x1e3   :  { %v11996_v34 = vpop.permute.xlu1 %9683  ;;  %8964 = vmatpush3.bf16.msra.mxu0 %v8961_v3  ;;  %v8969_v38 = vpack.c.bf16 %v15648_v13, %v15649_v53  ;;  %v12037_v3 = vpack.c.bf16 %v12014_v33, %v11875_v55 }
 0x1e4   :  { %v9679_v50 = vpop.permute.xlu0 %9678  ;;  %8966 = vmatprep.subr.bf16.mxu0 %v8965_v10 }
 0x1e5   :  { %1290 = vxpose.xlu1.b32.cont [9/16] (narrow) %v9660_v41, 8  ;;  %v15644_v41 = vmov 97   ;;  %16005 = vst [vmem:[#allocation70_spill] sm:$0xff] %v12037_v3 }
 0x1e6   :  { %1932 = vperm.xlu0 %9717, %v11819_v14  }
 0x1e7   :  { %v12003_v0 = vpop.permute.xlu1 %9693  ;;  %8968 = vmatpush3.bf16.msra.mxu0 %v8965_v10 }
 0x1e8   :  { %v12006_v37 = vpop.permute.xlu0 %9688  ;;  %8970 = vmatprep.subr.bf16.mxu0 %v8969_v38 }
 0x1e9   :  { %1291 = vxpose.xlu1.b32.cont [10/16] (narrow) %v9661_v6, 8  ;;  %v1041_v6 = vld [vmem:[%s15517_s1 + $0x18] sm:$0xff] }
 0x1ea   :  { %1937 = vperm.xlu0 %9717, %v11830_v28  }
 0x1eb   :  { %v12008_v57 = vpop.permute.xlu1 %1404  ;;  %8972 = vmatpush3.bf16.msra.mxu0 %v8969_v38  ;;  %v9681_v38 = vunpack.i.h.bf16 %v9679_v50 }
 0x1ec   :  { %v12016_v9 = vpop.permute.xlu0 %9698  ;;  %8973 = vmatprep.subr.bf16.mxu0 %v15655_v2 }
 0x1ed   :  { %1292 = vxpose.xlu1.b32.cont [11/16] (narrow) %v9665_v44, 8  ;;  %v16006_v44 = vmov 0 }
 0x1ee   :  { %9719 = vset.pattern.permute.xlu0 %v15644_v41  ;;  %8137 = vmatmul.mubr.f32.vlgmr.msra.gmra.mrb[16].mxu0 %v12014_v33  ;;  %v9680_v41 = vunpack.i.l.bf16 %v9679_v50  ;;  %v16007_v44 = vsel %vm12044_vm4, 4294967295, %v16006_v44 }
 0x1ef   :  { %v12022_v26 = vpop.permute.xlu1 %9703  ;;  %2302 = vperm.xlu0 %9719, %v16003_v5   ;;  %8139 = vmatprep.mubr.f32.mxu0 %v1040_v48  ;;  %16008 = vst [vmem:[#allocation71_spill] sm:$0xff] %v16007_v44 }
 0x1f0   :  { %v12027_v43 = vpop.permute.xlu0 %1402  ;;  %v9003_v50 = vpack.c.bf16 %v9681_v38, %v9680_v41  ;;  %v9685_v41 = vunpack.i.l.bf16 %v11996_v34  ;;  %v1045_v38 = vld [vmem:[%s15517_s1 + $0x38] sm:$0xff] }
 0x1f1   :  { %1293 = vxpose.xlu1.b32.cont [12/16] (narrow) %v9666_v21, 8  ;;  %v1044_v21 = vld [vmem:[%s15517_s1 + $0x30] sm:$0xff] }
 0x1f2   :  { %8140 = vmatmul.mubr.f32.gmra.mrb[18].mxu0 %v1041_v6 }
 0x1f3   :  { %v9709_v10 = vpop.permute.xlu1 %9708  ;;  %2318 = vperm.xlu0 %9719, %v11760_v25   ;;  %8142 = vmatprep.mubr.f32.mxu0 %v1042_v40 }
 0x1f4   :  { %v9711_v42 = vunpack.i.h.bf16 %v9709_v10  ;;  %v9710_v13 = vunpack.i.l.bf16 %v9709_v10  ;;  %v12040_v53 = vpop.permute.xlu0 %1406  ;;  %8975 = vmatpush3.bf16.xpose.msra.mxu0 %v12037_v3  ;;  %v1043_v10 = vld [vmem:[%s15517_s1 + $0x28] sm:$0xff]  ;;  %v15653_v3 = vmov 98  }
 0x1f5   :  { %8976 = vmatprep.subr.bf16.mxu0 %v15655_v2  ;;  %1294 = vxpose.xlu1.b32.cont [13/16] (narrow) %v9670_v16, 8  ;;  %v1046_v16 = vld [vmem:[%s15517_s1 + $0x40] sm:$0xff] }
 0x1f6   :  { %v8997_v55 = vpack.c.bf16 %v9711_v42, %v9710_v13  ;;  %8143 = vmatmul.mubr.f32.gmra.mrb[20].mxu0 %v1043_v10  ;;  %v9686_v13 = vunpack.i.h.bf16 %v11996_v34 }
 0x1f7   :  { %v1401_v36 = vpop.permute.xlu1 %1400  ;;  %2334 = vperm.xlu0 %9719, %v11799_v27   ;;  %8145 = vmatprep.mubr.f32.mxu0 %v1044_v21 }
 0x1f8   :  { %8999 = vmatprep.subr.msk.bf16.mxu1 %vm12044_vm4, %v8997_v55  ;;  %8227 = vmatprep.mubr.msk.f32.mxu1 %vm56_vm0, %v1401_v36  ;;  %v12059_v42 = vpop.permute.xlu0 %9713  ;;  %v12068_v36 = vpack.c.bf16 %v1041_v6, %v1040_v48  ;;  %v16010_v48 = vunpack.i.h.bf16 %v11983_v32  ;;  %v9009_v34 = vpack.c.bf16 %v9686_v13, %v9685_v41  ;;  %v1047_v6 = vld [vmem:[%s15517_s1 + $0x48] sm:$0xff]  ;;  %v1048_v32 = vld [vmem:[%s15517_s1 + $0x50] sm:$0xff]  ;;  %v16011_v13 = vunpack.i.l.bf16 %v11988_v4 }
 0x1f9   :  { %9002 = vmatpush3.bf16.xpose.msk.msra.mxu1 %vm12044_vm4, %v8997_v55  ;;  %v12100_v41 = vpack.c.bf16 %v1043_v10, %v1042_v40  ;;  %v1050_v40 = vld [vmem:[%s15517_s1 + $0x60] sm:$0xff]  ;;  %v16014_v10 = vmov 0.0|0.0  }
 0x1fa   :  { %9005 = vmatprep.subr.msk.bf16.mxu1 %vm12044_vm4, %v9003_v50  ;;  %16009 = vst [vmem:[#allocation61_spill] sm:$0xff] %v12068_v36  ;;  %1295 = vxpose.xlu1.b32.cont [14/16] (narrow) %v16010_v48, 8  ;;  %v9690_v48 = vunpack.i.l.bf16 %v12006_v37 }
 0x1fb   :  { %2350 = vperm.xlu0 %9719, %v11830_v28   ;;  %8146 = vmatmul.mubr.f32.gmra.mrb[22].mxu0 %v1045_v38  ;;  %16012 = vst [vmem:[#allocation84_spill] sm:$0xff] %v12100_v41 }
 0x1fc   :  { %v12076_v55 = vpop.permute.xlu0 %1408  ;;  %8978 = vmatpush3.bf16.xpose.msra.mxu0 %v12068_v36  ;;  %8148 = vmatprep.mubr.f32.mxu0 %v1046_v16  ;;  %v16013_v36 = vunpack.i.h.bf16 %v11988_v4  ;;  %v1051_v4 = vld [vmem:[%s15517_s1 + $0x68] sm:$0xff] }
 0x1fd   :  { %8979 = vmatprep.subr.bf16.mxu0 %v15655_v2  ;;  %v1049_v2 = vld [vmem:[%s15517_s1 + $0x58] sm:$0xff] }
 0x1fe   :  { %1296 = vxpose.xlu1.b32.cont [15/16] (narrow) %v16011_v13, 8 }
 0x1ff   :  { %9721 = vset.pattern.permute.xlu0 %v15653_v3  ;;  %8149 = vmatmul.mubr.f32.gmra.mrb[24].mxu0 %v1047_v6 }
 0x200   :  { %v12091_v63 = vpop.permute.xlu0 %1410  ;;  %2712 = vperm.xlu0 %9721, %v16003_v5   ;;  %8151 = vmatprep.mubr.f32.mxu0 %v1048_v32 }
 0x201   :  { %9008 = vmatpush3.bf16.xpose.msk.msra.mxu1 %vm12044_vm4, %v9003_v50  ;;  %v9691_v50 = vunpack.i.h.bf16 %v12006_v37 }
 0x202   :  { %9011 = vmatprep.subr.msk.bf16.mxu1 %vm12044_vm4, %v9009_v34  ;;  %1297 = vxpose.xlu1.b32.end [16/16] (narrow) %v16013_v36, 8  ;;  %v12127_v36 = vpack.c.bf16 %v1045_v38, %v1044_v21 }
 0x203   :  { %v9015_v37 = vpack.c.bf16 %v9691_v50, %v9690_v48  ;;  %8152 = vmatmul.mubr.f32.gmra.mrb[26].mxu0 %v1049_v2  ;;  %v1052_v50 = vld [vmem:[%s15517_s1 + $0x70] sm:$0xff]  ;;  %v9695_v48 = vunpack.i.l.bf16 %v12003_v0 }
 0x204   :  { %v12105_v3 = vpop.permute.xlu0 %1412  ;;  %8981 = vmatpush3.bf16.xpose.msra.mxu0 %v12100_v41  ;;  %2728 = vperm.xlu0 %9721, %v11760_v25   ;;  %16015 = vst [vmem:[#allocation62_spill] sm:$0xff] %v12127_v36 }
 0x205   :  { %8982 = vmatprep.subr.bf16.mxu0 %v16014_v10  ;;  %8154 = vmatprep.mubr.f32.mxu0 %v1050_v40 }
 0x207   :  { %8155 = vmatmul.mubr.f32.gmra.mrb[28].mxu0 %v1051_v4 }
 0x208   :  { %v12120_v13 = vpop.permute.xlu0 %1414  ;;  %2744 = vperm.xlu0 %9721, %v11799_v27   ;;  %8157 = vmatprep.mubr.f32.mxu0 %v1052_v50 }
 0x209   :  { %9014 = vmatpush3.bf16.xpose.msk.msra.mxu1 %vm12044_vm4, %v9009_v34  ;;  %v9696_v34 = vunpack.i.h.bf16 %v12003_v0  ;;  %v15664_v0 = vmov 0.0  }
 0x20a   :  { %9017 = vmatprep.subr.msk.bf16.mxu1 %vm12044_vm4, %v9015_v37 }
 0x20b   :  { %v9021_v21 = vpack.c.bf16 %v9696_v34, %v9695_v48  ;;  %8158 = vmatmul.mubr.f32.gmra.mrb[30].mxu0 %v1053_v47  ;;  %v9701_v34 = vunpack.i.h.bf16 %v12016_v9  ;;  %v9700_v48 = vunpack.i.l.bf16 %v12016_v9 }
 0x20c   :  { %v12135_v41 = vpop.permute.xlu0 %1416  ;;  %8984 = vmatpush3.bf16.xpose.msra.mxu0 %v12127_v36  ;;  %2760 = vperm.xlu0 %9721, %v11830_v28   ;;  %v12151_v36 = vpack.c.bf16 %v1047_v6, %v1046_v16  ;;  %v12164_v16 = vpack.c.bf16 %v1049_v2, %v1048_v32  ;;  %v9706_v6 = vunpack.i.h.bf16 %v12022_v26  ;;  %v9716_v2 = vunpack.i.h.bf16 %v12059_v42 }
 0x20d   :  { %8985 = vmatprep.subr.bf16.mxu0 %v16014_v10  ;;  %8192 = vmatprep.mubr.msk.f32.mxu0 %vm10662_vm5, %v15664_v0  ;;  %v9705_v0 = vunpack.i.l.bf16 %v12022_v26  ;;  %v9715_v32 = vunpack.i.l.bf16 %v12059_v42  ;;  %v12189_v42 = vpack.c.bf16 %v1053_v47, %v1052_v50  ;;  %v12206_v47 = vld [vmem:[%s15518_s3] ss:$0 sm:$0xff] }
 0x20e   :  { %16016 = vst [vmem:[#allocation77_spill] sm:$0xff] %v12151_v36  ;;  %16018 = vst [vmem:[#allocation86_spill] sm:$0xff] %v12164_v16 }
 0x20f   :  { %16021 = vst [vmem:[#allocation29_spill] sm:$0xff] %v12189_v42 }
 0x210   :  { %v12149_v38 = vpop.permute.xlu0 %1418  ;;  %9725 = vset.pattern.permute.xlu0 %v16017_v56 }
 0x211   :  { %9020 = vmatpush3.bf16.xpose.msk.msra.mxu1 %vm12044_vm4, %v9015_v37  ;;  %v9027_v37 = vpack.c.bf16 %v9701_v34, %v9700_v48  ;;  %v9033_v34 = vpack.c.bf16 %v9706_v6, %v9705_v0  ;;  %v16020_v48 = vmov 96   ;;  %v9039_v0 = vpack.c.bf16 %v9716_v2, %v9715_v32 }
 0x212   :  { %9023 = vmatprep.subr.msk.bf16.mxu1 %vm12044_vm4, %v9021_v21 }
 0x214   :  { %8987 = vmatpush3.bf16.xpose.msra.mxu0 %v12151_v36  ;;  %v12158_v51 = vpop.permute.xlu0 %1420 }
 0x215   :  { %8988 = vmatprep.subr.bf16.mxu0 %v16014_v10 }
 0x218   :  { %v12168_v9 = vpop.permute.xlu0 %1422 }
 0x219   :  { %9026 = vmatpush3.bf16.xpose.msk.msra.mxu1 %vm12044_vm4, %v9021_v21  ;;  %v12176_v21 = vpack.c.bf16 %v1051_v4, %v1050_v40 }
 0x21a   :  { %9029 = vmatprep.subr.msk.bf16.mxu1 %vm12044_vm4, %v9027_v37 }
 0x21b   :  { %16019 = vst [vmem:[#allocation36_spill] sm:$0xff] %v12176_v21 }
 0x21c   :  { %8990 = vmatpush3.bf16.xpose.msra.mxu0 %v12164_v16  ;;  %v1425_v26 = vpop.permute.xlu0 %1424 }
 0x21d   :  { %8991 = vmatprep.subr.bf16.mxu0 %v16014_v10 }
 0x220   :  { %9718 = vset.pattern.permute.xlu1 %v16020_v48  ;;  %v1427_v40 = vpop.permute.xlu0 %1426 }
 0x221   :  { %9032 = vmatpush3.bf16.xpose.msk.msra.mxu1 %vm12044_vm4, %v9027_v37  ;;  %1942 = vperm.xlu1 %9718, %v11835_v30   ;;  %v16022_v37 = vmov 97  }
 0x222   :  { %9035 = vmatprep.subr.msk.bf16.mxu1 %vm12044_vm4, %v9033_v34 }
 0x224   :  { %8993 = vmatpush3.bf16.xpose.msra.mxu0 %v12176_v21  ;;  %v1429_v4 = vpop.permute.xlu0 %1428 }
 0x225   :  { %8994 = vmatprep.subr.bf16.mxu0 %v16014_v10  ;;  %1947 = vperm.xlu1 %9718, %v11839_v24  }
 0x228   :  { %v1431_v6 = vpop.permute.xlu0 %1430 }
 0x229   :  { %9038 = vmatpush3.bf16.xpose.msk.msra.mxu1 %vm12044_vm4, %v9033_v34  ;;  %1952 = vperm.xlu1 %9718, %v11846_v54  }
 0x22a   :  { %9041 = vmatprep.subr.msk.bf16.mxu1 %vm12044_vm4, %v9039_v0 }
 0x22c   :  { %8996 = vmatpush3.bf16.xpose.msra.mxu0 %v12189_v42 }
 0x22d   :  { %9720 = vset.pattern.permute.xlu1 %v16022_v37 }
 0x22e   :  { %2306 = vperm.xlu1 %9720, %v16004_v7  }
 0x231   :  { %9044 = vmatpush3.bf16.xpose.msk.msra.mxu1 %vm12044_vm4, %v9039_v0 }
 0x232   :  { %2310 = vperm.xlu1 %9720, %v11698_v31  }
 0x236   :  { %2314 = vperm.xlu1 %9720, %v11714_v17  }
 0x238   :  { %8228 = vmatmul.mubr.msk.f32.vlgmr.msra.gmra.mrb[0].mxu1 %vm56_vm0, %v12027_v43 }
 0x239   :  { %8230 = vmatprep.mubr.msk.f32.mxu1 %vm56_vm0, %v12008_v57  ;;  %v1878_v50 = vpop.permute.xlu0 %1877 }
 0x23a   :  { %v1959_v34 = vmul.f32 %v12206_v47, %v1878_v50  ;;  %2322 = vperm.xlu1 %9720, %v11764_v46  }
 0x23c   :  { %8231 = vmatmul.mubr.msk.f32.gmra.mrb[2].mxu1 %vm56_vm0, %v12040_v53  ;;  %v1975_v2 = vmul.f32 %v1959_v34, %v11923_v22 }
 0x23d   :  { %8233 = vmatprep.mubr.msk.f32.mxu1 %vm56_vm0, %v12076_v55  ;;  %v1883_v43 = vpop.permute.xlu0 %1882 }
 0x23e   :  { %v1960_v57 = vmul.f32 %v12206_v47, %v1883_v43  ;;  %2326 = vperm.xlu1 %9720, %v11783_v59  }
 0x240   :  { %8234 = vmatmul.mubr.msk.f32.gmra.mrb[4].mxu1 %vm56_vm0, %v12091_v63  ;;  %v1976_v32 = vmul.f32 %v1960_v57, %v11929_v1 }
 0x241   :  { %8236 = vmatprep.mubr.msk.f32.mxu1 %vm56_vm0, %v12105_v3  ;;  %v1888_v53 = vpop.permute.xlu0 %1887 }
 0x242   :  { %v9045_v0 = vpack.c.bf16 %v1976_v32, %v1975_v2  ;;  %v1961_v55 = vmul.f32 %v12206_v47, %v1888_v53  ;;  %2330 = vperm.xlu1 %9720, %v11787_v49  }
 0x244   :  { %8237 = vmatmul.mubr.msk.f32.gmra.mrb[6].mxu1 %vm56_vm0, %v12120_v13  ;;  %9046 = vmatprep.subr.bf16.mxu0 %v9045_v0  ;;  %v1977_v3 = vmul.f32 %v1961_v55, %v11865_v15 }
 0x245   :  { %8239 = vmatprep.mubr.msk.f32.mxu1 %vm56_vm0, %v12135_v41  ;;  %v1893_v63 = vpop.permute.xlu0 %1892 }
 0x246   :  { %v1962_v50 = vmul.f32 %v12206_v47, %v1893_v63  ;;  %2338 = vperm.xlu1 %9720, %v11803_v8   ;;  %v1298_v13 = vpop.trf.xlu1 }
 0x247   :  { %8193 = vmatmul.mubr.f32.vlgmr.msra.gmra.mrb[32].mxu0 %v1298_v13 }
 0x248   :  { %8240 = vmatmul.mubr.msk.f32.gmra.mrb[8].mxu1 %vm56_vm0, %v12149_v38  ;;  %v1978_v34 = vmul.f32 %v1962_v50, %v11869_v29  ;;  %9048 = vmatpush3.bf16.msra.mxu0 %v9045_v0 }
 0x249   :  { %8242 = vmatprep.mubr.msk.f32.mxu1 %vm56_vm0, %v12158_v51  ;;  %v1898_v41 = vpop.permute.xlu0 %1897 }
 0x24a   :  { %v9049_v43 = vpack.c.bf16 %v1978_v34, %v1977_v3  ;;  %v1963_v57 = vmul.f32 %v12206_v47, %v1898_v41  ;;  %2342 = vperm.xlu1 %9720, %v11815_v60  }
 0x24c   :  { %8243 = vmatmul.mubr.msk.f32.gmra.mrb[10].mxu1 %vm56_vm0, %v12168_v9  ;;  %9050 = vmatprep.subr.bf16.mxu0 %v9049_v43  ;;  %v1979_v2 = vmul.f32 %v1963_v57, %v11853_v52 }
 0x24d   :  { %8245 = vmatprep.mubr.msk.f32.mxu1 %vm56_vm0, %v1425_v26  ;;  %v1903_v38 = vpop.permute.xlu0 %1902  ;;  %9052 = vmatpush3.bf16.msra.mxu0 %v9049_v43  ;;  %v16023_v43 = vmov 98  }
 0x24e   :  { %v1964_v51 = vmul.f32 %v12206_v47, %v1903_v38  ;;  %2346 = vperm.xlu1 %9720, %v11819_v14  }
 0x250   :  { %8246 = vmatmul.mubr.msk.f32.gmra.mrb[12].mxu1 %vm56_vm0, %v1427_v40  ;;  %v1980_v32 = vmul.f32 %v1964_v51, %v11857_v11 }
 0x251   :  { %8248 = vmatprep.mubr.msk.f32.mxu1 %vm56_vm0, %v1429_v4  ;;  %v1908_v9 = vpop.permute.xlu0 %1907 }
 0x252   :  { %v9053_v53 = vpack.c.bf16 %v1980_v32, %v1979_v2  ;;  %v1965_v26 = vmul.f32 %v12206_v47, %v1908_v9  ;;  %2354 = vperm.xlu1 %9720, %v11835_v30  }
 0x254   :  { %8249 = vmatmul.mubr.msk.f32.gmra.mrb[14].mxu1 %vm56_vm0, %v1431_v6  ;;  %9054 = vmatprep.subr.bf16.mxu0 %v9053_v53  ;;  %v1981_v55 = vmul.f32 %v1965_v26, %v11890_v20 }
 0x255   :  { %v1913_v0 = vpop.permute.xlu0 %1912  ;;  %9056 = vmatpush3.bf16.msra.mxu0 %v9053_v53 }
 0x256   :  { %v1966_v40 = vmul.f32 %v12206_v47, %v1913_v0  ;;  %2358 = vperm.xlu1 %9720, %v11839_v24   ;;  %v15667_v0 = vmov 99  }
 0x258   :  { %v1982_v63 = vmul.f32 %v1966_v40, %v11894_v18  ;;  %v16024_v40 = vmov 0  }
 0x259   :  { %v1918_v4 = vpop.permute.xlu0 %1917 }
 0x25a   :  { %v9057_v50 = vpack.c.bf16 %v1982_v63, %v1981_v55  ;;  %v1967_v3 = vmul.f32 %v12206_v47, %v1918_v4  ;;  %2362 = vperm.xlu1 %9720, %v11846_v54  }
 0x25c   :  { %9058 = vmatprep.subr.bf16.mxu0 %v9057_v50  ;;  %v1983_v13 = vmul.f32 %v1967_v3, %v11879_v19 }
 0x25d   :  { %v1923_v6 = vpop.permute.xlu0 %1922  ;;  %9060 = vmatpush3.bf16.msra.mxu0 %v9057_v50 }
 0x25e   :  { %v1968_v34 = vmul.f32 %v12206_v47, %v1923_v6  ;;  %9722 = vset.pattern.permute.xlu1 %v16023_v43 }
 0x25f   :  { %2716 = vperm.xlu1 %9722, %v16004_v7  }
 0x260   :  { %v1984_v41 = vmul.f32 %v1968_v34, %v11882_v39 }
 0x261   :  { %v1928_v57 = vpop.permute.xlu0 %1927 }
 0x262   :  { %v9061_v38 = vpack.c.bf16 %v1984_v41, %v1983_v13  ;;  %v1969_v51 = vmul.f32 %v12206_v47, %v1928_v57 }
 0x263   :  { %2720 = vperm.xlu1 %9722, %v11698_v31  }
 0x264   :  { %9062 = vmatprep.subr.bf16.mxu0 %v9061_v38  ;;  %v1985_v9 = vmul.f32 %v1969_v51, %v11903_v62 }
 0x265   :  { %v1933_v2 = vpop.permute.xlu0 %1932  ;;  %9064 = vmatpush3.bf16.msra.mxu0 %v9061_v38 }
 0x266   :  { %v1970_v32 = vmul.f32 %v12206_v47, %v1933_v2 }
 0x267   :  { %2724 = vperm.xlu1 %9722, %v11714_v17  }
 0x268   :  { %v1986_v53 = vmul.f32 %v1970_v32, %v11906_v12 }
 0x269   :  { %v1938_v55 = vpop.permute.xlu0 %1937 }
 0x26a   :  { %v9065_v26 = vpack.c.bf16 %v1986_v53, %v1985_v9  ;;  %v1971_v63 = vmul.f32 %v12206_v47, %v1938_v55 }
 0x26b   :  { %2732 = vperm.xlu1 %9722, %v11764_v46  }
 0x26c   :  { %9066 = vmatprep.subr.bf16.mxu0 %v9065_v26  ;;  %v1987_v3 = vmul.f32 %v1971_v63, %v11916_v61 }
 0x26d   :  { %9068 = vmatpush3.bf16.msra.mxu0 %v9065_v26 }
 0x26e   :  { %v2303_v38 = vpop.permute.xlu0 %2302 }
 0x26f   :  { %2736 = vperm.xlu1 %9722, %v11783_v59  }
 0x273   :  { %2740 = vperm.xlu1 %9722, %v11787_v49  }
 0x277   :  { %2748 = vperm.xlu1 %9722, %v11803_v8  }
 0x27b   :  { %2752 = vperm.xlu1 %9722, %v11815_v60  }
 0x27f   :  { %2756 = vperm.xlu1 %9722, %v11819_v14  }
 0x283   :  { %2764 = vperm.xlu1 %9722, %v11835_v30  }
 0x287   :  { %2768 = vperm.xlu1 %9722, %v11839_v24  }
 0x28b   :  { %2772 = vperm.xlu1 %9722, %v11846_v54  }
 0x28f   :  { %9723 = vset.pattern.permute.xlu1 %v15667_v0 }
 0x290   :  { %3126 = vperm.xlu1 %9723, %v16004_v7   ;;  %v12287_v7 = vld [vmem:[%s15518_s3 + $0x1] ss:$0 sm:$0xff] }
 0x291   :  { %v2369_v9 = vmul.f32 %v12287_v7, %v2303_v38  ;;  %v16025_v38 = vmov 2  }
 0x293   :  { %v2385_v63 = vmul.f32 %v2369_v9, %v11923_v22 }
 0x294   :  { %9724 = vset.pattern.permute.xlu1 %v16024_v40 }
 0x2a0   :  { %v1943_v4 = vpop.permute.xlu1 %1942 }
 0x2a1   :  { %v1972_v50 = vmul.f32 %v12206_v47, %v1943_v4 }
 0x2a3   :  { %v1988_v6 = vmul.f32 %v1972_v50, %v11912_v58 }
 0x2a4   :  { %v1948_v34 = vpop.permute.xlu1 %1947 }
 0x2a5   :  { %v9069_v13 = vpack.c.bf16 %v1988_v6, %v1987_v3  ;;  %v1973_v41 = vmul.f32 %v12206_v47, %v1948_v34 }
 0x2a7   :  { %9070 = vmatprep.subr.bf16.mxu0 %v9069_v13  ;;  %v1989_v2 = vmul.f32 %v1973_v41, %v11937_v45 }
 0x2a8   :  { %9072 = vmatpush3.bf16.msra.mxu0 %v9069_v13  ;;  %v1953_v57 = vpop.permute.xlu1 %1952 }
 0x2a9   :  { %v1974_v51 = vmul.f32 %v12206_v47, %v1953_v57 }
 0x2ab   :  { %v1990_v32 = vmul.f32 %v1974_v51, %v11941_v35 }
 0x2ad   :  { %v2307_v53 = vpop.permute.xlu1 %2306  ;;  %v9073_v26 = vpack.c.bf16 %v1990_v32, %v1989_v2  ;;  %v15665_v32 = vmov 3  }
 0x2ae   :  { %v2370_v55 = vmul.f32 %v12287_v7, %v2307_v53 }
 0x2af   :  { %9074 = vmatprep.subr.bf16.mxu0 %v9073_v26 }
 0x2b0   :  { %v2386_v4 = vmul.f32 %v2370_v55, %v11929_v1  ;;  %9076 = vmatpush3.bf16.msra.mxu0 %v9073_v26 }
 0x2b1   :  { %v12296_v50 = vpop.permute.xlu1 %2310 }
 0x2b2   :  { %v12298_v3 = vpack.c.bf16 %v2386_v4, %v2385_v63 }
 0x2b4   :  { %9078 = vmatprep.subr.bf16.mxu0 %v12298_v3 }
 0x2b5   :  { %v12301_v47 = vpop.permute.xlu1 %2314 }
 0x2b9   :  { %v12303_v6 = vpop.permute.xlu1 %2322 }
 0x2bd   :  { %v12307_v41 = vpop.permute.xlu1 %2326 }
 0x2c1   :  { %v8138_v34 = vpop.f32.mrb[16].mxu0  ;;  %v12316_v2 = vpop.permute.xlu1 %2330 }
 0x2c2   :  { %2157 = vperm.xlu0 %9725, %v8138_v34   ;;  %v12305_v13 = vpop.f32.mrb[17].mxu0  ;;  %1717 = vperm.xlu1 %9724, %v8138_v34  }
 0x2c5   :  { %v12309_v57 = vpop.f32.mrb[18].mxu0  ;;  %v12329_v55 = vpop.permute.xlu1 %2338 }
 0x2c6   :  { %9726 = vset.pattern.permute.xlu0 %v16025_v38  ;;  %9727 = vset.pattern.permute.xlu1 %v16017_v56  ;;  %v12313_v51 = vpop.f32.mrb[19].mxu0  ;;  %16026 = vst [vmem:[#allocation89_spill] sm:$0xff] %v12329_v55  ;;  %v16078_v55 = vld [vmem:[#allocation18_spill] sm:$0xff] }
 0x2c7   :  { %2567 = vperm.xlu0 %9726, %v8138_v34   ;;  %2153 = vperm.xlu1 %9727, %v12305_v13  }
 0x2c9   :  { %v12321_v9 = vpop.f32.mrb[20].mxu0 }
 0x2ca   :  { %v12323_v53 = vpop.f32.mrb[21].mxu0 }
 0x2cb   :  { %9753 = vset.pattern.permute.xlu0 %v15665_v32  ;;  %9728 = vset.pattern.permute.xlu1 %v16025_v38  ;;  %v12342_v32 = vpop.permute.xlu1 %2342 }
 0x2cc   :  { %2977 = vperm.xlu0 %9753, %v8138_v34   ;;  %2563 = vperm.xlu1 %9728, %v12305_v13   ;;  %16028 = vst [vmem:[#allocation92_spill] sm:$0xff] %v12342_v32 }
 0x2ce   :  { %v12327_v26 = vpop.f32.mrb[22].mxu0 }
 0x2cf   :  { %v12333_v63 = vpop.f32.mrb[23].mxu0  ;;  %v12351_v42 = vpop.permute.xlu1 %2346 }
 0x2d0   :  { %9754 = vset.pattern.permute.xlu0 %v15667_v0  ;;  %9729 = vset.pattern.permute.xlu1 %v16017_v56  ;;  %16030 = vst [vmem:[#allocation94_spill] sm:$0xff] %v12351_v42 }
 0x2d1   :  { %3122 = vperm.xlu0 %9754, %v16003_v5   ;;  %2165 = vperm.xlu1 %9729, %v12309_v57  }
 0x2d2   :  { %v12335_v4 = vpop.f32.mrb[24].mxu0 }
 0x2d3   :  { %16027 = vst [vmem:[#allocation91_spill] sm:$0xff] %v12335_v4  ;;  %v12339_v34 = vpop.f32.mrb[25].mxu0  ;;  %v12366_v16 = vpop.permute.xlu1 %2354 }
 0x2d4   :  { %16032 = vst [vmem:[#allocation96_spill] sm:$0xff] %v12366_v16 }
 0x2d5   :  { %3138 = vperm.xlu0 %9754, %v11760_v25   ;;  %9730 = vset.pattern.permute.xlu1 %v16025_v38 }
 0x2d6   :  { %2575 = vperm.xlu1 %9730, %v12309_v57   ;;  %v12345_v0 = vpop.f32.mrb[26].mxu0 }
 0x2d7   :  { %16029 = vst [vmem:[#allocation93_spill] sm:$0xff] %v12345_v0  ;;  %v12348_v5 = vpop.f32.mrb[27].mxu0 }
 0x2d9   :  { %3154 = vperm.xlu0 %9754, %v11799_v27  }
 0x2da   :  { %9731 = vset.pattern.permute.xlu1 %v16024_v40  ;;  %v12354_v25 = vpop.f32.mrb[28].mxu0 }
 0x2db   :  { %1732 = vperm.xlu1 %9731, %v12323_v53   ;;  %16031 = vst [vmem:[#allocation95_spill] sm:$0xff] %v12354_v25  ;;  %v12356_v21 = vpop.f32.mrb[29].mxu0 }
 0x2dd   :  { %3170 = vperm.xlu0 %9754, %v11830_v28   ;;  %v12371_v28 = vpop.permute.xlu1 %2358 }
 0x2de   :  { %v12361_v27 = vpop.f32.mrb[30].mxu0  ;;  %16033 = vst [vmem:[#allocation97_spill] sm:$0xff] %v12371_v28 }
 0x2df   :  { %9732 = vset.pattern.permute.xlu1 %v16017_v56  ;;  %v12364_v43 = vpop.f32.mrb[31].mxu0 }
 0x2e0   :  { %2169 = vperm.xlu1 %9732, %v12323_v53  }
 0x2e1   :  { %9757 = vset.pattern.permute.xlu0 %v16024_v40  ;;  %v12378_v36 = vpop.permute.xlu1 %2362 }
 0x2e2   :  { %1712 = vperm.xlu0 %9757, %v12305_v13   ;;  %16034 = vst [vmem:[#allocation98_spill] sm:$0xff] %v12378_v36  ;;  %v12436_v36 = vpop.permute.xlu0 %2318 }
 0x2e4   :  { %9733 = vset.pattern.permute.xlu1 %v16025_v38 }
 0x2e5   :  { %2579 = vperm.xlu1 %9733, %v12323_v53   ;;  %v12384_v37 = vpop.permute.xlu1 %2716 }
 0x2e6   :  { %1722 = vperm.xlu0 %9757, %v12313_v51   ;;  %16035 = vst [vmem:[#allocation99_spill] sm:$0xff] %v12384_v37  ;;  %v12451_v12 = vpop.permute.xlu0 %2334 }
 0x2e7   :  { %16049 = vst [vmem:[#allocation113_spill] sm:$0xff] %v12451_v12 }
 0x2e9   :  { %9734 = vset.pattern.permute.xlu1 %v16024_v40  ;;  %v12390_v10 = vpop.permute.xlu1 %2720 }
 0x2ea   :  { %1727 = vperm.xlu0 %9757, %v12309_v57   ;;  %1747 = vperm.xlu1 %9734, %v12327_v26   ;;  %16036 = vst [vmem:[#allocation100_spill] sm:$0xff] %v12390_v10 }
 0x2ed   :  { %v12395_v44 = vpop.permute.xlu1 %2724 }
 0x2ee   :  { %1737 = vperm.xlu0 %9757, %v12321_v9   ;;  %9735 = vset.pattern.permute.xlu1 %v16017_v56  ;;  %16037 = vst [vmem:[#allocation101_spill] sm:$0xff] %v12395_v44 }
 0x2ef   :  { %2181 = vperm.xlu1 %9735, %v12327_v26  }
 0x2f1   :  { %v12401_v22 = vpop.permute.xlu1 %2732 }
 0x2f2   :  { %1742 = vperm.xlu0 %9757, %v12333_v63   ;;  %16038 = vst [vmem:[#allocation102_spill] sm:$0xff] %v12401_v22 }
 0x2f3   :  { %9736 = vset.pattern.permute.xlu1 %v16025_v38 }
 0x2f4   :  { %2591 = vperm.xlu1 %9736, %v12327_v26  }
 0x2f5   :  { %v12412_v44 = vpop.permute.xlu1 %2736 }
 0x2f6   :  { %1757 = vperm.xlu0 %9757, %v12335_v4   ;;  %16039 = vst [vmem:[#allocation103_spill] sm:$0xff] %v12412_v44 }
 0x2f8   :  { %9737 = vset.pattern.permute.xlu1 %v16024_v40 }
 0x2f9   :  { %1752 = vperm.xlu1 %9737, %v12339_v34   ;;  %v12426_v35 = vpop.permute.xlu1 %2740 }
 0x2fa   :  { %1762 = vperm.xlu0 %9757, %v12348_v5   ;;  %16042 = vst [vmem:[#allocation106_spill] sm:$0xff] %v12426_v35 }
 0x2fd   :  { %9738 = vset.pattern.permute.xlu1 %v16017_v56  ;;  %v12438_v61 = vpop.permute.xlu1 %2748 }
 0x2fe   :  { %1777 = vperm.xlu0 %9757, %v12354_v25   ;;  %2185 = vperm.xlu1 %9738, %v12339_v34   ;;  %16045 = vst [vmem:[#allocation109_spill] sm:$0xff] %v12438_v61 }
 0x301   :  { %v12455_v61 = vpop.permute.xlu1 %2752 }
 0x302   :  { %1782 = vperm.xlu0 %9757, %v12364_v43   ;;  %9739 = vset.pattern.permute.xlu1 %v16024_v40  ;;  %16051 = vst [vmem:[#allocation115_spill] sm:$0xff] %v12455_v61 }
 0x303   :  { %1767 = vperm.xlu1 %9739, %v12345_v0  }
 0x306   :  { %9759 = vset.pattern.permute.xlu0 %v16017_v56 }
 0x307   :  { %2161 = vperm.xlu0 %9759, %v12313_v51   ;;  %9740 = vset.pattern.permute.xlu1 %v16017_v56 }
 0x308   :  { %2197 = vperm.xlu1 %9740, %v12345_v0  }
 0x30b   :  { %v12406_v10 = vpop.f32.mrb[0].mxu1  ;;  %2173 = vperm.xlu0 %9759, %v12321_v9  }
 0x30c   :  { %v12408_v1 = vpop.f32.mrb[1].mxu1  ;;  %9741 = vset.pattern.permute.xlu1 %v16024_v40 }
 0x30d   :  { %1772 = vperm.xlu1 %9741, %v12356_v21  }
 0x30f   :  { %v12415_v48 = vpop.f32.mrb[2].mxu1  ;;  %2177 = vperm.xlu0 %9759, %v12333_v63  }
 0x310   :  { %v12417_v22 = vpop.f32.mrb[3].mxu1 }
 0x311   :  { %9742 = vset.pattern.permute.xlu1 %v16017_v56 }
 0x312   :  { %2201 = vperm.xlu1 %9742, %v12356_v21  }
 0x313   :  { %v12421_v45 = vpop.f32.mrb[4].mxu1  ;;  %2189 = vperm.xlu0 %9759, %v12335_v4  }
 0x314   :  { %16040 = vst [vmem:[#allocation104_spill] sm:$0xff] %v12421_v45  ;;  %v12424_v37 = vpop.f32.mrb[5].mxu1  ;;  %v16075_v45 = vld [vmem:[#allocation14_spill] sm:$0xff] }
 0x315   :  { %16041 = vst [vmem:[#allocation105_spill] sm:$0xff] %v12424_v37 }
 0x316   :  { %9743 = vset.pattern.permute.xlu1 %v16024_v40 }
 0x317   :  { %v12429_v44 = vpop.f32.mrb[6].mxu1  ;;  %2193 = vperm.xlu0 %9759, %v12348_v5   ;;  %1787 = vperm.xlu1 %9743, %v12361_v27  }
 0x318   :  { %16043 = vst [vmem:[#allocation107_spill] sm:$0xff] %v12429_v44  ;;  %v12432_v28 = vpop.f32.mrb[7].mxu1 }
 0x319   :  { %16044 = vst [vmem:[#allocation108_spill] sm:$0xff] %v12432_v28 }
 0x31a   :  { %v12447_v40 = vpop.f32.mrb[32].mxu0 }
 0x31b   :  { %v12440_v58 = vpop.f32.mrb[8].mxu1  ;;  %2205 = vperm.xlu0 %9759, %v12354_v25   ;;  %9744 = vset.pattern.permute.xlu1 %v16025_v38  ;;  %v8194_v44 = vpop.f32.mrb[33].mxu0 }
 0x31c   :  { %16046 = vst [vmem:[#allocation110_spill] sm:$0xff] %v12440_v58  ;;  %v12442_v62 = vpop.f32.mrb[9].mxu1  ;;  %2595 = vperm.xlu1 %9744, %v12339_v34   ;;  %v16052_v58 = vmov 99   ;;  %v12468_v44 = vpop.permute.xlu1 %2756 }
 0x31d   :  { %16047 = vst [vmem:[#allocation111_spill] sm:$0xff] %v12442_v62  ;;  %16056 = vst [vmem:[#allocation119_spill] sm:$0xff] %v12468_v44 }
 0x31f   :  { %v12449_v35 = vpop.f32.mrb[10].mxu1  ;;  %2209 = vperm.xlu0 %9759, %v12364_v43  }
 0x320   :  { %16048 = vst [vmem:[#allocation112_spill] sm:$0xff] %v12449_v35  ;;  %v12453_v28 = vpop.f32.mrb[11].mxu1  ;;  %9745 = vset.pattern.permute.xlu1 %v16052_v58  ;;  %v12465_v35 = vpop.permute.xlu0 %2350 }
 0x321   :  { %16050 = vst [vmem:[#allocation114_spill] sm:$0xff] %v12453_v28  ;;  %3130 = vperm.xlu1 %9745, %v11698_v31   ;;  %16055 = vst [vmem:[#allocation118_spill] sm:$0xff] %v12465_v35  ;;  %v16067_v35 = vld [vmem:[#allocation31_spill] sm:$0xff] }
 0x322   :  { %v3386_v32 = vsub.f32 0.0, %v16067_v35 }
 0x323   :  { %v12460_v62 = vpop.f32.mrb[12].mxu1  ;;  %9760 = vset.pattern.permute.xlu0 %v16025_v38 }
 0x324   :  { %16053 = vst [vmem:[#allocation116_spill] sm:$0xff] %v12460_v62  ;;  %v12462_v16 = vpop.f32.mrb[13].mxu1  ;;  %2571 = vperm.xlu0 %9760, %v12313_v51   ;;  %v12478_v31 = vpop.permute.xlu0 %2712 }
 0x325   :  { %16054 = vst [vmem:[#allocation117_spill] sm:$0xff] %v12462_v16  ;;  %3134 = vperm.xlu1 %9745, %v11714_v17   ;;  %16059 = vst [vmem:[#allocation122_spill] sm:$0xff] %v12478_v31  ;;  %v12480_v16 = vpop.permute.xlu1 %2764  ;;  %v16066_v31 = vld [vmem:[#allocation26_spill] sm:$0xff] }
 0x326   :  { %16060 = vst [vmem:[#allocation123_spill] sm:$0xff] %v12480_v16 }
 0x327   :  { %v12471_v61 = vpop.f32.mrb[14].mxu1 }
 0x328   :  { %16057 = vst [vmem:[#allocation120_spill] sm:$0xff] %v12471_v61  ;;  %v12473_v28 = vpop.f32.mrb[15].mxu1  ;;  %2583 = vperm.xlu0 %9760, %v12321_v9   ;;  %v12486_v17 = vpop.permute.xlu0 %2728  ;;  %v16063_v61 = vld [vmem:[#allocation22_spill] sm:$0xff] }
 0x329   :  { %16058 = vst [vmem:[#allocation121_spill] sm:$0xff] %v12473_v28  ;;  %9746 = vset.pattern.permute.xlu1 %v16025_v38  ;;  %16061 = vst [vmem:[#allocation124_spill] sm:$0xff] %v12486_v17  ;;  %v12488_v44 = vpop.permute.xlu1 %2768  ;;  %v3382_v16 = vsub.f32 0.0, %v16063_v61 }
 0x32a   :  { %2607 = vperm.xlu1 %9746, %v12345_v0   ;;  %16062 = vst [vmem:[#allocation125_spill] sm:$0xff] %v12488_v44  ;;  %v16074_v0 = vmov 3  }
 0x32b   :  { %v3398_v17 = vmul.f32 1.442695, %v3382_v16  ;;  %v16071_v16 = vld [vmem:[#allocation16_spill] sm:$0xff] }
 0x32c   :  { %2587 = vperm.xlu0 %9760, %v12333_v63   ;;  %v12494_v28 = vpop.permute.xlu0 %2744 }
 0x32d   :  { %16064 = vst [vmem:[#allocation22_spill] sm:$0xff] %v12494_v28  ;;  %v12496_v62 = vpop.permute.xlu1 %2772  ;;  %10024 = vpow2.f32 %v3398_v17 }
 0x32e   :  { %9747 = vset.pattern.permute.xlu1 %v16052_v58  ;;  %16065 = vst [vmem:[#allocation126_spill] sm:$0xff] %v12496_v62  ;;  %v16070_v62 = vld [vmem:[#allocation17_spill] sm:$0xff] }
 0x32f   :  { %3142 = vperm.xlu1 %9747, %v11764_v46   ;;  %v3384_v46 = vsub.f32 0.0, %v16066_v31 }
 0x330   :  { %2599 = vperm.xlu0 %9760, %v12335_v4   ;;  %v12504_v19 = vpop.permute.xlu0 %2760 }
 0x331   :  { %v3402_v44 = vmul.f32 1.442695, %v3384_v46  ;;  %16068 = vst [vmem:[#allocation26_spill] sm:$0xff] %v12504_v19  ;;  %v12506_v28 = vpop.permute.xlu1 %3126  ;;  %v16073_v46 = vld [vmem:[#allocation35_spill] sm:$0xff]  ;;  %v3406_v19 = vmul.f32 1.442695, %v3386_v32 }
 0x332   :  { %16069 = vst [vmem:[#allocation31_spill] sm:$0xff] %v12506_v28  ;;  %v3388_v17 = vsub.f32 0.0, %v16073_v46 }
 0x333   :  { %9748 = vset.pattern.permute.xlu1 %v16025_v38  ;;  %10026 = vpow2.f32 %v3402_v44  ;;  %v16076_v44 = vld [vmem:[#allocation39_spill] sm:$0xff] }
 0x334   :  { %2603 = vperm.xlu0 %9760, %v12348_v5   ;;  %2611 = vperm.xlu1 %9748, %v12356_v21   ;;  %v3390_v12 = vsub.f32 0.0, %v16076_v44  ;;  %10028 = vpow2.f32 %v3406_v19 }
 0x337   :  { %v10025_v20 = vpop.eup %10024 }
 0x338   :  { %2615 = vperm.xlu0 %9760, %v12354_v25   ;;  %9749 = vset.pattern.permute.xlu1 %v16052_v58  ;;  %v12512_v25 = vrot.slane %v12447_v40, %v16070_v62  ;;  %v3410_v62 = vmul.f32 1.442695, %v3388_v17 }
 0x339   :  { %3146 = vperm.xlu1 %9749, %v11783_v59   ;;  %v12516_v59 = vrot.slane %v12447_v40, %v16071_v16  ;;  %v12526_v16 = vrot.slane %v12447_v40, %v16075_v45  ;;  %v3414_v45 = vmul.f32 1.442695, %v3390_v12 }
 0x33a   :  { %10030 = vpow2.f32 %v3410_v62 }
 0x33b   :  { %16072 = vst [vmem:[#allocation127_spill] sm:$0xff] %v12516_v59 }
 0x33c   :  { %2619 = vperm.xlu0 %9760, %v12364_v43  }
 0x33d   :  { %9750 = vset.pattern.permute.xlu1 %v16017_v56 }
 0x33e   :  { %2213 = vperm.xlu1 %9750, %v12361_v27  }
 0x340   :  { %9761 = vset.pattern.permute.xlu0 %v16074_v0 }
 0x341   :  { %v2158_v42 = vpop.permute.xlu0 %2157  ;;  %2981 = vperm.xlu0 %9761, %v12313_v51   ;;  %v1718_v56 = vpop.permute.xlu1 %1717 }
 0x342   :  { %v2221_v28 = vsub.f32 %v2158_v42, %v12516_v59  ;;  %v1795_v39 = vsub.f32 %v1718_v56, %v12512_v25  ;;  %9751 = vset.pattern.permute.xlu1 %v16052_v58 }
 0x343   :  { %3150 = vperm.xlu1 %9751, %v11787_v49   ;;  %v16077_v49 = vld [vmem:[#allocation42_spill] sm:$0xff] }
 0x344   :  { %v2237_v32 = vmin.f32 %v2221_v28, 0.0  ;;  %v1811_v4 = vmin.f32 %v1795_v39, 0.0  ;;  %v3392_v37 = vsub.f32 0.0, %v16077_v49  ;;  %v12538_v39 = vrot.slane %v12447_v40, %v16078_v55  ;;  %v16080_v40 = vld [vmem:[#allocation46_spill] sm:$0xff] }
 0x345   :  { %2993 = vperm.xlu0 %9761, %v12321_v9   ;;  %v10027_v9 = vpop.eup %10026 }
 0x346   :  { %v2254_v51 = vmul.f32 1.442695, %v2237_v32  ;;  %v1828_v42 = vmul.f32 1.442695, %v1811_v4  ;;  %v2568_v59 = vpop.permute.xlu0 %2567  ;;  %v12531_v56 = vpop.permute.xlu1 %2153  ;;  %16079 = vst [vmem:[#allocation35_spill] sm:$0xff] %v12538_v39  ;;  %v3430_v4 = vadd.f32 1.0, %v10025_v20 }
 0x347   :  { %v2631_v17 = vsub.f32 %v2568_v59, %v12526_v16  ;;  %3158 = vperm.xlu1 %9751, %v11803_v8   ;;  %v3418_v8 = vmul.f32 1.442695, %v3392_v37  ;;  %v3394_v32 = vsub.f32 0.0, %v16080_v40  ;;  %v10029_v20 = vpop.eup %10028 }
 0x348   :  { %10032 = vpow2.f32 %v2254_v51  ;;  %v10031_v37 = vpop.eup %10030 }
 0x349   :  { %10034 = vpow2.f32 %v1828_v42  ;;  %v2647_v19 = vmin.f32 %v2631_v17, 0.0  ;;  %2997 = vperm.xlu0 %9761, %v12333_v63   ;;  %v3432_v63 = vadd.f32 1.0, %v10027_v9  ;;  %v3434_v9 = vadd.f32 1.0, %v10029_v20 }
 0x34a   :  { %10036 = vpow2.f32 %v3414_v45 }
 0x34b   :  { %v2664_v28 = vmul.f32 1.442695, %v2647_v19  ;;  %v2978_v62 = vpop.permute.xlu0 %2977  ;;  %9752 = vset.pattern.permute.xlu1 %v16074_v0  ;;  %v12542_v59 = vpop.permute.xlu1 %2563  ;;  %v3422_v19 = vmul.f32 1.442695, %v3394_v32 }
 0x34c   :  { %v3041_v12 = vsub.f32 %v2978_v62, %v12538_v39  ;;  %2973 = vperm.xlu1 %9752, %v12305_v13   ;;  %v3396_v13 = vsub.f32 0.0, %v11130_v23 }
 0x34d   :  { %10038 = vpow2.f32 %v2664_v28  ;;  %3005 = vperm.xlu0 %9761, %v12339_v34   ;;  %v1674_v28 = vmul.f32 %v12406_v10, %v12014_v33  ;;  %v3436_v10 = vadd.f32 1.0, %v10031_v37 }
 0x34e   :  { %v3057_v51 = vmin.f32 %v3041_v12, 0.0  ;;  %10040 = vrcp.f32 %v3430_v4  ;;  %v3426_v32 = vmul.f32 1.442695, %v3396_v13 }
 0x34f   :  { %10042 = vpow2.f32 %v3418_v8 }
 0x350   :  { %v3074_v42 = vmul.f32 1.442695, %v3057_v51  ;;  %v12548_v17 = vpop.permute.xlu0 %3122  ;;  %9755 = vset.pattern.permute.xlu1 %v16052_v58  ;;  %v12551_v45 = vpop.permute.xlu1 %2165  ;;  %10044 = vrcp.f32 %v3432_v63 }
 0x351   :  { %16081 = vst [vmem:[#allocation39_spill] sm:$0xff] %v12548_v17  ;;  %3013 = vperm.xlu0 %9761, %v12348_v5   ;;  %3162 = vperm.xlu1 %9755, %v11815_v60   ;;  %v16116_v17 = vld [vmem:[#allocation80_spill] sm:$0xff] }
 0x352   :  { %v10033_v34 = vpop.eup %10032  ;;  %10046 = vpow2.f32 %v3074_v42 }
 0x353   :  { %v10035_v4 = vpop.eup %10034  ;;  %v12558_v62 = vmul.f32 %v10033_v34, %v1674_v28  ;;  %10048 = vpow2.f32 %v3422_v19 }
 0x354   :  { %v12560_v8 = vpop.permute.xlu0 %3138  ;;  %v12562_v12 = vmul.f32 %v10035_v4, %v1674_v28  ;;  %v10037_v60 = vpop.eup %10036  ;;  %10050 = vrcp.f32 %v3434_v9 }
 0x355   :  { %16082 = vst [vmem:[#allocation42_spill] sm:$0xff] %v12560_v8  ;;  %3021 = vperm.xlu0 %9761, %v12356_v21   ;;  %3166 = vperm.xlu1 %9755, %v11819_v14   ;;  %v12566_v33 = vpop.permute.xlu1 %2575  ;;  %10052 = vpow2.f32 %v3426_v32  ;;  %v3438_v21 = vadd.f32 1.0, %v10037_v60 }
 0x356   :  { %16083 = vst [vmem:[#allocation46_spill] sm:$0xff] %v12566_v33  ;;  %10054 = vrcp.f32 %v3436_v10 }
 0x357   :  { %v10039_v5 = vpop.eup %10038  ;;  %10056 = vrcp.f32 %v3438_v21 }
 0x358   :  { %v10041_v63 = vpop.eup %10040  ;;  %v12568_v51 = vpop.permute.xlu0 %3154  ;;  %v12570_v20 = vmul.f32 %v10039_v5, %v1674_v28  ;;  %v16089_v5 = vld [vmem:[#allocation23_spill] sm:$0xff] }
 0x359   :  { %16084 = vst [vmem:[#allocation128_spill] sm:$0xff] %v12568_v51  ;;  %3029 = vperm.xlu0 %9761, %v12364_v43   ;;  %9756 = vset.pattern.permute.xlu1 %v16074_v0  ;;  %v10043_v42 = vpop.eup %10042  ;;  %v3462_v37 = vmul.f32 %v10041_v63, %v16063_v61  ;;  %v3385_v63 = vsub.f32 0.0, %v16089_v5 }
 0x35a   :  { %16085 = vst [vmem:[#allocation129_spill] sm:$0xff] %v12570_v20  ;;  %2985 = vperm.xlu1 %9756, %v12309_v57   ;;  %v1733_v14 = vpop.permute.xlu1 %1732  ;;  %v10045_v19 = vpop.eup %10044  ;;  %v3440_v43 = vadd.f32 1.0, %v10043_v42  ;;  %v16088_v57 = vld [vmem:[#allocation21_spill] sm:$0xff] }
 0x35b   :  { %v3383_v32 = vsub.f32 0.0, %v16088_v57  ;;  %v3464_v61 = vmul.f32 %v10045_v19, %v16066_v31 }
 0x35c   :  { %v10047_v13 = vpop.eup %10046  ;;  %v12576_v34 = vpop.permute.xlu0 %3170  ;;  %10058 = vrcp.f32 %v3440_v43 }
 0x35d   :  { %16086 = vst [vmem:[#allocation130_spill] sm:$0xff] %v12576_v34  ;;  %3494 = vrot.lane.b32.xlu0 %v3462_v37, %s10666_s26  ;;  %v12579_v9 = vmul.f32 %v10047_v13, %v1674_v28  ;;  %v10049_v4 = vpop.eup %10048  ;;  %v3400_v37 = vmul.f32 1.442695, %v3383_v32  ;;  %v1798_v13 = vsub.f32 %v1733_v14, %v12512_v25  ;;  %v3404_v34 = vmul.f32 1.442695, %v3385_v63  ;;  %v16092_v63 = vld [vmem:[#allocation34_spill] sm:$0xff] }
 0x35e   :  { %9758 = vset.pattern.permute.xlu1 %v16025_v38  ;;  %v10051_v10 = vpop.eup %10050  ;;  %v3442_v21 = vadd.f32 1.0, %v10049_v4 }
 0x35f   :  { %16087 = vst [vmem:[#allocation131_spill] sm:$0xff] %v12579_v9  ;;  %2623 = vperm.xlu1 %9758, %v12361_v27   ;;  %v12584_v60 = vpop.permute.xlu1 %2169  ;;  %v10053_v42 = vpop.eup %10052  ;;  %v3466_v38 = vmul.f32 %v10051_v10, %v16067_v35  ;;  %v1814_v32 = vmin.f32 %v1798_v13, 0.0 }
 0x360   :  { %v10055_v9 = vpop.eup %10054  ;;  %10060 = vrcp.f32 %v3442_v21  ;;  %v3444_v14 = vadd.f32 1.0, %v10053_v42 }
 0x361   :  { %v1713_v55 = vpop.permute.xlu0 %1712  ;;  %3498 = vrot.lane.b32.xlu0 %v3464_v61, %s10666_s26  ;;  %v16091_v61 = vld [vmem:[#allocation30_spill] sm:$0xff]  ;;  %10062 = vpow2.f32 %v3400_v37  ;;  %v3468_v35 = vmul.f32 %v10055_v9, %v16073_v46  ;;  %v10057_v10 = vpop.eup %10056  ;;  %v16093_v46 = vld [vmem:[#allocation37_spill] sm:$0xff]  ;;  %v1834_v13 = vmul.f32 1.442695, %v1814_v32 }
 0x362   :  { %v1794_v28 = vsub.f32 %v1713_v55, %v12512_v25  ;;  %v3387_v51 = vsub.f32 0.0, %v16091_v61  ;;  %v3391_v9 = vsub.f32 0.0, %v16093_v46 }
 0x363   :  { %9762 = vset.pattern.permute.xlu1 %v16052_v58 }
 0x364   :  { %v1810_v31 = vmin.f32 %v1794_v28, 0.0  ;;  %3174 = vperm.xlu1 %9762, %v11835_v30   ;;  %v12594_v19 = vpop.permute.xlu1 %2579  ;;  %v3389_v28 = vsub.f32 0.0, %v16092_v63  ;;  %v3408_v21 = vmul.f32 1.442695, %v3387_v51  ;;  %v3416_v32 = vmul.f32 1.442695, %v3391_v9 }
 0x365   :  { %16090 = vst [vmem:[#allocation21_spill] sm:$0xff] %v12594_v19  ;;  %v1723_v55 = vpop.permute.xlu0 %1722  ;;  %3502 = vrot.lane.b32.xlu0 %v3466_v38, %s10666_s26  ;;  %v16117_v19 = vld [vmem:[#allocation81_spill] sm:$0xff] }
 0x366   :  { %v1826_v43 = vmul.f32 1.442695, %v1810_v31  ;;  %v1796_v4 = vsub.f32 %v1723_v55, %v12512_v25  ;;  %v10059_v55 = vpop.eup %10058 }
 0x368   :  { %10064 = vpow2.f32 %v1826_v43  ;;  %v1812_v30 = vmin.f32 %v1796_v4, 0.0  ;;  %9763 = vset.pattern.permute.xlu1 %v16074_v0  ;;  %v3412_v4 = vmul.f32 1.442695, %v3389_v28 }
 0x369   :  { %10066 = vpow2.f32 %v3404_v34  ;;  %v1728_v39 = vpop.permute.xlu0 %1727  ;;  %3506 = vrot.lane.b32.xlu0 %v3468_v35, %s10666_s26  ;;  %2989 = vperm.xlu1 %9763, %v12323_v53   ;;  %v1748_v38 = vpop.permute.xlu1 %1747  ;;  %v3470_v34 = vmul.f32 %v10057_v10, %v16076_v44  ;;  %v16094_v35 = vld [vmem:[#allocation41_spill] sm:$0xff] }
 0x36a   :  { %v1830_v42 = vmul.f32 1.442695, %v1812_v30  ;;  %v1797_v37 = vsub.f32 %v1728_v39, %v12512_v25  ;;  %10068 = vrcp.f32 %v3444_v14  ;;  %v1801_v31 = vsub.f32 %v1748_v38, %v12512_v25  ;;  %v10061_v28 = vpop.eup %10060 }
 0x36b   :  { %v3393_v20 = vsub.f32 0.0, %v16094_v35  ;;  %v2372_v39 = vmul.f32 %v12287_v7, %v12301_v47  ;;  %v3472_v30 = vmul.f32 %v10059_v55, %v16077_v49  ;;  %v2371_v38 = vmul.f32 %v12287_v7, %v12296_v50 }
 0x36c   :  { %10070 = vpow2.f32 %v1830_v42  ;;  %v1813_v43 = vmin.f32 %v1797_v37, 0.0  ;;  %v1817_v10 = vmin.f32 %v1801_v31, 0.0  ;;  %v10063_v42 = vpop.eup %10062  ;;  %v2373_v50 = vmul.f32 %v12287_v7, %v12436_v36 }
 0x36d   :  { %v1738_v53 = vpop.permute.xlu0 %1737  ;;  %3510 = vrot.lane.b32.xlu0 %v3470_v34, %s10666_s26  ;;  %9764 = vset.pattern.permute.xlu1 %v16052_v58  ;;  %10072 = vpow2.f32 %v3408_v21  ;;  %v2374_v21 = vmul.f32 %v12287_v7, %v12303_v6  ;;  %v3420_v37 = vmul.f32 1.442695, %v3393_v20  ;;  %v2388_v6 = vmul.f32 %v2372_v39, %v11869_v29  ;;  %v16109_v58 = vld [vmem:[#allocation96_spill] sm:$0xff] }
 0x36e   :  { %v1832_v51 = vmul.f32 1.442695, %v1813_v43  ;;  %v1799_v14 = vsub.f32 %v1738_v53, %v12512_v25  ;;  %3178 = vperm.xlu1 %9764, %v11839_v24   ;;  %v12615_v44 = vpop.permute.xlu1 %2181  ;;  %10074 = vpow2.f32 %v1834_v13  ;;  %v10601_v24 = vld [vmem:[%s15517_s1] sm:$0xff]  ;;  %v1840_v55 = vmul.f32 1.442695, %v1817_v10 }
 0x36f   :  { %v12626_v9 = vmul.f32 %v10601_v24, %v12408_v1  ;;  %v3474_v1 = vmul.f32 %v10061_v28, %v16080_v40  ;;  %v2390_v36 = vmul.f32 %v2374_v21, %v11857_v11  ;;  %v3431_v10 = vadd.f32 1.0, %v10063_v42  ;;  %v16096_v24 = vld [vmem:[#allocation45_spill] sm:$0xff] }
 0x370   :  { %10076 = vpow2.f32 %v1832_v51  ;;  %v1815_v47 = vmin.f32 %v1799_v14, 0.0  ;;  %v2387_v51 = vmul.f32 %v2371_v38, %v11865_v15  ;;  %v10602_v14 = vld [vmem:[%s15517_s1 + $0x10] sm:$0xff]  ;;  %v2389_v28 = vmul.f32 %v2373_v50, %v11853_v52 }
 0x371   :  { %10078 = vpow2.f32 %v3412_v4  ;;  %v1743_v49 = vpop.permute.xlu0 %1742  ;;  %3514 = vrot.lane.b32.xlu0 %v3472_v30, %s10666_s26 }
 0x372   :  { %v10065_v13 = vpop.eup %10064  ;;  %v1836_v31 = vmul.f32 1.442695, %v1815_v47  ;;  %v1800_v34 = vsub.f32 %v1743_v49, %v12512_v25  ;;  %3182 = vperm.xlu1 %9764, %v11846_v54   ;;  %10080 = vpow2.f32 %v3416_v32  ;;  %v2376_v54 = vmul.f32 %v12287_v7, %v12316_v2 }
 0x373   :  { %v10067_v20 = vpop.eup %10066  ;;  %v12634_v43 = vpop.permute.xlu1 %2591  ;;  %v1858_v4 = vmul.f32 %v10065_v13, %v12626_v9  ;;  %v12646_v32 = vmul.f32 %v10602_v14, %v12417_v22  ;;  %v9081_v2 = vpack.c.bf16 %v2388_v6, %v2387_v51  ;;  %v2375_v22 = vmul.f32 %v12287_v7, %v12307_v41  ;;  %v16098_v51 = vld [vmem:[#allocation105_spill] sm:$0xff]  ;;  %v16099_v14 = vld [vmem:[#allocation54_spill] sm:$0xff] }
 0x374   :  { %16095 = vst [vmem:[#allocation23_spill] sm:$0xff] %v12634_v43  ;;  %v10069_v53 = vpop.eup %10068  ;;  %10082 = vpow2.f32 %v1836_v31  ;;  %v1816_v39 = vmin.f32 %v1800_v34, 0.0  ;;  %v3395_v49 = vsub.f32 0.0, %v16096_v24  ;;  %v9085_v50 = vpack.c.bf16 %v2390_v36, %v2389_v28 }
 0x375   :  { %10084 = vpow2.f32 %v3420_v37  ;;  %v1758_v40 = vpop.permute.xlu0 %1757  ;;  %3518 = vrot.lane.b32.xlu0 %v3474_v1, %s10666_s26  ;;  %8283 = vmatprep.mubr.f32.mxu0 %v1858_v4  ;;  %v3476_v47 = vmul.f32 %v10069_v53, %v11130_v23  ;;  %v2392_v41 = vmul.f32 %v2376_v54, %v11894_v18  ;;  %v3433_v34 = vadd.f32 1.0, %v10067_v20  ;;  %v16097_v1 = vld [vmem:[#allocation89_spill] sm:$0xff]  ;;  %v10604_v53 = vld [vmem:[%s15517_s1 + $0x20] sm:$0xff]  ;;  %v16100_v20 = vld [vmem:[#allocation91_spill] sm:$0xff] }
 0x376   :  { %v10071_v30 = vpop.eup %10070  ;;  %v1838_v38 = vmul.f32 1.442695, %v1816_v39  ;;  %v1803_v21 = vsub.f32 %v1758_v40, %v12512_v25  ;;  %9765 = vset.pattern.permute.xlu1 %v16074_v0  ;;  %8284 = vmatmul.mubr.f32.vlgmr.msra.gmra.mrb[34].mxu0 %v12562_v12  ;;  %10086 = vpow2.f32 %v1840_v55  ;;  %v2378_v4 = vmul.f32 %v12287_v7, %v16097_v1 }
 0x377   :  { %9080 = vmatpush3.bf16.msra.mxu0 %v12298_v3  ;;  %3001 = vperm.xlu1 %9765, %v12327_v26   ;;  %v1860_v42 = vmul.f32 %v10071_v30, %v12646_v32  ;;  %v10073_v37 = vpop.eup %10072  ;;  %v10603_v3 = vld [vmem:[%s15517_s1 + $0x18] sm:$0xff]  ;;  %v12675_v36 = vmul.f32 %v10604_v53, %v16098_v51  ;;  %v2391_v40 = vmul.f32 %v2375_v22, %v16099_v14  ;;  %v16103_v22 = vld [vmem:[#allocation104_spill] sm:$0xff]  ;;  %v16104_v51 = vld [vmem:[#allocation66_spill] sm:$0xff] }
 0x378   :  { %10088 = vpow2.f32 %v1838_v38  ;;  %v1819_v13 = vmin.f32 %v1803_v21, 0.0  ;;  %9082 = vmatprep.subr.bf16.mxu0 %v9081_v2  ;;  %v1753_v12 = vpop.permute.xlu1 %1752  ;;  %v10075_v6 = vpop.eup %10074  ;;  %v12665_v26 = vmul.f32 %v10603_v3, %v12415_v48  ;;  %v16101_v38 = vld [vmem:[#allocation49_spill] sm:$0xff] }
 0x379   :  { %v1802_v23 = vsub.f32 %v1753_v12, %v12512_v25  ;;  %v1763_v31 = vpop.permute.xlu0 %1762  ;;  %3522 = vrot.lane.b32.xlu0 %v3476_v47, %s10666_s26  ;;  %8286 = vmatprep.mubr.f32.mxu0 %v1860_v42  ;;  %10090 = vrcp.f32 %v3431_v10  ;;  %v3397_v21 = vsub.f32 0.0, %v16101_v38  ;;  %v16102_v47 = vld [vmem:[#allocation113_spill] sm:$0xff]  ;;  %v9089_v1 = vpack.c.bf16 %v2392_v41, %v2391_v40  ;;  %v16107_v41 = vld [vmem:[#allocation63_spill] sm:$0xff]  ;;  %v16108_v40 = vld [vmem:[#allocation92_spill] sm:$0xff] }
 0x37a   :  { %v10077_v55 = vpop.eup %10076  ;;  %v1844_v48 = vmul.f32 1.442695, %v1819_v13  ;;  %v1804_v39 = vsub.f32 %v1763_v31, %v12512_v25  ;;  %v2377_v42 = vmul.f32 %v12287_v7, %v16102_v47  ;;  %v1862_v13 = vmul.f32 %v10075_v6, %v12675_v36 }
 0x37b   :  { %v10079_v54 = vpop.eup %10078  ;;  %v1818_v30 = vmin.f32 %v1802_v23, 0.0  ;;  %9084 = vmatpush3.bf16.msra.mxu0 %v9081_v2  ;;  %3009 = vperm.xlu1 %9765, %v16100_v20   ;;  %v1861_v28 = vmul.f32 %v10077_v55, %v12665_v26  ;;  %v10605_v2 = vld [vmem:[%s15517_s1 + $0x28] sm:$0xff]  ;;  %10092 = vrcp.f32 %v3433_v34  ;;  %v2394_v6 = vmul.f32 %v2378_v4, %v16104_v51 }
 0x37c   :  { %v1820_v12 = vmin.f32 %v1804_v39, 0.0  ;;  %9086 = vmatprep.subr.bf16.mxu0 %v9085_v50  ;;  %v12685_v3 = vpop.eup %10080  ;;  %v12691_v23 = vmul.f32 %v10605_v2, %v16103_v22  ;;  %v16105_v39 = vld [vmem:[#allocation94_spill] sm:$0xff]  ;;  %10094 = vpow2.f32 %v1844_v48  ;;  %v3424_v2 = vmul.f32 1.442695, %v3395_v49  ;;  %v10606_v49 = vld [vmem:[%s15517_s1 + $0x30] sm:$0xff] }
 0x37d   :  { %v1842_v31 = vmul.f32 1.442695, %v1818_v30  ;;  %v12693_v10 = vpop.permute.xlu0 %1777  ;;  %8287 = vmatmul.mubr.f32.gmra.mrb[36].mxu0 %v1861_v28  ;;  %v12695_v55 = vpop.permute.xlu1 %2185  ;;  %v2380_v20 = vmul.f32 %v12287_v7, %v16105_v39  ;;  %v16106_v30 = vld [vmem:[#allocation93_spill] sm:$0xff]  ;;  %v3435_v22 = vadd.f32 1.0, %v10073_v37  ;;  %v2393_v34 = vmul.f32 %v2377_v42, %v16107_v41 }
 0x37e   :  { %v10083_v53 = vpop.eup %10082  ;;  %v1846_v47 = vmul.f32 1.442695, %v1820_v12  ;;  %8289 = vmatprep.mubr.f32.mxu0 %v1862_v13  ;;  %v2379_v4 = vmul.f32 %v12287_v7, %v16108_v40  ;;  %v2382_v39 = vmul.f32 %v12287_v7, %v16109_v58  ;;  %v3428_v12 = vmul.f32 1.442695, %v3397_v21  ;;  %v10607_v58 = vld [vmem:[%s15517_s1 + $0x38] sm:$0xff]  ;;  %v16113_v21 = vld [vmem:[#allocation107_spill] sm:$0xff] }
 0x37f   :  { %v10085_v0 = vpop.eup %10084  ;;  %10096 = vpow2.f32 %v1842_v31  ;;  %9088 = vmatpush3.bf16.msra.mxu0 %v9085_v50  ;;  %3017 = vperm.xlu1 %9765, %v16106_v30   ;;  %v1863_v28 = vmul.f32 %v10083_v53, %v12691_v23  ;;  %v16110_v50 = vld [vmem:[#allocation108_spill] sm:$0xff]  ;;  %v16111_v31 = vld [vmem:[#allocation118_spill] sm:$0xff]  ;;  %v16112_v30 = vld [vmem:[#allocation55_spill] sm:$0xff]  ;;  %v9093_v43 = vpack.c.bf16 %v2394_v6, %v2393_v34 }
 0x380   :  { %10098 = vpow2.f32 %v1846_v47  ;;  %9090 = vmatprep.subr.bf16.mxu0 %v9089_v1  ;;  %v10087_v48 = vpop.eup %10086  ;;  %v12711_v13 = vmul.f32 %v10606_v49, %v16110_v50  ;;  %v2381_v53 = vmul.f32 %v12287_v7, %v16111_v31  ;;  %v2396_v40 = vmul.f32 %v2380_v20, %v16112_v30  ;;  %v16119_v34 = vld [vmem:[#allocation98_spill] sm:$0xff] }
 0x381   :  { %v1783_v37 = vpop.permute.xlu0 %1782  ;;  %8290 = vmatmul.mubr.f32.gmra.mrb[38].mxu0 %v1863_v28  ;;  %v12720_v47 = vmul.f32 %v10607_v58, %v16113_v21  ;;  %10100 = vpow2.f32 %v3424_v2  ;;  %v16115_v28 = vld [vmem:[#allocation95_spill] sm:$0xff]  ;;  %v3437_v31 = vadd.f32 1.0, %v10079_v54  ;;  %v2395_v20 = vmul.f32 %v2379_v4, %v16116_v17 }
 0x382   :  { %v10089_v42 = vpop.eup %10088  ;;  %v1768_v8 = vpop.permute.xlu1 %1767  ;;  %v2398_v33 = vmul.f32 %v2382_v39, %v16117_v19  ;;  %10102 = vrcp.f32 %v3435_v22  ;;  %v2384_v54 = vmul.f32 %v12287_v7, %v16119_v34  ;;  %v1808_v4 = vsub.f32 %v1783_v37, %v12512_v25  ;;  %v10608_v37 = vld [vmem:[%s15517_s1 + $0x40] sm:$0xff] }
 0x383   :  { %16114 = vst [vmem:[#allocation30_spill] sm:$0xff] %v12720_v47  ;;  %9092 = vmatpush3.bf16.msra.mxu0 %v9089_v1  ;;  %v1805_v49 = vsub.f32 %v1768_v8, %v12512_v25  ;;  %3025 = vperm.xlu1 %9765, %v16115_v28   ;;  %v1864_v50 = vmul.f32 %v10089_v42, %v12711_v13  ;;  %v10091_v58 = vpop.eup %10090  ;;  %10104 = vpow2.f32 %v3428_v12  ;;  %v16118_v8 = vld [vmem:[#allocation60_spill] sm:$0xff] }
 0x384   :  { %9094 = vmatprep.subr.bf16.mxu0 %v9093_v43  ;;  %v1865_v30 = vmul.f32 %v10087_v48, %v12720_v47  ;;  %v1807_v1 = vsub.f32 %v12693_v10, %v12512_v25  ;;  %v2397_v2 = vmul.f32 %v2381_v53, %v16118_v8  ;;  %v9097_v39 = vpack.c.bf16 %v2396_v40, %v2395_v20  ;;  %v10610_v20 = vld [vmem:[%s15517_s1 + $0x50] sm:$0xff] }
 0x385   :  { %v1821_v6 = vmin.f32 %v1805_v49, 0.0  ;;  %8292 = vmatprep.mubr.f32.mxu0 %v1864_v50  ;;  %v10093_v48 = vpop.eup %10092  ;;  %10106 = vrcp.f32 %v3437_v31  ;;  %v3439_v10 = vadd.f32 1.0, %v12685_v3  ;;  %v3441_v53 = vadd.f32 1.0, %v10085_v0  ;;  %v16120_v49 = vld [vmem:[#allocation97_spill] sm:$0xff]  ;;  %v12752_v0 = vld [vmem:[%s15518_s3 + $0x2] ss:$0 sm:$0xff] }
 0x386   :  { %v12734_v42 = vpop.permute.xlu0 %2161  ;;  %8293 = vmatmul.mubr.f32.gmra.mrb[40].mxu0 %v1865_v30  ;;  %v10095_v21 = vpop.eup %10094  ;;  %v2383_v28 = vmul.f32 %v12287_v7, %v16120_v49  ;;  %v16121_v30 = vld [vmem:[#allocation111_spill] sm:$0xff]  ;;  %v16123_v3 = vld [vmem:[#allocation110_spill] sm:$0xff] }
 0x387   :  { %v1848_v22 = vmul.f32 1.442695, %v1821_v6  ;;  %9096 = vmatpush3.bf16.msra.mxu0 %v9093_v43  ;;  %3033 = vperm.xlu1 %9765, %v12361_v27   ;;  %v12737_v12 = vpop.permute.xlu1 %2197  ;;  %v12746_v40 = vmul.f32 %v10608_v37, %v16121_v30  ;;  %v3463_v27 = vmul.f32 %v10091_v58, %v16088_v57  ;;  %v9101_v43 = vpack.c.bf16 %v2398_v33, %v2397_v2  ;;  %v10609_v7 = vld [vmem:[%s15517_s1 + $0x48] sm:$0xff]  ;;  %v16125_v6 = vld [vmem:[#allocation114_spill] sm:$0xff] }
 0x388   :  { %9098 = vmatprep.subr.bf16.mxu0 %v9097_v39  ;;  %v12758_v31 = vmul.f32 %v10609_v7, %v16123_v3  ;;  %v12764_v57 = vmul.f32 %v10610_v20, %v16125_v6  ;;  %v1823_v33 = vmin.f32 %v1807_v1, 0.0  ;;  %v16127_v2 = vld [vmem:[#allocation67_spill] sm:$0xff]  ;;  %v1824_v30 = vmin.f32 %v1808_v4, 0.0  ;;  %v16129_v1 = vld [vmem:[#allocation122_spill] sm:$0xff] }
 0x389   :  { %16122 = vst [vmem:[#allocation34_spill] sm:$0xff] %v12746_v40  ;;  %v10097_v50 = vpop.eup %10096  ;;  %10108 = vpow2.f32 %v1848_v22  ;;  %v2400_v34 = vmul.f32 %v2384_v54, %v16127_v2  ;;  %v16128_v49 = vld [vmem:[#allocation99_spill] sm:$0xff]  ;;  %v2779_v22 = vmul.f32 %v12752_v0, %v16129_v1 }
 0x38a   :  { %16124 = vst [vmem:[#allocation37_spill] sm:$0xff] %v12758_v31  ;;  %16126 = vst [vmem:[#allocation41_spill] sm:$0xff] %v12764_v57  ;;  %v10099_v58 = vpop.eup %10098  ;;  %v2780_v37 = vmul.f32 %v12752_v0, %v16128_v49  ;;  %v12769_v8 = vpop.permute.xlu0 %2173  ;;  %v1866_v7 = vmul.f32 %v10097_v50, %v12746_v40  ;;  %v1867_v3 = vmul.f32 %v10095_v21, %v12758_v31  ;;  %10110 = vrcp.f32 %v3439_v10  ;;  %v16130_v54 = vld [vmem:[#allocation47_spill] sm:$0xff] }
 0x38b   :  { %9100 = vmatpush3.bf16.msra.mxu0 %v9097_v39  ;;  %3496 = vrot.lane.b32.xlu1 %v3463_v27, %s10666_s26  ;;  %v1868_v20 = vmul.f32 %v10099_v58, %v12764_v57  ;;  %v2399_v6 = vmul.f32 %v2383_v28, %v16130_v54  ;;  %v10101_v49 = vpop.eup %10100  ;;  %v1852_v2 = vmul.f32 1.442695, %v1823_v33  ;;  %v3465_v39 = vmul.f32 %v10093_v48, %v16089_v5  ;;  %v16132_v58 = vld [vmem:[#allocation74_spill] sm:$0xff]  ;;  %v16133_v33 = vld [vmem:[#allocation48_spill] sm:$0xff] }
 0x38c   :  { %9102 = vmatprep.subr.bf16.mxu0 %v9101_v43  ;;  %8295 = vmatprep.mubr.f32.mxu0 %v1866_v7  ;;  %v1773_v4 = vpop.permute.xlu1 %1772  ;;  %v16131_v27 = vmov 96   ;;  %v10103_v21 = vpop.eup %10102  ;;  %v2796_v10 = vmul.f32 %v2780_v37, %v16132_v58  ;;  %v1854_v57 = vmul.f32 1.442695, %v1824_v30  ;;  %10112 = vrcp.f32 %v3441_v53  ;;  %v10611_v53 = vld [vmem:[%s15517_s1 + $0x58] sm:$0xff] }
 0x38d   :  { %v1806_v50 = vsub.f32 %v1773_v4, %v12512_v25  ;;  %8296 = vmatmul.mubr.f32.gmra.mrb[42].mxu0 %v1867_v3  ;;  %9846 = vset.pattern.permute.xlu1 %v16131_v27  ;;  %v9105_v28 = vpack.c.bf16 %v2400_v34, %v2399_v6  ;;  %v10105_v7 = vpop.eup %10104  ;;  %v2795_v3 = vmul.f32 %v2779_v22, %v16133_v33  ;;  %v3443_v5 = vadd.f32 1.0, %v10101_v49  ;;  %v16134_v4 = vld [vmem:[#allocation127_spill] sm:$0xff] }
 0x38e   :  { %v12782_v31 = vpop.permute.xlu0 %2177  ;;  %8298 = vmatprep.mubr.f32.mxu0 %v1868_v20  ;;  %v2220_v27 = vsub.f32 %v12531_v56, %v16134_v4  ;;  %10114 = vpow2.f32 %v1852_v2  ;;  %v3467_v34 = vmul.f32 %v10103_v21, %v16091_v61  ;;  %v3445_v61 = vadd.f32 1.0, %v10105_v7 }
 0x38f   :  { %v1822_v1 = vmin.f32 %v1806_v50, 0.0  ;;  %9104 = vmatpush3.bf16.msra.mxu0 %v9101_v43  ;;  %3500 = vrot.lane.b32.xlu1 %v3465_v39, %s10666_s26  ;;  %v10107_v48 = vpop.eup %10106  ;;  %v16135_v43 = vld [vmem:[#allocation112_spill] sm:$0xff]  ;;  %10116 = vpow2.f32 %v1854_v57  ;;  %v12797_v22 = vpack.c.bf16 %v2796_v10, %v2795_v3  ;;  %v2222_v57 = vsub.f32 %v12734_v42, %v16134_v4 }
 0x390   :  { %9106 = vmatprep.subr.bf16.mxu0 %v9105_v28  ;;  %v12795_v20 = vmul.f32 %v10611_v53, %v16135_v43  ;;  %v2236_v50 = vmin.f32 %v2220_v27, 0.0  ;;  %v3469_v39 = vmul.f32 %v10107_v48, %v16092_v63  ;;  %v2224_v27 = vsub.f32 %v12584_v60, %v16134_v4  ;;  %v16136_v53 = vld [vmem:[#allocation116_spill] sm:$0xff]  ;;  %v10613_v60 = vld [vmem:[%s15517_s1 + $0x60] sm:$0xff] }
 0x391   :  { %v1850_v37 = vmul.f32 1.442695, %v1822_v1  ;;  %v12788_v30 = vpop.permute.xlu1 %2201  ;;  %v2223_v1 = vsub.f32 %v12551_v45, %v16134_v4  ;;  %v2238_v42 = vmin.f32 %v2222_v57, 0.0 }
 0x392   :  { %v12799_v49 = vpop.permute.xlu0 %2189  ;;  %v2252_v7 = vmul.f32 1.442695, %v2236_v50  ;;  %v2240_v50 = vmin.f32 %v2224_v27, 0.0 }
 0x393   :  { %v10109_v6 = vpop.eup %10108  ;;  %10118 = vpow2.f32 %v1850_v37  ;;  %9108 = vmatpush3.bf16.msra.mxu0 %v9105_v28  ;;  %3504 = vrot.lane.b32.xlu1 %v3467_v34, %s10666_s26  ;;  %v2256_v57 = vmul.f32 1.442695, %v2238_v42  ;;  %v2228_v42 = vsub.f32 %v12695_v55, %v16134_v4 }
 0x394   :  { %9110 = vmatprep.subr.bf16.mxu0 %v12797_v22  ;;  %v1869_v56 = vmul.f32 %v10109_v6, %v12795_v20  ;;  %10120 = vrcp.f32 %v3443_v5  ;;  %v10111_v2 = vpop.eup %10110  ;;  %v16137_v6 = vld [vmem:[#allocation117_spill] sm:$0xff] }
 0x395   :  { %v3471_v3 = vmul.f32 %v10111_v2, %v16093_v46  ;;  %10122 = vrcp.f32 %v3445_v61  ;;  %v10612_v46 = vld [vmem:[%s15517_s1 + $0x68] sm:$0xff]  ;;  %v2239_v61 = vmin.f32 %v2223_v1, 0.0  ;;  %v2225_v2 = vsub.f32 %v12769_v8, %v16134_v4 }
 0x396   :  { %8299 = vmatmul.mubr.f32.gmra.mrb[44].mxu0 %v1869_v56  ;;  %v1788_v21 = vpop.permute.xlu1 %1787  ;;  %v10113_v28 = vpop.eup %10112  ;;  %v12824_v43 = vmul.f32 %v10612_v46, %v16136_v53  ;;  %v12830_v56 = vmul.f32 %v10613_v60, %v16137_v6  ;;  %10124 = vpow2.f32 %v2252_v7  ;;  %v2227_v8 = vsub.f32 %v12615_v44, %v16134_v4 }
 0x397   :  { %v1809_v10 = vsub.f32 %v1788_v21, %v12512_v25  ;;  %3508 = vrot.lane.b32.xlu1 %v3469_v39, %s10666_s26  ;;  %v12814_v5 = vpop.permute.xlu0 %2193  ;;  %v3473_v34 = vmul.f32 %v10113_v28, %v16094_v35  ;;  %v2226_v39 = vsub.f32 %v12782_v31, %v16134_v4  ;;  %v16138_v28 = vld [vmem:[#allocation121_spill] sm:$0xff]  ;;  %v2258_v27 = vmul.f32 1.442695, %v2239_v61 }
 0x398   :  { %v10115_v48 = vpop.eup %10114  ;;  %v2260_v53 = vmul.f32 1.442695, %v2240_v50  ;;  %v2229_v61 = vsub.f32 %v12799_v49, %v16134_v4  ;;  %v10615_v49 = vld [vmem:[%s15517_s1 + $0x78] sm:$0xff] }
 0x399   :  { %v1825_v63 = vmin.f32 %v1809_v10, 0.0  ;;  %v10117_v45 = vpop.eup %10116  ;;  %v10614_v10 = vld [vmem:[%s15517_s1 + $0x70] sm:$0xff]  ;;  %v1871_v31 = vmul.f32 %v10115_v48, %v12824_v43  ;;  %v2242_v60 = vmin.f32 %v2226_v39, 0.0  ;;  %v2244_v48 = vmin.f32 %v2228_v42, 0.0 }
 0x39a   :  { %v16139_v39 = vld [vmem:[#allocation100_spill] sm:$0xff]  ;;  %v2245_v42 = vmin.f32 %v2229_v61, 0.0 }
 0x39b   :  { %v1856_v37 = vmul.f32 1.442695, %v1825_v63  ;;  %3512 = vrot.lane.b32.xlu1 %v3471_v3, %s10666_s26  ;;  %v12817_v25 = vpop.permute.xlu1 %2595  ;;  %v12840_v3 = vmul.f32 %v10614_v10, %v16138_v28  ;;  %v12845_v7 = vpop.permute.xlu0 %2205  ;;  %v2241_v63 = vmin.f32 %v2225_v2, 0.0  ;;  %v16140_v10 = vld [vmem:[#allocation101_spill] sm:$0xff] }
 0x39c   :  { %v2782_v28 = vmul.f32 %v12752_v0, %v16140_v10 }
 0x39d   :  { %v10119_v35 = vpop.eup %10118  ;;  %10126 = vpow2.f32 %v1856_v37  ;;  %v1872_v37 = vmul.f32 %v10117_v45, %v12840_v3  ;;  %v2262_v55 = vmul.f32 1.442695, %v2241_v63  ;;  %v2264_v45 = vmul.f32 1.442695, %v2242_v60 }
 0x39e   :  { %v10121_v21 = vpop.eup %10120  ;;  %v1870_v1 = vmul.f32 %v10119_v35, %v12830_v56  ;;  %10128 = vpow2.f32 %v2256_v57  ;;  %v2230_v35 = vsub.f32 %v12814_v5, %v16134_v4  ;;  %v2232_v63 = vsub.f32 %v12788_v30, %v16134_v4 }
 0x39f   :  { %3516 = vrot.lane.b32.xlu1 %v3473_v34, %s10666_s26  ;;  %v3475_v44 = vmul.f32 %v10121_v21, %v16096_v24  ;;  %v10123_v6 = vpop.eup %10122  ;;  %v2243_v34 = vmin.f32 %v2227_v8, 0.0  ;;  %10130 = vpow2.f32 %v2258_v27  ;;  %v2210_v50 = vpop.permute.xlu0 %2209  ;;  %v2781_v21 = vmul.f32 %v12752_v0, %v16139_v39 }
 0x3a0   :  { %8301 = vmatprep.mubr.f32.mxu0 %v1870_v1  ;;  %v12851_v46 = vpop.permute.xlu1 %3130  ;;  %10132 = vpow2.f32 %v2260_v53  ;;  %v3477_v24 = vmul.f32 %v10123_v6, %v16101_v38  ;;  %v10125_v57 = vpop.eup %10124  ;;  %v16141_v1 = vld [vmem:[#allocation120_spill] sm:$0xff]  ;;  %v2268_v27 = vmul.f32 1.442695, %v2244_v48  ;;  %v2231_v38 = vsub.f32 %v12737_v12, %v16134_v4 }
 0x3a1   :  { %8302 = vmatmul.mubr.f32.gmra.mrb[46].mxu0 %v1871_v31  ;;  %v12871_v8 = vmul.f32 %v10615_v49, %v16141_v1  ;;  %v2266_v31 = vmul.f32 1.442695, %v2243_v34  ;;  %10134 = vpow2.f32 %v2262_v55  ;;  %v16142_v34 = vld [vmem:[#allocation124_spill] sm:$0xff]  ;;  %v2798_v12 = vmul.f32 %v2782_v28, %v11869_v29  ;;  %v16143_v55 = vld [vmem:[#allocation102_spill] sm:$0xff] }
 0x3a2   :  { %8304 = vmatprep.mubr.f32.mxu0 %v1872_v37  ;;  %10136 = vpow2.f32 %v2264_v45  ;;  %v2246_v37 = vmin.f32 %v2230_v35, 0.0  ;;  %v2783_v48 = vmul.f32 %v12752_v0, %v16142_v34  ;;  %v2784_v61 = vmul.f32 %v12752_v0, %v16143_v55 }
 0x3a3   :  { %3520 = vrot.lane.b32.xlu1 %v3475_v44, %s10666_s26  ;;  %v2284_v44 = vmul.f32 %v10125_v57, %v12626_v9  ;;  %v12888_v45 = vpop.permute.xlu0 %2571  ;;  %10138 = vpow2.f32 %v2266_v31  ;;  %v2247_v30 = vmin.f32 %v2231_v38, 0.0  ;;  %v2270_v35 = vmul.f32 1.442695, %v2245_v42  ;;  %v16144_v38 = vld [vmem:[#allocation106_spill] sm:$0xff] }
 0x3a4   :  { %v12858_v2 = vpop.permute.xlu1 %3134  ;;  %v2233_v57 = vsub.f32 %v12845_v7, %v16134_v4  ;;  %10140 = vpow2.f32 %v2268_v27  ;;  %v2248_v39 = vmin.f32 %v2232_v63, 0.0  ;;  %v2272_v10 = vmul.f32 1.442695, %v2246_v37  ;;  %v16145_v27 = vld [vmem:[#allocation103_spill] sm:$0xff] }
 0x3a5   :  { %v2800_v31 = vmul.f32 %v2784_v61, %v11857_v11  ;;  %v2786_v42 = vmul.f32 %v12752_v0, %v16144_v38  ;;  %v2785_v63 = vmul.f32 %v12752_v0, %v16145_v27  ;;  %10142 = vpow2.f32 %v2270_v35  ;;  %v16146_v61 = vld [vmem:[#allocation109_spill] sm:$0xff] }
 0x3a6   :  { %v2249_v37 = vmin.f32 %v2233_v57, 0.0  ;;  %10144 = vpow2.f32 %v2272_v10  ;;  %v16147_v57 = vld [vmem:[#allocation22_spill] sm:$0xff] }
 0x3a7   :  { %3524 = vrot.lane.b32.xlu1 %v3477_v24, %s10666_s26  ;;  %v10127_v5 = vpop.eup %10126  ;;  %v2797_v24 = vmul.f32 %v2781_v21, %v11865_v15  ;;  %v2234_v21 = vsub.f32 %v2210_v50, %v16134_v4  ;;  %v2274_v50 = vmul.f32 1.442695, %v2247_v30  ;;  %v12904_v34 = vpop.permute.xlu0 %2583  ;;  %v2788_v30 = vmul.f32 %v12752_v0, %v16146_v61  ;;  %v16151_v61 = vld [vmem:[#allocation26_spill] sm:$0xff] }
 0x3a8   :  { %v1873_v60 = vmul.f32 %v10127_v5, %v12871_v8  ;;  %v10129_v6 = vpop.eup %10128  ;;  %v2278_v10 = vmul.f32 1.442695, %v2249_v37  ;;  %v16149_v37 = vld [vmem:[#allocation115_spill] sm:$0xff] }
 0x3a9   :  { %v12878_v53 = vpop.permute.xlu1 %2607  ;;  %v10131_v49 = vpop.eup %10130  ;;  %v2286_v1 = vmul.f32 %v10129_v6, %v12646_v32  ;;  %v9113_v7 = vpack.c.bf16 %v2798_v12, %v2797_v24  ;;  %v2250_v6 = vmin.f32 %v2234_v21, 0.0  ;;  %v2802_v12 = vmul.f32 %v2786_v42, %v11894_v18  ;;  %v16148_v42 = vld [vmem:[#allocation119_spill] sm:$0xff] }
 0x3aa   :  { %8305 = vmatmul.mubr.f32.gmra.mrb[48].mxu0 %v1873_v60  ;;  %v10133_v5 = vpop.eup %10132  ;;  %v2799_v60 = vmul.f32 %v2783_v48, %v11853_v52  ;;  %v2287_v48 = vmul.f32 %v10131_v49, %v12665_v26  ;;  %10146 = vpow2.f32 %v2274_v50  ;;  %v2801_v21 = vmul.f32 %v2785_v63, %v16099_v14 }
 0x3ab   :  { %8339 = vmatprep.mubr.f32.mxu0 %v2284_v44  ;;  %v2276_v44 = vmul.f32 1.442695, %v2248_v39  ;;  %v10135_v55 = vpop.eup %10134  ;;  %v2787_v39 = vmul.f32 %v12752_v0, %v16147_v57  ;;  %v2280_v49 = vmul.f32 1.442695, %v2250_v6  ;;  %v2790_v27 = vmul.f32 %v12752_v0, %v16148_v42  ;;  %v12923_v50 = vpop.permute.xlu0 %2587 }
 0x3ac   :  { %v10137_v24 = vpop.eup %10136  ;;  %v9121_v63 = vpack.c.bf16 %v2802_v12, %v2801_v21  ;;  %v2791_v12 = vmul.f32 %v12752_v0, %v16151_v61 }
 0x3ad   :  { %10148 = vpow2.f32 %v2276_v44  ;;  %v2290_v38 = vmul.f32 %v10137_v24, %v12711_v13  ;;  %v2789_v44 = vmul.f32 %v12752_v0, %v16149_v37 }
 0x3ae   :  { %v12893_v28 = vpop.permute.xlu1 %3142  ;;  %8340 = vmatmul.mubr.f32.vlgmr.msra.gmra.mrb[34].mxu0 %v12558_v62  ;;  %v2288_v62 = vmul.f32 %v10133_v5, %v12675_v36  ;;  %v10139_v5 = vpop.eup %10138  ;;  %10150 = vpow2.f32 %v2278_v10 }
 0x3af   :  { %9112 = vmatpush3.bf16.msra.mxu0 %v12797_v22  ;;  %8342 = vmatprep.mubr.f32.mxu0 %v2286_v1  ;;  %v9117_v22 = vpack.c.bf16 %v2800_v31, %v2799_v60  ;;  %v2289_v1 = vmul.f32 %v10135_v55, %v12691_v23  ;;  %v10141_v60 = vpop.eup %10140  ;;  %v2804_v31 = vmul.f32 %v2788_v30, %v16104_v51  ;;  %v16150_v55 = vld [vmem:[#allocation123_spill] sm:$0xff]  ;;  %10152 = vpow2.f32 %v2280_v49 }
 0x3b0   :  { %9114 = vmatprep.subr.bf16.mxu0 %v9113_v7  ;;  %v10143_v24 = vpop.eup %10142  ;;  %v2292_v30 = vmul.f32 %v10141_v60, %v12746_v40  ;;  %v2805_v49 = vmul.f32 %v2789_v44, %v16116_v17  ;;  %v16154_v60 = vld [vmem:[#allocation46_spill] sm:$0xff]  ;;  %v16157_v44 = vld [vmem:[#allocation41_spill] sm:$0xff] }
 0x3b1   :  { %v10145_v57 = vpop.eup %10144  ;;  %v2633_v37 = vsub.f32 %v16154_v60, %v12526_v16 }
 0x3b2   :  { %8343 = vmatmul.mubr.f32.gmra.mrb[36].mxu0 %v2287_v48  ;;  %v2803_v48 = vmul.f32 %v2787_v39, %v16107_v41  ;;  %v2632_v39 = vsub.f32 %v12888_v45, %v12526_v16  ;;  %v2294_v61 = vmul.f32 %v10145_v57, %v16157_v44 }
 0x3b3   :  { %v12911_v35 = vpop.permute.xlu1 %2611  ;;  %9116 = vmatpush3.bf16.msra.mxu0 %v9113_v7  ;;  %8345 = vmatprep.mubr.f32.mxu0 %v2288_v62  ;;  %v2630_v7 = vsub.f32 %v12542_v59, %v12526_v16  ;;  %v2792_v62 = vmul.f32 %v12752_v0, %v16150_v55  ;;  %v2291_v59 = vmul.f32 %v10139_v5, %v12720_v47  ;;  %v12945_v55 = vpop.permute.xlu0 %2599  ;;  %v2649_v57 = vmin.f32 %v2633_v37, 0.0 }
 0x3b4   :  { %9118 = vmatprep.subr.bf16.mxu0 %v9117_v22  ;;  %v2648_v17 = vmin.f32 %v2632_v39, 0.0 }
 0x3b5   :  { %v2646_v21 = vmin.f32 %v2630_v7, 0.0  ;;  %v2808_v5 = vmul.f32 %v2792_v62, %v16117_v19  ;;  %v16155_v7 = vld [vmem:[#allocation37_spill] sm:$0xff] }
 0x3b6   :  { %8346 = vmatmul.mubr.f32.gmra.mrb[38].mxu0 %v2289_v1  ;;  %v9125_v1 = vpack.c.bf16 %v2804_v31, %v2803_v48  ;;  %v2293_v45 = vmul.f32 %v10143_v24, %v16155_v7  ;;  %v16156_v31 = vld [vmem:[#allocation60_spill] sm:$0xff]  ;;  %v16160_v24 = vld [vmem:[#allocation67_spill] sm:$0xff]  ;;  %v2666_v37 = vmul.f32 1.442695, %v2648_v17  ;;  %v2638_v17 = vsub.f32 %v12817_v25, %v12526_v16 }
 0x3b7   :  { %9120 = vmatpush3.bf16.msra.mxu0 %v9117_v22  ;;  %8348 = vmatprep.mubr.f32.mxu0 %v2290_v38  ;;  %v16152_v22 = vld [vmem:[#allocation55_spill] sm:$0xff]  ;;  %v16153_v38 = vld [vmem:[#allocation126_spill] sm:$0xff]  ;;  %v2807_v48 = vmul.f32 %v2791_v12, %v16156_v31 }
 0x3b8   :  { %v12927_v6 = vpop.permute.xlu1 %3146  ;;  %9122 = vmatprep.subr.bf16.mxu0 %v9121_v63  ;;  %v2806_v10 = vmul.f32 %v2790_v27, %v16152_v22  ;;  %v2794_v42 = vmul.f32 %v12752_v0, %v16153_v38  ;;  %v16158_v38 = vld [vmem:[#allocation21_spill] sm:$0xff] }
 0x3b9   :  { %v2634_v19 = vsub.f32 %v16158_v38, %v12526_v16  ;;  %v16159_v22 = vld [vmem:[#allocation125_spill] sm:$0xff]  ;;  %v9133_v39 = vpack.c.bf16 %v2808_v5, %v2807_v48  ;;  %v2604_v5 = vpop.permute.xlu0 %2603 }
 0x3ba   :  { %8349 = vmatmul.mubr.f32.gmra.mrb[40].mxu0 %v2291_v59  ;;  %v10147_v59 = vpop.eup %10146  ;;  %v9129_v60 = vpack.c.bf16 %v2806_v10, %v2805_v49  ;;  %v2793_v40 = vmul.f32 %v12752_v0, %v16159_v22  ;;  %v2810_v12 = vmul.f32 %v2794_v42, %v16160_v24  ;;  %v16161_v10 = vld [vmem:[#allocation39_spill] sm:$0xff]  ;;  %v2635_v0 = vsub.f32 %v12904_v34, %v12526_v16 }
 0x3bb   :  { %9124 = vmatpush3.bf16.msra.mxu0 %v9121_v63  ;;  %8351 = vmatprep.mubr.f32.mxu0 %v2292_v30  ;;  %v10149_v62 = vpop.eup %10148  ;;  %v2662_v30 = vmul.f32 1.442695, %v2646_v21  ;;  %v2295_v21 = vmul.f32 %v10147_v59, %v12795_v20  ;;  %v2636_v59 = vsub.f32 %v12923_v50, %v12526_v16  ;;  %v16163_v34 = vld [vmem:[#allocation23_spill] sm:$0xff] }
 0x3bc   :  { %9126 = vmatprep.subr.bf16.mxu0 %v9125_v1  ;;  %v2296_v42 = vmul.f32 %v10149_v62, %v12830_v56  ;;  %v2809_v48 = vmul.f32 %v2793_v40, %v16130_v54  ;;  %v2637_v62 = vsub.f32 %v16163_v34, %v12526_v16  ;;  %v2651_v50 = vmin.f32 %v2635_v0, 0.0 }
 0x3bd   :  { %v2214_v27 = vpop.permute.xlu1 %2213  ;;  %10154 = vpow2.f32 %v2662_v30 }
 0x3be   :  { %v2235_v63 = vsub.f32 %v2214_v27, %v16134_v4  ;;  %8352 = vmatmul.mubr.f32.gmra.mrb[42].mxu0 %v2293_v45  ;;  %v12959_v4 = vld [vmem:[%s15518_s3 + $0x3] ss:$0 sm:$0xff]  ;;  %v10151_v27 = vpop.eup %10150  ;;  %v2653_v25 = vmin.f32 %v2637_v62, 0.0  ;;  %v2672_v0 = vmul.f32 1.442695, %v2651_v50  ;;  %v2642_v62 = vsub.f32 %v12911_v35, %v12526_v16 }
 0x3bf   :  { %9128 = vmatpush3.bf16.msra.mxu0 %v9125_v1  ;;  %8354 = vmatprep.mubr.f32.mxu0 %v2294_v61  ;;  %v3189_v49 = vmul.f32 %v12959_v4, %v16161_v10  ;;  %v10153_v45 = vpop.eup %10152  ;;  %v16162_v61 = vld [vmem:[#allocation31_spill] sm:$0xff] }
 0x3c0   :  { %v2251_v47 = vmin.f32 %v2235_v63, 0.0  ;;  %9130 = vmatprep.subr.bf16.mxu0 %v9129_v60  ;;  %v2650_v63 = vmin.f32 %v2634_v19, 0.0  ;;  %v3190_v38 = vmul.f32 %v12959_v4, %v16162_v61  ;;  %v2297_v19 = vmul.f32 %v10151_v27, %v12824_v43  ;;  %v2616_v27 = vpop.permute.xlu0 %2615 }
 0x3c1   :  { %v2298_v40 = vmul.f32 %v10153_v45, %v12840_v3  ;;  %v3205_v10 = vmul.f32 %v3189_v49, %v16133_v33  ;;  %v2639_v45 = vsub.f32 %v12945_v55, %v12526_v16  ;;  %v2640_v49 = vsub.f32 %v2604_v5, %v12526_v16 }
 0x3c2   :  { %v2282_v22 = vmul.f32 1.442695, %v2251_v47  ;;  %v12966_v1 = vpop.permute.xlu1 %3150  ;;  %8355 = vmatmul.mubr.f32.gmra.mrb[44].mxu0 %v2295_v21  ;;  %v2668_v47 = vmul.f32 1.442695, %v2649_v57  ;;  %v9137_v21 = vpack.c.bf16 %v2810_v12, %v2809_v48  ;;  %v2652_v57 = vmin.f32 %v2636_v59, 0.0 }
 0x3c3   :  { %9132 = vmatpush3.bf16.msra.mxu0 %v9129_v60  ;;  %8357 = vmatprep.mubr.f32.mxu0 %v2296_v42  ;;  %v2670_v60 = vmul.f32 1.442695, %v2650_v63  ;;  %v2654_v42 = vmin.f32 %v2638_v17, 0.0  ;;  %v2676_v59 = vmul.f32 1.442695, %v2653_v25  ;;  %v3192_v61 = vmul.f32 %v12959_v4, %v12858_v2 }
 0x3c4   :  { %10156 = vpow2.f32 %v2282_v22  ;;  %9134 = vmatprep.subr.bf16.mxu0 %v9133_v39  ;;  %v3206_v22 = vmul.f32 %v3190_v38, %v16132_v58  ;;  %v2674_v12 = vmul.f32 1.442695, %v2652_v57  ;;  %v2641_v55 = vsub.f32 %v12878_v53, %v12526_v16  ;;  %v2620_v17 = vpop.permute.xlu0 %2619 }
 0x3c5   :  { %10158 = vpow2.f32 %v2666_v37  ;;  %v2678_v48 = vmul.f32 1.442695, %v2654_v42  ;;  %v2655_v5 = vmin.f32 %v2639_v45, 0.0  ;;  %v2656_v34 = vmin.f32 %v2640_v49, 0.0 }
 0x3c6   :  { %v12979_v30 = vpop.permute.xlu1 %3158  ;;  %8358 = vmatmul.mubr.f32.gmra.mrb[46].mxu0 %v2297_v19  ;;  %10160 = vpow2.f32 %v2668_v47  ;;  %v9141_v63 = vpack.c.bf16 %v3206_v22, %v3205_v10  ;;  %v3191_v47 = vmul.f32 %v12959_v4, %v12851_v46  ;;  %v3208_v53 = vmul.f32 %v3192_v61, %v11869_v29  ;;  %v16165_v61 = vld [vmem:[#allocation129_spill] sm:$0xff] }
 0x3c7   :  { %9136 = vmatpush3.bf16.msra.mxu0 %v9133_v39  ;;  %8360 = vmatprep.mubr.f32.mxu0 %v2298_v40  ;;  %10162 = vpow2.f32 %v2670_v60  ;;  %v10155_v39 = vpop.eup %10154  ;;  %v3194_v10 = vmul.f32 %v12959_v4, %v12893_v28  ;;  %v2657_v35 = vmin.f32 %v2641_v55, 0.0  ;;  %v2680_v60 = vmul.f32 1.442695, %v2655_v5 }
 0x3c8   :  { %9138 = vmatprep.subr.bf16.mxu0 %v9137_v21  ;;  %10164 = vpow2.f32 %v2672_v0  ;;  %v2694_v2 = vmul.f32 %v10155_v39, %v12626_v9  ;;  %v2643_v57 = vsub.f32 %v2616_v27, %v12526_v16  ;;  %v3207_v25 = vmul.f32 %v3191_v47, %v11865_v15 }
 0x3c9   :  { %10166 = vpow2.f32 %v2674_v12  ;;  %v2682_v42 = vmul.f32 1.442695, %v2656_v34  ;;  %v2658_v0 = vmin.f32 %v2642_v62, 0.0  ;;  %v2644_v45 = vsub.f32 %v2620_v17, %v12526_v16 }
 0x3ca   :  { %10168 = vpow2.f32 %v2676_v59  ;;  %v3210_v59 = vmul.f32 %v3194_v10, %v11857_v11  ;;  %v3196_v27 = vmul.f32 %v12959_v4, %v12966_v1  ;;  %v2684_v47 = vmul.f32 1.442695, %v2657_v35  ;;  %v16167_v35 = vld [vmem:[#allocation128_spill] sm:$0xff] }
 0x3cb   :  { %v12987_v37 = vpop.permute.xlu1 %2973  ;;  %9140 = vmatpush3.bf16.msra.mxu0 %v9137_v21  ;;  %v16164_v21 = vld [vmem:[#allocation42_spill] sm:$0xff]  ;;  %10170 = vpow2.f32 %v2678_v48  ;;  %v13012_v48 = vpop.permute.xlu0 %2981  ;;  %v2659_v55 = vmin.f32 %v2643_v57, 0.0  ;;  %v2686_v34 = vmul.f32 1.442695, %v2658_v0  ;;  %v3195_v62 = vmul.f32 %v12959_v4, %v12927_v6 }
 0x3cc   :  { %9142 = vmatprep.subr.bf16.mxu0 %v9141_v63  ;;  %v3193_v46 = vmul.f32 %v12959_v4, %v16164_v21  ;;  %10172 = vpow2.f32 %v2680_v60  ;;  %v2660_v17 = vmin.f32 %v2644_v45, 0.0  ;;  %v3197_v6 = vmul.f32 %v12959_v4, %v16167_v35 }
 0x3cd   :  { %10174 = vpow2.f32 %v2682_v42  ;;  %v2688_v60 = vmul.f32 1.442695, %v2659_v55  ;;  %v3211_v57 = vmul.f32 %v3195_v62, %v16099_v14 }
 0x3ce   :  { %v10157_v38 = vpop.eup %10156  ;;  %v3209_v28 = vmul.f32 %v3193_v46, %v11853_v52  ;;  %v3212_v46 = vmul.f32 %v3196_v27, %v11894_v18  ;;  %10176 = vpow2.f32 %v2684_v47  ;;  %v16168_v47 = vld [vmem:[#allocation30_spill] sm:$0xff] }
 0x3cf   :  { %v2299_v19 = vmul.f32 %v10157_v38, %v12871_v8  ;;  %v10159_v40 = vpop.eup %10158  ;;  %v9145_v38 = vpack.c.bf16 %v3208_v53, %v3207_v25  ;;  %10178 = vpow2.f32 %v2686_v34  ;;  %v13031_v25 = vpop.permute.xlu0 %2993 }
 0x3d0   :  { %v12998_v50 = vpop.permute.xlu1 %3162  ;;  %v10161_v22 = vpop.eup %10160  ;;  %v2696_v49 = vmul.f32 %v10159_v40, %v12646_v32  ;;  %v9149_v10 = vpack.c.bf16 %v3210_v59, %v3209_v28  ;;  %v9153_v28 = vpack.c.bf16 %v3212_v46, %v3211_v57  ;;  %v3213_v59 = vmul.f32 %v3197_v6, %v16107_v41 }
 0x3d1   :  { %8361 = vmatmul.mubr.f32.gmra.mrb[48].mxu0 %v2299_v19  ;;  %v10163_v39 = vpop.eup %10162  ;;  %v2697_v5 = vmul.f32 %v10161_v22, %v12665_v26  ;;  %v2690_v22 = vmul.f32 1.442695, %v2660_v17  ;;  %10180 = vpow2.f32 %v2688_v60 }
 0x3d2   :  { %8395 = vmatprep.mubr.f32.mxu0 %v2694_v2  ;;  %v10165_v19 = vpop.eup %10164  ;;  %v16166_v2 = vld [vmem:[#allocation35_spill] sm:$0xff]  ;;  %v2698_v40 = vmul.f32 %v10163_v39, %v12675_v36 }
 0x3d3   :  { %v3040_v1 = vsub.f32 %v12987_v37, %v16166_v2  ;;  %v10167_v21 = vpop.eup %10166  ;;  %10182 = vpow2.f32 %v2690_v22 }
 0x3d4   :  { %v3167_v12 = vpop.permute.xlu1 %3166  ;;  %v10169_v37 = vpop.eup %10168  ;;  %v2700_v45 = vmul.f32 %v10167_v21, %v12711_v13 }
 0x3d5   :  { %8396 = vmatmul.mubr.f32.vlgmr.msra.gmra.mrb[34].mxu0 %v16165_v61  ;;  %v10171_v42 = vpop.eup %10170  ;;  %v3056_v0 = vmin.f32 %v3040_v1, 0.0  ;;  %v3200_v39 = vmul.f32 %v12959_v4, %v3167_v12  ;;  %v3199_v61 = vmul.f32 %v12959_v4, %v12998_v50  ;;  %v2701_v55 = vmul.f32 %v10169_v37, %v16168_v47  ;;  %v16169_v12 = vld [vmem:[#allocation34_spill] sm:$0xff]  ;;  %v16170_v1 = vld [vmem:[#allocation55_spill] sm:$0xff] }
 0x3d6   :  { %9144 = vmatpush3.bf16.msra.mxu0 %v9141_v63  ;;  %8398 = vmatprep.mubr.f32.mxu0 %v2696_v49  ;;  %v3198_v63 = vmul.f32 %v12959_v4, %v12979_v30  ;;  %v2699_v30 = vmul.f32 %v10165_v19, %v12691_v23  ;;  %v2702_v62 = vmul.f32 %v10171_v42, %v16169_v12  ;;  %v2998_v19 = vpop.permute.xlu0 %2997 }
 0x3d7   :  { %9146 = vmatprep.subr.bf16.mxu0 %v9145_v38  ;;  %v3072_v34 = vmul.f32 1.442695, %v3056_v0  ;;  %v3042_v50 = vsub.f32 %v13012_v48, %v16166_v2 }
 0x3d8   :  { %v3214_v49 = vmul.f32 %v3198_v63, %v16104_v51  ;;  %v16171_v63 = vld [vmem:[#allocation130_spill] sm:$0xff] }
 0x3d9   :  { %8399 = vmatmul.mubr.f32.gmra.mrb[36].mxu0 %v2697_v5  ;;  %v13026_v53 = vpop.permute.xlu1 %2985  ;;  %v10173_v5 = vpop.eup %10172  ;;  %10184 = vpow2.f32 %v3072_v34  ;;  %v3045_v34 = vsub.f32 %v13031_v25, %v16166_v2 }
 0x3da   :  { %9148 = vmatpush3.bf16.msra.mxu0 %v9145_v38  ;;  %8401 = vmatprep.mubr.f32.mxu0 %v2698_v40  ;;  %v10175_v17 = vpop.eup %10174  ;;  %v3216_v40 = vmul.f32 %v3200_v39, %v16170_v1  ;;  %v9157_v46 = vpack.c.bf16 %v3214_v49, %v3213_v59  ;;  %v2703_v37 = vmul.f32 %v10173_v5, %v16155_v7  ;;  %v3058_v49 = vmin.f32 %v3042_v50, 0.0  ;;  %v16173_v39 = vld [vmem:[#allocation81_spill] sm:$0xff]  ;;  %v3006_v59 = vpop.permute.xlu0 %3005 }
 0x3db   :  { %9150 = vmatprep.subr.bf16.mxu0 %v9149_v10  ;;  %v10177_v57 = vpop.eup %10176  ;;  %v3043_v0 = vsub.f32 %v13026_v53, %v16166_v2  ;;  %v3061_v50 = vmin.f32 %v3045_v34, 0.0 }
 0x3dc   :  { %v10179_v42 = vpop.eup %10178 }
 0x3dd   :  { %8402 = vmatmul.mubr.f32.gmra.mrb[38].mxu0 %v2699_v30  ;;  %v2704_v30 = vmul.f32 %v10175_v17, %v16157_v44 }
 0x3de   :  { %9152 = vmatpush3.bf16.msra.mxu0 %v9149_v10  ;;  %8404 = vmatprep.mubr.f32.mxu0 %v2700_v45  ;;  %v2624_v27 = vpop.permute.xlu1 %2623  ;;  %v3201_v10 = vmul.f32 %v12959_v4, %v16171_v63 }
 0x3df   :  { %9154 = vmatprep.subr.bf16.mxu0 %v9153_v28  ;;  %v2645_v38 = vsub.f32 %v2624_v27, %v12526_v16  ;;  %v16172_v16 = vld [vmem:[#allocation80_spill] sm:$0xff]  ;;  %v2705_v27 = vmul.f32 %v10177_v57, %v12795_v20 }
 0x3e0   :  { %v3215_v35 = vmul.f32 %v3199_v61, %v16172_v16  ;;  %v3217_v45 = vmul.f32 %v3201_v10, %v16156_v31  ;;  %v10181_v61 = vpop.eup %10180 }
 0x3e1   :  { %v2661_v21 = vmin.f32 %v2645_v38, 0.0  ;;  %8405 = vmatmul.mubr.f32.gmra.mrb[40].mxu0 %v2701_v55  ;;  %v2706_v55 = vmul.f32 %v10179_v42, %v12830_v56  ;;  %v10183_v53 = vpop.eup %10182  ;;  %v2707_v63 = vmul.f32 %v10181_v61, %v12824_v43 }
 0x3e2   :  { %9156 = vmatpush3.bf16.msra.mxu0 %v9153_v28  ;;  %8407 = vmatprep.mubr.f32.mxu0 %v2702_v62  ;;  %v9161_v48 = vpack.c.bf16 %v3216_v40, %v3215_v35  ;;  %v3059_v62 = vmin.f32 %v3043_v0, 0.0  ;;  %v3076_v40 = vmul.f32 1.442695, %v3058_v49  ;;  %v2708_v10 = vmul.f32 %v10183_v53, %v12840_v3  ;;  %v3014_v35 = vpop.permute.xlu0 %3013 }
 0x3e3   :  { %v2692_v6 = vmul.f32 1.442695, %v2661_v21  ;;  %9158 = vmatprep.subr.bf16.mxu0 %v9157_v46  ;;  %v3175_v60 = vpop.permute.xlu1 %3174  ;;  %v3046_v21 = vsub.f32 %v2998_v19, %v16166_v2  ;;  %v3082_v0 = vmul.f32 1.442695, %v3061_v50 }
 0x3e4   :  { %v3202_v22 = vmul.f32 %v12959_v4, %v3175_v60  ;;  %v10185_v60 = vpop.eup %10184 }
 0x3e5   :  { %10186 = vpow2.f32 %v2692_v6  ;;  %8408 = vmatmul.mubr.f32.gmra.mrb[42].mxu0 %v2703_v37  ;;  %v3078_v6 = vmul.f32 1.442695, %v3059_v62  ;;  %v3062_v37 = vmin.f32 %v3046_v21, 0.0 }
 0x3e6   :  { %v3218_v28 = vmul.f32 %v3202_v22, %v16173_v39  ;;  %9160 = vmatpush3.bf16.msra.mxu0 %v9157_v46  ;;  %8410 = vmatprep.mubr.f32.mxu0 %v2704_v30  ;;  %10188 = vpow2.f32 %v3076_v40  ;;  %v3048_v22 = vsub.f32 %v3006_v59, %v16166_v2 }
 0x3e7   :  { %9162 = vmatprep.subr.bf16.mxu0 %v9161_v48  ;;  %10190 = vpow2.f32 %v3078_v6  ;;  %v3084_v49 = vmul.f32 1.442695, %v3062_v37 }
 0x3e8   :  { %v2990_v38 = vpop.permute.xlu1 %2989  ;;  %v9165_v5 = vpack.c.bf16 %v3218_v28, %v3217_v45  ;;  %v3104_v45 = vmul.f32 %v10185_v60, %v12626_v9  ;;  %v3064_v61 = vmin.f32 %v3048_v22, 0.0 }
 0x3e9   :  { %v3044_v17 = vsub.f32 %v2990_v38, %v16166_v2  ;;  %8411 = vmatmul.mubr.f32.gmra.mrb[44].mxu0 %v2705_v27  ;;  %v3022_v27 = vpop.permute.xlu0 %3021  ;;  %v3050_v38 = vsub.f32 %v3014_v35, %v16166_v2 }
 0x3ea   :  { %9164 = vmatpush3.bf16.msra.mxu0 %v9161_v48  ;;  %8413 = vmatprep.mubr.f32.mxu0 %v2706_v55  ;;  %v3088_v62 = vmul.f32 1.442695, %v3064_v61 }
 0x3eb   :  { %v3060_v46 = vmin.f32 %v3044_v17, 0.0  ;;  %9166 = vmatprep.subr.bf16.mxu0 %v9165_v5  ;;  %v3066_v17 = vmin.f32 %v3050_v38, 0.0 }
 0x3ed   :  { %8414 = vmatmul.mubr.f32.gmra.mrb[46].mxu0 %v2707_v63  ;;  %v3179_v25 = vpop.permute.xlu1 %3178  ;;  %v3080_v57 = vmul.f32 1.442695, %v3060_v46  ;;  %v3030_v40 = vpop.permute.xlu0 %3029 }
 0x3ee   :  { %9168 = vmatpush3.bf16.msra.mxu0 %v9165_v5  ;;  %8416 = vmatprep.mubr.f32.mxu0 %v2708_v10  ;;  %v3203_v30 = vmul.f32 %v12959_v4, %v3179_v25  ;;  %v3092_v25 = vmul.f32 1.442695, %v3066_v17  ;;  %v3054_v37 = vsub.f32 %v3030_v40, %v16166_v2 }
 0x3ef   :  { %v10187_v19 = vpop.eup %10186  ;;  %10192 = vpow2.f32 %v3080_v57  ;;  %v16174_v57 = vld [vmem:[#allocation131_spill] sm:$0xff] }
 0x3f0   :  { %v2709_v42 = vmul.f32 %v10187_v19, %v12871_v8  ;;  %v3219_v59 = vmul.f32 %v3203_v30, %v16130_v54  ;;  %10194 = vpow2.f32 %v3082_v0  ;;  %v10189_v34 = vpop.eup %10188 }
 0x3f1   :  { %v3183_v48 = vpop.permute.xlu1 %3182  ;;  %10196 = vpow2.f32 %v3084_v49  ;;  %v10191_v63 = vpop.eup %10190  ;;  %v3106_v35 = vmul.f32 %v10189_v34, %v12646_v32 }
 0x3f2   :  { %v3204_v28 = vmul.f32 %v12959_v4, %v3183_v48  ;;  %8417 = vmatmul.mubr.f32.gmra.mrb[48].mxu0 %v2709_v42  ;;  %v3052_v4 = vsub.f32 %v3022_v27, %v16166_v2  ;;  %10198 = vpow2.f32 %v3088_v62  ;;  %v3107_v30 = vmul.f32 %v10191_v63, %v12665_v26 }
 0x3f3   :  { %8451 = vmatprep.mubr.f32.mxu0 %v3104_v45 }
 0x3f4   :  { %v3220_v55 = vmul.f32 %v3204_v28, %v16160_v24  ;;  %v3068_v60 = vmin.f32 %v3052_v4, 0.0  ;;  %v3070_v28 = vmin.f32 %v3054_v37, 0.0  ;;  %v3495_v37 = vpop.permute.xlu0 %3494 }
 0x3f6   :  { %v3002_v5 = vpop.permute.xlu1 %3001  ;;  %v9169_v53 = vpack.c.bf16 %v3220_v55, %v3219_v59  ;;  %v3096_v49 = vmul.f32 1.442695, %v3068_v60 }
 0x3f7   :  { %v3047_v9 = vsub.f32 %v3002_v5, %v16166_v2  ;;  %v3100_v5 = vmul.f32 1.442695, %v3070_v28 }
 0x3f8   :  { %9170 = vmatprep.subr.bf16.mxu0 %v9169_v53 }
 0x3f9   :  { %v3063_v21 = vmin.f32 %v3047_v9, 0.0  ;;  %9172 = vmatpush3.bf16.msra.mxu0 %v9169_v53  ;;  %v10193_v6 = vpop.eup %10192 }
 0x3fa   :  { %v3010_v46 = vpop.permute.xlu1 %3009  ;;  %v10195_v42 = vpop.eup %10194  ;;  %v3108_v32 = vmul.f32 %v10193_v6, %v12675_v36 }
 0x3fb   :  { %v3086_v10 = vmul.f32 1.442695, %v3063_v21  ;;  %v3049_v50 = vsub.f32 %v3010_v46, %v16166_v2  ;;  %v10197_v45 = vpop.eup %10196  ;;  %v3109_v38 = vmul.f32 %v10195_v42, %v12691_v23 }
 0x3fc   :  { %8452 = vmatmul.mubr.f32.vlgmr.msra.gmra.mrb[34].mxu0 %v16174_v57  ;;  %v3110_v55 = vmul.f32 %v10197_v45, %v12711_v13  ;;  %v10199_v53 = vpop.eup %10198 }
 0x3fd   :  { %10200 = vpow2.f32 %v3086_v10  ;;  %v3065_v19 = vmin.f32 %v3049_v50, 0.0  ;;  %8454 = vmatprep.mubr.f32.mxu0 %v3106_v35  ;;  %v3112_v40 = vmul.f32 %v10199_v53, %v16169_v12 }
 0x3fe   :  { %v3018_v22 = vpop.permute.xlu1 %3017  ;;  %10202 = vpow2.f32 %v3092_v25 }
 0x3ff   :  { %v3090_v0 = vmul.f32 1.442695, %v3065_v19  ;;  %v3051_v48 = vsub.f32 %v3018_v22, %v16166_v2  ;;  %v13113_v19 = vld [vmem:[%s15520_s8] ss:$0 sm:$0xff]  ;;  %v3499_v22 = vpop.permute.xlu0 %3498 }
 0x400   :  { %8455 = vmatmul.mubr.f32.gmra.mrb[36].mxu0 %v3107_v30  ;;  %v1695_v30 = vmul.f32 %v13113_v19, %v16132_v58  ;;  %v1696_v58 = vmul.f32 %v13113_v19, %v11865_v15 }
 0x401   :  { %10204 = vpow2.f32 %v3090_v0  ;;  %v3067_v27 = vmin.f32 %v3051_v48, 0.0  ;;  %8457 = vmatprep.mubr.f32.mxu0 %v3108_v32  ;;  %v1694_v0 = vmul.f32 %v13113_v19, %v16133_v33 }
 0x402   :  { %v3026_v61 = vpop.permute.xlu1 %3025  ;;  %10206 = vpow2.f32 %v3096_v49 }
 0x403   :  { %v3094_v59 = vmul.f32 1.442695, %v3067_v27  ;;  %v3053_v26 = vsub.f32 %v3026_v61, %v16166_v2  ;;  %v3503_v28 = vpop.permute.xlu0 %3502  ;;  %v1697_v61 = vmul.f32 %v13113_v19, %v11869_v29  ;;  %v1699_v29 = vmul.f32 %v13113_v19, %v11857_v11 }
 0x404   :  { %8458 = vmatmul.mubr.f32.gmra.mrb[38].mxu0 %v3109_v38 }
 0x405   :  { %10208 = vpow2.f32 %v3094_v59  ;;  %v3069_v36 = vmin.f32 %v3053_v26, 0.0  ;;  %8460 = vmatprep.mubr.f32.mxu0 %v3110_v55 }
 0x406   :  { %v3034_v9 = vpop.permute.xlu1 %3033  ;;  %10210 = vpow2.f32 %v3100_v5 }
 0x407   :  { %v10201_v34 = vpop.eup %10200  ;;  %v3098_v62 = vmul.f32 1.442695, %v3069_v36  ;;  %v3055_v17 = vsub.f32 %v3034_v9, %v16166_v2 }
 0x408   :  { %v3111_v23 = vmul.f32 %v10201_v34, %v16168_v47  ;;  %v10203_v13 = vpop.eup %10202 }
 0x409   :  { %10212 = vpow2.f32 %v3098_v62  ;;  %v3071_v4 = vmin.f32 %v3055_v17, 0.0  ;;  %v3114_v10 = vmul.f32 %v10203_v13, %v16157_v44 }
 0x40a   :  { %8461 = vmatmul.mubr.f32.gmra.mrb[40].mxu0 %v3111_v23  ;;  %v1698_v23 = vmul.f32 %v13113_v19, %v11853_v52  ;;  %v1701_v52 = vmul.f32 %v13113_v19, %v11894_v18 }
 0x40b   :  { %v10205_v21 = vpop.eup %10204  ;;  %v3102_v46 = vmul.f32 1.442695, %v3071_v4  ;;  %8463 = vmatprep.mubr.f32.mxu0 %v3112_v40  ;;  %v3507_v4 = vpop.permute.xlu0 %3506 }
 0x40c   :  { %v3113_v63 = vmul.f32 %v10205_v21, %v16155_v7  ;;  %v10207_v50 = vpop.eup %10206 }
 0x40d   :  { %10214 = vpow2.f32 %v3102_v46  ;;  %v3116_v35 = vmul.f32 %v10207_v50, %v12830_v56  ;;  %v3710_v56 = vld [vmem:[%s15519_s10 + $0x8] sm:$0xff] }
 0x40e   :  { %8464 = vmatmul.mubr.f32.gmra.mrb[42].mxu0 %v3113_v63 }
 0x40f   :  { %v10209_v2 = vpop.eup %10208  ;;  %8466 = vmatprep.mubr.f32.mxu0 %v3114_v10 }
 0x410   :  { %v3115_v47 = vmul.f32 %v10209_v2, %v12795_v20  ;;  %v10211_v6 = vpop.eup %10210  ;;  %v3709_v20 = vld [vmem:[%s15519_s10] sm:$0xff] }
 0x411   :  { %v3118_v60 = vmul.f32 %v10211_v6, %v12840_v3  ;;  %v9173_v3 = vpack.c.bf16 %v3710_v56, %v3709_v20  ;;  %v1700_v6 = vmul.f32 %v13113_v19, %v16099_v14 }
 0x412   :  { %8467 = vmatmul.mubr.f32.gmra.mrb[44].mxu0 %v3115_v47 }
 0x413   :  { %v10213_v12 = vpop.eup %10212  ;;  %8469 = vmatprep.mubr.f32.mxu0 %v3116_v35  ;;  %9175 = vmatprep.subr.msk.bf16.mxu1 %vm13102_vm7, %v9173_v3 }
 0x414   :  { %v3117_v25 = vmul.f32 %v10213_v12, %v12824_v43  ;;  %v16175_v43 = vmov 0  ;;  %9178 = vmatpush3.bf16.xpose.msk.msra.mxu1 %vm13102_vm7, %v9173_v3  ;;  %v3511_v12 = vpop.permute.xlu0 %3510  ;;  %v1703_v3 = vmul.f32 %v13113_v19, %v16104_v51 }
 0x415   :  { %v16176_v43 = vsel %vm13102_vm7, 4294967295, %v16175_v43 }
 0x416   :  { %8470 = vmatmul.mubr.f32.gmra.mrb[46].mxu0 %v3117_v25  ;;  %16177 = vst [vmem:[#allocation45_spill] sm:$0xff] %v16176_v43 }
 0x417   :  { %v10215_v7 = vpop.eup %10214  ;;  %8472 = vmatprep.mubr.f32.mxu0 %v3118_v60 }
 0x418   :  { %v3119_v44 = vmul.f32 %v10215_v7, %v12871_v8  ;;  %v3497_v8 = vpop.permute.xlu1 %3496 }
 0x41a   :  { %8473 = vmatmul.mubr.f32.gmra.mrb[48].mxu0 %v3119_v44 }
 0x41c   :  { %v3501_v57 = vpop.permute.xlu1 %3500 }
 0x420   :  { %v3505_v45 = vpop.permute.xlu1 %3504 }
 0x424   :  { %v3509_v34 = vpop.permute.xlu1 %3508 }
 0x428   :  { %v3513_v47 = vpop.permute.xlu1 %3512 }
 0x4cf   :  { %v8453_v42 = vpop.f32.mrb[34].mxu0 }
 0x4d0   :  { %v9463_v48 = vadd.f32 %v8453_v42, %v1695_v30  ;;  %v3287_v32 = vpop.f32.mrb[35].mxu0  ;;  %v3517_v42 = vpop.permute.xlu1 %3516 }
 0x4d1   :  { %v9464_v49 = vadd.f32 %v3287_v32, %v1694_v0 }
 0x4d2   :  { %v13119_v27 = vmul.f32 %v9463_v48, %v3497_v8 }
 0x4d3   :  { %v13123_v38 = vmul.f32 %v9464_v49, %v3495_v37  ;;  %v8456_v59 = vpop.f32.mrb[36].mxu0  ;;  %v1702_v37 = vmul.f32 %v13113_v19, %v16107_v41  ;;  %v1705_v49 = vmul.f32 %v13113_v19, %v16170_v1 }
 0x4d4   :  { %v9465_v26 = vadd.f32 %v8456_v59, %v1697_v61  ;;  %v3297_v55 = vpop.f32.mrb[37].mxu0  ;;  %v3559_v33 = vmul.f32 %v13119_v27, %v13119_v27  ;;  %v1704_v59 = vmul.f32 %v13113_v19, %v16172_v16  ;;  %v3521_v16 = vpop.permute.xlu1 %3520 }
 0x4d5   :  { %v9466_v5 = vadd.f32 %v3297_v55, %v1696_v58  ;;  %v3558_v36 = vmul.f32 %v13123_v38, %v13123_v38 }
 0x4d6   :  { %v13131_v53 = vmul.f32 %v9465_v26, %v3501_v57  ;;  %v3578_v9 = vsel %vm3574_vm6, %v3559_v33, 0.0 }
 0x4d7   :  { %v13136_v62 = vmul.f32 %v9466_v5, %v3499_v22  ;;  %v8459_v15 = vpop.f32.mrb[38].mxu0  ;;  %3579 = vadd.xlane.f32.xlu1 %v3578_v9  ;;  %v3575_v17 = vsel %vm3574_vm6, %v3558_v36, 0.0 }
 0x4d8   :  { %v9467_v40 = vadd.f32 %v8459_v15, %v1699_v29  ;;  %3576 = vadd.xlane.f32.xlu0 %v3575_v17  ;;  %v3307_v13 = vpop.f32.mrb[39].mxu0  ;;  %v3561_v21 = vmul.f32 %v13131_v53, %v13131_v53  ;;  %v1707_v29 = vmul.f32 %v13113_v19, %v16173_v39  ;;  %v1706_v17 = vmul.f32 %v13113_v19, %v16156_v31 }
 0x4d9   :  { %v9468_v11 = vadd.f32 %v3307_v13, %v1698_v23  ;;  %v3560_v50 = vmul.f32 %v13136_v62, %v13136_v62 }
 0x4da   :  { %v13143_v46 = vmul.f32 %v9467_v40, %v3505_v45  ;;  %v3584_v63 = vsel %vm3574_vm6, %v3561_v21, 0.0  ;;  %v3515_v45 = vpop.permute.xlu0 %3514 }
 0x4db   :  { %v13146_v10 = vmul.f32 %v9468_v11, %v3503_v28  ;;  %v3581_v20 = vsel %vm3574_vm6, %v3560_v50, 0.0  ;;  %v1709_v50 = vmul.f32 %v13113_v19, %v16160_v24 }
 0x4dc   :  { %3585 = vadd.xlane.f32.xlu0 %v3584_v63  ;;  %v3563_v2 = vmul.f32 %v13143_v46, %v13143_v46 }
 0x4dd   :  { %v8462_v35 = vpop.f32.mrb[40].mxu0  ;;  %v3562_v18 = vmul.f32 %v13146_v10, %v13146_v10 }
 0x4de   :  { %v9469_v25 = vadd.f32 %v8462_v35, %v1701_v52  ;;  %v3317_v60 = vpop.f32.mrb[41].mxu0  ;;  %v3590_v7 = vsel %vm3574_vm6, %v3563_v2, 0.0  ;;  %v3519_v23 = vpop.permute.xlu0 %3518 }
 0x4df   :  { %v9470_v44 = vadd.f32 %v3317_v60, %v1700_v6  ;;  %3591 = vadd.xlane.f32.xlu1 %v3590_v7  ;;  %v3587_v48 = vsel %vm3574_vm6, %v3562_v18, 0.0 }
 0x4e0   :  { %v13160_v56 = vmul.f32 %v9469_v25, %v3509_v34  ;;  %3582 = vadd.xlane.f32.xlu0 %v3581_v20  ;;  %v3525_v25 = vpop.permute.xlu1 %3524 }
 0x4e1   :  { %v13164_v8 = vmul.f32 %v9470_v44, %v3507_v4  ;;  %v8465_v14 = vpop.f32.mrb[42].mxu0 }
 0x4e2   :  { %v9471_v57 = vadd.f32 %v8465_v14, %v1703_v3  ;;  %v3327_v22 = vpop.f32.mrb[43].mxu0  ;;  %v3565_v30 = vmul.f32 %v13160_v56, %v13160_v56  ;;  %v3523_v44 = vpop.permute.xlu0 %3522 }
 0x4e3   :  { %v9472_v0 = vadd.f32 %v3327_v22, %v1702_v37  ;;  %v3564_v32 = vmul.f32 %v13164_v8, %v13164_v8  ;;  %v7529_v22 = vld [vmem:[%s15514_s7 + $0x1] ss:$0 sm:$0xff] }
 0x4e4   :  { %v13173_v51 = vmul.f32 %v9471_v57, %v3513_v47  ;;  %3588 = vadd.xlane.f32.xlu0 %v3587_v48  ;;  %v3596_v41 = vsel %vm3574_vm6, %v3565_v30, 0.0  ;;  %v1708_v47 = vmul.f32 %v13113_v19, %v16130_v54  ;;  %v7511_v30 = vld [vmem:[%s15512_s4 + $0x10] sm:$0xff] }
 0x4e5   :  { %v13178_v28 = vmul.f32 %v9472_v0, %v3511_v12  ;;  %v8468_v61 = vpop.f32.mrb[44].mxu0  ;;  %3597 = vadd.xlane.f32.xlu1 %v3596_v41  ;;  %v3593_v5 = vsel %vm3574_vm6, %v3564_v32, 0.0 }
 0x4e6   :  { %v9473_v58 = vadd.f32 %v8468_v61, %v1705_v49  ;;  %v3337_v26 = vpop.f32.mrb[45].mxu0  ;;  %v3567_v55 = vmul.f32 %v13173_v51, %v13173_v51 }
 0x4e7   :  { %v9474_v33 = vadd.f32 %v3337_v26, %v1704_v59  ;;  %v3566_v1 = vmul.f32 %v13178_v28, %v13178_v28 }
 0x4e8   :  { %v13187_v36 = vmul.f32 %v9473_v58, %v3517_v42  ;;  %3594 = vadd.xlane.f32.xlu0 %v3593_v5  ;;  %v3602_v9 = vsel %vm3574_vm6, %v3567_v55, 0.0  ;;  %v7512_v42 = vld [vmem:[%s15512_s4 + $0x18] sm:$0xff] }
 0x4e9   :  { %v13192_v34 = vmul.f32 %v9474_v33, %v3515_v45  ;;  %v8471_v15 = vpop.f32.mrb[46].mxu0  ;;  %3603 = vadd.xlane.f32.xlu1 %v3602_v9  ;;  %v3599_v11 = vsel %vm3574_vm6, %v3566_v1, 0.0  ;;  %v9179_v0 = vpack.c.bf16 %v7512_v42, %v7511_v30 }
 0x4ea   :  { %v9475_v4 = vadd.f32 %v8471_v15, %v1707_v29  ;;  %v3347_v40 = vpop.f32.mrb[47].mxu0  ;;  %v3569_v13 = vmul.f32 %v13187_v36, %v13187_v36 }
 0x4eb   :  { %v9476_v21 = vadd.f32 %v3347_v40, %v1706_v17  ;;  %v3568_v39 = vmul.f32 %v13192_v34, %v13192_v34  ;;  %9180 = vmatprep.subr.bf16.mxu1 %v9179_v0 }
 0x4ec   :  { %v13201_v63 = vmul.f32 %v9475_v4, %v3521_v16  ;;  %3600 = vadd.xlane.f32.xlu0 %v3599_v11  ;;  %v3608_v31 = vsel %vm3574_vm6, %v3569_v13, 0.0  ;;  %v13241_v13 = vld [vmem:[%s15521_s9] ss:$0 sm:$0xff] }
 0x4ed   :  { %v13206_v52 = vmul.f32 %v9476_v21, %v3519_v23  ;;  %v8474_v2 = vpop.f32.mrb[48].mxu0  ;;  %3609 = vadd.xlane.f32.xlu1 %v3608_v31  ;;  %v3605_v7 = vsel %vm3574_vm6, %v3568_v39, 0.0 }
 0x4ee   :  { %v9477_v35 = vadd.f32 %v8474_v2, %v1709_v50  ;;  %v3357_v6 = vpop.f32.mrb[49].mxu0  ;;  %v3571_v12 = vmul.f32 %v13201_v63, %v13201_v63 }
 0x4ef   :  { %v9478_v60 = vadd.f32 %v3357_v6, %v1708_v47  ;;  %v3570_v24 = vmul.f32 %v13206_v52, %v13206_v52 }
 0x4f0   :  { %v13215_v20 = vmul.f32 %v9477_v35, %v3525_v25  ;;  %3606 = vadd.xlane.f32.xlu0 %v3605_v7  ;;  %v3614_v18 = vsel %vm3574_vm6, %v3571_v12, 0.0 }
 0x4f1   :  { %v13218_v3 = vmul.f32 %v9478_v60, %v3523_v44  ;;  %3615 = vadd.xlane.f32.xlu1 %v3614_v18  ;;  %v3611_v19 = vsel %vm3574_vm6, %v3570_v24, 0.0 }
 0x4f2   :  { %v3573_v54 = vmul.f32 %v13215_v20, %v13215_v20 }
 0x4f3   :  { %v3572_v14 = vmul.f32 %v13218_v3, %v13218_v3 }
 0x4f4   :  { %3612 = vadd.xlane.f32.xlu0 %v3611_v19  ;;  %v3620_v37 = vsel %vm3574_vm6, %v3573_v54, 0.0 }
 0x4f5   :  { %3621 = vadd.xlane.f32.xlu1 %v3620_v37  ;;  %v3617_v57 = vsel %vm3574_vm6, %v3572_v14, 0.0 }
 0x4f8   :  { %3618 = vadd.xlane.f32.xlu0 %v3617_v57 }
 0x506   :  { %4666 = vrot.lane.b32.xlu1 %v7529_v22, %s10655_s23 }
 0x50e   :  { %4112 = vrot.lane.b32.xlu0 %v7529_v22, %s10654_s18 }
 0x564   :  { %v3580_v48 = vpop.xlane.xlu1 %3579 }
 0x565   :  { %v3625_v32 = vmul.f32 0.03125, %v3580_v48  ;;  %v3577_v45 = vpop.xlane.xlu0 %3576 }
 0x566   :  { %v3624_v49 = vmul.f32 0.03125, %v3577_v45 }
 0x567   :  { %v3641_v41 = vadd.f32 1e-05, %v3625_v32 }
 0x568   :  { %v3640_v61 = vadd.f32 1e-05, %v3624_v49 }
 0x569   :  { %10216 = vrsqrt.f32 %v3641_v41  ;;  %v3586_v59 = vpop.xlane.xlu0 %3585 }
 0x56a   :  { %10218 = vrsqrt.f32 %v3640_v61  ;;  %v3627_v58 = vmul.f32 0.03125, %v3586_v59 }
 0x56c   :  { %v3643_v26 = vadd.f32 1e-05, %v3627_v58  ;;  %v3592_v55 = vpop.xlane.xlu1 %3591 }
 0x56d   :  { %v3629_v33 = vmul.f32 0.03125, %v3592_v55  ;;  %v3583_v5 = vpop.xlane.xlu0 %3582 }
 0x56e   :  { %v3626_v1 = vmul.f32 0.03125, %v3583_v5  ;;  %10220 = vrsqrt.f32 %v3643_v26 }
 0x56f   :  { %v3645_v29 = vadd.f32 1e-05, %v3629_v33 }
 0x570   :  { %v3642_v9 = vadd.f32 1e-05, %v3626_v1 }
 0x571   :  { %v3589_v16 = vpop.xlane.xlu0 %3588 }
 0x572   :  { %10222 = vrsqrt.f32 %v3642_v9  ;;  %v3628_v15 = vmul.f32 0.03125, %v3589_v16  ;;  %v3598_v17 = vpop.xlane.xlu1 %3597 }
 0x573   :  { %v10217_v23 = vpop.eup %10216  ;;  %10224 = vrsqrt.f32 %v3645_v29  ;;  %v3631_v4 = vmul.f32 0.03125, %v3598_v17 }
 0x574   :  { %v10219_v40 = vpop.eup %10218  ;;  %v3673_v21 = vmul.f32 %v10217_v23, %v13119_v27  ;;  %v3644_v11 = vadd.f32 1e-05, %v3628_v15 }
 0x575   :  { %v3647_v39 = vadd.f32 1e-05, %v3631_v4  ;;  %v3595_v50 = vpop.xlane.xlu0 %3594  ;;  %v3672_v31 = vmul.f32 %v10219_v40, %v13123_v38 }
 0x576   :  { %10226 = vrsqrt.f32 %v3644_v11  ;;  %v3630_v2 = vmul.f32 0.03125, %v3595_v50  ;;  %v3604_v47 = vpop.xlane.xlu1 %3603  ;;  %v3694_v12 = vmul.f32 %v13241_v13, %v3673_v21 }
 0x577   :  { %10228 = vrsqrt.f32 %v3647_v39  ;;  %v3633_v35 = vmul.f32 0.03125, %v3604_v47  ;;  %v3693_v6 = vmul.f32 %v13241_v13, %v3672_v31 }
 0x578   :  { %v3646_v25 = vadd.f32 1e-05, %v3630_v2  ;;  %v10221_v60 = vpop.eup %10220 }
 0x579   :  { %v3649_v7 = vadd.f32 1e-05, %v3633_v35  ;;  %8479 = vmatprep.mubr.msk.f32.mxu1 %vm3574_vm6, %v3693_v6  ;;  %v3601_v27 = vpop.xlane.xlu0 %3600  ;;  %v3675_v19 = vmul.f32 %v10221_v60, %v13131_v53 }
 0x57a   :  { %10230 = vrsqrt.f32 %v3646_v25  ;;  %v3632_v24 = vmul.f32 0.03125, %v3601_v27  ;;  %8480 = vmatmul.mubr.msk.f32.vlgmr.msra.gmra.mrb[16].mxu1 %vm3574_vm6, %v3694_v12  ;;  %v3610_v38 = vpop.xlane.xlu1 %3609 }
 0x57b   :  { %10232 = vrsqrt.f32 %v3649_v7  ;;  %v3635_v44 = vmul.f32 0.03125, %v3610_v38  ;;  %9182 = vmatpush3.bf16.msra.mxu1 %v9179_v0  ;;  %v3696_v0 = vmul.f32 %v13241_v13, %v3675_v19 }
 0x57c   :  { %v10223_v18 = vpop.eup %10222  ;;  %v3648_v54 = vadd.f32 1e-05, %v3632_v24 }
 0x57d   :  { %v10225_v14 = vpop.eup %10224  ;;  %v3651_v37 = vadd.f32 1e-05, %v3635_v44  ;;  %v3607_v57 = vpop.xlane.xlu0 %3606  ;;  %v3674_v22 = vmul.f32 %v10223_v18, %v13136_v62 }
 0x57e   :  { %10234 = vrsqrt.f32 %v3648_v54  ;;  %v3634_v30 = vmul.f32 0.03125, %v3607_v57  ;;  %v3616_v42 = vpop.xlane.xlu1 %3615  ;;  %v3677_v41 = vmul.f32 %v10225_v14, %v13143_v46 }
 0x57f   :  { %10236 = vrsqrt.f32 %v3651_v37  ;;  %v3637_v48 = vmul.f32 0.03125, %v3616_v42  ;;  %v3695_v32 = vmul.f32 %v13241_v13, %v3674_v22 }
 0x580   :  { %v10227_v45 = vpop.eup %10226  ;;  %v3650_v49 = vadd.f32 1e-05, %v3634_v30  ;;  %v3698_v46 = vmul.f32 %v13241_v13, %v3677_v41 }
 0x581   :  { %v10229_v61 = vpop.eup %10228  ;;  %v3653_v53 = vadd.f32 1e-05, %v3637_v48  ;;  %v3613_v59 = vpop.xlane.xlu0 %3612  ;;  %8482 = vmatprep.mubr.msk.f32.mxu1 %vm3574_vm6, %v3695_v32  ;;  %v3676_v62 = vmul.f32 %v10227_v45, %v13146_v10  ;;  %v10616_v45 = vld [vmem:[%s15517_s1] sm:$0xff] }
 0x582   :  { %10238 = vrsqrt.f32 %v3650_v49  ;;  %v3636_v58 = vmul.f32 0.03125, %v3613_v59  ;;  %8483 = vmatmul.mubr.msk.f32.gmra.mrb[18].mxu1 %vm3574_vm6, %v3696_v0  ;;  %v3622_v26 = vpop.xlane.xlu1 %3621  ;;  %v3679_v29 = vmul.f32 %v10229_v61, %v13160_v56  ;;  %v7530_v49 = vld [vmem:[%s15515_s5 + $0x4] sm:$0xf]  ;;  %v16179_v61 = vld [vmem:[#allocation16_spill] sm:$0xff]  ;;  %v16180_v59 = vld [vmem:[#allocation17_spill] sm:$0xff] }
 0x583   :  { %10240 = vrsqrt.f32 %v3653_v53  ;;  %v3639_v55 = vmul.f32 0.03125, %v3622_v26  ;;  %v3697_v33 = vmul.f32 %v13241_v13, %v3676_v62  ;;  %v16178_v0 = vld [vmem:[#allocation14_spill] sm:$0xff]  ;;  %v13317_v53 = vrot.slane %v7530_v49, %v16179_v61 }
 0x584   :  { %v10231_v5 = vpop.eup %10230  ;;  %v3652_v1 = vadd.f32 1e-05, %v3636_v58  ;;  %v3700_v21 = vmul.f32 %v13241_v13, %v3679_v29  ;;  %v13314_v41 = vrot.slane %v7530_v49, %v16178_v0  ;;  %v13320_v62 = vrot.slane %v7530_v49, %v16180_v59  ;;  %v16182_v26 = vld [vmem:[#allocation18_spill] sm:$0xff] }
 0x585   :  { %v10233_v9 = vpop.eup %10232  ;;  %v3655_v16 = vadd.f32 1e-05, %v3639_v55  ;;  %v3619_v15 = vpop.xlane.xlu0 %3618  ;;  %8485 = vmatprep.mubr.msk.f32.mxu1 %vm3574_vm6, %v3697_v33  ;;  %v3678_v10 = vmul.f32 %v10231_v5, %v13164_v8  ;;  %v13325_v55 = vrot.slane %v7530_v49, %v16182_v26  ;;  %v16225_v61 = vld [vmem:[#allocation50_spill] sm:$0xff] }
 0x586   :  { %10242 = vrsqrt.f32 %v3652_v1  ;;  %v3638_v17 = vmul.f32 0.03125, %v3619_v15  ;;  %8486 = vmatmul.mubr.msk.f32.gmra.mrb[20].mxu1 %vm3574_vm6, %v3698_v46  ;;  %v3681_v56 = vmul.f32 %v10233_v9, %v13173_v51 }
 0x587   :  { %10244 = vrsqrt.f32 %v3655_v16  ;;  %v3699_v23 = vmul.f32 %v13241_v13, %v3678_v10 }
 0x588   :  { %v10235_v4 = vpop.eup %10234  ;;  %v3654_v40 = vadd.f32 1e-05, %v3638_v17  ;;  %v3702_v31 = vmul.f32 %v13241_v13, %v3681_v56 }
 0x589   :  { %v10237_v11 = vpop.eup %10236  ;;  %8488 = vmatprep.mubr.msk.f32.mxu1 %vm3574_vm6, %v3699_v23  ;;  %v3680_v39 = vmul.f32 %v10235_v4, %v13178_v28  ;;  %v13355_v4 = vld [vmem:[%s15516_s6 + $0x1] ss:$0 sm:$0xff] }
 0x58a   :  { %10246 = vrsqrt.f32 %v3654_v40  ;;  %8489 = vmatmul.mubr.msk.f32.gmra.mrb[22].mxu1 %vm3574_vm6, %v3700_v21  ;;  %v3683_v2 = vmul.f32 %v10237_v11, %v13187_v36 }
 0x58b   :  { %v3701_v8 = vmul.f32 %v13241_v13, %v3680_v39 }
 0x58c   :  { %v10239_v50 = vpop.eup %10238  ;;  %v3704_v6 = vmul.f32 %v13241_v13, %v3683_v2  ;;  %v16188_v2 = vld [vmem:[#allocation3_spill] sm:$0xff] }
 0x58d   :  { %v10241_v47 = vpop.eup %10240  ;;  %8491 = vmatprep.mubr.msk.f32.mxu1 %vm3574_vm6, %v3701_v8  ;;  %v3682_v51 = vmul.f32 %v10239_v50, %v13192_v34 }
 0x58e   :  { %8492 = vmatmul.mubr.msk.f32.gmra.mrb[24].mxu1 %vm3574_vm6, %v3702_v31  ;;  %v3685_v12 = vmul.f32 %v10241_v47, %v13201_v63 }
 0x58f   :  { %v3703_v35 = vmul.f32 %v13241_v13, %v3682_v51 }
 0x590   :  { %v10243_v28 = vpop.eup %10242  ;;  %v3706_v34 = vmul.f32 %v13241_v13, %v3685_v12  ;;  %v16189_v12 = vld [vmem:[#allocation4_spill] sm:$0xff] }
 0x591   :  { %v10245_v25 = vpop.eup %10244  ;;  %8494 = vmatprep.mubr.msk.f32.mxu1 %vm3574_vm6, %v3703_v35  ;;  %v3684_v60 = vmul.f32 %v10243_v28, %v13206_v52  ;;  %v13378_v28 = vpop.permute.xlu0 %4112 }
 0x592   :  { %8495 = vmatmul.mubr.msk.f32.gmra.mrb[26].mxu1 %vm3574_vm6, %v3704_v6  ;;  %v3687_v27 = vmul.f32 %v10245_v25, %v13215_v20 }
 0x593   :  { %v3705_v36 = vmul.f32 %v13241_v13, %v3684_v60 }
 0x594   :  { %v10247_v7 = vpop.eup %10246  ;;  %v3708_v38 = vmul.f32 %v13241_v13, %v3687_v27 }
 0x595   :  { %8497 = vmatprep.mubr.msk.f32.mxu1 %vm3574_vm6, %v3705_v36  ;;  %v3686_v24 = vmul.f32 %v10247_v7, %v13218_v3 }
 0x596   :  { %8498 = vmatmul.mubr.msk.f32.gmra.mrb[28].mxu1 %vm3574_vm6, %v3706_v34 }
 0x597   :  { %v3707_v63 = vmul.f32 %v13241_v13, %v3686_v24 }
 0x599   :  { %8500 = vmatprep.mubr.msk.f32.mxu1 %vm3574_vm6, %v3707_v63  ;;  %v16192_v63 = vld [vmem:[#allocation9_spill] sm:$0xff] }
 0x59a   :  { %8501 = vmatmul.mubr.msk.f32.gmra.mrb[30].mxu1 %vm3574_vm6, %v3708_v38 }
 0x64d   :  { %v8481_v52 = vpop.f32.mrb[16].mxu1 }
 0x64e   :  { %v3831_v44 = vpop.f32.mrb[17].mxu1 }
 0x64f   :  { %8507 = vmatprep.mubr.msk.f32.mxu1 %vm56_vm0, %v3831_v44 }
 0x650   :  { %8508 = vmatmul.mubr.msk.f32.vlgmr.msra.gmra.mrb[32].mxu1 %vm56_vm0, %v8481_v52 }
 0x655   :  { %v8484_v20 = vpop.f32.mrb[18].mxu1 }
 0x656   :  { %v3841_v18 = vpop.f32.mrb[19].mxu1 }
 0x657   :  { %8510 = vmatprep.mubr.msk.f32.mxu1 %vm56_vm0, %v3841_v18 }
 0x658   :  { %8511 = vmatmul.mubr.msk.f32.gmra.mrb[34].mxu1 %vm56_vm0, %v8484_v20 }
 0x659   :  { %v8487_v3 = vpop.f32.mrb[20].mxu1 }
 0x65a   :  { %v3851_v54 = vpop.f32.mrb[21].mxu1 }
 0x65b   :  { %8513 = vmatprep.mubr.msk.f32.mxu1 %vm56_vm0, %v3851_v54 }
 0x65c   :  { %8514 = vmatmul.mubr.msk.f32.gmra.mrb[36].mxu1 %vm56_vm0, %v8487_v3 }
 0x65d   :  { %v8490_v13 = vpop.f32.mrb[22].mxu1 }
 0x65e   :  { %v3861_v19 = vpop.f32.mrb[23].mxu1 }
 0x65f   :  { %8516 = vmatprep.mubr.msk.f32.mxu1 %vm56_vm0, %v3861_v19 }
 0x660   :  { %8517 = vmatmul.mubr.msk.f32.gmra.mrb[38].mxu1 %vm56_vm0, %v8490_v13 }
 0x661   :  { %v8493_v14 = vpop.f32.mrb[24].mxu1 }
 0x662   :  { %v3871_v37 = vpop.f32.mrb[25].mxu1 }
 0x663   :  { %8519 = vmatprep.mubr.msk.f32.mxu1 %vm56_vm0, %v3871_v37 }
 0x664   :  { %8520 = vmatmul.mubr.msk.f32.gmra.mrb[40].mxu1 %vm56_vm0, %v8493_v14 }
 0x665   :  { %v8496_v57 = vpop.f32.mrb[26].mxu1 }
 0x666   :  { %v3881_v22 = vpop.f32.mrb[27].mxu1 }
 0x667   :  { %8522 = vmatprep.mubr.msk.f32.mxu1 %vm56_vm0, %v3881_v22 }
 0x668   :  { %8523 = vmatmul.mubr.msk.f32.gmra.mrb[42].mxu1 %vm56_vm0, %v8496_v57 }
 0x669   :  { %v8499_v30 = vpop.f32.mrb[28].mxu1 }
 0x66a   :  { %v3891_v42 = vpop.f32.mrb[29].mxu1 }
 0x66b   :  { %8525 = vmatprep.mubr.msk.f32.mxu1 %vm56_vm0, %v3891_v42 }
 0x66c   :  { %8526 = vmatmul.mubr.msk.f32.gmra.mrb[44].mxu1 %vm56_vm0, %v8499_v30 }
 0x66d   :  { %v8502_v48 = vpop.f32.mrb[30].mxu1 }
 0x66e   :  { %v3901_v32 = vpop.f32.mrb[31].mxu1 }
 0x66f   :  { %8528 = vmatprep.mubr.msk.f32.mxu1 %vm56_vm0, %v3901_v32 }
 0x670   :  { %8529 = vmatmul.mubr.msk.f32.gmra.mrb[46].mxu1 %vm56_vm0, %v8502_v48 }
 0x671   :  { %8563 = vmatprep.mubr.f32.mxu1 %v10616_v45 }
 0x723   :  { %v13322_v58 = vpop.f32.mrb[32].mxu1 }
 0x724   :  { %16181 = vst [vmem:[#allocation89_spill] sm:$0xff] %v13322_v58  ;;  %v4323_v33 = vmul.f32 %v13322_v58, %v13314_v41  ;;  %v13329_v5 = vpop.f32.mrb[33].mxu1  ;;  %v4407_v1 = vmul.f32 %v13322_v58, %v13317_v53  ;;  %v13335_v46 = vmul.f32 %v13322_v58, %v13320_v62  ;;  %v4283_v29 = vmul.f32 %v13322_v58, %v13325_v55 }
 0x725   :  { %16183 = vst [vmem:[#allocation105_spill] sm:$0xff] %v13329_v5  ;;  %v13341_v16 = vmul.f32 %v13314_v41, %v13329_v5  ;;  %v13346_v17 = vmul.f32 %v13317_v53, %v13329_v5  ;;  %v13350_v23 = vmul.f32 %v13320_v62, %v13329_v5  ;;  %v13395_v27 = vadd.f32 %v13322_v58, %v13378_v28 }
 0x726   :  { %v4339_v9 = vrot.slane %v4323_v33, 7  ;;  %v4423_v15 = vrot.slane %v4407_v1, 6  ;;  %v4507_v10 = vrot.slane %v13335_v46, 5  ;;  %v4303_v31 = vadd.f32 %v13355_v4, %v4283_v29 }
 0x727   :  { %16184 = vst [vmem:[#allocation54_spill] sm:$0xff] %v13350_v23  ;;  %v15722_v40 = vrot.slane %v13341_v16, 7  ;;  %v15721_v21 = vrot.slane %v13346_v17, 6  ;;  %v15720_v56 = vrot.slane %v13350_v23, 5  ;;  %v13404_v44 = vadd.f32 %v13378_v28, %v13329_v5 }
 0x728   :  { %v4148_v57 = vand.u32 2147483647, %v13395_v27 }
 0x729   :  { %v4368_v8 = vsel %vm499_vm1, %v15722_v40, %v4339_v9  ;;  %v4452_v51 = vsel %vm680_vm2, %v15721_v21, %v4423_v15  ;;  %v4536_v35 = vsel %vm829_vm3, %v15720_v56, %v4507_v10  ;;  %v4147_v49 = vand.u32 2147483647, %v13404_v44  ;;  %v16211_v40 = vld [vmem:[#allocation19_spill] sm:$0xff] }
 0x72a   :  { %v4371_v47 = vmul.f32 %v4368_v8, %v16188_v2  ;;  %v4455_v25 = vmul.f32 %v4452_v51, %v16189_v12  ;;  %v4539_v38 = vmul.f32 %v4536_v35, %v16192_v63  ;;  %v16198_v51 = vld [vmem:[#allocation6_spill] sm:$0xff] }
 0x72b   :  { %v13360_v11 = vpop.f32.mrb[34].mxu1 }
 0x72c   :  { %16185 = vst [vmem:[#allocation91_spill] sm:$0xff] %v13360_v11  ;;  %v13366_v50 = vpop.f32.mrb[35].mxu1  ;;  %v4387_v6 = vadd.f32 %v4371_v47, %v4303_v31  ;;  %v13383_v60 = vmul.f32 %v13360_v11, %v13314_v41  ;;  %v13389_v7 = vmul.f32 %v13360_v11, %v13317_v53  ;;  %v13400_v52 = vmul.f32 %v13360_v11, %v13320_v62 }
 0x72d   :  { %16187 = vst [vmem:[#allocation49_spill] sm:$0xff] %v13366_v50  ;;  %v4324_v13 = vmul.f32 %v13314_v41, %v13366_v50  ;;  %v4408_v19 = vmul.f32 %v13317_v53, %v13366_v50  ;;  %v4492_v14 = vmul.f32 %v13320_v62, %v13366_v50  ;;  %v4285_v22 = vmul.f32 %v13360_v11, %v13325_v55 }
 0x72e   :  { %v4471_v24 = vadd.f32 %v4455_v25, %v4387_v6  ;;  %v4341_v18 = vrot.slane %v13383_v60, 7  ;;  %v15724_v54 = vrot.slane %v13389_v7, 6  ;;  %v4284_v30 = vmul.f32 %v13325_v55, %v13366_v50  ;;  %v16199_v6 = vld [vmem:[#allocation8_spill] sm:$0xff] }
 0x72f   :  { %v13385_v36 = vpop.f32.mrb[36].mxu1  ;;  %v15723_v42 = vrot.slane %v13400_v52, 5  ;;  %v4340_v48 = vrot.slane %v4324_v13, 7  ;;  %v4424_v32 = vrot.slane %v4408_v19, 6  ;;  %v4508_v45 = vrot.slane %v4492_v14, 5  ;;  %v16201_v13 = vld [vmem:[#allocation10_spill] sm:$0xff] }
 0x730   :  { %16190 = vst [vmem:[#allocation113_spill] sm:$0xff] %v13385_v36  ;;  %v13391_v34 = vpop.f32.mrb[37].mxu1  ;;  %v13406_v20 = vadd.f32 %v4539_v38, %v4471_v24  ;;  %v4305_v2 = vadd.f32 %v13355_v4, %v4285_v22  ;;  %v4304_v47 = vadd.f32 %v13355_v4, %v4284_v30  ;;  %v4164_v25 = vsub.f32 0.0, %v4148_v57 }
 0x731   :  { %16191 = vst [vmem:[#allocation104_spill] sm:$0xff] %v13391_v34  ;;  %v4366_v1 = vsel %vm499_vm1, %v4340_v48, %v4341_v18  ;;  %v4367_v46 = vsel %vm499_vm1, %v4339_v9, %v4340_v48  ;;  %v4450_v29 = vsel %vm680_vm2, %v4424_v32, %v15724_v54  ;;  %v4451_v8 = vsel %vm680_vm2, %v4423_v15, %v4424_v32  ;;  %v16200_v9 = vld [vmem:[#allocation15_spill] sm:$0xff] }
 0x732   :  { %16193 = vst [vmem:[#allocation66_spill] sm:$0xff] %v13406_v20  ;;  %v4372_v35 = vmul.f32 %v4367_v46, %v16198_v51  ;;  %v4373_v12 = vmul.f32 %v4366_v1, %v16199_v6  ;;  %v4456_v24 = vmul.f32 %v4451_v8, %v16200_v9  ;;  %v4534_v63 = vsel %vm829_vm3, %v4508_v45, %v15723_v42  ;;  %v16204_v1 = vld [vmem:[#allocation13_spill] sm:$0xff]  ;;  %v16205_v8 = vld [vmem:[#allocation44_spill] sm:$0xff] }
 0x733   :  { %v13409_v3 = vpop.f32.mrb[38].mxu1  ;;  %v4457_v19 = vmul.f32 %v4450_v29, %v16201_v13  ;;  %v4535_v14 = vsel %vm829_vm3, %v4507_v10, %v4508_v45  ;;  %v4163_v30 = vsub.f32 0.0, %v4147_v49  ;;  %v4541_v51 = vmul.f32 %v4534_v63, %v16205_v8 }
 0x734   :  { %16194 = vst [vmem:[#allocation94_spill] sm:$0xff] %v13409_v3  ;;  %v13418_v37 = vpop.f32.mrb[39].mxu1  ;;  %v4388_v38 = vadd.f32 %v4372_v35, %v4304_v47  ;;  %v4389_v15 = vadd.f32 %v4373_v12, %v4305_v2  ;;  %v4540_v46 = vmul.f32 %v4535_v14, %v16204_v1  ;;  %v4181_v6 = vmul.f32 1.442695, %v4164_v25 }
 0x735   :  { %16195 = vst [vmem:[#allocation93_spill] sm:$0xff] %v13418_v37  ;;  %v13467_v29 = vmul.f32 %v13385_v36, %v13314_v41  ;;  %v4179_v45 = vmul.f32 1.442695, %v4163_v30  ;;  %v13473_v49 = vadd.f32 %v13360_v11, %v13378_v28  ;;  %v13480_v12 = vmul.f32 %v13385_v36, %v13317_v53 }
 0x736   :  { %v4472_v57 = vadd.f32 %v4456_v24, %v4388_v38  ;;  %v4473_v32 = vadd.f32 %v4457_v19, %v4389_v15  ;;  %10248 = vpow2.f32 %v4181_v6  ;;  %v4326_v25 = vmul.f32 %v13314_v41, %v13391_v34 }
 0x737   :  { %v13427_v33 = vpop.f32.mrb[40].mxu1  ;;  %v15725_v35 = vrot.slane %v13467_v29, 7  ;;  %10250 = vpow2.f32 %v4179_v45  ;;  %v4150_v63 = vand.u32 2147483647, %v13473_v49  ;;  %v4287_v38 = vmul.f32 %v13385_v36, %v13325_v55  ;;  %v16210_v45 = vld [vmem:[#allocation24_spill] sm:$0xff] }
 0x738   :  { %16196 = vst [vmem:[#allocation63_spill] sm:$0xff] %v13427_v33  ;;  %v13441_v31 = vpop.f32.mrb[41].mxu1  ;;  %v13461_v9 = vadd.f32 %v4540_v46, %v4472_v57  ;;  %v13463_v2 = vadd.f32 %v4541_v51, %v4473_v32  ;;  %v13493_v13 = vadd.f32 %v13378_v28, %v13366_v50  ;;  %v4286_v19 = vmul.f32 %v13325_v55, %v13391_v34 }
 0x739   :  { %16197 = vst [vmem:[#allocation92_spill] sm:$0xff] %v13441_v31  ;;  %v4342_v14 = vrot.slane %v4326_v25, 7  ;;  %v13499_v30 = vmul.f32 %v13385_v36, %v13320_v62  ;;  %v4410_v57 = vmul.f32 %v13317_v53, %v13391_v34  ;;  %v13505_v32 = vadd.f32 %v13385_v36, %v13378_v28 }
 0x73a   :  { %16206 = vst [vmem:[#allocation118_spill] sm:$0xff] %v13461_v9  ;;  %16207 = vst [vmem:[#allocation107_spill] sm:$0xff] %v13463_v2  ;;  %v4166_v8 = vsub.f32 0.0, %v4150_v63  ;;  %v4307_v51 = vadd.f32 %v13355_v4, %v4287_v38  ;;  %v4149_v56 = vand.u32 2147483647, %v13493_v13  ;;  %v4306_v21 = vadd.f32 %v13355_v4, %v4286_v19 }
 0x73b   :  { %v13455_v22 = vpop.f32.mrb[42].mxu1  ;;  %v4364_v46 = vsel %vm499_vm1, %v4342_v14, %v15725_v35  ;;  %v4365_v6 = vsel %vm499_vm1, %v4341_v18, %v4342_v14  ;;  %v4426_v54 = vrot.slane %v4410_v57, 6  ;;  %v13524_v63 = vadd.f32 %v13378_v28, %v13391_v34  ;;  %v16215_v35 = vld [vmem:[#allocation32_spill] sm:$0xff] }
 0x73c   :  { %16202 = vst [vmem:[#allocation96_spill] sm:$0xff] %v13455_v22  ;;  %v13457_v48 = vpop.f32.mrb[43].mxu1  ;;  %v4375_v25 = vmul.f32 %v4364_v46, %v16210_v45  ;;  %v4374_v42 = vmul.f32 %v4365_v6, %v16211_v40  ;;  %v4494_v60 = vmul.f32 %v13320_v62, %v13391_v34  ;;  %v4152_v18 = vand.u32 2147483647, %v13505_v32  ;;  %v16214_v6 = vld [vmem:[#allocation20_spill] sm:$0xff] }
 0x73d   :  { %16203 = vst [vmem:[#allocation108_spill] sm:$0xff] %v13457_v48  ;;  %v16212_v46 = vrot.slane %v13480_v12, 6  ;;  %v16213_v40 = vrot.slane %v13389_v7, 6  ;;  %v4165_v43 = vsub.f32 0.0, %v4149_v56  ;;  %v16216_v58 = vrot.slane %v13499_v30, 5 }
 0x73e   :  { %v4391_v38 = vadd.f32 %v4375_v25, %v4307_v51  ;;  %v4390_v14 = vadd.f32 %v4374_v42, %v4306_v21  ;;  %v4510_v25 = vrot.slane %v4494_v60, 5  ;;  %v4151_v21 = vand.u32 2147483647, %v13524_v63  ;;  %v16218_v60 = vld [vmem:[#allocation52_spill] sm:$0xff] }
 0x73f   :  { %v13469_v10 = vpop.f32.mrb[44].mxu1  ;;  %v4448_v19 = vsel %vm680_vm2, %v4426_v54, %v16212_v46  ;;  %v4449_v57 = vsel %vm680_vm2, %v16213_v40, %v4426_v54  ;;  %v4185_v46 = vmul.f32 1.442695, %v4166_v8  ;;  %v4168_v26 = vsub.f32 0.0, %v4152_v18  ;;  %v16219_v40 = vld [vmem:[#allocation38_spill] sm:$0xff] }
 0x740   :  { %16208 = vst [vmem:[#allocation95_spill] sm:$0xff] %v13469_v10  ;;  %v13475_v47 = vpop.f32.mrb[45].mxu1  ;;  %v4458_v45 = vmul.f32 %v4449_v57, %v16214_v6  ;;  %v4459_v51 = vmul.f32 %v4448_v19, %v16215_v35  ;;  %v10249_v1 = vpop.eup %10248  ;;  %v4532_v7 = vsel %vm829_vm3, %v4510_v25, %v16216_v58  ;;  %v16217_v54 = vrot.slane %v13400_v52, 5 }
 0x741   :  { %v10251_v36 = vpop.eup %10250  ;;  %v4543_v19 = vmul.f32 %v4532_v7, %v16218_v60  ;;  %v4212_v56 = vadd.f32 1.0, %v10249_v1  ;;  %10252 = vpow2.f32 %v4185_v46  ;;  %v4189_v58 = vmul.f32 1.442695, %v4168_v26 }
 0x742   :  { %v4474_v42 = vadd.f32 %v4458_v45, %v4390_v14  ;;  %v4475_v11 = vadd.f32 %v4459_v51, %v4391_v38  ;;  %v4533_v35 = vsel %vm829_vm3, %v16217_v54, %v4510_v25  ;;  %v4211_v6 = vadd.f32 1.0, %v10251_v36 }
 0x743   :  { %v13484_v24 = vpop.f32.mrb[46].mxu1  ;;  %v4542_v57 = vmul.f32 %v4533_v35, %v16219_v40  ;;  %v4183_v38 = vmul.f32 1.442695, %v4165_v43  ;;  %v4167_v45 = vsub.f32 0.0, %v4151_v21  ;;  %10254 = vlog2.f32 %v4212_v56 }
 0x744   :  { %16209 = vst [vmem:[#allocation98_spill] sm:$0xff] %v13484_v24  ;;  %v13489_v15 = vpop.f32.mrb[47].mxu1  ;;  %v13550_v14 = vadd.f32 %v4543_v19, %v4475_v11  ;;  %v13556_v52 = vmul.f32 %v13409_v3, %v13314_v41  ;;  %v13560_v8 = vmul.f32 %v13409_v3, %v13317_v53  ;;  %10256 = vlog2.f32 %v4211_v6 }
 0x745   :  { %v13552_v51 = vadd.f32 %v4542_v57, %v4474_v42  ;;  %v4282_v43 = vmul.f32 %v13325_v55, %v13329_v5  ;;  %10258 = vpow2.f32 %v4183_v38  ;;  %v4187_v11 = vmul.f32 1.442695, %v4167_v45  ;;  %v16230_v5 = vld [vmem:[#allocation53_spill] sm:$0xff] }
 0x746   :  { %16220 = vst [vmem:[#allocation97_spill] sm:$0xff] %v13550_v14  ;;  %10260 = vpow2.f32 %v4189_v58  ;;  %v13568_v26 = vadd.f32 %v13409_v3, %v13378_v28  ;;  %v13572_v18 = vmul.f32 %v13409_v3, %v13320_v62  ;;  %v15734_v25 = vrot.slane %v13556_v52, 7 }
 0x747   :  { %16221 = vst [vmem:[#allocation111_spill] sm:$0xff] %v13552_v51  ;;  %v15737_v21 = vrot.slane %v13560_v8, 6  ;;  %v4328_v42 = vmul.f32 %v13314_v41, %v13418_v37  ;;  %v4412_v7 = vmul.f32 %v13317_v53, %v13418_v37  ;;  %v4571_v46 = vsub.f32 0.0, %v13406_v20 }
 0x748   :  { %v4572_v54 = vsub.f32 0.0, %v13461_v9  ;;  %v4288_v35 = vmul.f32 %v13325_v55, %v13418_v37  ;;  %v4496_v60 = vmul.f32 %v13320_v62, %v13418_v37  ;;  %10262 = vpow2.f32 %v4187_v11 }
 0x749   :  { %v4289_v19 = vmul.f32 %v13409_v3, %v13325_v55  ;;  %v4344_v56 = vrot.slane %v4328_v42, 7  ;;  %v4428_v40 = vrot.slane %v4412_v7, 6  ;;  %v4154_v57 = vand.u32 2147483647, %v13568_v26  ;;  %v16224_v3 = vld [vmem:[#allocation43_spill] sm:$0xff] }
 0x74a   :  { %v13592_v38 = vadd.f32 %v13378_v28, %v13418_v37  ;;  %v4512_v45 = vrot.slane %v4496_v60, 5  ;;  %v16222_v11 = vrot.slane %v13467_v29, 7  ;;  %v16223_v1 = vrot.slane %v13480_v12, 6 }
 0x74b   :  { %v4362_v58 = vsel %vm499_vm1, %v4344_v56, %v15734_v25  ;;  %v4446_v7 = vsel %vm680_vm2, %v4428_v40, %v15737_v21  ;;  %v10253_v36 = vpop.eup %10252  ;;  %v13611_v6 = vadd.f32 %v13355_v4, %v4282_v43  ;;  %v4573_v25 = vsub.f32 0.0, %v13463_v2  ;;  %v16231_v2 = vld [vmem:[#allocation58_spill] sm:$0xff] }
 0x74c   :  { %v4363_v42 = vsel %vm499_vm1, %v16222_v11, %v4344_v56  ;;  %v4447_v60 = vsel %vm680_vm2, %v16223_v1, %v4428_v40  ;;  %v4308_v29 = vadd.f32 %v13355_v4, %v4288_v35  ;;  %v4588_v0 = vmul.f32 1.442695, %v4571_v46  ;;  %v16226_v1 = vld [vmem:[#allocation27_spill] sm:$0xff] }
 0x74d   :  { %v4376_v56 = vmul.f32 %v4363_v42, %v16224_v3  ;;  %v10255_v11 = vpop.eup %10254  ;;  %v4590_v59 = vmul.f32 1.442695, %v4572_v54  ;;  %v4309_v21 = vadd.f32 %v13355_v4, %v4289_v19  ;;  %v4377_v12 = vmul.f32 %v4362_v58, %v16225_v61  ;;  %v16229_v61 = vld [vmem:[#allocation51_spill] sm:$0xff] }
 0x74e   :  { %v10257_v37 = vpop.eup %10256  ;;  %v4460_v40 = vmul.f32 %v4447_v60, %v16226_v1  ;;  %v16227_v43 = vrot.slane %v13572_v18, 5  ;;  %v16228_v35 = vrot.slane %v13499_v30, 5  ;;  %v4170_v54 = vsub.f32 0.0, %v4154_v57 }
 0x74f   :  { %v4392_v34 = vadd.f32 %v4376_v56, %v4308_v29  ;;  %v10259_v46 = vpop.eup %10258  ;;  %v4153_v19 = vand.u32 2147483647, %v13592_v38  ;;  %v4393_v42 = vadd.f32 %v4377_v12, %v4309_v21  ;;  %v4461_v58 = vmul.f32 %v4446_v7, %v16229_v61 }
 0x750   :  { %v4530_v50 = vsel %vm829_vm3, %v4512_v45, %v16227_v43  ;;  %v4531_v3 = vsel %vm829_vm3, %v16228_v35, %v4512_v45  ;;  %v10261_v29 = vpop.eup %10260  ;;  %v4592_v56 = vmul.f32 1.442695, %v4573_v25  ;;  %10264 = vpow2.f32 %v4588_v0 }
 0x751   :  { %v4476_v1 = vadd.f32 %v4460_v40, %v4392_v34  ;;  %v4544_v20 = vmul.f32 %v4531_v3, %v16230_v5  ;;  %v4214_v43 = vadd.f32 1.0, %v10253_v36  ;;  %v4477_v30 = vadd.f32 %v4461_v58, %v4393_v42 }
 0x752   :  { %v4545_v9 = vmul.f32 %v4530_v50, %v16231_v2  ;;  %v4230_v45 = vmul.f32 0.6931472, %v10255_v11  ;;  %v4228_v35 = vmul.f32 0.6931472, %v10257_v37  ;;  %v4213_v57 = vadd.f32 1.0, %v10259_v46  ;;  %v10263_v21 = vpop.eup %10262 }
 0x753   :  { %v13632_v23 = vadd.f32 %v4544_v20, %v4476_v1  ;;  %10266 = vpow2.f32 %v4590_v59  ;;  %v4193_v7 = vmul.f32 1.442695, %v4170_v54  ;;  %v4169_v12 = vsub.f32 0.0, %v4153_v19 }
 0x754   :  { %v13634_v61 = vadd.f32 %v4545_v9, %v4477_v30  ;;  %10268 = vpow2.f32 %v4592_v56  ;;  %v4216_v34 = vadd.f32 1.0, %v10261_v29  ;;  %v4575_v5 = vsub.f32 0.0, %v13550_v14 }
 0x755   :  { %16232 = vst [vmem:[#allocation110_spill] sm:$0xff] %v13632_v23  ;;  %v13639_v0 = vadd.f32 %v13427_v33, %v13378_v28  ;;  %10270 = vlog2.f32 %v4214_v43  ;;  %v13645_v59 = vmul.f32 %v13427_v33, %v13314_v41  ;;  %v16234_v37 = vmax.f32 %v13395_v27, 0.0 }
 0x756   :  { %16233 = vst [vmem:[#allocation114_spill] sm:$0xff] %v13634_v61  ;;  %v16235_v2 = vmax.f32 %v13404_v44, 0.0  ;;  %10272 = vlog2.f32 %v4213_v57  ;;  %v4191_v11 = vmul.f32 1.442695, %v4169_v12  ;;  %v13658_v40 = vmul.f32 %v13427_v33, %v13317_v53 }
 0x757   :  { %v13649_v9 = vadd.f32 %v4230_v45, %v16234_v37  ;;  %10274 = vpow2.f32 %v4193_v7  ;;  %v13662_v3 = vmul.f32 %v13427_v33, %v13320_v62  ;;  %v4215_v27 = vadd.f32 1.0, %v10263_v21 }
 0x758   :  { %v13653_v36 = vadd.f32 %v4228_v35, %v16235_v2  ;;  %10276 = vlog2.f32 %v4216_v34  ;;  %v4596_v46 = vmul.f32 1.442695, %v4575_v5  ;;  %v4156_v44 = vand.u32 2147483647, %v13639_v0 }
 0x759   :  { %v4291_v54 = vmul.f32 %v13427_v33, %v13325_v55  ;;  %v15750_v19 = vrot.slane %v13645_v59, 7  ;;  %v4330_v42 = vmul.f32 %v13314_v41, %v13441_v31  ;;  %v4414_v58 = vmul.f32 %v13317_v53, %v13441_v31 }
 0x75a   :  { %v4574_v29 = vsub.f32 0.0, %v13552_v51  ;;  %v13675_v56 = vadd.f32 %v13378_v28, %v13441_v31  ;;  %v4290_v1 = vmul.f32 %v13325_v55, %v13441_v31  ;;  %v4498_v43 = vmul.f32 %v13320_v62, %v13441_v31  ;;  %v13681_v30 = vpop.eup %10264 }
 0x75b   :  { %16236 = vst [vmem:[#allocation99_spill] sm:$0xff] %v13681_v30  ;;  %10278 = vpow2.f32 %v4191_v11  ;;  %v15751_v45 = vrot.slane %v13658_v40, 6  ;;  %v15756_v35 = vrot.slane %v13662_v3, 5  ;;  %v4346_v57 = vrot.slane %v4330_v42, 7  ;;  %v16238_v42 = vld [vmem:[#allocation56_spill] sm:$0xff] }
 0x75c   :  { %10280 = vpow2.f32 %v4596_v46  ;;  %v4172_v21 = vsub.f32 0.0, %v4156_v44  ;;  %v4430_v7 = vrot.slane %v4414_v58, 6  ;;  %v4514_v12 = vrot.slane %v4498_v43, 5 }
 0x75d   :  { %v10267_v34 = vpop.eup %10266  ;;  %10282 = vlog2.f32 %v4215_v27  ;;  %v4311_v5 = vadd.f32 %v13355_v4, %v4291_v54  ;;  %v4360_v37 = vsel %vm499_vm1, %v4346_v57, %v15750_v19  ;;  %v16237_v2 = vrot.slane %v13556_v52, 7  ;;  %v16239_v27 = vld [vmem:[#allocation57_spill] sm:$0xff] }
 0x75e   :  { %v10269_v25 = vpop.eup %10268  ;;  %v4155_v46 = vand.u32 2147483647, %v13675_v56  ;;  %v4310_v44 = vadd.f32 %v13355_v4, %v4290_v1  ;;  %v4379_v43 = vmul.f32 %v4360_v37, %v16239_v27  ;;  %v4444_v20 = vsel %vm680_vm2, %v4430_v7, %v15751_v45  ;;  %v16242_v45 = vld [vmem:[#allocation33_spill] sm:$0xff] }
 0x75f   :  { %v4361_v11 = vsel %vm499_vm1, %v16237_v2, %v4346_v57  ;;  %v10271_v54 = vpop.eup %10270  ;;  %v16240_v52 = vrot.slane %v13560_v8, 6  ;;  %v4528_v1 = vsel %vm829_vm3, %v4514_v12, %v15756_v35  ;;  %v16241_v2 = vrot.slane %v13572_v18, 5  ;;  %v16244_v18 = vld [vmem:[#allocation64_spill] sm:$0xff] }
 0x760   :  { %v4378_v58 = vmul.f32 %v4361_v11, %v16238_v42  ;;  %v10273_v11 = vpop.eup %10272  ;;  %v4197_v42 = vmul.f32 1.442695, %v4172_v21  ;;  %v4395_v19 = vadd.f32 %v4379_v43, %v4311_v5  ;;  %v4620_v60 = vadd.f32 1.0, %v10267_v34 }
 0x761   :  { %v4445_v57 = vsel %vm680_vm2, %v16240_v52, %v4430_v7  ;;  %v4529_v37 = vsel %vm829_vm3, %v16241_v2, %v4514_v12  ;;  %v10275_v8 = vpop.eup %10274  ;;  %v4621_v33 = vadd.f32 1.0, %v10269_v25  ;;  %v4576_v7 = vsub.f32 0.0, %v13632_v23  ;;  %v16243_v52 = vld [vmem:[#allocation59_spill] sm:$0xff] }
 0x762   :  { %v4394_v27 = vadd.f32 %v4378_v58, %v4310_v44  ;;  %v4462_v50 = vmul.f32 %v4445_v57, %v16242_v45  ;;  %v4463_v31 = vmul.f32 %v4444_v20, %v16243_v52  ;;  %v10277_v30 = vpop.eup %10276  ;;  %v4171_v35 = vsub.f32 0.0, %v4155_v46  ;;  %v16245_v45 = vld [vmem:[#allocation68_spill] sm:$0xff] }
 0x763   :  { %v4546_v51 = vmul.f32 %v4529_v37, %v16244_v18  ;;  %v13720_v12 = vadd.f32 %v13455_v22, %v13378_v28  ;;  %v4234_v21 = vmul.f32 0.6931472, %v10271_v54  ;;  %v4594_v5 = vmul.f32 1.442695, %v4574_v29 }
 0x764   :  { %v4478_v14 = vadd.f32 %v4462_v50, %v4394_v27  ;;  %v4479_v44 = vadd.f32 %v4463_v31, %v4395_v19  ;;  %v4547_v58 = vmul.f32 %v4528_v1, %v16245_v45  ;;  %v4232_v34 = vmul.f32 0.6931472, %v10273_v11 }
 0x765   :  { %v4218_v25 = vadd.f32 1.0, %v10275_v8  ;;  %10284 = vpow2.f32 %v4197_v42  ;;  %v10279_v20 = vpop.eup %10278  ;;  %v4598_v46 = vmul.f32 1.442695, %v4576_v7  ;;  %v4577_v54 = vsub.f32 0.0, %v13634_v61 }
 0x766   :  { %v13723_v43 = vadd.f32 %v4546_v51, %v4478_v14  ;;  %10286 = vrcp.f32 %v4620_v60  ;;  %v13726_v57 = vadd.f32 %v4547_v58, %v4479_v44  ;;  %v10281_v2 = vpop.eup %10280  ;;  %v4195_v29 = vmul.f32 1.442695, %v4171_v35 }
 0x767   :  { %10288 = vrcp.f32 %v4621_v33  ;;  %v4158_v31 = vand.u32 2147483647, %v13720_v12  ;;  %v10283_v19 = vpop.eup %10282  ;;  %v16248_v1 = vmax.f32 %v13473_v49, 0.0  ;;  %v13736_v14 = vmul.f32 %v13455_v22, %v13314_v41 }
 0x768   :  { %16246 = vst [vmem:[#allocation122_spill] sm:$0xff] %v13723_v43  ;;  %16247 = vst [vmem:[#allocation47_spill] sm:$0xff] %v13726_v57  ;;  %10290 = vpow2.f32 %v4594_v5  ;;  %v13740_v51 = vmul.f32 %v13455_v22, %v13317_v53  ;;  %v16250_v33 = vmax.f32 %v13493_v13, 0.0  ;;  %v4217_v11 = vadd.f32 1.0, %v10279_v20 }
 0x769   :  { %v13732_v37 = vadd.f32 %v4234_v21, %v16248_v1  ;;  %10292 = vlog2.f32 %v4218_v25  ;;  %v13747_v49 = vmul.f32 0.6931472, %v10277_v30  ;;  %v4623_v42 = vadd.f32 1.0, %v10281_v2 }
 0x76a   :  { %v13744_v60 = vadd.f32 %v4232_v34, %v16250_v33  ;;  %10294 = vpow2.f32 %v4598_v46  ;;  %v13751_v27 = vmul.f32 %v13455_v22, %v13320_v62  ;;  %v4600_v8 = vmul.f32 1.442695, %v4577_v54 }
 0x76b   :  { %16249 = vst [vmem:[#allocation74_spill] sm:$0xff] %v13732_v37  ;;  %10296 = vpow2.f32 %v4195_v29  ;;  %v4174_v7 = vsub.f32 0.0, %v4158_v31  ;;  %v13755_v13 = vadd.f32 %v13378_v28, %v13457_v48  ;;  %v15759_v52 = vrot.slane %v13736_v14, 7 }
 0x76c   :  { %v15760_v18 = vrot.slane %v13740_v51, 6  ;;  %v4332_v30 = vmul.f32 %v13314_v41, %v13457_v48  ;;  %v4416_v21 = vmul.f32 %v13317_v53, %v13457_v48  ;;  %v4236_v5 = vmul.f32 0.6931472, %v10283_v19 }
 0x76d   :  { %10298 = vlog2.f32 %v4217_v11  ;;  %v4292_v44 = vmul.f32 %v13325_v55, %v13457_v48  ;;  %v4500_v45 = vmul.f32 %v13320_v62, %v13457_v48  ;;  %v4293_v58 = vmul.f32 %v13455_v22, %v13325_v55  ;;  %v16257_v48 = vld [vmem:[#allocation40_spill] sm:$0xff] }
 0x76e   :  { %v15768_v34 = vrot.slane %v13751_v27, 5  ;;  %v4348_v25 = vrot.slane %v4332_v30, 7  ;;  %v4432_v20 = vrot.slane %v4416_v21, 6  ;;  %10300 = vpow2.f32 %v4600_v8 }
 0x76f   :  { %v10285_v46 = vpop.eup %10284  ;;  %v4201_v2 = vmul.f32 1.442695, %v4174_v7  ;;  %v4157_v54 = vand.u32 2147483647, %v13755_v13  ;;  %v4516_v29 = vrot.slane %v4500_v45, 5  ;;  %v16252_v1 = vrot.slane %v13645_v59, 7 }
 0x770   :  { %v13771_v31 = vpop.eup %10286  ;;  %v4358_v19 = vsel %vm499_vm1, %v4348_v25, %v15759_v52  ;;  %v4442_v11 = vsel %vm680_vm2, %v4432_v20, %v15760_v18  ;;  %v16253_v8 = vrot.slane %v13658_v40, 6  ;;  %v4578_v21 = vsub.f32 0.0, %v13723_v43  ;;  %v16255_v59 = vld [vmem:[#allocation65_spill] sm:$0xff] }
 0x771   :  { %16251 = vst [vmem:[#allocation48_spill] sm:$0xff] %v13771_v31  ;;  %v4359_v33 = vsel %vm499_vm1, %v16252_v1, %v4348_v25  ;;  %v13789_v30 = vpop.eup %10288  ;;  %v4312_v45 = vadd.f32 %v13355_v4, %v4292_v44  ;;  %v13796_v25 = vadd.f32 %v13469_v10, %v13378_v28  ;;  %v4220_v52 = vadd.f32 1.0, %v10285_v46  ;;  %v16256_v40 = vld [vmem:[#allocation69_spill] sm:$0xff]  ;;  %v16260_v31 = vld [vmem:[#allocation75_spill] sm:$0xff] }
 0x772   :  { %v4443_v7 = vsel %vm680_vm2, %v16253_v8, %v4432_v20  ;;  %16254 = vst [vmem:[#allocation127_spill] sm:$0xff] %v13789_v30  ;;  %v4380_v35 = vmul.f32 %v4359_v33, %v16255_v59  ;;  %v10291_v1 = vpop.eup %10290  ;;  %v4313_v18 = vadd.f32 %v13355_v4, %v4293_v58  ;;  %v4381_v50 = vmul.f32 %v4358_v19, %v16256_v40  ;;  %v16259_v40 = vld [vmem:[#allocation72_spill] sm:$0xff] }
 0x773   :  { %v4526_v20 = vsel %vm829_vm3, %v4516_v29, %v15768_v34  ;;  %v10293_v8 = vpop.eup %10292  ;;  %v4173_v22 = vsub.f32 0.0, %v4157_v54  ;;  %v4464_v33 = vmul.f32 %v4443_v7, %v16257_v48  ;;  %v16258_v59 = vrot.slane %v13662_v3, 5  ;;  %v16261_v7 = vld [vmem:[#allocation73_spill] sm:$0xff] }
 0x774   :  { %v4396_v44 = vadd.f32 %v4380_v35, %v4312_v45  ;;  %v10295_v46 = vpop.eup %10294  ;;  %v4579_v58 = vsub.f32 0.0, %v13726_v57  ;;  %10302 = vpow2.f32 %v4201_v2  ;;  %v4397_v19 = vadd.f32 %v4381_v50, %v4313_v18 }
 0x775   :  { %v4527_v61 = vsel %vm829_vm3, %v16258_v59, %v4516_v29  ;;  %v4465_v23 = vmul.f32 %v4442_v11, %v16259_v40  ;;  %v10297_v43 = vpop.eup %10296  ;;  %v4602_v30 = vmul.f32 1.442695, %v4578_v21  ;;  %v4160_v35 = vand.u32 2147483647, %v13796_v25  ;;  %v16273_v21 = vld [vmem:[#allocation76_spill] sm:$0xff] }
 0x776   :  { %v4480_v34 = vadd.f32 %v4464_v33, %v4396_v44  ;;  %v4548_v54 = vmul.f32 %v4527_v61, %v16260_v31  ;;  %v4622_v48 = vadd.f32 1.0, %v10291_v1  ;;  %10304 = vrcp.f32 %v4623_v42 }
 0x777   :  { %v4481_v3 = vadd.f32 %v4465_v23, %v4397_v19  ;;  %v4549_v45 = vmul.f32 %v4526_v20, %v16261_v7  ;;  %v10299_v29 = vpop.eup %10298  ;;  %v4242_v59 = vmul.f32 0.6931472, %v10293_v8  ;;  %v4199_v37 = vmul.f32 1.442695, %v4173_v22 }
 0x778   :  { %v13814_v57 = vadd.f32 %v4548_v54, %v4480_v34  ;;  %v4176_v50 = vsub.f32 0.0, %v4160_v35  ;;  %v16262_v18 = vmax.f32 %v13505_v32, 0.0  ;;  %10306 = vlog2.f32 %v4220_v52  ;;  %v10301_v11 = vpop.eup %10300 }
 0x779   :  { %v4219_v61 = vadd.f32 1.0, %v10297_v43  ;;  %v13821_v31 = vadd.f32 %v4549_v45, %v4481_v3  ;;  %v16263_v23 = vmax.f32 %v13524_v63, 0.0  ;;  %10308 = vpow2.f32 %v4602_v30 }
 0x77a   :  { %v13819_v2 = vadd.f32 %v13747_v49, %v16262_v18  ;;  %v4604_v22 = vmul.f32 1.442695, %v4579_v58  ;;  %10310 = vrcp.f32 %v4622_v48  ;;  %v13831_v32 = vmul.f32 %v13469_v10, %v13314_v41 }
 0x77b   :  { %v13825_v42 = vadd.f32 %v4236_v5, %v16263_v23  ;;  %v13835_v43 = vmul.f32 %v13469_v10, %v13317_v53  ;;  %v16264_v49 = vmax.f32 %v13568_v26, 0.0  ;;  %10312 = vpow2.f32 %v4199_v37 }
 0x77c   :  { %v4205_v52 = vmul.f32 1.442695, %v4176_v50  ;;  %v13843_v5 = vadd.f32 %v13378_v28, %v13475_v47  ;;  %v4624_v30 = vadd.f32 1.0, %v10295_v46  ;;  %10314 = vlog2.f32 %v4219_v61 }
 0x77d   :  { %v13839_v63 = vadd.f32 %v4242_v59, %v16264_v49  ;;  %v13848_v20 = vmul.f32 %v13469_v10, %v13320_v62  ;;  %v4240_v8 = vmul.f32 0.6931472, %v10299_v29  ;;  %v13850_v44 = vadd.f32 1.0, %v10301_v11 }
 0x77e   :  { %10316 = vpow2.f32 %v4604_v22  ;;  %v4159_v26 = vand.u32 2147483647, %v13843_v5  ;;  %v10303_v37 = vpop.eup %10302  ;;  %v15772_v33 = vrot.slane %v13831_v32, 7  ;;  %v15771_v58 = vrot.slane %v13835_v43, 6 }
 0x77f   :  { %v4334_v46 = vmul.f32 %v13314_v41, %v13475_v47  ;;  %v4418_v19 = vmul.f32 %v13317_v53, %v13475_v47  ;;  %10318 = vpow2.f32 %v4205_v52  ;;  %v4294_v54 = vmul.f32 %v13325_v55, %v13475_v47 }
 0x780   :  { %v4175_v40 = vsub.f32 0.0, %v4159_v26  ;;  %v4502_v35 = vmul.f32 %v13320_v62, %v13475_v47  ;;  %v13863_v48 = vpop.eup %10304  ;;  %v4295_v3 = vmul.f32 %v13469_v10, %v13325_v55  ;;  %v15773_v7 = vrot.slane %v13848_v20, 5 }
 0x781   :  { %v4350_v45 = vrot.slane %v4334_v46, 7  ;;  %v4434_v29 = vrot.slane %v4418_v19, 6  ;;  %10320 = vrcp.f32 %v4624_v30  ;;  %v4222_v59 = vadd.f32 1.0, %v10303_v37  ;;  %v16267_v46 = vld [vmem:[#allocation78_spill] sm:$0xff] }
 0x782   :  { %v4203_v50 = vmul.f32 1.442695, %v4175_v40  ;;  %v4518_v18 = vrot.slane %v4502_v35, 5  ;;  %v10307_v61 = vpop.eup %10306  ;;  %v16265_v23 = vrot.slane %v13736_v14, 7  ;;  %v16266_v52 = vrot.slane %v13740_v51, 6 }
 0x783   :  { %v4356_v11 = vsel %vm499_vm1, %v4350_v45, %v15772_v33  ;;  %v4440_v49 = vsel %vm680_vm2, %v4434_v29, %v15771_v58  ;;  %v10309_v26 = vpop.eup %10308  ;;  %v4314_v37 = vadd.f32 %v13355_v4, %v4294_v54  ;;  %v13888_v14 = vadd.f32 %v13484_v24, %v13378_v28 }
 0x784   :  { %v4357_v22 = vsel %vm499_vm1, %v16265_v23, %v4350_v45  ;;  %v4441_v30 = vsel %vm680_vm2, %v16266_v52, %v4434_v29  ;;  %10322 = vpow2.f32 %v4203_v50  ;;  %v13890_v40 = vpop.eup %10310  ;;  %v16268_v35 = vmax.f32 %v13592_v38, 0.0  ;;  %v16269_v23 = vld [vmem:[#allocation82_spill] sm:$0xff] }
 0x785   :  { %v4382_v19 = vmul.f32 %v4357_v22, %v16267_v46  ;;  %v4315_v51 = vadd.f32 %v13355_v4, %v4295_v3  ;;  %v4383_v29 = vmul.f32 %v4356_v11, %v16269_v23  ;;  %v4524_v54 = vsel %vm829_vm3, %v4518_v18, %v15773_v7  ;;  %v10313_v50 = vpop.eup %10312  ;;  %v16270_v46 = vld [vmem:[#allocation83_spill] sm:$0xff]  ;;  %v16272_v23 = vld [vmem:[#allocation85_spill] sm:$0xff] }
 0x786   :  { %v13894_v45 = vadd.f32 %v4240_v8, %v16268_v35  ;;  %v4246_v22 = vmul.f32 0.6931472, %v10307_v61  ;;  %v4466_v1 = vmul.f32 %v4441_v30, %v16270_v46  ;;  %v16271_v58 = vrot.slane %v13751_v27, 5  ;;  %v10315_v8 = vpop.eup %10314  ;;  %v16274_v27 = vld [vmem:[#allocation87_spill] sm:$0xff] }
 0x787   :  { %v4398_v52 = vadd.f32 %v4382_v19, %v4314_v37  ;;  %v4626_v35 = vadd.f32 1.0, %v10309_v26  ;;  %v4141_v3 = vmax.f32 %v13755_v13, 0.0  ;;  %v4399_v11 = vadd.f32 %v4383_v29, %v4315_v51 }
 0x788   :  { %v4525_v38 = vsel %vm829_vm3, %v16271_v58, %v4518_v18  ;;  %v4467_v33 = vmul.f32 %v4440_v49, %v16272_v23  ;;  %v10317_v34 = vpop.eup %10316  ;;  %10324 = vlog2.f32 %v4222_v59  ;;  %v4162_v37 = vand.u32 2147483647, %v13888_v14 }
 0x789   :  { %v4482_v7 = vadd.f32 %v4466_v1, %v4398_v52  ;;  %v4550_v61 = vmul.f32 %v4525_v38, %v16273_v21  ;;  %v4221_v30 = vadd.f32 1.0, %v10313_v50  ;;  %v4551_v46 = vmul.f32 %v4524_v54, %v16274_v27  ;;  %v10319_v18 = vpop.eup %10318  ;;  %v16278_v27 = vld [vmem:[#allocation2_spill] sm:$0xff] }
 0x78a   :  { %v4483_v19 = vadd.f32 %v4467_v33, %v4399_v11  ;;  %v13914_v58 = vmul.f32 %v13484_v24, %v13314_v41  ;;  %v16275_v26 = vmax.f32 %v13639_v0, 0.0  ;;  %v4244_v49 = vmul.f32 0.6931472, %v10315_v8 }
 0x78b   :  { %v13920_v59 = vadd.f32 %v4550_v61, %v4482_v7  ;;  %v4178_v1 = vsub.f32 0.0, %v4162_v37  ;;  %v4627_v21 = vadd.f32 1.0, %v10317_v34  ;;  %10326 = vrcp.f32 %v4626_v35  ;;  %v13925_v54 = vpop.eup %10320 }
 0x78c   :  { %v13918_v51 = vadd.f32 %v4246_v22, %v16275_v26  ;;  %v4144_v29 = vmax.f32 %v13796_v25, 0.0  ;;  %v13923_v33 = vadd.f32 %v4551_v46, %v4483_v19  ;;  %v4580_v50 = vsub.f32 0.0, %v13814_v57 }
 0x78d   :  { %v4582_v52 = vsub.f32 0.0, %v13920_v59  ;;  %v4209_v38 = vmul.f32 1.442695, %v4178_v1  ;;  %v4353_v0 = vrot.slane %v13914_v58, 7  ;;  %10328 = vlog2.f32 %v4221_v30 }
 0x78e   :  { %v4224_v22 = vadd.f32 1.0, %v10319_v18  ;;  %v4421_v7 = vmul.f32 %v13484_v24, %v13317_v53  ;;  %v4505_v34 = vmul.f32 %v13484_v24, %v13320_v62  ;;  %v10323_v8 = vpop.eup %10322  ;;  %v16276_v35 = vmax.f32 %v13675_v56, 0.0 }
 0x78f   :  { %v4610_v23 = vmul.f32 1.442695, %v4582_v52  ;;  %10330 = vpow2.f32 %v4209_v38  ;;  %v16277_v61 = vrot.slane %v13341_v16, 7  ;;  %v4223_v30 = vadd.f32 1.0, %v10323_v8  ;;  %v16281_v8 = vld [vmem:[#allocation54_spill] sm:$0xff] }
 0x790   :  { %v13936_v11 = vadd.f32 %v4244_v49, %v16276_v35  ;;  %v4583_v19 = vsub.f32 0.0, %v13923_v33  ;;  %v4437_v58 = vrot.slane %v4421_v7, 6  ;;  %10332 = vrcp.f32 %v4627_v21  ;;  %v16280_v7 = vld [vmem:[#allocation11_spill] sm:$0xff] }
 0x791   :  { %v4369_v37 = vsel %vm499_vm1, %v4353_v0, %v16277_v61  ;;  %v4581_v18 = vsub.f32 0.0, %v13821_v31  ;;  %v4521_v26 = vrot.slane %v4505_v34, 5  ;;  %v13947_v56 = vadd.f32 %v13378_v28, %v13489_v15  ;;  %v16283_v61 = vld [vmem:[#allocation5_spill] sm:$0xff] }
 0x792   :  { %v4370_v46 = vmul.f32 %v4369_v37, %v16278_v27  ;;  %v4606_v49 = vmul.f32 1.442695, %v4580_v50  ;;  %10334 = vlog2.f32 %v4224_v22  ;;  %v16279_v1 = vrot.slane %v13346_v17, 6  ;;  %v10325_v38 = vpop.eup %10324 }
 0x793   :  { %10336 = vpow2.f32 %v4610_v23  ;;  %v4297_v21 = vmul.f32 %v13484_v24, %v13325_v55  ;;  %v16282_v35 = vrot.slane %v16281_v8, 5  ;;  %v4612_v50 = vmul.f32 1.442695, %v4583_v19 }
 0x794   :  { %v4386_v16 = vadd.f32 %v4370_v46, %v13611_v6  ;;  %v4453_v52 = vsel %vm680_vm2, %v4437_v58, %v16279_v1  ;;  %10338 = vlog2.f32 %v4223_v30  ;;  %v4161_v6 = vand.u32 2147483647, %v13947_v56 }
 0x795   :  { %v4454_v34 = vmul.f32 %v4453_v52, %v16280_v7  ;;  %v4537_v28 = vsel %vm829_vm3, %v4521_v26, %v16282_v35  ;;  %v4296_v17 = vmul.f32 %v13325_v55, %v13489_v15  ;;  %v4336_v37 = vmul.f32 %v13314_v41, %v13489_v15  ;;  %v13969_v46 = vpop.eup %10326 }
 0x796   :  { %v4538_v23 = vmul.f32 %v4537_v28, %v16283_v61  ;;  %v4420_v27 = vmul.f32 %v13317_v53, %v13489_v15  ;;  %10340 = vpow2.f32 %v4606_v49  ;;  %v4608_v1 = vmul.f32 1.442695, %v4581_v18 }
 0x797   :  { %v4470_v22 = vadd.f32 %v4454_v34, %v4386_v16  ;;  %v4177_v30 = vsub.f32 0.0, %v4161_v6  ;;  %v4504_v19 = vmul.f32 %v13320_v62, %v13489_v15  ;;  %v4250_v52 = vmul.f32 0.6931472, %v10325_v38  ;;  %v10329_v34 = vpop.eup %10328  ;;  %v16285_v6 = vld [vmem:[#allocation79_spill] sm:$0xff] }
 0x798   :  { %v4317_v55 = vadd.f32 %v13355_v4, %v4297_v21  ;;  %v4352_v7 = vrot.slane %v4336_v37, 7  ;;  %10342 = vpow2.f32 %v4612_v50  ;;  %v4436_v8 = vrot.slane %v4420_v27, 6  ;;  %v13996_v27 = vpop.permute.xlu1 %4666 }
 0x799   :  { %v13974_v16 = vadd.f32 %v4538_v23, %v4470_v22  ;;  %v4207_v41 = vmul.f32 1.442695, %v4177_v30  ;;  %v4520_v35 = vrot.slane %v4504_v19, 5  ;;  %v10331_v53 = vpop.eup %10330  ;;  %v4316_v18 = vadd.f32 %v13355_v4, %v4296_v17  ;;  %v16286_v22 = vld [vmem:[#allocation28_spill] sm:$0xff] }
 0x79a   :  { %v4354_v49 = vsel %vm499_vm1, %v4352_v7, %v4353_v0  ;;  %v16284_v62 = vrot.slane %v13831_v32, 7  ;;  %v4226_v21 = vadd.f32 1.0, %v10331_v53  ;;  %v13986_v23 = vpop.eup %10332  ;;  %v4438_v4 = vsel %vm680_vm2, %v4436_v8, %v4437_v58  ;;  %v16288_v58 = vld [vmem:[#allocation7_spill] sm:$0xff] }
 0x79b   :  { %v4570_v28 = vsub.f32 0.0, %v13974_v16  ;;  %10344 = vpow2.f32 %v4207_v41  ;;  %v4385_v61 = vmul.f32 %v4354_v49, %v16286_v22  ;;  %v16287_v17 = vrot.slane %v13835_v43, 6  ;;  %v16289_v43 = vld [vmem:[#allocation88_spill] sm:$0xff] }
 0x79c   :  { %v4355_v38 = vsel %vm499_vm1, %v16284_v62, %v4352_v7  ;;  %v4522_v0 = vsel %vm829_vm3, %v4520_v35, %v4521_v26  ;;  %v10335_v30 = vpop.eup %10334  ;;  %v4248_v19 = vmul.f32 0.6931472, %v10329_v34  ;;  %10346 = vpow2.f32 %v4608_v1 }
 0x79d   :  { %v4384_v50 = vmul.f32 %v4355_v38, %v16285_v6  ;;  %v4586_v37 = vmul.f32 1.442695, %v4570_v28  ;;  %v4439_v32 = vsel %vm680_vm2, %v16287_v17, %v4436_v8  ;;  %v4401_v41 = vadd.f32 %v4385_v61, %v4317_v55  ;;  %v10337_v53 = vpop.eup %10336 }
 0x79e   :  { %v4143_v28 = vmax.f32 %v13843_v5, 0.0  ;;  %10348 = vlog2.f32 %v4226_v21  ;;  %v4468_v49 = vmul.f32 %v4439_v32, %v16288_v58  ;;  %v4469_v62 = vmul.f32 %v4438_v4, %v16289_v43  ;;  %v10339_v38 = vpop.eup %10338 }
 0x79f   :  { %v4400_v7 = vadd.f32 %v4384_v50, %v4316_v18  ;;  %v16290_v8 = vmax.f32 %v13720_v12, 0.0  ;;  %10350 = vpow2.f32 %v4586_v37  ;;  %v16292_v26 = vrot.slane %v13848_v20, 5  ;;  %v16293_v18 = vld [vmem:[#allocation25_spill] sm:$0xff]  ;;  %v16294_v50 = vld [vmem:[#allocation90_spill] sm:$0xff] }
 0x7a0   :  { %v4669_v55 = vmul.f32 %v13996_v27, %v13653_v36  ;;  %v4485_v34 = vadd.f32 %v4469_v62, %v4401_v41  ;;  %v4553_v22 = vmul.f32 %v4522_v0, %v16294_v50  ;;  %v10341_v61 = vpop.eup %10340  ;;  %v14015_v12 = vadd.f32 %v4248_v19, %v4141_v3 }
 0x7a1   :  { %v14003_v6 = vadd.f32 %v4250_v52, %v16290_v8  ;;  %v4523_v1 = vsel %vm829_vm3, %v16292_v26, %v4520_v35  ;;  %v4484_v5 = vadd.f32 %v4468_v49, %v4400_v7  ;;  %v4670_v20 = vmul.f32 %v13996_v27, %v13649_v9  ;;  %v16295_v52 = vld [vmem:[#allocation74_spill] sm:$0xff] }
 0x7a2   :  { %v4552_v21 = vmul.f32 %v4523_v1, %v16293_v18  ;;  %v4671_v39 = vmul.f32 %v13996_v27, %v13744_v60  ;;  %v4672_v35 = vmul.f32 %v13996_v27, %v16295_v52  ;;  %v4254_v37 = vmul.f32 0.6931472, %v10335_v30  ;;  %v10343_v13 = vpop.eup %10342 }
 0x7a3   :  { %16291 = vst [vmem:[#allocation112_spill] sm:$0xff] %v14003_v6  ;;  %v14025_v17 = vadd.f32 %v4553_v22, %v4485_v34  ;;  %v4673_v32 = vmul.f32 %v13996_v27, %v13825_v42  ;;  %v4252_v3 = vmul.f32 0.6931472, %v10339_v38  ;;  %v4630_v0 = vadd.f32 1.0, %v10337_v53  ;;  %v16297_v22 = vld [vmem:[#allocation111_spill] sm:$0xff] }
 0x7a4   :  { %v14023_v4 = vadd.f32 %v4552_v21, %v4484_v5  ;;  %v9766_v19 = vpack.i.bf16 %v4670_v20, %v4669_v55  ;;  %v4674_v7 = vmul.f32 %v13996_v27, %v13819_v2  ;;  %v9771_v49 = vpack.i.bf16 %v4672_v35, %v4671_v39  ;;  %v16298_v39 = vld [vmem:[#allocation97_spill] sm:$0xff] }
 0x7a5   :  { %v4585_v58 = vsub.f32 0.0, %v14025_v17  ;;  %v4677_v30 = vmul.f32 %v13996_v27, %v13936_v11  ;;  %v10345_v43 = vpop.eup %10344  ;;  %v4675_v38 = vmul.f32 %v13996_v27, %v13894_v45  ;;  %v4676_v53 = vmul.f32 %v13996_v27, %v13839_v63 }
 0x7a6   :  { %v4584_v41 = vsub.f32 0.0, %v14023_v4  ;;  %9767 = vrot.lane.b32.xlu1 %v9766_v19, %s10656_s19  ;;  %v9776_v62 = vpack.i.bf16 %v4674_v7, %v4673_v32  ;;  %v4678_v8 = vmul.f32 %v13996_v27, %v13918_v51  ;;  %10352 = vrcp.f32 %v13850_v44  ;;  %v10347_v55 = vpop.eup %10346  ;;  %v16299_v7 = vld [vmem:[#allocation99_spill] sm:$0xff] }
 0x7a7   :  { %v4225_v26 = vadd.f32 1.0, %v10345_v43  ;;  %v14045_v5 = vadd.f32 %v4254_v37, %v4144_v29  ;;  %v14047_v34 = vadd.f32 %v4252_v3, %v4143_v28  ;;  %v4616_v18 = vmul.f32 1.442695, %v4585_v58  ;;  %v16300_v58 = vld [vmem:[#allocation118_spill] sm:$0xff]  ;;  %v16302_v43 = vld [vmem:[#allocation107_spill] sm:$0xff] }
 0x7a8   :  { %v4614_v1 = vmul.f32 1.442695, %v4584_v41  ;;  %9777 = vrot.lane.b32.xlu0 %v9776_v62, %s10656_s19  ;;  %v9786_v21 = vpack.i.bf16 %v4678_v8, %v4677_v30  ;;  %v10349_v50 = vpop.eup %10348  ;;  %v14052_v20 = vmul.f32 %v13890_v40, %v16297_v22  ;;  %v14056_v44 = vmul.f32 %v13863_v48, %v16298_v39  ;;  %v16303_v62 = vld [vmem:[#allocation127_spill] sm:$0xff] }
 0x7a9   :  { %16296 = vst [vmem:[#allocation116_spill] sm:$0xff] %v14045_v5  ;;  %v4631_v35 = vadd.f32 1.0, %v10343_v13  ;;  %10354 = vlog2.f32 %v4225_v26  ;;  %v10351_v25 = vpop.eup %10350  ;;  %v9781_v29 = vpack.i.bf16 %v4676_v53, %v4675_v38  ;;  %v4679_v28 = vmul.f32 %v13996_v27, %v14015_v12 }
 0x7aa   :  { %10356 = vrcp.f32 %v4630_v0  ;;  %9772 = vrot.lane.b32.xlu1 %v9771_v49, %s10656_s19  ;;  %v4680_v37 = vmul.f32 %v13996_v27, %v14003_v6  ;;  %v4628_v32 = vadd.f32 1.0, %v10341_v61  ;;  %v4629_v40 = vadd.f32 1.0, %v10347_v55  ;;  %v16301_v49 = vld [vmem:[#allocation48_spill] sm:$0xff] }
 0x7ab   :  { %10358 = vpow2.f32 %v4614_v1  ;;  %v4681_v48 = vmul.f32 %v13996_v27, %v14047_v34  ;;  %v4682_v13 = vmul.f32 %v13996_v27, %v14045_v5  ;;  %v4618_v3 = vadd.f32 1.0, %v10351_v25  ;;  %v16304_v1 = vld [vmem:[#allocation122_spill] sm:$0xff] }
 0x7ac   :  { %10360 = vpow2.f32 %v4616_v18  ;;  %9787 = vrot.lane.b32.xlu0 %v9786_v21, %s10656_s19  ;;  %v4258_v0 = vmul.f32 0.6931472, %v10349_v50  ;;  %v9801_v19 = vpack.i.bf16 %v14056_v44, %v14052_v20  ;;  %v9791_v61 = vpack.i.bf16 %v4680_v37, %v4679_v28  ;;  %v16306_v18 = vld [vmem:[#allocation47_spill] sm:$0xff] }
 0x7ad   :  { %10362 = vrcp.f32 %v4631_v35  ;;  %v4619_v41 = vadd.f32 1.0, %v16299_v7  ;;  %v14074_v30 = vmul.f32 %v16301_v49, %v16300_v58  ;;  %v14078_v38 = vmul.f32 %v16303_v62, %v16302_v43 }
 0x7ae   :  { %9782 = vrot.lane.b32.xlu1 %v9781_v29, %s10656_s19  ;;  %10364 = vrcp.f32 %v4628_v32  ;;  %v4146_v53 = vmax.f32 %v13888_v14, 0.0  ;;  %v9806_v8 = vpack.i.bf16 %v4682_v13, %v4681_v48  ;;  %v14084_v55 = vmul.f32 %v13969_v46, %v16304_v1  ;;  %v16310_v13 = vld [vmem:[#allocation110_spill] sm:$0xff] }
 0x7af   :  { %10366 = vrcp.f32 %v4629_v40  ;;  %v14088_v21 = vmul.f32 %v13986_v23, %v16306_v18  ;;  %v4145_v39 = vmax.f32 %v13947_v56, 0.0  ;;  %v9796_v46 = vpack.i.bf16 %v14078_v38, %v14074_v30 }
 0x7b0   :  { %9802 = vrot.lane.b32.xlu0 %v9801_v19, %s10654_s18  ;;  %v10353_v26 = vpop.eup %10352  ;;  %10368 = vrcp.f32 %v4618_v3  ;;  %16305 = vst [vmem:[#allocation117_spill] sm:$0xff] %v14084_v55  ;;  %v14090_v50 = vadd.f32 %v4258_v0, %v4146_v53  ;;  %v14109_v3 = vmul.f32 %v13925_v54, %v16310_v13 }
 0x7b1   :  { %16307 = vst [vmem:[#allocation121_spill] sm:$0xff] %v14088_v21  ;;  %10370 = vrcp.f32 %v4619_v41  ;;  %v9821_v23 = vpack.i.bf16 %v14088_v21, %v14084_v55 }
 0x7b2   :  { %16308 = vst [vmem:[#allocation100_spill] sm:$0xff] %v14090_v50  ;;  %9792 = vrot.lane.b32.xlu1 %v9791_v61, %s10656_s19  ;;  %v4684_v37 = vmul.f32 %v13996_v27, %v14090_v50  ;;  %v16311_v61 = vld [vmem:[#allocation114_spill] sm:$0xff] }
 0x7b3   :  { %v10355_v22 = vpop.eup %10354  ;;  %v14112_v7 = vmul.f32 %v10353_v26, %v16311_v61 }
 0x7b4   :  { %v10357_v14 = vpop.eup %10356  ;;  %v4256_v35 = vmul.f32 0.6931472, %v10355_v22  ;;  %9807 = vrot.lane.b32.xlu0 %v9806_v8, %s10656_s19  ;;  %v16317_v8 = vld [vmem:[#allocation66_spill] sm:$0xff] }
 0x7b5   :  { %v10359_v25 = vpop.eup %10358  ;;  %v14115_v41 = vmul.f32 %v10357_v14, %v13920_v59 }
 0x7b6   :  { %v10361_v29 = vpop.eup %10360  ;;  %v14097_v28 = vadd.f32 %v4256_v35, %v4145_v39  ;;  %9797 = vrot.lane.b32.xlu1 %v9796_v46, %s10654_s18  ;;  %v4632_v56 = vadd.f32 1.0, %v10359_v25 }
 0x7b7   :  { %v10363_v32 = vpop.eup %10362  ;;  %v4633_v0 = vadd.f32 1.0, %v10361_v29  ;;  %16312 = vst [vmem:[#allocation120_spill] sm:$0xff] %v14115_v41 }
 0x7b8   :  { %16309 = vst [vmem:[#allocation101_spill] sm:$0xff] %v14097_v28  ;;  %9822 = vrot.lane.b32.xlu0 %v9821_v23, %s10654_s18  ;;  %v4683_v40 = vmul.f32 %v13996_v27, %v14097_v28  ;;  %v10365_v48 = vpop.eup %10364  ;;  %v14118_v58 = vmul.f32 %v10363_v32, %v13923_v33  ;;  %10372 = vrcp.f32 %v4632_v56  ;;  %v9816_v33 = vpack.i.bf16 %v14112_v7, %v14109_v3 }
 0x7b9   :  { %v10367_v19 = vpop.eup %10366  ;;  %v14124_v27 = vmul.f32 %v10365_v48, %v13814_v57  ;;  %10374 = vrcp.f32 %v4633_v0 }
 0x7ba   :  { %16313 = vst [vmem:[#allocation124_spill] sm:$0xff] %v14118_v58  ;;  %v9811_v49 = vpack.i.bf16 %v4684_v37, %v4683_v40  ;;  %v10369_v43 = vpop.eup %10368  ;;  %v14127_v62 = vmul.f32 %v10367_v19, %v13821_v31  ;;  %v9831_v53 = vpack.i.bf16 %v14118_v58, %v14115_v41 }
 0x7bb   :  { %v10371_v54 = vpop.eup %10370  ;;  %16314 = vst [vmem:[#allocation102_spill] sm:$0xff] %v14124_v27  ;;  %v14130_v59 = vmul.f32 %v10369_v43, %v13974_v16 }
 0x7bc   :  { %9812 = vrot.lane.b32.xlu1 %v9811_v49, %s10656_s19  ;;  %5016 = vrot.lane.b32.xlu0 %v14074_v30, %s10658_s25  ;;  %16315 = vst [vmem:[#allocation106_spill] sm:$0xff] %v14127_v62  ;;  %v14137_v26 = vmul.f32 %v10371_v54, %v16317_v8  ;;  %v9826_v57 = vpack.i.bf16 %v14127_v62, %v14124_v27 }
 0x7bd   :  { %16316 = vst [vmem:[#allocation103_spill] sm:$0xff] %v14130_v59 }
 0x7be   :  { %16318 = vst [vmem:[#allocation109_spill] sm:$0xff] %v14137_v26  ;;  %v9836_v31 = vpack.i.bf16 %v14137_v26, %v14130_v59 }
 0x7c0   :  { %9817 = vrot.lane.b32.xlu1 %v9816_v33, %s10654_s18  ;;  %9832 = vrot.lane.b32.xlu0 %v9831_v53, %s10654_s18 }
 0x7c2   :  { %v10373_v16 = vpop.eup %10372 }
 0x7c3   :  { %v10375_v1 = vpop.eup %10374  ;;  %v14152_v18 = vmul.f32 %v10373_v16, %v14023_v4 }
 0x7c4   :  { %9827 = vrot.lane.b32.xlu1 %v9826_v57, %s10654_s18  ;;  %9837 = vrot.lane.b32.xlu0 %v9836_v31, %s10654_s18  ;;  %v14155_v22 = vmul.f32 %v10375_v1, %v14025_v17 }
 0x7c5   :  { %16319 = vst [vmem:[#allocation22_spill] sm:$0xff] %v14152_v18 }
 0x7c6   :  { %16320 = vst [vmem:[#allocation119_spill] sm:$0xff] %v14155_v22  ;;  %v9841_v14 = vpack.i.bf16 %v14155_v22, %v14152_v18 }
 0x7c8   :  { %5014 = vrot.lane.b32.xlu1 %v14137_v26, %s10658_s25  ;;  %5012 = vrot.lane.b32.xlu0 %v14130_v59, %s10658_s25 }
 0x7cc   :  { %5018 = vrot.lane.b32.xlu1 %v14078_v38, %s10658_s25 }
 0x7d0   :  { %9842 = vrot.lane.b32.xlu1 %v9841_v14, %s10654_s18 }
 0x7d4   :  { %5020 = vrot.lane.b32.xlu1 %v14052_v20, %s10658_s25 }
 0x7d8   :  { %5022 = vrot.lane.b32.xlu1 %v14056_v44, %s10658_s25 }
 0x7dc   :  { %5024 = vrot.lane.b32.xlu1 %v14109_v3, %s10658_s25 }
 0x7e0   :  { %5026 = vrot.lane.b32.xlu1 %v14112_v7, %s10658_s25 }
 0x7e4   :  { %5028 = vrot.lane.b32.xlu1 %v14084_v55, %s10658_s25 }
 0x7e8   :  { %5030 = vrot.lane.b32.xlu1 %v14088_v21, %s10658_s25 }
 0x7ec   :  { %5032 = vrot.lane.b32.xlu1 %v14124_v27, %s10658_s25 }
 0x7f0   :  { %5034 = vrot.lane.b32.xlu1 %v14127_v62, %s10658_s25 }
 0x7f4   :  { %5036 = vrot.lane.b32.xlu1 %v14115_v41, %s10658_s25 }
 0x7f8   :  { %5038 = vrot.lane.b32.xlu1 %v14118_v58, %s10658_s25 }
 0x7fc   :  { %5040 = vrot.lane.b32.xlu1 %v14152_v18, %s10658_s25 }
 0x800   :  { %5042 = vrot.lane.b32.xlu1 %v14155_v22, %s10658_s25 }
 0x804   :  { %5488 = vperm.xlu1 %9846, %v13653_v36  }
 0x808   :  { %5493 = vperm.xlu1 %9846, %v13649_v9  }
 0x80c   :  { %5498 = vperm.xlu1 %9846, %v13744_v60  }
 0x810   :  { %5503 = vperm.xlu1 %9846, %v16295_v52  }
 0x814   :  { %5508 = vperm.xlu1 %9846, %v13825_v42  }
 0x818   :  { %v9768_v4 = vpop.permute.xlu1 %9767  ;;  %5513 = vperm.xlu1 %9846, %v13819_v2  }
 0x819   :  { %v9770_v17 = vunpack.i.h.bf16 %v9768_v4  ;;  %v9769_v39 = vunpack.i.l.bf16 %v9768_v4 }
 0x81a   :  { %v9778_v35 = vpop.permute.xlu0 %9777 }
 0x81b   :  { %4894 = vxpose.xlu0.b32.start [1/16] (narrow) %v9769_v39, 8  ;;  %v9183_v46 = vpack.c.bf16 %v9770_v17, %v9769_v39  ;;  %v9780_v25 = vunpack.i.h.bf16 %v9778_v35  ;;  %v9779_v29 = vunpack.i.l.bf16 %v9778_v35 }
 0x81c   :  { %v9773_v23 = vpop.permute.xlu1 %9772  ;;  %5518 = vperm.xlu1 %9846, %v13894_v45  }
 0x81d   :  { %9184 = vmatprep.subr.bf16.mxu1 %v9183_v46  ;;  %v9775_v37 = vunpack.i.h.bf16 %v9773_v23  ;;  %v9774_v32 = vunpack.i.l.bf16 %v9773_v23  ;;  %v9191_v48 = vpack.c.bf16 %v9780_v25, %v9779_v29 }
 0x81e   :  { %9186 = vmatpush3.bf16.msra.mxu1 %v9183_v46  ;;  %v14193_v56 = vpop.permute.xlu0 %9787 }
 0x81f   :  { %4895 = vxpose.xlu0.b32.cont [2/16] (narrow) %v9770_v17, 8  ;;  %v9187_v40 = vpack.c.bf16 %v9775_v37, %v9774_v32  ;;  %v9790_v49 = vunpack.i.h.bf16 %v14193_v56  ;;  %v9789_v43 = vunpack.i.l.bf16 %v14193_v56  ;;  %v10620_v56 = vld [vmem:[%s15517_s1 + $0x20] sm:$0xff] }
 0x820   :  { %v9783_v13 = vpop.permute.xlu1 %9782  ;;  %5523 = vperm.xlu1 %9846, %v13839_v63  }
 0x821   :  { %9188 = vmatprep.subr.bf16.mxu1 %v9187_v40  ;;  %v9785_v0 = vunpack.i.h.bf16 %v9783_v13  ;;  %v9784_v19 = vunpack.i.l.bf16 %v9783_v13  ;;  %v9199_v31 = vpack.c.bf16 %v9790_v49, %v9789_v43 }
 0x822   :  { %9190 = vmatpush3.bf16.msra.mxu1 %v9187_v40  ;;  %v14196_v61 = vpop.permute.xlu0 %9802 }
 0x823   :  { %4896 = vxpose.xlu0.b32.cont [3/16] (narrow) %v9774_v32, 8  ;;  %9192 = vmatprep.subr.bf16.mxu1 %v9191_v48  ;;  %v9195_v54 = vpack.c.bf16 %v9785_v0, %v9784_v19 }
 0x824   :  { %5528 = vperm.xlu1 %9846, %v13936_v11   ;;  %v14201_v33 = vpop.permute.xlu1 %9792 }
 0x825   :  { %v9795_v8 = vunpack.i.h.bf16 %v14201_v33  ;;  %v9794_v57 = vunpack.i.l.bf16 %v14201_v33 }
 0x826   :  { %9194 = vmatpush3.bf16.msra.mxu1 %v9191_v48  ;;  %v14203_v53 = vpop.permute.xlu0 %9807 }
 0x827   :  { %4897 = vxpose.xlu0.b32.cont [4/16] (narrow) %v9775_v37, 8  ;;  %9196 = vmatprep.subr.bf16.mxu1 %v9195_v54  ;;  %v15774_v14 = vunpack.i.h.bf16 %v14203_v53  ;;  %v15775_v4 = vunpack.i.l.bf16 %v14203_v53  ;;  %v9203_v17 = vpack.c.bf16 %v9795_v8, %v9794_v57  ;;  %v16325_v33 = vunpack.i.l.bf16 %v14203_v53 }
 0x828   :  { %5533 = vperm.xlu1 %9846, %v13918_v51   ;;  %v9798_v16 = vpop.permute.xlu1 %9797 }
 0x829   :  { %v9207_v23 = vpack.c.bf16 %v15774_v14, %v15775_v4 }
 0x82a   :  { %9198 = vmatpush3.bf16.msra.mxu1 %v9195_v54  ;;  %v14210_v1 = vpop.permute.xlu0 %9822 }
 0x82b   :  { %4898 = vxpose.xlu0.b32.cont [5/16] (narrow) %v9779_v29, 8  ;;  %9200 = vmatprep.subr.bf16.mxu1 %v9199_v31 }
 0x82c   :  { %5538 = vperm.xlu1 %9846, %v14015_v12  }
 0x82e   :  { %9202 = vmatpush3.bf16.msra.mxu1 %v9199_v31  ;;  %v14219_v39 = vpop.permute.xlu1 %9812  ;;  %v14221_v35 = vpop.permute.xlu0 %5016  ;;  %v9800_v31 = vunpack.i.h.bf16 %v9798_v16 }
 0x82f   :  { %4899 = vxpose.xlu0.b32.cont [6/16] (narrow) %v9780_v25, 8  ;;  %9204 = vmatprep.subr.bf16.mxu1 %v9203_v17  ;;  %v15776_v46 = vunpack.i.h.bf16 %v14219_v39  ;;  %v9814_v29 = vunpack.i.l.bf16 %v14219_v39 }
 0x830   :  { %5543 = vperm.xlu1 %9846, %v14003_v6  }
 0x831   :  { %v9211_v25 = vpack.c.bf16 %v15776_v46, %v9814_v29  ;;  %v16337_v46 = vmov 96  }
 0x832   :  { %9206 = vmatpush3.bf16.msra.mxu1 %v9203_v17  ;;  %v14230_v37 = vpop.permute.xlu1 %9817  ;;  %v14232_v32 = vpop.permute.xlu0 %9832  ;;  %v9799_v17 = vunpack.i.l.bf16 %v9798_v16 }
 0x833   :  { %4900 = vxpose.xlu0.b32.cont [7/16] (narrow) %v9784_v19, 8  ;;  %9208 = vmatprep.subr.bf16.mxu1 %v9207_v23 }
 0x834   :  { %5548 = vperm.xlu1 %9846, %v14047_v34  }
 0x836   :  { %9210 = vmatpush3.bf16.msra.mxu1 %v9207_v23  ;;  %v14239_v40 = vpop.permute.xlu1 %9827  ;;  %v9838_v48 = vpop.permute.xlu0 %9837  ;;  %v9245_v23 = vpack.c.bf16 %v9800_v31, %v9799_v17 }
 0x837   :  { %4901 = vxpose.xlu0.b32.cont [8/16] (narrow) %v9785_v0, 8  ;;  %9212 = vmatprep.subr.bf16.mxu1 %v9211_v25  ;;  %v9840_v13 = vunpack.i.h.bf16 %v9838_v48  ;;  %v9839_v54 = vunpack.i.l.bf16 %v9838_v48  ;;  %v14251_v0 = vld [vmem:[%s15517_s1 + $0x8] sm:$0xff]  ;;  %v9804_v48 = vunpack.i.l.bf16 %v14196_v61 }
 0x838   :  { %5553 = vperm.xlu1 %9846, %v14045_v5  }
 0x839   :  { %v9239_v19 = vpack.c.bf16 %v9840_v13, %v9839_v54  ;;  %v16323_v13 = vmov 97   ;;  %v10619_v54 = vld [vmem:[%s15517_s1 + $0x18] sm:$0xff] }
 0x83a   :  { %9214 = vmatpush3.bf16.msra.mxu1 %v9211_v25  ;;  %v14242_v14 = vpop.permute.xlu1 %5014  ;;  %v5013_v4 = vpop.permute.xlu0 %5012  ;;  %v9805_v25 = vunpack.i.h.bf16 %v14196_v61  ;;  %v16324_v61 = vld [vmem:[#allocation70_spill] sm:$0xff] }
 0x83b   :  { %4902 = vxpose.xlu0.b32.cont [9/16] (narrow) %v9789_v43, 8  ;;  %9241 = vmatprep.subr.msk.bf16.mxu0 %vm12044_vm4, %v9239_v19  ;;  %v10618_v43 = vld [vmem:[%s15517_s1 + $0x10] sm:$0xff] }
 0x83c   :  { %5558 = vperm.xlu1 %9846, %v14097_v28   ;;  %8654 = vmatprep.mubr.msk.f32.mxu0 %vm56_vm0, %v5013_v4  ;;  %v16322_v4 = vmov 0.0|0.0  }
 0x83d   :  { %8564 = vmatmul.mubr.f32.vlgmr.msra.gmra.mrb[48].mxu1 %v14251_v0  ;;  %9244 = vmatpush3.bf16.xpose.msk.msra.mxu0 %vm12044_vm4, %v9239_v19  ;;  %v10621_v19 = vld [vmem:[%s15517_s1 + $0x28] sm:$0xff] }
 0x83e   :  { %v14256_v16 = vpop.permute.xlu1 %5018  ;;  %9247 = vmatprep.subr.msk.bf16.mxu0 %vm12044_vm4, %v9245_v23  ;;  %8566 = vmatprep.mubr.f32.mxu1 %v10618_v43  ;;  %v9819_v43 = vunpack.i.l.bf16 %v14230_v37 }
 0x83f   :  { %4903 = vxpose.xlu0.b32.cont [10/16] (narrow) %v9790_v49, 8  ;;  %9215 = vmatprep.subr.bf16.mxu1 %v16322_v4  ;;  %v9251_v49 = vpack.c.bf16 %v9805_v25, %v9804_v48  ;;  %v10623_v48 = vld [vmem:[%s15517_s1 + $0x38] sm:$0xff] }
 0x840   :  { %9849 = vset.pattern.permute.xlu1 %v16323_v13 }
 0x841   :  { %5912 = vperm.xlu1 %9849, %v13649_v9   ;;  %8567 = vmatmul.mubr.f32.gmra.mrb[50].mxu1 %v10619_v54 }
 0x842   :  { %v14273_v31 = vpop.permute.xlu1 %9842  ;;  %8569 = vmatprep.mubr.f32.mxu1 %v10620_v56  ;;  %v16326_v56 = vld [vmem:[#allocation61_spill] sm:$0xff] }
 0x843   :  { %4904 = vxpose.xlu0.b32.cont [11/16] (narrow) %v9794_v57, 8  ;;  %9217 = vmatpush3.bf16.xpose.msra.mxu1 %v16324_v61  ;;  %v10622_v57 = vld [vmem:[%s15517_s1 + $0x30] sm:$0xff]  ;;  %v10625_v61 = vld [vmem:[%s15517_s1 + $0x48] sm:$0xff] }
 0x844   :  { %9218 = vmatprep.subr.bf16.mxu1 %v16322_v4 }
 0x845   :  { %5916 = vperm.xlu1 %9849, %v13744_v60   ;;  %9250 = vmatpush3.bf16.xpose.msk.msra.mxu0 %vm12044_vm4, %v9245_v23  ;;  %v9820_v23 = vunpack.i.h.bf16 %v14230_v37 }
 0x846   :  { %v14285_v17 = vpop.permute.xlu1 %5020  ;;  %9253 = vmatprep.subr.msk.bf16.mxu0 %vm12044_vm4, %v9251_v49  ;;  %8570 = vmatmul.mubr.f32.gmra.mrb[52].mxu1 %v10621_v19  ;;  %v16327_v19 = vunpack.i.h.bf16 %v14203_v53  ;;  %v10627_v53 = vld [vmem:[%s15517_s1 + $0x58] sm:$0xff] }
 0x847   :  { %4905 = vxpose.xlu0.b32.cont [12/16] (narrow) %v9795_v8, 8  ;;  %8572 = vmatprep.mubr.f32.mxu1 %v10622_v57  ;;  %v10624_v8 = vld [vmem:[%s15517_s1 + $0x40] sm:$0xff]  ;;  %v9257_v54 = vpack.c.bf16 %v9820_v23, %v9819_v43  ;;  %v10626_v57 = vld [vmem:[%s15517_s1 + $0x50] sm:$0xff]  ;;  %v9824_v23 = vunpack.i.l.bf16 %v14210_v1 }
 0x849   :  { %5920 = vperm.xlu1 %9849, %v16295_v52  }
 0x84a   :  { %v14300_v25 = vpop.permute.xlu1 %5022  ;;  %8573 = vmatmul.mubr.f32.gmra.mrb[54].mxu1 %v10623_v48  ;;  %v10628_v48 = vld [vmem:[%s15517_s1 + $0x60] sm:$0xff] }
 0x84b   :  { %4906 = vxpose.xlu0.b32.cont [13/16] (narrow) %v16325_v33, 8  ;;  %8575 = vmatprep.mubr.f32.mxu1 %v10624_v8  ;;  %v16328_v33 = vld [vmem:[#allocation84_spill] sm:$0xff] }
 0x84c   :  { %9220 = vmatpush3.bf16.xpose.msra.mxu1 %v16326_v56  ;;  %v16329_v56 = vunpack.i.h.bf16 %v14219_v39 }
 0x84d   :  { %5928 = vperm.xlu1 %9849, %v13819_v2   ;;  %9256 = vmatpush3.bf16.xpose.msk.msra.mxu0 %vm12044_vm4, %v9251_v49  ;;  %v9825_v49 = vunpack.i.h.bf16 %v14210_v1 }
 0x84e   :  { %v14314_v37 = vpop.permute.xlu1 %5024  ;;  %9259 = vmatprep.subr.msk.bf16.mxu0 %vm12044_vm4, %v9257_v54  ;;  %8576 = vmatmul.mubr.f32.gmra.mrb[56].mxu1 %v10625_v61  ;;  %v10630_v61 = vld [vmem:[%s15517_s1 + $0x70] sm:$0xff] }
 0x84f   :  { %4907 = vxpose.xlu0.b32.cont [14/16] (narrow) %v16327_v19, 8  ;;  %8578 = vmatprep.mubr.f32.mxu1 %v10626_v57  ;;  %v9263_v1 = vpack.c.bf16 %v9825_v49, %v9824_v23  ;;  %v9829_v19 = vunpack.i.l.bf16 %v14239_v40  ;;  %v10631_v57 = vld [vmem:[%s15517_s1 + $0x78] sm:$0xff]  ;;  %v16330_v49 = vmov 0.0  }
 0x850   :  { %9221 = vmatprep.subr.bf16.mxu1 %v16322_v4 }
 0x851   :  { %5932 = vperm.xlu1 %9849, %v13894_v45  }
 0x852   :  { %v14330_v43 = vpop.permute.xlu1 %5026  ;;  %8579 = vmatmul.mubr.f32.gmra.mrb[58].mxu1 %v10627_v53  ;;  %v16331_v53 = vld [vmem:[#allocation62_spill] sm:$0xff] }
 0x853   :  { %4908 = vxpose.xlu0.b32.cont [15/16] (narrow) %v9814_v29, 8  ;;  %8581 = vmatprep.mubr.f32.mxu1 %v10628_v48  ;;  %v10629_v29 = vld [vmem:[%s15517_s1 + $0x68] sm:$0xff]  ;;  %v9834_v48 = vunpack.i.l.bf16 %v14232_v32 }
 0x854   :  { %9223 = vmatpush3.bf16.xpose.msra.mxu1 %v16328_v33 }
 0x855   :  { %5936 = vperm.xlu1 %9849, %v13839_v63   ;;  %9262 = vmatpush3.bf16.xpose.msk.msra.mxu0 %vm12044_vm4, %v9257_v54  ;;  %v9830_v54 = vunpack.i.h.bf16 %v14239_v40  ;;  %v9835_v40 = vunpack.i.h.bf16 %v14232_v32  ;;  %v9844_v32 = vunpack.i.l.bf16 %v14273_v31 }
 0x856   :  { %v14344_v8 = vpop.permute.xlu1 %5028  ;;  %9265 = vmatprep.subr.msk.bf16.mxu0 %vm12044_vm4, %v9263_v1  ;;  %8582 = vmatmul.mubr.f32.gmra.mrb[60].mxu1 %v10629_v29 }
 0x857   :  { %4909 = vxpose.xlu0.b32.end [16/16] (narrow) %v16329_v56, 8  ;;  %8584 = vmatprep.mubr.f32.mxu1 %v10630_v61  ;;  %v9269_v23 = vpack.c.bf16 %v9830_v54, %v9829_v19  ;;  %v9275_v29 = vpack.c.bf16 %v9835_v40, %v9834_v48  ;;  %v16332_v56 = vld [vmem:[#allocation77_spill] sm:$0xff]  ;;  %v9845_v61 = vunpack.i.h.bf16 %v14273_v31  ;;  %v16333_v19 = vld [vmem:[#allocation86_spill] sm:$0xff] }
 0x858   :  { %9224 = vmatprep.subr.bf16.mxu1 %v16322_v4  ;;  %v16336_v40 = vld [vmem:[#allocation29_spill] sm:$0xff] }
 0x859   :  { %5944 = vperm.xlu1 %9849, %v13918_v51   ;;  %v9281_v54 = vpack.c.bf16 %v9845_v61, %v9844_v32 }
 0x85a   :  { %8585 = vmatmul.mubr.f32.gmra.mrb[62].mxu1 %v10631_v57  ;;  %v14363_v39 = vpop.permute.xlu1 %5030 }
 0x85b   :  { %8619 = vmatprep.mubr.msk.f32.mxu1 %vm10662_vm5, %v16330_v49  ;;  %v16334_v49 = vmov 98  }
 0x85c   :  { %9226 = vmatpush3.bf16.xpose.msra.mxu1 %v16331_v53 }
 0x85d   :  { %5948 = vperm.xlu1 %9849, %v14015_v12   ;;  %9268 = vmatpush3.bf16.xpose.msk.msra.mxu0 %vm12044_vm4, %v9263_v1 }
 0x85e   :  { %9271 = vmatprep.subr.msk.bf16.mxu0 %vm12044_vm4, %v9269_v23  ;;  %9227 = vmatprep.subr.bf16.mxu1 %v16322_v4  ;;  %v5033_v33 = vpop.permute.xlu1 %5032 }
 0x861   :  { %5952 = vperm.xlu1 %9849, %v14003_v6  }
 0x862   :  { %v5035_v1 = vpop.permute.xlu1 %5034 }
 0x864   :  { %9229 = vmatpush3.bf16.xpose.msra.mxu1 %v16332_v56 }
 0x865   :  { %5960 = vperm.xlu1 %9849, %v14045_v5   ;;  %9274 = vmatpush3.bf16.xpose.msk.msra.mxu0 %vm12044_vm4, %v9269_v23  ;;  %v16335_v23 = vld [vmem:[#allocation36_spill] sm:$0xff] }
 0x866   :  { %9277 = vmatprep.subr.msk.bf16.mxu0 %vm12044_vm4, %v9275_v29  ;;  %9230 = vmatprep.subr.bf16.mxu1 %v16322_v4  ;;  %v5037_v57 = vpop.permute.xlu1 %5036 }
 0x869   :  { %5964 = vperm.xlu1 %9849, %v14097_v28  }
 0x86a   :  { %v5039_v31 = vpop.permute.xlu1 %5038 }
 0x86c   :  { %9232 = vmatpush3.bf16.xpose.msra.mxu1 %v16333_v19 }
 0x86d   :  { %5968 = vperm.xlu1 %9849, %v14090_v50   ;;  %9280 = vmatpush3.bf16.xpose.msk.msra.mxu0 %vm12044_vm4, %v9275_v29 }
 0x86e   :  { %9283 = vmatprep.subr.msk.bf16.mxu0 %vm12044_vm4, %v9281_v54  ;;  %9233 = vmatprep.subr.bf16.mxu1 %v16322_v4  ;;  %v5041_v53 = vpop.permute.xlu1 %5040 }
 0x871   :  { %9851 = vset.pattern.permute.xlu1 %v16334_v49 }
 0x872   :  { %6317 = vperm.xlu1 %9851, %v13649_v9   ;;  %v5043_v48 = vpop.permute.xlu1 %5042 }
 0x874   :  { %9235 = vmatpush3.bf16.xpose.msra.mxu1 %v16335_v23 }
 0x875   :  { %9286 = vmatpush3.bf16.xpose.msk.msra.mxu0 %vm12044_vm4, %v9281_v54  ;;  %9236 = vmatprep.subr.bf16.mxu1 %v16322_v4 }
 0x876   :  { %6321 = vperm.xlu1 %9851, %v13744_v60  }
 0x87a   :  { %6325 = vperm.xlu1 %9851, %v16295_v52  }
 0x87c   :  { %8655 = vmatmul.mubr.msk.f32.vlgmr.msra.gmra.mrb[50].mxu0 %vm56_vm0, %v14242_v14  ;;  %9238 = vmatpush3.bf16.xpose.msra.mxu1 %v16336_v40 }
 0x87d   :  { %8657 = vmatprep.mubr.msk.f32.mxu0 %vm56_vm0, %v14221_v35  ;;  %v14424_v35 = vld [vmem:[%s15518_s3] ss:$0 sm:$0xff] }
 0x87e   :  { %6333 = vperm.xlu1 %9851, %v13819_v2  }
 0x880   :  { %9847 = vset.pattern.permute.xlu0 %v16337_v46  ;;  %8658 = vmatmul.mubr.msk.f32.gmra.mrb[52].mxu0 %vm56_vm0, %v14256_v16 }
 0x881   :  { %5563 = vperm.xlu0 %9847, %v14090_v50   ;;  %8660 = vmatprep.mubr.msk.f32.mxu0 %vm56_vm0, %v14285_v17 }
 0x882   :  { %6337 = vperm.xlu1 %9851, %v13894_v45  }
 0x883   :  { %v5489_v14 = vpop.permute.xlu1 %5488 }
 0x884   :  { %8661 = vmatmul.mubr.msk.f32.gmra.mrb[54].mxu0 %vm56_vm0, %v14300_v25  ;;  %v5566_v16 = vmul.f32 %v14424_v35, %v5489_v14 }
 0x885   :  { %9848 = vset.pattern.permute.xlu0 %v16323_v13  ;;  %8663 = vmatprep.mubr.msk.f32.mxu0 %vm56_vm0, %v14314_v37 }
 0x886   :  { %5908 = vperm.xlu0 %9848, %v13653_v36   ;;  %6341 = vperm.xlu1 %9851, %v13839_v63   ;;  %v5582_v13 = vmul.f32 %v5566_v16, %v14130_v59 }
 0x887   :  { %v5494_v4 = vpop.permute.xlu1 %5493 }
 0x888   :  { %v5567_v17 = vmul.f32 %v14424_v35, %v5494_v4  ;;  %8664 = vmatmul.mubr.msk.f32.gmra.mrb[56].mxu0 %vm56_vm0, %v14330_v43  ;;  %v16338_v4 = vmov 0  }
 0x889   :  { %8666 = vmatprep.mubr.msk.f32.mxu0 %vm56_vm0, %v14344_v8 }
 0x88a   :  { %5924 = vperm.xlu0 %9848, %v13825_v42   ;;  %v5583_v25 = vmul.f32 %v5567_v17, %v14137_v26  ;;  %6349 = vperm.xlu1 %9851, %v13918_v51  }
 0x88b   :  { %v5499_v37 = vpop.permute.xlu1 %5498 }
 0x88c   :  { %v9287_v29 = vpack.c.bf16 %v5583_v25, %v5582_v13  ;;  %8667 = vmatmul.mubr.msk.f32.gmra.mrb[58].mxu0 %vm56_vm0, %v14363_v39  ;;  %v5568_v39 = vmul.f32 %v14424_v35, %v5499_v37 }
 0x88d   :  { %8669 = vmatprep.mubr.msk.f32.mxu0 %vm56_vm0, %v5033_v33 }
 0x88e   :  { %5940 = vperm.xlu0 %9848, %v13936_v11   ;;  %6353 = vperm.xlu1 %9851, %v14015_v12   ;;  %v5584_v61 = vmul.f32 %v5568_v39, %v14074_v30 }
 0x88f   :  { %9288 = vmatprep.subr.bf16.mxu1 %v9287_v29  ;;  %v5504_v43 = vpop.permute.xlu1 %5503 }
 0x890   :  { %8670 = vmatmul.mubr.msk.f32.gmra.mrb[60].mxu0 %vm56_vm0, %v5035_v1  ;;  %v5569_v8 = vmul.f32 %v14424_v35, %v5504_v43 }
 0x891   :  { %8672 = vmatprep.mubr.msk.f32.mxu0 %vm56_vm0, %v5037_v57 }
 0x892   :  { %5956 = vperm.xlu0 %9848, %v14047_v34   ;;  %6357 = vperm.xlu1 %9851, %v14003_v6   ;;  %v5585_v33 = vmul.f32 %v5569_v8, %v14078_v38 }
 0x893   :  { %v5509_v56 = vpop.permute.xlu1 %5508 }
 0x894   :  { %8673 = vmatmul.mubr.msk.f32.gmra.mrb[62].mxu0 %vm56_vm0, %v5039_v31  ;;  %v5570_v32 = vmul.f32 %v14424_v35, %v5509_v56  ;;  %v9291_v19 = vpack.c.bf16 %v5585_v33, %v5584_v61 }
 0x895   :  { %8675 = vmatprep.mubr.msk.f32.mxu0 %vm56_vm0, %v5041_v53 }
 0x896   :  { %9850 = vset.pattern.permute.xlu0 %v16334_v49  ;;  %6365 = vperm.xlu1 %9851, %v14045_v5   ;;  %v5586_v23 = vmul.f32 %v5570_v32, %v14052_v20 }
 0x897   :  { %6313 = vperm.xlu0 %9850, %v13653_v36   ;;  %v5514_v1 = vpop.permute.xlu1 %5513 }
 0x898   :  { %v5571_v54 = vmul.f32 %v14424_v35, %v5514_v1  ;;  %8676 = vmatmul.mubr.msk.f32.gmra.mrb[64].mxu0 %vm56_vm0, %v5043_v48 }
 0x89a   :  { %v5587_v57 = vmul.f32 %v5571_v54, %v14056_v44  ;;  %6369 = vperm.xlu1 %9851, %v14097_v28  }
 0x89b   :  { %6329 = vperm.xlu0 %9850, %v13825_v42   ;;  %v4910_v49 = vpop.trf.xlu0  ;;  %v5519_v31 = vpop.permute.xlu1 %5518 }
 0x89c   :  { %8620 = vmatmul.mubr.f32.vlgmr.msra.gmra.mrb[64].mxu1 %v4910_v49  ;;  %v5572_v53 = vmul.f32 %v14424_v35, %v5519_v31  ;;  %v9295_v40 = vpack.c.bf16 %v5587_v57, %v5586_v23 }
 0x89d   :  { %9290 = vmatpush3.bf16.msra.mxu1 %v9287_v29  ;;  %v16339_v29 = vmov 1  }
 0x89e   :  { %9292 = vmatprep.subr.bf16.mxu1 %v9291_v19  ;;  %6373 = vperm.xlu1 %9851, %v14090_v50   ;;  %v5588_v14 = vmul.f32 %v5572_v53, %v14109_v3 }
 0x89f   :  { %6345 = vperm.xlu0 %9850, %v13936_v11   ;;  %v5524_v48 = vpop.permute.xlu1 %5523 }
 0x8a0   :  { %v5573_v46 = vmul.f32 %v14424_v35, %v5524_v48 }
 0x8a1   :  { %9294 = vmatpush3.bf16.msra.mxu1 %v9291_v19 }
 0x8a2   :  { %9296 = vmatprep.subr.bf16.mxu1 %v9295_v40  ;;  %v5589_v16 = vmul.f32 %v5573_v46, %v14112_v7  ;;  %9852 = vset.pattern.permute.xlu1 %v16338_v4 }
 0x8a3   :  { %6361 = vperm.xlu0 %9850, %v14047_v34   ;;  %v5529_v17 = vpop.permute.xlu1 %5528 }
 0x8a4   :  { %v9299_v13 = vpack.c.bf16 %v5589_v16, %v5588_v14  ;;  %v5574_v25 = vmul.f32 %v14424_v35, %v5529_v17 }
 0x8a5   :  { %9298 = vmatpush3.bf16.msra.mxu1 %v9295_v40 }
 0x8a6   :  { %9300 = vmatprep.subr.bf16.mxu1 %v9299_v13  ;;  %v5590_v8 = vmul.f32 %v5574_v25, %v14084_v55 }
 0x8a7   :  { %v5534_v37 = vpop.permute.xlu1 %5533  ;;  %9853 = vset.pattern.permute.xlu0 %v16339_v29 }
 0x8a8   :  { %v5575_v43 = vmul.f32 %v14424_v35, %v5534_v37 }
 0x8a9   :  { %9302 = vmatpush3.bf16.msra.mxu1 %v9299_v13 }
 0x8aa   :  { %v5591_v56 = vmul.f32 %v5575_v43, %v14088_v21 }
 0x8ab   :  { %v5539_v39 = vpop.permute.xlu1 %5538 }
 0x8ac   :  { %v9303_v33 = vpack.c.bf16 %v5591_v56, %v5590_v8  ;;  %v5576_v1 = vmul.f32 %v14424_v35, %v5539_v39  ;;  %v14490_v8 = vld [vmem:[%s15518_s3 + $0x1] ss:$0 sm:$0xff] }
 0x8ae   :  { %9304 = vmatprep.subr.bf16.mxu1 %v9303_v33  ;;  %v5592_v54 = vmul.f32 %v5576_v1, %v14124_v27 }
 0x8af   :  { %v5544_v61 = vpop.permute.xlu1 %5543  ;;  %9306 = vmatpush3.bf16.msra.mxu1 %v9303_v33 }
 0x8b0   :  { %v5577_v32 = vmul.f32 %v14424_v35, %v5544_v61 }
 0x8b2   :  { %v5593_v19 = vmul.f32 %v5577_v32, %v14127_v62 }
 0x8b3   :  { %v5549_v57 = vpop.permute.xlu1 %5548 }
 0x8b4   :  { %v9307_v49 = vpack.c.bf16 %v5593_v19, %v5592_v54  ;;  %v5578_v31 = vmul.f32 %v14424_v35, %v5549_v57 }
 0x8b6   :  { %9308 = vmatprep.subr.bf16.mxu1 %v9307_v49  ;;  %v5594_v40 = vmul.f32 %v5578_v31, %v14115_v41 }
 0x8b7   :  { %v5554_v23 = vpop.permute.xlu1 %5553  ;;  %9310 = vmatpush3.bf16.msra.mxu1 %v9307_v49 }
 0x8b8   :  { %v5579_v53 = vmul.f32 %v14424_v35, %v5554_v23 }
 0x8ba   :  { %v5595_v48 = vmul.f32 %v5579_v53, %v14118_v58  ;;  %v16340_v53 = vmov 2  }
 0x8bb   :  { %v5559_v14 = vpop.permute.xlu1 %5558 }
 0x8bc   :  { %v9311_v46 = vpack.c.bf16 %v5595_v48, %v5594_v40  ;;  %v5580_v16 = vmul.f32 %v14424_v35, %v5559_v14 }
 0x8be   :  { %9312 = vmatprep.subr.bf16.mxu1 %v9311_v46  ;;  %v5596_v37 = vmul.f32 %v5580_v16, %v14152_v18 }
 0x8bf   :  { %9314 = vmatpush3.bf16.msra.mxu1 %v9311_v46 }
 0x8c0   :  { %v5913_v13 = vpop.permute.xlu1 %5912 }
 0x8c1   :  { %v5972_v56 = vmul.f32 %v14490_v8, %v5913_v13  ;;  %v16344_v13 = vmov 99  }
 0x8c4   :  { %v14494_v61 = vpop.permute.xlu1 %5916 }
 0x8c8   :  { %v14501_v19 = vpop.permute.xlu1 %5920 }
 0x8cc   :  { %v14505_v31 = vpop.permute.xlu1 %5928 }
 0x8d0   :  { %v14514_v48 = vpop.permute.xlu1 %5932 }
 0x900   :  { %v5564_v17 = vpop.permute.xlu0 %5563 }
 0x901   :  { %v5581_v25 = vmul.f32 %v14424_v35, %v5564_v17  ;;  %v5988_v35 = vmul.f32 %v5972_v56, %v14137_v26  ;;  %v14526_v17 = vpop.permute.xlu1 %5936 }
 0x903   :  { %v5597_v43 = vmul.f32 %v5581_v25, %v14155_v22 }
 0x905   :  { %v5909_v39 = vpop.permute.xlu0 %5908  ;;  %v9315_v33 = vpack.c.bf16 %v5597_v43, %v5596_v37  ;;  %v14540_v56 = vpop.permute.xlu1 %5944 }
 0x906   :  { %v5971_v1 = vmul.f32 %v14490_v8, %v5909_v39 }
 0x907   :  { %9316 = vmatprep.subr.bf16.mxu1 %v9315_v33 }
 0x908   :  { %v5987_v32 = vmul.f32 %v5971_v1, %v14130_v59  ;;  %9318 = vmatpush3.bf16.msra.mxu1 %v9315_v33 }
 0x90a   :  { %v14498_v54 = vpack.c.bf16 %v5988_v35, %v5987_v32  ;;  %v14554_v35 = vpop.permute.xlu1 %5948 }
 0x90c   :  { %9320 = vmatprep.subr.bf16.mxu1 %v14498_v54 }
 0x910   :  { %v8565_v57 = vpop.f32.mrb[48].mxu1 }
 0x911   :  { %5329 = vperm.xlu1 %9852, %v8565_v57   ;;  %v14503_v49 = vpop.f32.mrb[49].mxu1  ;;  %5764 = vperm.xlu0 %9853, %v8565_v57  }
 0x914   :  { %v14507_v23 = vpop.f32.mrb[50].mxu1 }
 0x915   :  { %9856 = vset.pattern.permute.xlu1 %v16339_v29  ;;  %9854 = vset.pattern.permute.xlu0 %v16340_v53  ;;  %v14511_v40 = vpop.f32.mrb[51].mxu1 }
 0x916   :  { %16341 = vst [vmem:[#allocation115_spill] sm:$0xff] %v14511_v40  ;;  %5760 = vperm.xlu1 %9856, %v14503_v49   ;;  %6169 = vperm.xlu0 %9854, %v8565_v57  }
 0x919   :  { %v14516_v46 = vpop.f32.mrb[52].mxu1 }
 0x91a   :  { %16342 = vst [vmem:[#allocation123_spill] sm:$0xff] %v14516_v46  ;;  %9857 = vset.pattern.permute.xlu1 %v16340_v53  ;;  %9855 = vset.pattern.permute.xlu0 %v16338_v4  ;;  %v14522_v14 = vpop.f32.mrb[53].mxu1 }
 0x91b   :  { %6165 = vperm.xlu1 %9857, %v14503_v49   ;;  %5324 = vperm.xlu0 %9855, %v14503_v49  }
 0x91d   :  { %v14524_v16 = vpop.f32.mrb[54].mxu1 }
 0x91e   :  { %16343 = vst [vmem:[#allocation26_spill] sm:$0xff] %v14524_v16  ;;  %v14530_v25 = vpop.f32.mrb[55].mxu1 }
 0x91f   :  { %9858 = vset.pattern.permute.xlu1 %v16338_v4  ;;  %9874 = vset.pattern.permute.xlu0 %v16344_v13 }
 0x920   :  { %5339 = vperm.xlu1 %9858, %v14507_v23   ;;  %6718 = vperm.xlu0 %9874, %v13653_v36  }
 0x921   :  { %v14534_v37 = vpop.f32.mrb[56].mxu1 }
 0x922   :  { %16345 = vst [vmem:[#allocation126_spill] sm:$0xff] %v14534_v37  ;;  %v14536_v43 = vpop.f32.mrb[57].mxu1 }
 0x924   :  { %9859 = vset.pattern.permute.xlu1 %v16339_v29  ;;  %6734 = vperm.xlu0 %9874, %v13825_v42   ;;  %v16348_v42 = vmov 3  }
 0x925   :  { %5772 = vperm.xlu1 %9859, %v14507_v23   ;;  %v14543_v39 = vpop.f32.mrb[58].mxu1 }
 0x926   :  { %16346 = vst [vmem:[#allocation46_spill] sm:$0xff] %v14543_v39  ;;  %v14545_v33 = vpop.f32.mrb[59].mxu1 }
 0x928   :  { %6750 = vperm.xlu0 %9874, %v13936_v11   ;;  %v14563_v11 = vpop.permute.xlu1 %5952 }
 0x929   :  { %9860 = vset.pattern.permute.xlu1 %v16340_v53  ;;  %v14549_v36 = vpop.f32.mrb[60].mxu1 }
 0x92a   :  { %16347 = vst [vmem:[#allocation37_spill] sm:$0xff] %v14549_v36  ;;  %6177 = vperm.xlu1 %9860, %v14507_v23   ;;  %v14552_v1 = vpop.f32.mrb[61].mxu1 }
 0x92c   :  { %9884 = vset.pattern.permute.xlu0 %v16348_v42  ;;  %v14569_v10 = vpop.permute.xlu1 %5960 }
 0x92d   :  { %6574 = vperm.xlu0 %9884, %v8565_v57   ;;  %v14557_v32 = vpop.f32.mrb[62].mxu1  ;;  %16349 = vst [vmem:[#allocation60_spill] sm:$0xff] %v14569_v10 }
 0x92e   :  { %9861 = vset.pattern.permute.xlu1 %v16338_v4  ;;  %v14560_v24 = vpop.f32.mrb[63].mxu1 }
 0x92f   :  { %5334 = vperm.xlu1 %9861, %v14511_v40  }
 0x930   :  { %v14575_v57 = vpop.permute.xlu1 %5964 }
 0x931   :  { %9885 = vset.pattern.permute.xlu0 %v16338_v4  ;;  %16350 = vst [vmem:[#allocation41_spill] sm:$0xff] %v14575_v57 }
 0x932   :  { %5369 = vperm.xlu0 %9885, %v14534_v37  }
 0x933   :  { %5349 = vperm.xlu1 %9861, %v14516_v46  }
 0x934   :  { %v14581_v50 = vpop.permute.xlu1 %5968 }
 0x935   :  { %16351 = vst [vmem:[#allocation21_spill] sm:$0xff] %v14581_v50 }
 0x936   :  { %5374 = vperm.xlu0 %9885, %v14545_v33  }
 0x937   :  { %5344 = vperm.xlu1 %9861, %v14522_v14  }
 0x938   :  { %v14587_v28 = vpop.permute.xlu1 %6317 }
 0x939   :  { %16352 = vst [vmem:[#allocation125_spill] sm:$0xff] %v14587_v28 }
 0x93a   :  { %5389 = vperm.xlu0 %9885, %v14549_v36  }
 0x93b   :  { %9862 = vset.pattern.permute.xlu1 %v16339_v29 }
 0x93c   :  { %5776 = vperm.xlu1 %9862, %v14522_v14   ;;  %v14592_v26 = vpop.permute.xlu1 %6321 }
 0x93d   :  { %16353 = vst [vmem:[#allocation67_spill] sm:$0xff] %v14592_v26 }
 0x93e   :  { %5394 = vperm.xlu0 %9885, %v14560_v24  }
 0x940   :  { %9863 = vset.pattern.permute.xlu1 %v16340_v53  ;;  %v14607_v5 = vpop.permute.xlu1 %6325 }
 0x941   :  { %6181 = vperm.xlu1 %9863, %v14522_v14   ;;  %16356 = vst [vmem:[#allocation23_spill] sm:$0xff] %v14607_v5 }
 0x942   :  { %9887 = vset.pattern.permute.xlu0 %v16339_v29 }
 0x943   :  { %5768 = vperm.xlu0 %9887, %v14511_v40  }
 0x944   :  { %v14616_v58 = vpop.permute.xlu1 %6333 }
 0x945   :  { %9864 = vset.pattern.permute.xlu1 %v16338_v4  ;;  %16359 = vst [vmem:[#allocation35_spill] sm:$0xff] %v14616_v58 }
 0x946   :  { %5359 = vperm.xlu1 %9864, %v14524_v16  }
 0x947   :  { %5780 = vperm.xlu0 %9887, %v14516_v46  }
 0x94a   :  { %9865 = vset.pattern.permute.xlu1 %v16339_v29 }
 0x94b   :  { %5788 = vperm.xlu1 %9865, %v14524_v16   ;;  %5784 = vperm.xlu0 %9887, %v14530_v25  }
 0x94f   :  { %9866 = vset.pattern.permute.xlu1 %v16338_v4  ;;  %5796 = vperm.xlu0 %9887, %v14534_v37   ;;  %v14596_v59 = vpop.f32.mrb[50].mxu0 }
 0x950   :  { %5354 = vperm.xlu1 %9866, %v14530_v25   ;;  %v14599_v18 = vpop.f32.mrb[51].mxu0 }
 0x953   :  { %5800 = vperm.xlu0 %9887, %v14545_v33   ;;  %v14602_v28 = vpop.f32.mrb[52].mxu0 }
 0x954   :  { %16354 = vst [vmem:[#allocation39_spill] sm:$0xff] %v14602_v28  ;;  %5364 = vperm.xlu1 %9866, %v14536_v43   ;;  %v14605_v22 = vpop.f32.mrb[53].mxu0 }
 0x955   :  { %16355 = vst [vmem:[#allocation31_spill] sm:$0xff] %v14605_v22 }
 0x957   :  { %5812 = vperm.xlu0 %9887, %v14549_v36   ;;  %v14610_v26 = vpop.f32.mrb[54].mxu0 }
 0x958   :  { %16357 = vst [vmem:[#allocation42_spill] sm:$0xff] %v14610_v26  ;;  %9867 = vset.pattern.permute.xlu1 %v16339_v29  ;;  %v14613_v57 = vpop.f32.mrb[55].mxu0 }
 0x959   :  { %16358 = vst [vmem:[#allocation129_spill] sm:$0xff] %v14613_v57  ;;  %5792 = vperm.xlu1 %9867, %v14536_v43   ;;  %v14631_v57 = vpop.permute.xlu1 %6337 }
 0x95a   :  { %16364 = vst [vmem:[#allocation130_spill] sm:$0xff] %v14631_v57 }
 0x95b   :  { %5816 = vperm.xlu0 %9887, %v14560_v24   ;;  %v14619_v28 = vpop.f32.mrb[56].mxu0 }
 0x95c   :  { %16360 = vst [vmem:[#allocation128_spill] sm:$0xff] %v14619_v28  ;;  %v14621_v41 = vpop.f32.mrb[57].mxu0 }
 0x95d   :  { %16361 = vst [vmem:[#allocation30_spill] sm:$0xff] %v14621_v41  ;;  %9868 = vset.pattern.permute.xlu1 %v16338_v4  ;;  %v14640_v41 = vpop.permute.xlu1 %6341 }
 0x95e   :  { %5379 = vperm.xlu1 %9868, %v14543_v39   ;;  %16367 = vst [vmem:[#allocation131_spill] sm:$0xff] %v14640_v41 }
 0x95f   :  { %9888 = vset.pattern.permute.xlu0 %v16340_v53  ;;  %v14626_v5 = vpop.f32.mrb[58].mxu0 }
 0x960   :  { %16362 = vst [vmem:[#allocation34_spill] sm:$0xff] %v14626_v5  ;;  %6173 = vperm.xlu0 %9888, %v14511_v40   ;;  %v14629_v26 = vpop.f32.mrb[59].mxu0  ;;  %v14645_v40 = vpop.permute.xlu0 %5924 }
 0x961   :  { %16363 = vst [vmem:[#allocation55_spill] sm:$0xff] %v14629_v26 }
 0x962   :  { %9869 = vset.pattern.permute.xlu1 %v16339_v29 }
 0x963   :  { %5804 = vperm.xlu1 %9869, %v14543_v39   ;;  %v14635_v58 = vpop.f32.mrb[60].mxu0 }
 0x964   :  { %16365 = vst [vmem:[#allocation80_spill] sm:$0xff] %v14635_v58  ;;  %6185 = vperm.xlu0 %9888, %v14516_v46   ;;  %v14638_v28 = vpop.f32.mrb[61].mxu0  ;;  %v14658_v41 = vpop.permute.xlu0 %5940 }
 0x965   :  { %16366 = vst [vmem:[#allocation81_spill] sm:$0xff] %v14638_v28 }
 0x967   :  { %9870 = vset.pattern.permute.xlu1 %v16338_v4  ;;  %v14643_v5 = vpop.f32.mrb[62].mxu0 }
 0x968   :  { %16368 = vst [vmem:[#allocation12_spill] sm:$0xff] %v14643_v5  ;;  %5384 = vperm.xlu1 %9870, %v14552_v1   ;;  %6189 = vperm.xlu0 %9888, %v14530_v25   ;;  %v14649_v57 = vpop.f32.mrb[63].mxu0  ;;  %v14660_v5 = vpop.permute.xlu1 %6349 }
 0x969   :  { %16369 = vst [vmem:[#allocation3_spill] sm:$0xff] %v14649_v57  ;;  %16372 = vst [vmem:[#allocation6_spill] sm:$0xff] %v14660_v5 }
 0x96b   :  { %v14651_v26 = vpop.f32.mrb[64].mxu0 }
 0x96c   :  { %16370 = vst [vmem:[#allocation4_spill] sm:$0xff] %v14651_v26  ;;  %9871 = vset.pattern.permute.xlu1 %v16339_v29  ;;  %6201 = vperm.xlu0 %9888, %v14534_v37   ;;  %v14655_v58 = vpop.f32.mrb[65].mxu0  ;;  %v14667_v26 = vpop.permute.xlu0 %5956 }
 0x96d   :  { %16371 = vst [vmem:[#allocation9_spill] sm:$0xff] %v14655_v58  ;;  %5808 = vperm.xlu1 %9871, %v14552_v1   ;;  %16373 = vst [vmem:[#allocation8_spill] sm:$0xff] %v14667_v26  ;;  %v14669_v57 = vpop.permute.xlu1 %6353  ;;  %v16375_v58 = vld [vmem:[#allocation105_spill] sm:$0xff] }
 0x96e   :  { %16374 = vst [vmem:[#allocation15_spill] sm:$0xff] %v14669_v57  ;;  %v6974_v37 = vsub.f32 0.0, %v16375_v58 }
 0x96f   :  { %v14662_v28 = vpop.f32.mrb[64].mxu1 }
 0x970   :  { %6205 = vperm.xlu0 %9888, %v14545_v33   ;;  %v8621_v46 = vpop.f32.mrb[65].mxu1  ;;  %v6990_v5 = vmul.f32 1.442695, %v6974_v37 }
 0x971   :  { %9872 = vset.pattern.permute.xlu1 %v16338_v4  ;;  %v16376_v46 = vld [vmem:[#allocation49_spill] sm:$0xff]  ;;  %v14677_v4 = vpop.permute.xlu0 %6313  ;;  %v14679_v6 = vpop.permute.xlu1 %6357 }
 0x972   :  { %5399 = vperm.xlu1 %9872, %v14557_v32   ;;  %v6976_v50 = vsub.f32 0.0, %v16376_v46  ;;  %16377 = vst [vmem:[#allocation10_spill] sm:$0xff] %v14677_v4  ;;  %16378 = vst [vmem:[#allocation13_spill] sm:$0xff] %v14679_v6  ;;  %10376 = vpow2.f32 %v6990_v5  ;;  %v16382_v6 = vld [vmem:[#allocation93_spill] sm:$0xff]  ;;  %v16383_v5 = vld [vmem:[#allocation92_spill] sm:$0xff] }
 0x973   :  { %v6980_v4 = vsub.f32 0.0, %v16382_v6 }
 0x974   :  { %6217 = vperm.xlu0 %9888, %v14549_v36   ;;  %v6994_v57 = vmul.f32 1.442695, %v6976_v50  ;;  %v16379_v36 = vld [vmem:[#allocation104_spill] sm:$0xff] }
 0x975   :  { %v14686_v22 = vpop.permute.xlu0 %6329  ;;  %v14688_v37 = vpop.permute.xlu1 %6365  ;;  %v7002_v50 = vmul.f32 1.442695, %v6980_v4 }
 0x976   :  { %9873 = vset.pattern.permute.xlu1 %v16340_v53  ;;  %16380 = vst [vmem:[#allocation44_spill] sm:$0xff] %v14686_v22  ;;  %16381 = vst [vmem:[#allocation24_spill] sm:$0xff] %v14688_v37  ;;  %10378 = vpow2.f32 %v6994_v57  ;;  %v16384_v22 = vld [vmem:[#allocation108_spill] sm:$0xff] }
 0x977   :  { %6193 = vperm.xlu1 %9873, %v14524_v16   ;;  %v6978_v16 = vsub.f32 0.0, %v16379_v36  ;;  %v6984_v37 = vsub.f32 0.0, %v16384_v22 }
 0x978   :  { %6221 = vperm.xlu0 %9888, %v14560_v24  }
 0x979   :  { %v14698_v10 = vpop.permute.xlu0 %6345  ;;  %v14700_v27 = vpop.permute.xlu1 %6369 }
 0x97a   :  { %16385 = vst [vmem:[#allocation19_spill] sm:$0xff] %v14698_v10  ;;  %16386 = vst [vmem:[#allocation20_spill] sm:$0xff] %v14700_v27  ;;  %v6986_v27 = vsub.f32 0.0, %v13475_v47 }
 0x97b   :  { %9875 = vset.pattern.permute.xlu1 %v16344_v13 }
 0x97c   :  { %6722 = vperm.xlu1 %9875, %v13649_v9   ;;  %9890 = vset.pattern.permute.xlu0 %v16344_v13  ;;  %v6998_v9 = vmul.f32 1.442695, %v6978_v16  ;;  %v10377_v16 = vpop.eup %10376 }
 0x97d   :  { %6766 = vperm.xlu0 %9890, %v14047_v34   ;;  %v6982_v34 = vsub.f32 0.0, %v16383_v5  ;;  %v14706_v26 = vpop.permute.xlu0 %6361  ;;  %v14708_v62 = vpop.permute.xlu1 %6373 }
 0x97e   :  { %10380 = vpow2.f32 %v6998_v9  ;;  %v7022_v9 = vadd.f32 1.0, %v10377_v16  ;;  %16387 = vst [vmem:[#allocation32_spill] sm:$0xff] %v14706_v26  ;;  %16388 = vst [vmem:[#allocation52_spill] sm:$0xff] %v14708_v62  ;;  %v16390_v16 = vld [vmem:[#allocation17_spill] sm:$0xff]  ;;  %v16391_v62 = vld [vmem:[#allocation14_spill] sm:$0xff] }
 0x97f   :  { %v7006_v57 = vmul.f32 1.442695, %v6982_v34  ;;  %10382 = vpow2.f32 %v7002_v50  ;;  %v7014_v50 = vmul.f32 1.442695, %v6986_v27  ;;  %v14726_v26 = vrot.slane %v14662_v28, %v16391_v62 }
 0x980   :  { %9876 = vset.pattern.permute.xlu1 %v16340_v53  ;;  %v10379_v4 = vpop.eup %10378 }
 0x981   :  { %6197 = vperm.xlu1 %9876, %v14536_v43   ;;  %9892 = vset.pattern.permute.xlu0 %v16348_v42  ;;  %10384 = vpow2.f32 %v7006_v57  ;;  %v14720_v57 = vrot.slane %v14662_v28, %v16390_v16 }
 0x982   :  { %6582 = vperm.xlu0 %9892, %v14507_v23   ;;  %v7010_v23 = vmul.f32 1.442695, %v6984_v37 }
 0x984   :  { %10386 = vpow2.f32 %v7010_v23  ;;  %v6988_v23 = vsub.f32 0.0, %v13489_v15 }
 0x985   :  { %9877 = vset.pattern.permute.xlu1 %v16344_v13  ;;  %10388 = vrcp.f32 %v7022_v9 }
 0x986   :  { %6726 = vperm.xlu1 %9877, %v13744_v60   ;;  %6586 = vperm.xlu0 %9892, %v14522_v14   ;;  %v16389_v60 = vld [vmem:[#allocation16_spill] sm:$0xff] }
 0x987   :  { %v14713_v14 = vrot.slane %v14662_v28, %v16389_v60 }
 0x98a   :  { %6730 = vperm.xlu1 %9877, %v16295_v52   ;;  %6594 = vperm.xlu0 %9892, %v14530_v25   ;;  %v7024_v52 = vadd.f32 1.0, %v10379_v4  ;;  %v10381_v25 = vpop.eup %10380 }
 0x98b   :  { %v7026_v9 = vadd.f32 1.0, %v10381_v25  ;;  %v10383_v27 = vpop.eup %10382 }
 0x98c   :  { %10390 = vrcp.f32 %v7024_v52 }
 0x98d   :  { %10392 = vpow2.f32 %v7014_v50 }
 0x98e   :  { %9878 = vset.pattern.permute.xlu1 %v16340_v53  ;;  %6602 = vperm.xlu0 %9892, %v14536_v43   ;;  %10394 = vrcp.f32 %v7026_v9 }
 0x98f   :  { %6209 = vperm.xlu1 %9878, %v14543_v39   ;;  %v7018_v39 = vmul.f32 1.442695, %v6988_v23 }
 0x990   :  { %v5330_v37 = vpop.permute.xlu1 %5329  ;;  %v5765_v34 = vpop.permute.xlu0 %5764 }
 0x991   :  { %v5828_v60 = vsub.f32 %v5765_v34, %v14713_v14  ;;  %v5407_v4 = vsub.f32 %v5330_v37, %v14720_v57 }
 0x992   :  { %6610 = vperm.xlu0 %9892, %v14545_v33   ;;  %v10385_v33 = vpop.eup %10384 }
 0x993   :  { %v5844_v43 = vmin.f32 %v5828_v60, 0.0  ;;  %9879 = vset.pattern.permute.xlu1 %v16344_v13  ;;  %v7028_v60 = vadd.f32 1.0, %v10383_v27  ;;  %v10387_v52 = vpop.eup %10386  ;;  %v5423_v50 = vmin.f32 %v5407_v4, 0.0  ;;  %v7030_v9 = vadd.f32 1.0, %v10385_v33 }
 0x994   :  { %6738 = vperm.xlu1 %9879, %v13819_v2   ;;  %v10389_v2 = vpop.eup %10388 }
 0x995   :  { %v5861_v34 = vmul.f32 1.442695, %v5844_v43  ;;  %v14732_v16 = vpop.permute.xlu1 %5760  ;;  %v6170_v10 = vpop.permute.xlu0 %6169  ;;  %v7054_v27 = vmul.f32 %v10389_v2, %v16375_v58 }
 0x996   :  { %v6233_v62 = vsub.f32 %v6170_v10, %v14726_v26  ;;  %6618 = vperm.xlu0 %9892, %v14552_v1  }
 0x997   :  { %10396 = vpow2.f32 %v5861_v34  ;;  %v7032_v34 = vadd.f32 1.0, %v10387_v52 }
 0x998   :  { %v6249_v25 = vmin.f32 %v6233_v62, 0.0  ;;  %9880 = vset.pattern.permute.xlu1 %v16339_v29  ;;  %10398 = vpow2.f32 %v7018_v39  ;;  %v10391_v62 = vpop.eup %10390  ;;  %v5440_v29 = vmul.f32 1.442695, %v5423_v50 }
 0x999   :  { %5820 = vperm.xlu1 %9880, %v14557_v32   ;;  %10400 = vrcp.f32 %v7028_v60  ;;  %v10393_v39 = vpop.eup %10392  ;;  %v7056_v58 = vmul.f32 %v10391_v62, %v16376_v46  ;;  %v14752_v60 = vmul.f32 %v14251_v0, %v14596_v59 }
 0x99a   :  { %v6266_v37 = vmul.f32 1.442695, %v6249_v25  ;;  %v14738_v43 = vpop.permute.xlu1 %6165  ;;  %6626 = vperm.xlu0 %9892, %v14560_v24   ;;  %v5325_v10 = vpop.permute.xlu0 %5324  ;;  %v7034_v52 = vadd.f32 1.0, %v10393_v39 }
 0x99b   :  { %16392 = vst [vmem:[#allocation38_spill] sm:$0xff] %v14738_v43  ;;  %v5406_v23 = vsub.f32 %v5325_v10, %v14720_v57  ;;  %v10395_v33 = vpop.eup %10394 }
 0x99c   :  { %10402 = vpow2.f32 %v6266_v37  ;;  %v7058_v59 = vmul.f32 %v10395_v33, %v16379_v36  ;;  %v5975_v33 = vmul.f32 %v14490_v8, %v14645_v40 }
 0x99d   :  { %v5422_v4 = vmin.f32 %v5406_v23, 0.0  ;;  %9881 = vset.pattern.permute.xlu1 %v16340_v53  ;;  %10404 = vrcp.f32 %v7030_v9  ;;  %v5974_v9 = vmul.f32 %v14490_v8, %v14501_v19 }
 0x99e   :  { %6213 = vperm.xlu1 %9881, %v14552_v1   ;;  %7086 = vrot.lane.b32.xlu0 %v7054_v27, %s10666_s26  ;;  %10406 = vrcp.f32 %v7032_v34 }
 0x99f   :  { %v5438_v24 = vmul.f32 1.442695, %v5422_v4  ;;  %v5340_v25 = vpop.permute.xlu1 %5339  ;;  %v14746_v43 = vpop.permute.xlu0 %6718  ;;  %9895 = vset.pattern.permute.xlu0 %v16344_v13  ;;  %10408 = vpow2.f32 %v5440_v29  ;;  %v16397_v29 = vld [vmem:[#allocation18_spill] sm:$0xff] }
 0x9a0   :  { %16393 = vst [vmem:[#allocation43_spill] sm:$0xff] %v14746_v43  ;;  %v5409_v27 = vsub.f32 %v5340_v25, %v14720_v57  ;;  %v14778_v4 = vrot.slane %v14662_v28, %v16397_v29 }
 0x9a1   :  { %v10397_v1 = vpop.eup %10396  ;;  %10410 = vpow2.f32 %v5438_v24  ;;  %v5973_v24 = vmul.f32 %v14490_v8, %v14494_v61 }
 0x9a2   :  { %9882 = vset.pattern.permute.xlu1 %v16344_v13  ;;  %7090 = vrot.lane.b32.xlu0 %v7056_v58, %s10666_s26  ;;  %v14760_v46 = vmul.f32 %v10397_v1, %v14752_v60  ;;  %v10399_v50 = vpop.eup %10398  ;;  %10412 = vrcp.f32 %v7034_v52  ;;  %v5990_v58 = vmul.f32 %v5974_v9, %v14078_v38  ;;  %v5425_v61 = vmin.f32 %v5409_v27, 0.0 }
 0x9a3   :  { %6742 = vperm.xlu1 %9882, %v13894_v45   ;;  %v14757_v2 = vpop.permute.xlu0 %6734  ;;  %v10401_v0 = vpop.eup %10400  ;;  %v7036_v45 = vadd.f32 1.0, %v10399_v50  ;;  %v5978_v27 = vmul.f32 %v14490_v8, %v14526_v17 }
 0x9a4   :  { %16394 = vst [vmem:[#allocation50_spill] sm:$0xff] %v14757_v2  ;;  %v14762_v37 = vpop.permute.xlu1 %5772  ;;  %v7060_v34 = vmul.f32 %v10401_v0, %v16382_v6  ;;  %v10634_v6 = vld [vmem:[%s15517_s1] sm:$0xff] }
 0x9a5   :  { %v14789_v25 = vmul.f32 %v10634_v6, %v14599_v18  ;;  %10414 = vrcp.f32 %v7036_v45  ;;  %v5989_v18 = vmul.f32 %v5973_v24, %v14074_v30 }
 0x9a6   :  { %7094 = vrot.lane.b32.xlu0 %v7058_v59, %s10666_s26  ;;  %v10403_v10 = vpop.eup %10402 }
 0x9a7   :  { %6746 = vperm.xlu1 %9882, %v13839_v63   ;;  %v14767_v23 = vpop.permute.xlu0 %6750  ;;  %v14774_v62 = vmul.f32 %v10403_v10, %v14752_v60  ;;  %v10405_v36 = vpop.eup %10404 }
 0x9a8   :  { %16395 = vst [vmem:[#allocation27_spill] sm:$0xff] %v14767_v23  ;;  %v10407_v63 = vpop.eup %10406  ;;  %v7062_v52 = vmul.f32 %v10405_v36, %v16383_v5  ;;  %v9323_v36 = vpack.c.bf16 %v5990_v58, %v5989_v18  ;;  %v5994_v58 = vmul.f32 %v5978_v27, %v14112_v7 }
 0x9a9   :  { %16396 = vst [vmem:[#allocation51_spill] sm:$0xff] %v14774_v62  ;;  %v14780_v39 = vpop.permute.xlu1 %6177  ;;  %v10409_v19 = vpop.eup %10408  ;;  %v7064_v5 = vmul.f32 %v10407_v63, %v16384_v22  ;;  %v5977_v22 = vmul.f32 %v14490_v8, %v14514_v48  ;;  %v16423_v62 = vld [vmem:[#allocation109_spill] sm:$0xff] }
 0x9aa   :  { %16398 = vst [vmem:[#allocation53_spill] sm:$0xff] %v14780_v39  ;;  %7098 = vrot.lane.b32.xlu0 %v7060_v34, %s10666_s26  ;;  %v5471_v10 = vmul.f32 %v10409_v19, %v14752_v60  ;;  %v5991_v34 = vmul.f32 %v5975_v33, %v14052_v20 }
 0x9ab   :  { %6754 = vperm.xlu1 %9882, %v13918_v51   ;;  %v10411_v28 = vpop.eup %10410  ;;  %v5976_v51 = vmul.f32 %v14490_v8, %v14505_v31  ;;  %v5444_v31 = vmul.f32 1.442695, %v5425_v61 }
 0x9ac   :  { %v6575_v1 = vpop.permute.xlu0 %6574  ;;  %v5470_v59 = vmul.f32 %v10411_v28, %v14789_v25  ;;  %v10413_v9 = vpop.eup %10412 }
 0x9ad   :  { %v6638_v50 = vsub.f32 %v6575_v1, %v14778_v4  ;;  %v5992_v6 = vmul.f32 %v5976_v51, %v14056_v44  ;;  %v7066_v28 = vmul.f32 %v10413_v9, %v13475_v47  ;;  %v5980_v47 = vmul.f32 %v14490_v8, %v14540_v56 }
 0x9ae   :  { %v5335_v0 = vpop.permute.xlu1 %5334  ;;  %7102 = vrot.lane.b32.xlu0 %v7062_v52, %s10666_s26  ;;  %8710 = vmatprep.mubr.f32.mxu1 %v5470_v59  ;;  %v5993_v52 = vmul.f32 %v5977_v22, %v14109_v3 }
 0x9af   :  { %v6654_v45 = vmin.f32 %v6638_v50, 0.0  ;;  %v5408_v40 = vsub.f32 %v5335_v0, %v14720_v57  ;;  %9883 = vset.pattern.permute.xlu1 %v16348_v42  ;;  %8711 = vmatmul.mubr.f32.vlgmr.msra.gmra.mrb[66].mxu1 %v5471_v10  ;;  %v9327_v33 = vpack.c.bf16 %v5992_v6, %v5991_v34  ;;  %v10415_v48 = vpop.eup %10414  ;;  %v5981_v0 = vmul.f32 %v14490_v8, %v14554_v35  ;;  %v16400_v35 = vld [vmem:[#allocation8_spill] sm:$0xff] }
 0x9b0   :  { %6570 = vperm.xlu1 %9883, %v14503_v49   ;;  %9322 = vmatpush3.bf16.msra.mxu1 %v14498_v54  ;;  %v5979_v54 = vmul.f32 %v14490_v8, %v14658_v41  ;;  %v5982_v41 = vmul.f32 %v14490_v8, %v14563_v11  ;;  %v9331_v51 = vpack.c.bf16 %v5994_v58, %v5993_v52  ;;  %v16399_v11 = vld [vmem:[#allocation106_spill] sm:$0xff]  ;;  %v16402_v6 = vld [vmem:[#allocation60_spill] sm:$0xff] }
 0x9b1   :  { %v6671_v29 = vmul.f32 1.442695, %v6654_v45  ;;  %v5424_v24 = vmin.f32 %v5408_v40, 0.0  ;;  %v14811_v19 = vpop.permute.xlu0 %5369  ;;  %9324 = vmatprep.subr.bf16.mxu1 %v9323_v36  ;;  %v7068_v45 = vmul.f32 %v10415_v48, %v13489_v15  ;;  %v5996_v40 = vmul.f32 %v5980_v47, %v14088_v21  ;;  %v16406_v48 = vld [vmem:[#allocation21_spill] sm:$0xff]  ;;  %v16407_v52 = vld [vmem:[#allocation120_spill] sm:$0xff] }
 0x9b2   :  { %v5350_v17 = vpop.permute.xlu1 %5349  ;;  %7106 = vrot.lane.b32.xlu0 %v7064_v5, %s10666_s26  ;;  %v5995_v59 = vmul.f32 %v5979_v54, %v14084_v55  ;;  %v5998_v5 = vmul.f32 %v5982_v41, %v16399_v11  ;;  %v5983_v34 = vmul.f32 %v14490_v8, %v16400_v35  ;;  %v5984_v22 = vmul.f32 %v14490_v8, %v16402_v6  ;;  %v16408_v41 = vld [vmem:[#allocation39_spill] sm:$0xff] }
 0x9b3   :  { %10416 = vpow2.f32 %v6671_v29  ;;  %v5442_v63 = vmul.f32 1.442695, %v5424_v24  ;;  %v5411_v49 = vsub.f32 %v5350_v17, %v14720_v57  ;;  %v16401_v29 = vld [vmem:[#allocation102_spill] sm:$0xff]  ;;  %v10635_v17 = vld [vmem:[%s15517_s1 + $0x10] sm:$0xff] }
 0x9b4   :  { %10418 = vpow2.f32 %v5444_v31  ;;  %9886 = vset.pattern.permute.xlu1 %v16340_v53  ;;  %9326 = vmatpush3.bf16.msra.mxu1 %v9323_v36  ;;  %v9335_v31 = vpack.c.bf16 %v5996_v40, %v5995_v59  ;;  %v5997_v15 = vmul.f32 %v5981_v0, %v16401_v29  ;;  %v5999_v47 = vmul.f32 %v5983_v34, %v16407_v52  ;;  %v16411_v0 = vld [vmem:[#allocation41_spill] sm:$0xff]  ;;  %v14886_v34 = vld [vmem:[%s15518_s3 + $0x2] ss:$0 sm:$0xff] }
 0x9b5   :  { %10420 = vpow2.f32 %v5442_v63  ;;  %v5427_v61 = vmin.f32 %v5411_v49, 0.0  ;;  %6225 = vperm.xlu1 %9886, %v14557_v32   ;;  %v14824_v1 = vpop.permute.xlu0 %5374  ;;  %9328 = vmatprep.subr.bf16.mxu1 %v9327_v33  ;;  %v16403_v63 = vld [vmem:[#allocation31_spill] sm:$0xff] }
 0x9b6   :  { %v5345_v50 = vpop.permute.xlu1 %5344  ;;  %7110 = vrot.lane.b32.xlu0 %v7066_v28, %s10666_s26  ;;  %v14857_v49 = vmul.f32 %v10635_v17, %v16403_v63  ;;  %v16404_v28 = vld [vmem:[#allocation112_spill] sm:$0xff]  ;;  %v16416_v63 = vld [vmem:[#allocation22_spill] sm:$0xff] }
 0x9b7   :  { %v5410_v53 = vsub.f32 %v5345_v50, %v14720_v57  ;;  %v5448_v18 = vmul.f32 1.442695, %v5427_v61  ;;  %v5986_v61 = vmul.f32 %v14490_v8, %v16406_v48  ;;  %v10636_v50 = vld [vmem:[%s15517_s1 + $0x18] sm:$0xff]  ;;  %v10638_v48 = vld [vmem:[%s15517_s1 + $0x20] sm:$0xff] }
 0x9b8   :  { %9330 = vmatpush3.bf16.msra.mxu1 %v9327_v33  ;;  %v9339_v33 = vpack.c.bf16 %v5998_v5, %v5997_v15  ;;  %v16415_v15 = vld [vmem:[#allocation89_spill] sm:$0xff] }
 0x9b9   :  { %v5426_v10 = vmin.f32 %v5410_v53, 0.0  ;;  %9889 = vset.pattern.permute.xlu1 %v16344_v13  ;;  %v14837_v56 = vpop.permute.xlu0 %5389  ;;  %9332 = vmatprep.subr.bf16.mxu1 %v9331_v51  ;;  %10422 = vpow2.f32 %v5448_v18  ;;  %v14870_v53 = vmul.f32 %v10636_v50, %v16408_v41  ;;  %v6975_v6 = vsub.f32 0.0, %v16415_v15  ;;  %v10639_v41 = vld [vmem:[%s15517_s1 + $0x28] sm:$0xff] }
 0x9ba   :  { %6758 = vperm.xlu1 %9889, %v14015_v12   ;;  %7114 = vrot.lane.b32.xlu0 %v7068_v45, %s10666_s26  ;;  %v16412_v45 = vld [vmem:[#allocation116_spill] sm:$0xff] }
 0x9bb   :  { %v5446_v9 = vmul.f32 1.442695, %v5426_v10  ;;  %v14844_v27 = vpop.permute.xlu1 %5776  ;;  %v5985_v10 = vmul.f32 %v14490_v8, %v16411_v0  ;;  %v16420_v0 = vld [vmem:[#allocation115_spill] sm:$0xff] }
 0x9bc   :  { %9334 = vmatpush3.bf16.msra.mxu1 %v9331_v51 }
 0x9bd   :  { %v10417_v36 = vpop.eup %10416  ;;  %10424 = vpow2.f32 %v5446_v9  ;;  %v14849_v24 = vpop.permute.xlu0 %5394  ;;  %9336 = vmatprep.subr.bf16.mxu1 %v9335_v31  ;;  %v16413_v9 = vld [vmem:[#allocation119_spill] sm:$0xff] }
 0x9be   :  { %v10419_v12 = vpop.eup %10418  ;;  %6762 = vperm.xlu1 %9889, %v16404_v28   ;;  %v14861_v58 = vmul.f32 %v10417_v36, %v14752_v60  ;;  %v16410_v60 = vld [vmem:[#allocation124_spill] sm:$0xff]  ;;  %v6002_v35 = vmul.f32 %v5986_v61, %v16413_v9  ;;  %v16417_v28 = vld [vmem:[#allocation125_spill] sm:$0xff] }
 0x9bf   :  { %v10421_v54 = vpop.eup %10420  ;;  %v6000_v51 = vmul.f32 %v5984_v22, %v16410_v60  ;;  %v5473_v5 = vmul.f32 %v10419_v12, %v14870_v53  ;;  %v6001_v12 = vmul.f32 %v5985_v10, %v16416_v63  ;;  %v16418_v61 = vld [vmem:[#allocation129_spill] sm:$0xff]  ;;  %v16421_v10 = vld [vmem:[#allocation91_spill] sm:$0xff] }
 0x9c0   :  { %16405 = vst [vmem:[#allocation58_spill] sm:$0xff] %v14861_v58  ;;  %v14872_v59 = vpop.permute.xlu1 %6181  ;;  %v5472_v18 = vmul.f32 %v10421_v54, %v14857_v49  ;;  %9338 = vmatpush3.bf16.msra.mxu1 %v9335_v31  ;;  %v16414_v31 = vld [vmem:[#allocation10_spill] sm:$0xff]  ;;  %v6377_v54 = vmul.f32 %v14886_v34, %v16417_v28  ;;  %v14898_v50 = vmul.f32 %v10638_v48, %v16418_v61  ;;  %v6992_v61 = vmul.f32 1.442695, %v6975_v6 }
 0x9c1   :  { %16409 = vst [vmem:[#allocation56_spill] sm:$0xff] %v14872_v59  ;;  %9340 = vmatprep.subr.bf16.mxu1 %v9339_v33  ;;  %v6376_v36 = vmul.f32 %v14886_v34, %v16414_v31  ;;  %v9343_v8 = vpack.c.bf16 %v6000_v51, %v5999_v47  ;;  %v9347_v28 = vpack.c.bf16 %v6002_v35, %v6001_v12  ;;  %v16425_v6 = vld [vmem:[#allocation94_spill] sm:$0xff] }
 0x9c2   :  { %6770 = vperm.xlu1 %9889, %v16412_v45   ;;  %v14879_v40 = vpop.permute.xlu0 %5768  ;;  %8713 = vmatprep.mubr.f32.mxu1 %v5472_v18  ;;  %v16419_v18 = vld [vmem:[#allocation42_spill] sm:$0xff]  ;;  %v6977_v45 = vsub.f32 0.0, %v16421_v10  ;;  %v6393_v2 = vmul.f32 %v6377_v54, %v16423_v62  ;;  %10426 = vpow2.f32 %v6992_v61  ;;  %v5416_v54 = vsub.f32 %v14824_v1, %v14720_v57  ;;  %v16428_v61 = vld [vmem:[#allocation100_spill] sm:$0xff] }
 0x9c3   :  { %8714 = vmatmul.mubr.f32.gmra.mrb[68].mxu1 %v5473_v5  ;;  %v10423_v17 = vpop.eup %10422  ;;  %v14907_v51 = vmul.f32 %v10639_v41, %v16419_v18  ;;  %v16422_v5 = vld [vmem:[#allocation103_spill] sm:$0xff] }
 0x9c4   :  { %9342 = vmatpush3.bf16.msra.mxu1 %v9339_v33  ;;  %v6392_v31 = vmul.f32 %v6376_v36, %v16422_v5  ;;  %v6996_v35 = vmul.f32 1.442695, %v6977_v45  ;;  %v16427_v45 = vld [vmem:[#allocation63_spill] sm:$0xff]  ;;  %v5432_v1 = vmin.f32 %v5416_v54, 0.0 }
 0x9c5   :  { %v5360_v22 = vpop.permute.xlu1 %5359  ;;  %9344 = vmatprep.subr.bf16.mxu1 %v9343_v8  ;;  %v5475_v23 = vmul.f32 %v10423_v17, %v14907_v51  ;;  %v16426_v17 = vld [vmem:[#allocation101_spill] sm:$0xff] }
 0x9c6   :  { %9891 = vset.pattern.permute.xlu1 %v16348_v42  ;;  %v14901_v47 = vpop.permute.xlu0 %5780  ;;  %v5413_v58 = vsub.f32 %v5360_v22, %v14720_v57  ;;  %v6981_v22 = vsub.f32 0.0, %v16425_v6  ;;  %v14925_v12 = vpack.c.bf16 %v6393_v2, %v6392_v31  ;;  %10428 = vpow2.f32 %v6996_v35 }
 0x9c7   :  { %v10425_v33 = vpop.eup %10424  ;;  %6578 = vperm.xlu1 %9891, %v16420_v0   ;;  %v16424_v0 = vld [vmem:[#allocation113_spill] sm:$0xff] }
 0x9c8   :  { %v5474_v48 = vmul.f32 %v10425_v33, %v14898_v50  ;;  %9346 = vmatpush3.bf16.msra.mxu1 %v9343_v8  ;;  %v6979_v43 = vsub.f32 0.0, %v16424_v0  ;;  %v5415_v8 = vsub.f32 %v14811_v19, %v14720_v57  ;;  %v5429_v33 = vmin.f32 %v5413_v58, 0.0 }
 0x9c9   :  { %9348 = vmatprep.subr.bf16.mxu1 %v9347_v28 }
 0x9ca   :  { %v14916_v41 = vpop.permute.xlu1 %5788  ;;  %8716 = vmatprep.mubr.f32.mxu1 %v5474_v48  ;;  %v5785_v18 = vpop.permute.xlu0 %5784  ;;  %v5431_v2 = vmin.f32 %v5415_v8, 0.0  ;;  %v5452_v58 = vmul.f32 1.442695, %v5429_v33  ;;  %v16429_v8 = vld [vmem:[#allocation123_spill] sm:$0xff] }
 0x9cb   :  { %v5833_v36 = vsub.f32 %v5785_v18, %v14713_v14  ;;  %9893 = vset.pattern.permute.xlu1 %v16344_v13  ;;  %8717 = vmatmul.mubr.f32.gmra.mrb[70].mxu1 %v5475_v23  ;;  %v7000_v23 = vmul.f32 1.442695, %v6979_v43  ;;  %v6983_v18 = vsub.f32 0.0, %v16427_v45 }
 0x9cc   :  { %6774 = vperm.xlu1 %9893, %v16426_v17   ;;  %9350 = vmatpush3.bf16.msra.mxu1 %v9347_v28  ;;  %v7004_v17 = vmul.f32 1.442695, %v6981_v22  ;;  %v5456_v9 = vmul.f32 1.442695, %v5431_v2  ;;  %v5458_v22 = vmul.f32 1.442695, %v5432_v1  ;;  %v10427_v33 = vpop.eup %10426 }
 0x9cd   :  { %v5849_v48 = vmin.f32 %v5833_v36, 0.0  ;;  %9352 = vmatprep.subr.bf16.mxu1 %v14925_v12  ;;  %v7008_v62 = vmul.f32 1.442695, %v6983_v18  ;;  %v7023_v1 = vadd.f32 1.0, %v10427_v33 }
 0x9ce   :  { %v14930_v13 = vpop.permute.xlu0 %5796 }
 0x9cf   :  { %v5871_v5 = vmul.f32 1.442695, %v5849_v48  ;;  %v5355_v19 = vpop.permute.xlu1 %5354 }
 0x9d0   :  { %v5412_v31 = vsub.f32 %v5355_v19, %v14720_v57  ;;  %6778 = vperm.xlu1 %9893, %v16428_v61  }
 0x9d1   :  { %10430 = vpow2.f32 %v5871_v5 }
 0x9d2   :  { %v5428_v28 = vmin.f32 %v5412_v31, 0.0  ;;  %v14935_v36 = vpop.permute.xlu0 %5800  ;;  %10432 = vpow2.f32 %v7000_v23  ;;  %v16430_v23 = vld [vmem:[#allocation96_spill] sm:$0xff]  ;;  %v16431_v31 = vld [vmem:[#allocation26_spill] sm:$0xff] }
 0x9d3   :  { %v5365_v43 = vpop.permute.xlu1 %5364  ;;  %10434 = vpow2.f32 %v7004_v17  ;;  %v6985_v18 = vsub.f32 0.0, %v16430_v23 }
 0x9d4   :  { %v5450_v48 = vmul.f32 1.442695, %v5428_v28  ;;  %v5414_v35 = vsub.f32 %v5365_v43, %v14720_v57  ;;  %9894 = vset.pattern.permute.xlu1 %v16348_v42  ;;  %10436 = vpow2.f32 %v5452_v58  ;;  %v10429_v42 = vpop.eup %10428  ;;  %v16432_v58 = vld [vmem:[#allocation95_spill] sm:$0xff]  ;;  %v16433_v43 = vld [vmem:[#allocation30_spill] sm:$0xff] }
 0x9d5   :  { %6590 = vperm.xlu1 %9894, %v16429_v8   ;;  %v6987_v28 = vsub.f32 0.0, %v16432_v58 }
 0x9d6   :  { %10438 = vpow2.f32 %v5450_v48  ;;  %v5430_v54 = vmin.f32 %v5414_v35, 0.0  ;;  %v14940_v5 = vpop.permute.xlu0 %5812 }
 0x9d7   :  { %10440 = vpow2.f32 %v7008_v62  ;;  %v10640_v62 = vld [vmem:[%s15517_s1 + $0x30] sm:$0xff]  ;;  %v7016_v52 = vmul.f32 1.442695, %v6987_v28  ;;  %v5420_v28 = vsub.f32 %v14849_v24, %v14720_v57  ;;  %v16441_v24 = vld [vmem:[#allocation55_spill] sm:$0xff] }
 0x9d8   :  { %10442 = vpow2.f32 %v5456_v9  ;;  %v5454_v19 = vmul.f32 1.442695, %v5430_v54  ;;  %v5793_v17 = vpop.permute.xlu1 %5792  ;;  %v14952_v9 = vmul.f32 %v10640_v62, %v16433_v43  ;;  %v16436_v62 = vld [vmem:[#allocation98_spill] sm:$0xff] }
 0x9d9   :  { %10444 = vpow2.f32 %v5458_v22  ;;  %v5835_v2 = vsub.f32 %v5793_v17, %v14713_v14  ;;  %6598 = vperm.xlu1 %9894, %v16431_v31   ;;  %v7012_v22 = vmul.f32 1.442695, %v6985_v18  ;;  %v16434_v31 = vld [vmem:[#allocation126_spill] sm:$0xff]  ;;  %v6989_v43 = vsub.f32 0.0, %v16436_v62 }
 0x9da   :  { %10446 = vpow2.f32 %v5454_v19  ;;  %v14945_v61 = vpop.permute.xlu0 %5816  ;;  %v7025_v19 = vadd.f32 1.0, %v10429_v42  ;;  %v10641_v42 = vld [vmem:[%s15517_s1 + $0x38] sm:$0xff] }
 0x9db   :  { %v5851_v48 = vmin.f32 %v5835_v2, 0.0  ;;  %v10431_v35 = vpop.eup %10430  ;;  %10448 = vrcp.f32 %v7023_v1 }
 0x9dc   :  { %v10433_v8 = vpop.eup %10432  ;;  %v14956_v33 = vmul.f32 %v10431_v35, %v14952_v9 }
 0x9dd   :  { %v5875_v54 = vmul.f32 1.442695, %v5851_v48  ;;  %v5380_v17 = vpop.permute.xlu1 %5379  ;;  %6606 = vperm.xlu1 %9894, %v16434_v31   ;;  %v10435_v63 = vpop.eup %10434  ;;  %v16438_v48 = vld [vmem:[#allocation128_spill] sm:$0xff] }
 0x9de   :  { %16435 = vst [vmem:[#allocation57_spill] sm:$0xff] %v14956_v33  ;;  %v5417_v59 = vsub.f32 %v5380_v17, %v14720_v57  ;;  %v10437_v60 = vpop.eup %10436  ;;  %v14966_v35 = vmul.f32 %v10641_v42, %v16438_v48  ;;  %v5419_v17 = vsub.f32 %v14837_v56, %v14720_v57  ;;  %v7020_v56 = vmul.f32 1.442695, %v6989_v43 }
 0x9df   :  { %10450 = vpow2.f32 %v5875_v54  ;;  %v14960_v2 = vpop.permute.xlu0 %6173  ;;  %v16440_v54 = vld [vmem:[#allocation46_spill] sm:$0xff]  ;;  %v7029_v43 = vadd.f32 1.0, %v10435_v63 }
 0x9e0   :  { %16437 = vst [vmem:[#allocation33_spill] sm:$0xff] %v14960_v2  ;;  %v10439_v18 = vpop.eup %10438  ;;  %10452 = vpow2.f32 %v7012_v22  ;;  %16439 = vst [vmem:[#allocation59_spill] sm:$0xff] %v14966_v35  ;;  %v5433_v1 = vmin.f32 %v5417_v59, 0.0  ;;  %v7027_v22 = vadd.f32 1.0, %v10433_v8  ;;  %v5477_v42 = vmul.f32 %v10437_v60, %v14966_v35  ;;  %v10642_v59 = vld [vmem:[%s15517_s1 + $0x40] sm:$0xff] }
 0x9e1   :  { %v10441_v31 = vpop.eup %10440  ;;  %6614 = vperm.xlu1 %9894, %v16440_v54   ;;  %v5476_v39 = vmul.f32 %v10439_v18, %v14952_v9  ;;  %10454 = vrcp.f32 %v7025_v19  ;;  %v14981_v21 = vmul.f32 %v10642_v59, %v16441_v24  ;;  %v10643_v19 = vld [vmem:[%s15517_s1 + $0x48] sm:$0xff]  ;;  %v10644_v54 = vld [vmem:[%s15517_s1 + $0x50] sm:$0xff]  ;;  %v16445_v59 = vld [vmem:[#allocation81_spill] sm:$0xff]  ;;  %v5436_v24 = vmin.f32 %v5420_v28, 0.0 }
 0x9e2   :  { %v10443_v29 = vpop.eup %10442  ;;  %v5460_v2 = vmul.f32 1.442695, %v5433_v1  ;;  %v14974_v11 = vpop.permute.xlu1 %5804  ;;  %10456 = vpow2.f32 %v7016_v52  ;;  %v16443_v1 = vld [vmem:[#allocation34_spill] sm:$0xff]  ;;  %v5435_v52 = vmin.f32 %v5419_v17, 0.0  ;;  %v7031_v17 = vadd.f32 1.0, %v10441_v31 }
 0x9e3   :  { %v10445_v48 = vpop.eup %10444  ;;  %8719 = vmatprep.mubr.f32.mxu1 %v5476_v39  ;;  %v14983_v18 = vpop.permute.xlu0 %6185  ;;  %v14989_v60 = vmul.f32 %v10643_v19, %v16443_v1  ;;  %v14995_v39 = vmul.f32 %v10644_v54, %v16445_v59  ;;  %v5466_v59 = vmul.f32 1.442695, %v5436_v24 }
 0x9e4   :  { %16442 = vst [vmem:[#allocation64_spill] sm:$0xff] %v14983_v18  ;;  %v10447_v8 = vpop.eup %10446  ;;  %10458 = vpow2.f32 %v5460_v2  ;;  %8720 = vmatmul.mubr.f32.gmra.mrb[72].mxu1 %v5477_v42  ;;  %v16446_v18 = vld [vmem:[#allocation37_spill] sm:$0xff]  ;;  %v5464_v33 = vmul.f32 1.442695, %v5435_v52 }
 0x9e5   :  { %16444 = vst [vmem:[#allocation68_spill] sm:$0xff] %v14989_v60  ;;  %6622 = vperm.xlu1 %9894, %v16446_v18   ;;  %v5478_v35 = vmul.f32 %v10447_v8, %v14981_v21  ;;  %10460 = vrcp.f32 %v7027_v22  ;;  %v5479_v19 = vmul.f32 %v10443_v29, %v14989_v60  ;;  %v5480_v63 = vmul.f32 %v10445_v48, %v14995_v39  ;;  %v10449_v42 = vpop.eup %10448 }
 0x9e6   :  { %10462 = vpow2.f32 %v7020_v56  ;;  %v7055_v52 = vmul.f32 %v10449_v42, %v16415_v15 }
 0x9e7   :  { %v5385_v1 = vpop.permute.xlu1 %5384  ;;  %8722 = vmatprep.mubr.f32.mxu1 %v5478_v35  ;;  %v6190_v2 = vpop.permute.xlu0 %6189  ;;  %10464 = vrcp.f32 %v7029_v43  ;;  %v5827_v35 = vsub.f32 %v14732_v16, %v14713_v14  ;;  %v10645_v16 = vld [vmem:[%s15517_s1 + $0x58] sm:$0xff] }
 0x9e8   :  { %v5418_v54 = vsub.f32 %v5385_v1, %v14720_v57  ;;  %v6238_v28 = vsub.f32 %v6190_v2, %v14726_v26  ;;  %8723 = vmatmul.mubr.f32.gmra.mrb[74].mxu1 %v5479_v19  ;;  %10466 = vrcp.f32 %v7031_v17  ;;  %v16447_v1 = vld [vmem:[#allocation80_spill] sm:$0xff] }
 0x9e9   :  { %v10451_v18 = vpop.eup %10450  ;;  %6630 = vperm.xlu1 %9894, %v14557_v32   ;;  %8725 = vmatprep.mubr.f32.mxu1 %v5480_v63  ;;  %10468 = vpow2.f32 %v5464_v33  ;;  %v15016_v2 = vmul.f32 %v10645_v16, %v16447_v1  ;;  %v5843_v15 = vmin.f32 %v5827_v35, 0.0 }
 0x9ea   :  { %v10453_v29 = vpop.eup %10452  ;;  %v5434_v22 = vmin.f32 %v5418_v54, 0.0  ;;  %v6254_v31 = vmin.f32 %v6238_v28, 0.0  ;;  %v15007_v48 = vmul.f32 %v10451_v18, %v14981_v21  ;;  %10470 = vpow2.f32 %v5466_v59 }
 0x9eb   :  { %v10455_v56 = vpop.eup %10454  ;;  %v15009_v8 = vpop.permute.xlu0 %6201  ;;  %v7033_v17 = vadd.f32 1.0, %v10453_v29  ;;  %v5829_v28 = vsub.f32 %v14879_v40, %v14713_v14 }
 0x9ec   :  { %v5462_v24 = vmul.f32 1.442695, %v5434_v22  ;;  %v6276_v32 = vmul.f32 1.442695, %v6254_v31  ;;  %v5809_v19 = vpop.permute.xlu1 %5808  ;;  %v10457_v43 = vpop.eup %10456  ;;  %v7057_v33 = vmul.f32 %v10455_v56, %v16421_v10  ;;  %v5830_v31 = vsub.f32 %v14762_v37, %v14713_v14 }
 0x9ed   :  { %v5839_v63 = vsub.f32 %v5809_v19, %v14713_v14  ;;  %7088 = vrot.lane.b32.xlu1 %v7055_v52, %s10666_s26  ;;  %v7035_v40 = vadd.f32 1.0, %v10457_v43  ;;  %v5831_v19 = vsub.f32 %v14844_v27, %v14713_v14  ;;  %v5845_v16 = vmin.f32 %v5829_v28, 0.0  ;;  %v16448_v28 = vld [vmem:[#allocation3_spill] sm:$0xff] }
 0x9ee   :  { %v10459_v54 = vpop.eup %10458  ;;  %10472 = vpow2.f32 %v5462_v24 }
 0x9ef   :  { %v10461_v42 = vpop.eup %10460  ;;  %10474 = vpow2.f32 %v6276_v32  ;;  %v5855_v18 = vmin.f32 %v5839_v63, 0.0  ;;  %v15023_v22 = vpop.permute.xlu0 %6205  ;;  %v5481_v59 = vmul.f32 %v10459_v54, %v15016_v2  ;;  %v5859_v32 = vmul.f32 1.442695, %v5843_v15 }
 0x9f0   :  { %v10463_v10 = vpop.eup %10462  ;;  %v7059_v56 = vmul.f32 %v10461_v42, %v16424_v0  ;;  %10476 = vrcp.f32 %v7033_v17  ;;  %v5846_v54 = vmin.f32 %v5830_v31, 0.0  ;;  %v5832_v0 = vsub.f32 %v14901_v47, %v14713_v14  ;;  %v10646_v42 = vld [vmem:[%s15517_s1 + $0x60] sm:$0xff] }
 0x9f1   :  { %v5883_v52 = vmul.f32 1.442695, %v5855_v18  ;;  %7092 = vrot.lane.b32.xlu1 %v7057_v33, %s10666_s26  ;;  %v5400_v35 = vpop.permute.xlu1 %5399  ;;  %8726 = vmatmul.mubr.f32.gmra.mrb[76].mxu1 %v5481_v59  ;;  %v10465_v24 = vpop.eup %10464  ;;  %v7037_v33 = vadd.f32 1.0, %v10463_v10  ;;  %v15045_v18 = vmul.f32 %v10646_v42, %v16448_v28  ;;  %v5847_v59 = vmin.f32 %v5831_v19, 0.0 }
 0x9f2   :  { %v5421_v29 = vsub.f32 %v5400_v35, %v14720_v57  ;;  %v10467_v63 = vpop.eup %10466  ;;  %v7061_v15 = vmul.f32 %v10465_v24, %v16425_v6  ;;  %v5863_v31 = vmul.f32 1.442695, %v5845_v16  ;;  %v10647_v35 = vld [vmem:[%s15517_s1 + $0x68] sm:$0xff]  ;;  %v16449_v6 = vld [vmem:[#allocation12_spill] sm:$0xff]  ;;  %v5848_v16 = vmin.f32 %v5832_v0, 0.0 }
 0x9f3   :  { %10478 = vpow2.f32 %v5883_v52  ;;  %v15033_v37 = vpop.permute.xlu0 %6217  ;;  %v10469_v57 = vpop.eup %10468  ;;  %v15053_v10 = vmul.f32 %v10647_v35, %v16449_v6  ;;  %v5867_v28 = vmul.f32 1.442695, %v5847_v59  ;;  %v5836_v59 = vsub.f32 %v14930_v13, %v14713_v14  ;;  %v16453_v6 = vld [vmem:[#allocation23_spill] sm:$0xff]  ;;  %v10649_v13 = vld [vmem:[%s15517_s1 + $0x78] sm:$0xff] }
 0x9f4   :  { %v5437_v1 = vmin.f32 %v5421_v29, 0.0  ;;  %10480 = vrcp.f32 %v7035_v40  ;;  %v10471_v27 = vpop.eup %10470  ;;  %v16450_v40 = vld [vmem:[#allocation9_spill] sm:$0xff] }
 0x9f5   :  { %7096 = vrot.lane.b32.xlu1 %v7059_v56, %s10666_s26  ;;  %10482 = vpow2.f32 %v5859_v32  ;;  %v10648_v56 = vld [vmem:[%s15517_s1 + $0x70] sm:$0xff]  ;;  %v5865_v32 = vmul.f32 1.442695, %v5846_v54  ;;  %v7063_v54 = vmul.f32 %v10467_v63, %v16427_v45  ;;  %v5837_v45 = vsub.f32 %v14935_v36, %v14713_v14 }
 0x9f6   :  { %v5468_v43 = vmul.f32 1.442695, %v5437_v1  ;;  %v15038_v17 = vpop.permute.xlu1 %6193  ;;  %v15059_v24 = vmul.f32 %v10648_v56, %v16450_v40  ;;  %v5834_v1 = vsub.f32 %v14916_v41, %v14713_v14  ;;  %v5869_v41 = vmul.f32 1.442695, %v5848_v16  ;;  %v16455_v16 = vld [vmem:[#allocation4_spill] sm:$0xff] }
 0x9f7   :  { %v15047_v52 = vpop.permute.xlu0 %6221 }
 0x9f8   :  { %v10473_v47 = vpop.eup %10472  ;;  %10484 = vpow2.f32 %v5468_v43  ;;  %v5483_v43 = vmul.f32 %v10469_v57, %v15053_v10  ;;  %v5850_v57 = vmin.f32 %v5834_v1, 0.0  ;;  %v15092_v1 = vmul.f32 %v10649_v13, %v16455_v16 }
 0x9f9   :  { %v10475_v29 = vpop.eup %10474  ;;  %7100 = vrot.lane.b32.xlu1 %v7061_v15, %s10666_s26  ;;  %v5482_v19 = vmul.f32 %v10473_v47, %v15045_v18  ;;  %10486 = vrcp.f32 %v7037_v33  ;;  %v5484_v15 = vmul.f32 %v10471_v27, %v15059_v24 }
 0x9fa   :  { %v15067_v42 = vmul.f32 %v10475_v29, %v14952_v9  ;;  %10488 = vpow2.f32 %v5863_v31  ;;  %v10477_v47 = vpop.eup %10476  ;;  %v6379_v29 = vmul.f32 %v14886_v34, %v16453_v6 }
 0x9fb   :  { %v15069_v35 = vpop.permute.xlu1 %6722  ;;  %8728 = vmatprep.mubr.f32.mxu1 %v5482_v19  ;;  %10490 = vpow2.f32 %v5865_v32  ;;  %v7065_v63 = vmul.f32 %v10477_v47, %v16430_v23  ;;  %v16454_v32 = vld [vmem:[#allocation67_spill] sm:$0xff] }
 0x9fc   :  { %16451 = vst [vmem:[#allocation65_spill] sm:$0xff] %v15067_v42  ;;  %8729 = vmatmul.mubr.f32.gmra.mrb[78].mxu1 %v5483_v43  ;;  %v15073_v33 = vpop.permute.xlu0 %6766  ;;  %10492 = vpow2.f32 %v5867_v28  ;;  %v6378_v19 = vmul.f32 %v14886_v34, %v16454_v32  ;;  %v5873_v28 = vmul.f32 1.442695, %v5850_v57 }
 0x9fd   :  { %16452 = vst [vmem:[#allocation69_spill] sm:$0xff] %v15073_v33  ;;  %v10479_v0 = vpop.eup %10478  ;;  %7104 = vrot.lane.b32.xlu1 %v7063_v54, %s10666_s26  ;;  %8731 = vmatprep.mubr.f32.mxu1 %v5484_v15  ;;  %10494 = vpow2.f32 %v5869_v41  ;;  %v5852_v54 = vmin.f32 %v5836_v59, 0.0  ;;  %v5838_v15 = vsub.f32 %v14974_v11, %v14713_v14  ;;  %v16457_v41 = vld [vmem:[#allocation35_spill] sm:$0xff]  ;;  %v16458_v59 = vld [vmem:[#allocation44_spill] sm:$0xff] }
 0x9fe   :  { %v15079_v31 = vmul.f32 %v10479_v0, %v15045_v18  ;;  %v10481_v27 = vpop.eup %10480  ;;  %v5853_v0 = vmin.f32 %v5837_v45, 0.0  ;;  %v6381_v57 = vmul.f32 %v14886_v34, %v16457_v41  ;;  %v6380_v11 = vmul.f32 %v14886_v34, %v16458_v59 }
 0x9ff   :  { %v10483_v40 = vpop.eup %10482  ;;  %v7067_v32 = vmul.f32 %v10481_v27, %v16432_v58  ;;  %10496 = vpow2.f32 %v5873_v28  ;;  %v5877_v27 = vmul.f32 1.442695, %v5852_v54  ;;  %v16460_v54 = vld [vmem:[#allocation131_spill] sm:$0xff] }
 0xa00   :  { %v6198_v56 = vpop.permute.xlu1 %6197  ;;  %v6397_v28 = vmul.f32 %v6381_v57, %v14056_v44  ;;  %v6383_v59 = vmul.f32 %v14886_v34, %v16460_v54 }
 0xa01   :  { %v6240_v36 = vsub.f32 %v6198_v56, %v14726_v26  ;;  %7108 = vrot.lane.b32.xlu1 %v7065_v63, %s10666_s26  ;;  %v15096_v23 = vpop.permute.xlu0 %6582  ;;  %v6395_v56 = vmul.f32 %v6379_v29, %v14078_v38  ;;  %v5891_v63 = vmul.f32 %v10483_v40, %v14789_v25  ;;  %v5840_v29 = vsub.f32 %v14940_v5, %v14713_v14 }
 0xa02   :  { %16456 = vst [vmem:[#allocation40_spill] sm:$0xff] %v15096_v23  ;;  %v10485_v43 = vpop.eup %10484  ;;  %v6394_v23 = vmul.f32 %v6378_v19, %v14074_v30  ;;  %v5854_v40 = vmin.f32 %v5838_v15, 0.0  ;;  %v6396_v5 = vmul.f32 %v6380_v11, %v14052_v20  ;;  %v6399_v11 = vmul.f32 %v6383_v59, %v14112_v7 }
 0xa03   :  { %v10487_v47 = vpop.eup %10486  ;;  %v6256_v6 = vmin.f32 %v6240_v36, 0.0  ;;  %v5485_v13 = vmul.f32 %v10485_v43, %v15092_v1  ;;  %v5879_v36 = vmul.f32 1.442695, %v5853_v0  ;;  %v5841_v43 = vsub.f32 %v14945_v61, %v14713_v14 }
 0xa04   :  { %v10489_v16 = vpop.eup %10488 }
 0xa05   :  { %v6280_v33 = vmul.f32 1.442695, %v6256_v6  ;;  %7112 = vrot.lane.b32.xlu1 %v7067_v32, %s10666_s26  ;;  %v15110_v45 = vpop.permute.xlu1 %6726  ;;  %8732 = vmatmul.mubr.f32.gmra.mrb[80].mxu1 %v5485_v13  ;;  %v15112_v58 = vpop.permute.xlu0 %6586  ;;  %v7069_v6 = vmul.f32 %v10487_v47, %v16436_v62  ;;  %v5893_v32 = vmul.f32 %v10489_v16, %v14857_v49  ;;  %v9355_v13 = vpack.c.bf16 %v6395_v56, %v6394_v23  ;;  %v16461_v47 = vld [vmem:[#allocation130_spill] sm:$0xff] }
 0xa06   :  { %16459 = vst [vmem:[#allocation72_spill] sm:$0xff] %v15112_v58  ;;  %8766 = vmatprep.mubr.f32.mxu1 %v5891_v63  ;;  %v10491_v19 = vpop.eup %10490  ;;  %v5856_v62 = vmin.f32 %v5840_v29, 0.0  ;;  %v6382_v0 = vmul.f32 %v14886_v34, %v16461_v47  ;;  %v5857_v56 = vmin.f32 %v5841_v43, 0.0  ;;  %v16477_v58 = vld [vmem:[#allocation20_spill] sm:$0xff] }
 0xa07   :  { %10498 = vpow2.f32 %v6280_v33  ;;  %v10493_v41 = vpop.eup %10492  ;;  %v5881_v33 = vmul.f32 1.442695, %v5854_v40  ;;  %v5894_v63 = vmul.f32 %v10491_v19, %v14870_v53  ;;  %v9359_v40 = vpack.c.bf16 %v6397_v28, %v6396_v5 }
 0xa08   :  { %10500 = vpow2.f32 %v5877_v27  ;;  %v10495_v16 = vpop.eup %10494  ;;  %v16462_v27 = vld [vmem:[#allocation19_spill] sm:$0xff]  ;;  %v6398_v19 = vmul.f32 %v6382_v0, %v14109_v3  ;;  %v5887_v59 = vmul.f32 1.442695, %v5857_v56 }
 0xa09   :  { %7116 = vrot.lane.b32.xlu1 %v7069_v6, %s10666_s26  ;;  %v15125_v15 = vpop.permute.xlu1 %6730  ;;  %8767 = vmatmul.mubr.f32.vlgmr.msra.gmra.mrb[66].mxu1 %v14760_v46  ;;  %v6595_v61 = vpop.permute.xlu0 %6594  ;;  %10502 = vpow2.f32 %v5879_v36  ;;  %v5895_v46 = vmul.f32 %v10493_v41, %v14898_v50  ;;  %v5885_v6 = vmul.f32 1.442695, %v5856_v62  ;;  %v16463_v41 = vld [vmem:[#allocation6_spill] sm:$0xff]  ;;  %v16464_v62 = vld [vmem:[#allocation13_spill] sm:$0xff] }
 0xa0a   :  { %9354 = vmatpush3.bf16.msra.mxu1 %v14925_v12  ;;  %v6643_v23 = vsub.f32 %v6595_v61, %v14778_v4  ;;  %8769 = vmatprep.mubr.f32.mxu1 %v5893_v32  ;;  %v6384_v12 = vmul.f32 %v14886_v34, %v16462_v27  ;;  %10504 = vpow2.f32 %v5881_v33  ;;  %v6385_v54 = vmul.f32 %v14886_v34, %v16463_v41  ;;  %v16469_v27 = vld [vmem:[#allocation121_spill] sm:$0xff] }
 0xa0b   :  { %9356 = vmatprep.subr.bf16.mxu1 %v9355_v13  ;;  %v5896_v61 = vmul.f32 %v10495_v16, %v14907_v51  ;;  %v9363_v0 = vpack.c.bf16 %v6399_v11, %v6398_v19  ;;  %v16467_v16 = vld [vmem:[#allocation57_spill] sm:$0xff]  ;;  %v16471_v11 = vld [vmem:[#allocation59_spill] sm:$0xff] }
 0xa0c   :  { %v6659_v57 = vmin.f32 %v6643_v23, 0.0  ;;  %v10497_v23 = vpop.eup %10496  ;;  %v6400_v33 = vmul.f32 %v6384_v12, %v14084_v55 }
 0xa0d   :  { %8770 = vmatmul.mubr.f32.gmra.mrb[68].mxu1 %v5894_v63  ;;  %v6603_v29 = vpop.permute.xlu0 %6602  ;;  %v16466_v63 = vld [vmem:[#allocation38_spill] sm:$0xff]  ;;  %v5898_v19 = vmul.f32 %v10497_v23, %v16471_v11 }
 0xa0e   :  { %v6681_v32 = vmul.f32 1.442695, %v6659_v57  ;;  %9358 = vmatpush3.bf16.msra.mxu1 %v9355_v13  ;;  %v6645_v36 = vsub.f32 %v6603_v29, %v14778_v4  ;;  %v15138_v43 = vpop.permute.xlu1 %6209  ;;  %8772 = vmatprep.mubr.f32.mxu1 %v5895_v46  ;;  %v6387_v13 = vmul.f32 %v14886_v34, %v16464_v62  ;;  %v6232_v57 = vsub.f32 %v16466_v63, %v14726_v26  ;;  %v16474_v62 = vld [vmem:[#allocation24_spill] sm:$0xff] }
 0xa0f   :  { %9360 = vmatprep.subr.bf16.mxu1 %v9359_v40  ;;  %v6401_v29 = vmul.f32 %v6385_v54, %v16469_v27  ;;  %v6389_v54 = vmul.f32 %v14886_v34, %v16474_v62 }
 0xa10   :  { %10506 = vpow2.f32 %v6681_v32  ;;  %v6661_v28 = vmin.f32 %v6645_v36, 0.0  ;;  %v16470_v32 = vld [vmem:[#allocation15_spill] sm:$0xff] }
 0xa11   :  { %v10499_v5 = vpop.eup %10498  ;;  %8773 = vmatmul.mubr.f32.gmra.mrb[70].mxu1 %v5896_v61  ;;  %v15147_v47 = vpop.permute.xlu0 %6610  ;;  %10508 = vpow2.f32 %v5885_v6  ;;  %v6386_v12 = vmul.f32 %v14886_v34, %v16470_v32  ;;  %v16472_v6 = vld [vmem:[#allocation32_spill] sm:$0xff]  ;;  %v16475_v32 = vld [vmem:[#allocation33_spill] sm:$0xff] }
 0xa12   :  { %16465 = vst [vmem:[#allocation75_spill] sm:$0xff] %v15147_v47  ;;  %v6685_v56 = vmul.f32 1.442695, %v6661_v28  ;;  %9362 = vmatpush3.bf16.msra.mxu1 %v9359_v40  ;;  %8775 = vmatprep.mubr.f32.mxu1 %v16467_v16  ;;  %v15153_v46 = vmul.f32 %v10499_v5, %v14981_v21  ;;  %10510 = vpow2.f32 %v5887_v59  ;;  %v10501_v41 = vpop.eup %10500  ;;  %v6388_v40 = vmul.f32 %v14886_v34, %v16472_v6  ;;  %v16473_v28 = vld [vmem:[#allocation106_spill] sm:$0xff] }
 0xa13   :  { %9364 = vmatprep.subr.bf16.mxu1 %v9363_v0  ;;  %v15158_v36 = vpop.permute.xlu1 %6738  ;;  %v10503_v61 = vpop.eup %10502  ;;  %v6403_v5 = vmul.f32 %v6387_v13, %v16473_v28  ;;  %v9367_v16 = vpack.c.bf16 %v6401_v29, %v6400_v33  ;;  %v6248_v59 = vmin.f32 %v6232_v57, 0.0  ;;  %v6234_v47 = vsub.f32 %v16475_v32, %v14726_v26  ;;  %v16476_v6 = vld [vmem:[#allocation102_spill] sm:$0xff]  ;;  %v16478_v28 = vld [vmem:[#allocation53_spill] sm:$0xff]  ;;  %v16479_v29 = vld [vmem:[#allocation120_spill] sm:$0xff] }
 0xa14   :  { %16468 = vst [vmem:[#allocation73_spill] sm:$0xff] %v15153_v46  ;;  %10512 = vpow2.f32 %v6685_v56  ;;  %v6402_v56 = vmul.f32 %v6386_v12, %v16476_v6  ;;  %v6390_v13 = vmul.f32 %v14886_v34, %v16477_v58  ;;  %v6235_v62 = vsub.f32 %v16478_v28, %v14726_v26  ;;  %v10505_v57 = vpop.eup %10504  ;;  %v16480_v32 = vld [vmem:[#allocation52_spill] sm:$0xff] }
 0xa15   :  { %8776 = vmatmul.mubr.f32.gmra.mrb[72].mxu1 %v5898_v19  ;;  %v6619_v63 = vpop.permute.xlu0 %6618  ;;  %v5900_v33 = vmul.f32 %v10501_v41, %v14989_v60  ;;  %v6404_v19 = vmul.f32 %v6388_v40, %v16479_v29  ;;  %v16481_v12 = vld [vmem:[#allocation124_spill] sm:$0xff]  ;;  %v6264_v55 = vmul.f32 1.442695, %v6248_v59  ;;  %v6250_v42 = vmin.f32 %v6234_v47, 0.0  ;;  %v15193_v47 = vld [vmem:[%s15518_s3 + $0x3] ss:$0 sm:$0xff] }
 0xa16   :  { %9366 = vmatpush3.bf16.msra.mxu1 %v9363_v0  ;;  %v6649_v23 = vsub.f32 %v6619_v63, %v14778_v4  ;;  %8778 = vmatprep.mubr.f32.mxu1 %v15007_v48  ;;  %v6391_v0 = vmul.f32 %v14886_v34, %v16480_v32  ;;  %v5901_v48 = vmul.f32 %v10503_v61, %v14995_v39  ;;  %v16482_v41 = vld [vmem:[#allocation56_spill] sm:$0xff]  ;;  %v6251_v34 = vmin.f32 %v6235_v62, 0.0 }
 0xa17   :  { %9368 = vmatprep.subr.bf16.mxu1 %v9367_v16  ;;  %v6405_v6 = vmul.f32 %v6389_v54, %v16481_v12  ;;  %v9371_v11 = vpack.c.bf16 %v6403_v5, %v6402_v56  ;;  %v6236_v60 = vsub.f32 %v16482_v41, %v14726_v26  ;;  %v5902_v61 = vmul.f32 %v10505_v57, %v15016_v2  ;;  %v16484_v56 = vld [vmem:[#allocation119_spill] sm:$0xff]  ;;  %v16486_v57 = vld [vmem:[#allocation64_spill] sm:$0xff] }
 0xa18   :  { %v6665_v63 = vmin.f32 %v6649_v23, 0.0  ;;  %v5821_v46 = vpop.permute.xlu1 %5820  ;;  %v6407_v59 = vmul.f32 %v6391_v0, %v16484_v56 }
 0xa19   :  { %v5842_v58 = vsub.f32 %v5821_v46, %v14713_v14  ;;  %8779 = vmatmul.mubr.f32.gmra.mrb[74].mxu1 %v5900_v33  ;;  %v16483_v46 = vld [vmem:[#allocation22_spill] sm:$0xff]  ;;  %v9375_v33 = vpack.c.bf16 %v6405_v6, %v6404_v19  ;;  %v6252_v6 = vmin.f32 %v6236_v60, 0.0  ;;  %v6268_v19 = vmul.f32 1.442695, %v6250_v42  ;;  %v16487_v60 = vld [vmem:[#allocation109_spill] sm:$0xff] }
 0xa1a   :  { %v10507_v28 = vpop.eup %10506  ;;  %v6693_v40 = vmul.f32 1.442695, %v6665_v63  ;;  %9370 = vmatpush3.bf16.msra.mxu1 %v9367_v16  ;;  %8781 = vmatprep.mubr.f32.mxu1 %v5901_v48  ;;  %v6406_v5 = vmul.f32 %v6390_v13, %v16483_v46  ;;  %v16485_v16 = vld [vmem:[#allocation43_spill] sm:$0xff]  ;;  %v6782_v63 = vmul.f32 %v15193_v47, %v15069_v35 }
 0xa1b   :  { %v5858_v23 = vmin.f32 %v5842_v58, 0.0  ;;  %9372 = vmatprep.subr.bf16.mxu1 %v9371_v11  ;;  %v15186_v54 = vmul.f32 %v10507_v28, %v14952_v9  ;;  %v10509_v14 = vpop.eup %10508  ;;  %v6781_v62 = vmul.f32 %v15193_v47, %v16485_v16  ;;  %v6237_v9 = vsub.f32 %v16486_v57, %v14726_v26 }
 0xa1c   :  { %10514 = vpow2.f32 %v6693_v40  ;;  %v10511_v32 = vpop.eup %10510  ;;  %v6270_v28 = vmul.f32 1.442695, %v6251_v34  ;;  %v5904_v41 = vmul.f32 %v10509_v14, %v15053_v10  ;;  %v6798_v42 = vmul.f32 %v6782_v63, %v16487_v60  ;;  %v16488_v14 = vld [vmem:[#allocation103_spill] sm:$0xff] }
 0xa1d   :  { %v5889_v13 = vmul.f32 1.442695, %v5858_v23  ;;  %v6214_v48 = vpop.permute.xlu1 %6213  ;;  %8782 = vmatmul.mubr.f32.gmra.mrb[76].mxu1 %v5902_v61  ;;  %10516 = vpow2.f32 %v6264_v55  ;;  %v5905_v23 = vmul.f32 %v10511_v32, %v15059_v24  ;;  %v6253_v61 = vmin.f32 %v6237_v9, 0.0 }
 0xa1e   :  { %v10513_v0 = vpop.eup %10512  ;;  %v6244_v58 = vsub.f32 %v6214_v48, %v14726_v26  ;;  %9374 = vmatpush3.bf16.msra.mxu1 %v9371_v11  ;;  %8784 = vmatprep.mubr.f32.mxu1 %v15079_v31  ;;  %v6239_v55 = vsub.f32 %v15038_v17, %v14726_v26  ;;  %v9379_v11 = vpack.c.bf16 %v6407_v59, %v6406_v5  ;;  %v6272_v31 = vmul.f32 1.442695, %v6252_v6 }
 0xa1f   :  { %10518 = vpow2.f32 %v5889_v13  ;;  %9376 = vmatprep.subr.bf16.mxu1 %v9375_v33  ;;  %v15205_v40 = vmul.f32 %v10513_v0, %v14981_v21  ;;  %v6797_v21 = vmul.f32 %v6781_v62, %v16488_v14  ;;  %v6274_v32 = vmul.f32 1.442695, %v6253_v61 }
 0xa20   :  { %v6260_v35 = vmin.f32 %v6244_v58, 0.0  ;;  %10520 = vpow2.f32 %v6268_v19  ;;  %v6241_v57 = vsub.f32 %v15009_v8, %v14726_v26  ;;  %v6255_v17 = vmin.f32 %v6239_v55, 0.0 }
 0xa21   :  { %8785 = vmatmul.mubr.f32.gmra.mrb[78].mxu1 %v5904_v41  ;;  %10522 = vpow2.f32 %v6270_v28  ;;  %v9383_v9 = vpack.c.bf16 %v6798_v42, %v6797_v21  ;;  %v6242_v5 = vsub.f32 %v15023_v22, %v14726_v26  ;;  %v6784_v13 = vmul.f32 %v15193_v47, %v15125_v15 }
 0xa22   :  { %v6288_v34 = vmul.f32 1.442695, %v6260_v35  ;;  %9378 = vmatpush3.bf16.msra.mxu1 %v9375_v33  ;;  %v6743_v16 = vpop.permute.xlu1 %6742  ;;  %8787 = vmatprep.mubr.f32.mxu1 %v5905_v23  ;;  %v6257_v8 = vmin.f32 %v6241_v57, 0.0  ;;  %v6278_v0 = vmul.f32 1.442695, %v6255_v17  ;;  %v6243_v6 = vsub.f32 %v15138_v43, %v14726_v26  ;;  %v16489_v23 = vld [vmem:[#allocation50_spill] sm:$0xff] }
 0xa23   :  { %9380 = vmatprep.subr.bf16.mxu1 %v9379_v11  ;;  %v6258_v19 = vmin.f32 %v6242_v5, 0.0  ;;  %v6783_v22 = vmul.f32 %v15193_v47, %v15110_v45  ;;  %v6785_v15 = vmul.f32 %v15193_v47, %v16489_v23  ;;  %v6800_v61 = vmul.f32 %v6784_v13, %v14078_v38  ;;  %v16490_v13 = vld [vmem:[#allocation51_spill] sm:$0xff] }
 0xa24   :  { %10524 = vpow2.f32 %v6288_v34  ;;  %v6786_v55 = vmul.f32 %v15193_v47, %v15158_v36  ;;  %v6282_v42 = vmul.f32 1.442695, %v6257_v8  ;;  %v6245_v45 = vsub.f32 %v15033_v37, %v14726_v26  ;;  %v16491_v23 = vld [vmem:[#allocation27_spill] sm:$0xff] }
 0xa25   :  { %10526 = vpow2.f32 %v6272_v31  ;;  %v6284_v34 = vmul.f32 1.442695, %v6258_v19  ;;  %v6246_v21 = vsub.f32 %v15047_v52, %v14726_v26  ;;  %v6801_v5 = vmul.f32 %v6785_v15, %v14052_v20 }
 0xa26   :  { %v10515_v63 = vpop.eup %10514  ;;  %9382 = vmatpush3.bf16.msra.mxu1 %v9379_v11  ;;  %v6747_v59 = vpop.permute.xlu1 %6746  ;;  %10528 = vpow2.f32 %v6274_v32  ;;  %v6259_v11 = vmin.f32 %v6243_v6, 0.0  ;;  %v6799_v32 = vmul.f32 %v6783_v22, %v14074_v30  ;;  %v6802_v37 = vmul.f32 %v6786_v55, %v14056_v44 }
 0xa27   :  { %9384 = vmatprep.subr.bf16.mxu1 %v9383_v9  ;;  %v15217_v33 = vmul.f32 %v10515_v63, %v15045_v18  ;;  %v10517_v62 = vpop.eup %10516  ;;  %10530 = vpow2.f32 %v6278_v0  ;;  %v6261_v52 = vmin.f32 %v6245_v45, 0.0  ;;  %v6787_v6 = vmul.f32 %v15193_v47, %v6743_v16 }
 0xa28   :  { %v6296_v41 = vmul.f32 %v10517_v62, %v14789_v25  ;;  %v6788_v62 = vmul.f32 %v15193_v47, %v6747_v59  ;;  %10532 = vpow2.f32 %v6282_v42  ;;  %v6286_v8 = vmul.f32 1.442695, %v6259_v11 }
 0xa29   :  { %v10519_v48 = vpop.eup %10518  ;;  %10534 = vpow2.f32 %v6284_v34  ;;  %v6789_v15 = vmul.f32 %v15193_v47, %v16491_v23  ;;  %v16499_v23 = vld [vmem:[#allocation106_spill] sm:$0xff] }
 0xa2a   :  { %v6755_v58 = vpop.permute.xlu1 %6754  ;;  %v5906_v28 = vmul.f32 %v10519_v48, %v15092_v1  ;;  %v10521_v35 = vpop.eup %10520  ;;  %v9387_v48 = vpack.c.bf16 %v6800_v61, %v6799_v32  ;;  %v6290_v61 = vmul.f32 1.442695, %v6261_v52  ;;  %10536 = vpow2.f32 %v6286_v8 }
 0xa2b   :  { %v10523_v43 = vpop.eup %10522  ;;  %v6298_v17 = vmul.f32 %v10521_v35, %v14857_v49 }
 0xa2c   :  { %8788 = vmatmul.mubr.f32.gmra.mrb[80].mxu1 %v5906_v28  ;;  %v6299_v0 = vmul.f32 %v10523_v43, %v14870_v53  ;;  %v6804_v28 = vmul.f32 %v6788_v62, %v14112_v7  ;;  %v6803_v43 = vmul.f32 %v6787_v6, %v14109_v3  ;;  %10538 = vpow2.f32 %v6290_v61  ;;  %v16496_v6 = vld [vmem:[#allocation68_spill] sm:$0xff] }
 0xa2d   :  { %8822 = vmatprep.mubr.f32.mxu1 %v6296_v41  ;;  %v6790_v41 = vmul.f32 %v15193_v47, %v6755_v58 }
 0xa2e   :  { %v10525_v31 = vpop.eup %10524  ;;  %v9395_v34 = vpack.c.bf16 %v6804_v28, %v6803_v43  ;;  %v16497_v28 = vld [vmem:[#allocation69_spill] sm:$0xff] }
 0xa2f   :  { %v6571_v57 = vpop.permute.xlu1 %6570  ;;  %v15239_v36 = vmul.f32 %v10525_v31, %v15045_v18  ;;  %v10527_v63 = vpop.eup %10526  ;;  %v6262_v18 = vmin.f32 %v6246_v21, 0.0  ;;  %v6806_v31 = vmul.f32 %v6790_v41, %v16469_v27  ;;  %v6793_v41 = vmul.f32 %v15193_v47, %v16497_v28 }
 0xa30   :  { %8823 = vmatmul.mubr.f32.vlgmr.msra.gmra.mrb[66].mxu1 %v16490_v13  ;;  %v6637_v19 = vsub.f32 %v6571_v57, %v14778_v4  ;;  %v10529_v22 = vpop.eup %10528  ;;  %v6300_v59 = vmul.f32 %v10527_v63, %v14898_v50  ;;  %v16493_v57 = vld [vmem:[#allocation117_spill] sm:$0xff] }
 0xa31   :  { %9386 = vmatpush3.bf16.msra.mxu1 %v9383_v9  ;;  %8825 = vmatprep.mubr.f32.mxu1 %v6298_v17  ;;  %v9391_v9 = vpack.c.bf16 %v6802_v37, %v6801_v5  ;;  %v6292_v55 = vmul.f32 1.442695, %v6262_v18  ;;  %v6301_v45 = vmul.f32 %v10529_v22, %v14907_v51  ;;  %v10531_v58 = vpop.eup %10530  ;;  %v6805_v17 = vmul.f32 %v6789_v15, %v16493_v57  ;;  %v16494_v5 = vld [vmem:[#allocation59_spill] sm:$0xff] }
 0xa32   :  { %9388 = vmatprep.subr.bf16.mxu1 %v9387_v48  ;;  %v6653_v42 = vmin.f32 %v6637_v19, 0.0  ;;  %v6303_v37 = vmul.f32 %v10531_v58, %v16494_v5  ;;  %v10533_v62 = vpop.eup %10532 }
 0xa33   :  { %10540 = vpow2.f32 %v6292_v55  ;;  %v10535_v13 = vpop.eup %10534  ;;  %v9399_v52 = vpack.c.bf16 %v6806_v31, %v6805_v17  ;;  %v6305_v19 = vmul.f32 %v10533_v62, %v16496_v6  ;;  %v6809_v31 = vmul.f32 %v6793_v41, %v16479_v29 }
 0xa34   :  { %v6226_v35 = vpop.permute.xlu1 %6225  ;;  %8826 = vmatmul.mubr.f32.gmra.mrb[68].mxu1 %v6299_v0  ;;  %v6669_v63 = vmul.f32 1.442695, %v6653_v42  ;;  %v16495_v0 = vld [vmem:[#allocation73_spill] sm:$0xff]  ;;  %v10537_v22 = vpop.eup %10536 }
 0xa35   :  { %v6247_v16 = vsub.f32 %v6226_v35, %v14726_v26  ;;  %9390 = vmatpush3.bf16.msra.mxu1 %v9387_v48  ;;  %8828 = vmatprep.mubr.f32.mxu1 %v6300_v59  ;;  %v16492_v26 = vld [vmem:[#allocation65_spill] sm:$0xff]  ;;  %v6306_v59 = vmul.f32 %v10535_v13, %v14995_v39  ;;  %v16498_v35 = vld [vmem:[#allocation102_spill] sm:$0xff]  ;;  %v6307_v55 = vmul.f32 %v10537_v22, %v15016_v2 }
 0xa36   :  { %9392 = vmatprep.subr.bf16.mxu1 %v9391_v9  ;;  %v10539_v42 = vpop.eup %10538 }
 0xa37   :  { %v6263_v11 = vmin.f32 %v6247_v16, 0.0  ;;  %v6309_v17 = vmul.f32 %v10539_v42, %v15053_v10 }
 0xa38   :  { %8829 = vmatmul.mubr.f32.gmra.mrb[70].mxu1 %v6301_v45  ;;  %v16500_v45 = vld [vmem:[#allocation40_spill] sm:$0xff] }
 0xa39   :  { %v6294_v21 = vmul.f32 1.442695, %v6263_v11  ;;  %9394 = vmatpush3.bf16.msra.mxu1 %v9391_v9  ;;  %v6759_v32 = vpop.permute.xlu1 %6758  ;;  %8831 = vmatprep.mubr.f32.mxu1 %v16492_v26  ;;  %v6640_v58 = vsub.f32 %v16500_v45, %v14778_v4 }
 0xa3a   :  { %9396 = vmatprep.subr.bf16.mxu1 %v9395_v34  ;;  %v6791_v48 = vmul.f32 %v15193_v47, %v6759_v32 }
 0xa3b   :  { %10542 = vpow2.f32 %v6294_v21  ;;  %v6656_v62 = vmin.f32 %v6640_v58, 0.0 }
 0xa3c   :  { %8832 = vmatmul.mubr.f32.gmra.mrb[72].mxu1 %v6303_v37  ;;  %10544 = vpow2.f32 %v6669_v63  ;;  %v6807_v9 = vmul.f32 %v6791_v48, %v16498_v35 }
 0xa3d   :  { %9398 = vmatpush3.bf16.msra.mxu1 %v9395_v34  ;;  %v6763_v8 = vpop.permute.xlu1 %6762  ;;  %8834 = vmatprep.mubr.f32.mxu1 %v16495_v0  ;;  %v10541_v11 = vpop.eup %10540  ;;  %v16501_v34 = vld [vmem:[#allocation72_spill] sm:$0xff] }
 0xa3e   :  { %v6792_v18 = vmul.f32 %v15193_v47, %v6763_v8  ;;  %9400 = vmatprep.subr.bf16.mxu1 %v9399_v52  ;;  %v6641_v21 = vsub.f32 %v16501_v34, %v14778_v4  ;;  %v6310_v48 = vmul.f32 %v10541_v11, %v15059_v24 }
 0xa40   :  { %v6808_v15 = vmul.f32 %v6792_v18, %v16499_v23  ;;  %8835 = vmatmul.mubr.f32.gmra.mrb[74].mxu1 %v6305_v19  ;;  %v6657_v8 = vmin.f32 %v6641_v21, 0.0  ;;  %v6675_v18 = vmul.f32 1.442695, %v6656_v62 }
 0xa41   :  { %9402 = vmatpush3.bf16.msra.mxu1 %v9399_v52  ;;  %v6771_v61 = vpop.permute.xlu1 %6770  ;;  %8837 = vmatprep.mubr.f32.mxu1 %v6306_v59 }
 0xa42   :  { %v6794_v16 = vmul.f32 %v15193_v47, %v6771_v61  ;;  %v9403_v43 = vpack.c.bf16 %v6808_v15, %v6807_v9  ;;  %v6677_v28 = vmul.f32 1.442695, %v6657_v8 }
 0xa44   :  { %v6810_v32 = vmul.f32 %v6794_v16, %v16481_v12  ;;  %8838 = vmatmul.mubr.f32.gmra.mrb[76].mxu1 %v6307_v55  ;;  %9404 = vmatprep.subr.bf16.mxu1 %v9403_v43 }
 0xa45   :  { %8840 = vmatprep.mubr.f32.mxu1 %v15239_v36  ;;  %9406 = vmatpush3.bf16.msra.mxu1 %v9403_v43  ;;  %v10543_v37 = vpop.eup %10542 }
 0xa46   :  { %v6579_v26 = vpop.permute.xlu1 %6578  ;;  %v9407_v63 = vpack.c.bf16 %v6810_v32, %v6809_v31  ;;  %v10545_v52 = vpop.eup %10544  ;;  %v6311_v36 = vmul.f32 %v10543_v37, %v15092_v1 }
 0xa47   :  { %v6639_v13 = vsub.f32 %v6579_v26, %v14778_v4  ;;  %v6701_v59 = vmul.f32 %v10545_v52, %v14789_v25  ;;  %v16502_v25 = vld [vmem:[#allocation75_spill] sm:$0xff]  ;;  %v6627_v37 = vpop.permute.xlu0 %6626 }
 0xa48   :  { %8841 = vmatmul.mubr.f32.gmra.mrb[78].mxu1 %v6309_v17  ;;  %9408 = vmatprep.subr.bf16.mxu1 %v9407_v63  ;;  %v6647_v45 = vsub.f32 %v16502_v25, %v14778_v4 }
 0xa49   :  { %v6655_v0 = vmin.f32 %v6639_v13, 0.0  ;;  %8843 = vmatprep.mubr.f32.mxu1 %v6310_v48  ;;  %9410 = vmatpush3.bf16.msra.mxu1 %v9407_v63  ;;  %v16503_v63 = vld [vmem:[#allocation58_spill] sm:$0xff] }
 0xa4a   :  { %v6663_v17 = vmin.f32 %v6647_v45, 0.0 }
 0xa4b   :  { %v6673_v19 = vmul.f32 1.442695, %v6655_v0  ;;  %v6775_v22 = vpop.permute.xlu1 %6774 }
 0xa4c   :  { %8844 = vmatmul.mubr.f32.gmra.mrb[80].mxu1 %v6311_v36  ;;  %v6795_v41 = vmul.f32 %v15193_v47, %v6775_v22  ;;  %v6689_v0 = vmul.f32 1.442695, %v6663_v17  ;;  %v6651_v36 = vsub.f32 %v6627_v37, %v14778_v4 }
 0xa4d   :  { %10546 = vpow2.f32 %v6673_v19  ;;  %8878 = vmatprep.mubr.f32.mxu1 %v6701_v59 }
 0xa4e   :  { %10548 = vpow2.f32 %v6675_v18  ;;  %v6811_v61 = vmul.f32 %v6795_v41, %v16483_v46 }
 0xa4f   :  { %v6779_v9 = vpop.permute.xlu1 %6778  ;;  %10550 = vpow2.f32 %v6677_v28  ;;  %v6667_v28 = vmin.f32 %v6651_v36, 0.0 }
 0xa50   :  { %v6796_v15 = vmul.f32 %v15193_v47, %v6779_v9 }
 0xa52   :  { %v6812_v16 = vmul.f32 %v6796_v15, %v16484_v56 }
 0xa54   :  { %v6591_v55 = vpop.permute.xlu1 %6590  ;;  %v9411_v43 = vpack.c.bf16 %v6812_v16, %v6811_v61  ;;  %v6697_v61 = vmul.f32 1.442695, %v6667_v28 }
 0xa55   :  { %v6642_v42 = vsub.f32 %v6591_v55, %v14778_v4 }
 0xa56   :  { %9412 = vmatprep.subr.bf16.mxu1 %v9411_v43 }
 0xa57   :  { %v10547_v58 = vpop.eup %10546  ;;  %v6658_v11 = vmin.f32 %v6642_v42, 0.0  ;;  %9414 = vmatpush3.bf16.msra.mxu1 %v9411_v43 }
 0xa58   :  { %v6599_v31 = vpop.permute.xlu1 %6598  ;;  %v6703_v34 = vmul.f32 %v10547_v58, %v14857_v49  ;;  %v10549_v21 = vpop.eup %10548 }
 0xa59   :  { %v6679_v47 = vmul.f32 1.442695, %v6658_v11  ;;  %v6644_v32 = vsub.f32 %v6599_v31, %v14778_v4  ;;  %v10551_v26 = vpop.eup %10550  ;;  %v6704_v48 = vmul.f32 %v10549_v21, %v14870_v53 }
 0xa5a   :  { %8879 = vmatmul.mubr.f32.vlgmr.msra.gmra.mrb[66].mxu1 %v16503_v63  ;;  %v6705_v49 = vmul.f32 %v10551_v26, %v14898_v50  ;;  %v7087_v63 = vpop.permute.xlu0 %7086 }
 0xa5b   :  { %10552 = vpow2.f32 %v6679_v47  ;;  %v6660_v62 = vmin.f32 %v6644_v32, 0.0  ;;  %8881 = vmatprep.mubr.f32.mxu1 %v6703_v34 }
 0xa5c   :  { %v6607_v13 = vpop.permute.xlu1 %6606 }
 0xa5d   :  { %v6683_v52 = vmul.f32 1.442695, %v6660_v62  ;;  %v6646_v8 = vsub.f32 %v6607_v13, %v14778_v4 }
 0xa5e   :  { %8882 = vmatmul.mubr.f32.gmra.mrb[68].mxu1 %v6704_v48  ;;  %v7091_v62 = vpop.permute.xlu0 %7090 }
 0xa5f   :  { %10554 = vpow2.f32 %v6683_v52  ;;  %v6662_v18 = vmin.f32 %v6646_v8, 0.0  ;;  %8884 = vmatprep.mubr.f32.mxu1 %v6705_v49 }
 0xa60   :  { %v6615_v19 = vpop.permute.xlu1 %6614  ;;  %10556 = vpow2.f32 %v6689_v0 }
 0xa61   :  { %v6687_v22 = vmul.f32 1.442695, %v6662_v18  ;;  %v6648_v59 = vsub.f32 %v6615_v19, %v14778_v4 }
 0xa62   :  { %v7095_v28 = vpop.permute.xlu0 %7094 }
 0xa63   :  { %10558 = vpow2.f32 %v6687_v22  ;;  %v6664_v53 = vmin.f32 %v6648_v59, 0.0 }
 0xa64   :  { %v6623_v41 = vpop.permute.xlu1 %6622 }
 0xa65   :  { %v10553_v9 = vpop.eup %10552  ;;  %v6691_v15 = vmul.f32 1.442695, %v6664_v53  ;;  %v6650_v50 = vsub.f32 %v6623_v41, %v14778_v4 }
 0xa66   :  { %v6706_v16 = vmul.f32 %v10553_v9, %v14907_v51 }
 0xa67   :  { %10560 = vpow2.f32 %v6691_v15  ;;  %v6666_v55 = vmin.f32 %v6650_v50, 0.0 }
 0xa68   :  { %v6631_v43 = vpop.permute.xlu1 %6630  ;;  %8885 = vmatmul.mubr.f32.gmra.mrb[70].mxu1 %v6706_v16  ;;  %10562 = vpow2.f32 %v6697_v61  ;;  %v7099_v16 = vpop.permute.xlu0 %7098 }
 0xa69   :  { %v10555_v42 = vpop.eup %10554  ;;  %v6695_v25 = vmul.f32 1.442695, %v6666_v55  ;;  %v6652_v45 = vsub.f32 %v6631_v43, %v14778_v4  ;;  %8887 = vmatprep.mubr.f32.mxu1 %v15186_v54 }
 0xa6a   :  { %v6708_v58 = vmul.f32 %v10555_v42, %v16494_v5  ;;  %v10557_v31 = vpop.eup %10556 }
 0xa6b   :  { %10564 = vpow2.f32 %v6695_v25  ;;  %v6668_v11 = vmin.f32 %v6652_v45, 0.0  ;;  %v6711_v47 = vmul.f32 %v10557_v31, %v14995_v39 }
 0xa6c   :  { %8888 = vmatmul.mubr.f32.gmra.mrb[72].mxu1 %v6708_v58  ;;  %v7089_v39 = vpop.permute.xlu1 %7088 }
 0xa6d   :  { %v10559_v34 = vpop.eup %10558  ;;  %v6699_v21 = vmul.f32 1.442695, %v6668_v11  ;;  %8890 = vmatprep.mubr.f32.mxu1 %v15205_v40 }
 0xa6e   :  { %v6710_v51 = vmul.f32 %v10559_v34, %v16496_v6 }
 0xa6f   :  { %10566 = vpow2.f32 %v6699_v21 }
 0xa70   :  { %8891 = vmatmul.mubr.f32.gmra.mrb[74].mxu1 %v6710_v51  ;;  %v7093_v37 = vpop.permute.xlu1 %7092 }
 0xa71   :  { %v10561_v4 = vpop.eup %10560  ;;  %8893 = vmatprep.mubr.f32.mxu1 %v6711_v47 }
 0xa72   :  { %v6712_v54 = vmul.f32 %v10561_v4, %v15016_v2  ;;  %v10563_v32 = vpop.eup %10562  ;;  %v15314_v2 = vld [vmem:[%s15520_s8 + $0x1] ss:$0 sm:$0xff]  ;;  %v7103_v4 = vpop.permute.xlu0 %7102 }
 0xa73   :  { %v6715_v17 = vmul.f32 %v10563_v32, %v15059_v24  ;;  %v5306_v24 = vmul.f32 %v15314_v2, %v16488_v14  ;;  %v5309_v8 = vmul.f32 %v15314_v2, %v14078_v38  ;;  %v5311_v55 = vmul.f32 %v15314_v2, %v14056_v44 }
 0xa74   :  { %8894 = vmatmul.mubr.f32.gmra.mrb[76].mxu1 %v6712_v54  ;;  %v7097_v19 = vpop.permute.xlu1 %7096  ;;  %v5310_v42 = vmul.f32 %v15314_v2, %v14052_v20  ;;  %v5313_v34 = vmul.f32 %v15314_v2, %v14112_v7  ;;  %v5312_v44 = vmul.f32 %v15314_v2, %v14109_v3  ;;  %v5315_v7 = vmul.f32 %v15314_v2, %v16469_v27 }
 0xa75   :  { %v10565_v5 = vpop.eup %10564  ;;  %8896 = vmatprep.mubr.f32.mxu1 %v15217_v33  ;;  %v5307_v33 = vmul.f32 %v15314_v2, %v16487_v60  ;;  %v5308_v60 = vmul.f32 %v15314_v2, %v14074_v30 }
 0xa76   :  { %v6714_v26 = vmul.f32 %v10565_v5, %v15053_v10 }
 0xa78   :  { %8897 = vmatmul.mubr.f32.gmra.mrb[78].mxu1 %v6714_v26  ;;  %v7101_v15 = vpop.permute.xlu1 %7100 }
 0xa79   :  { %v10567_v40 = vpop.eup %10566  ;;  %8899 = vmatprep.mubr.f32.mxu1 %v6715_v17 }
 0xa7a   :  { %v6716_v6 = vmul.f32 %v10567_v40, %v15092_v1 }
 0xa7c   :  { %8900 = vmatmul.mubr.f32.gmra.mrb[80].mxu1 %v6716_v6  ;;  %v7105_v21 = vpop.permute.xlu1 %7104 }
 0xb2d   :  { %v8880_v10 = vpop.f32.mrb[66].mxu1 }
 0xb2e   :  { %v9479_v13 = vadd.f32 %v8880_v10, %v5307_v33  ;;  %v6879_v48 = vpop.f32.mrb[67].mxu1 }
 0xb2f   :  { %v9480_v1 = vadd.f32 %v6879_v48, %v5306_v24  ;;  %v7109_v24 = vpop.permute.xlu1 %7108 }
 0xb30   :  { %v15320_v52 = vmul.f32 %v9479_v13, %v7089_v39  ;;  %v5314_v39 = vmul.f32 %v15314_v2, %v16493_v57  ;;  %v7107_v13 = vpop.permute.xlu0 %7106 }
 0xb31   :  { %v15324_v49 = vmul.f32 %v9480_v1, %v7087_v63  ;;  %v8883_v0 = vpop.f32.mrb[68].mxu1  ;;  %v5317_v1 = vmul.f32 %v15314_v2, %v16499_v23 }
 0xb32   :  { %v9481_v36 = vadd.f32 %v8883_v0, %v5309_v8  ;;  %v6889_v18 = vpop.f32.mrb[69].mxu1  ;;  %v7151_v14 = vmul.f32 %v15320_v52, %v15320_v52 }
 0xb33   :  { %v9482_v22 = vadd.f32 %v6889_v18, %v5308_v60  ;;  %v7150_v59 = vmul.f32 %v15324_v49, %v15324_v49  ;;  %v5316_v60 = vmul.f32 %v15314_v2, %v16498_v35  ;;  %v7113_v35 = vpop.permute.xlu1 %7112 }
 0xb34   :  { %v7169_v53 = vsel %vm3574_vm6, %v7151_v14, 0.0  ;;  %v15333_v38 = vmul.f32 %v9481_v36, %v7093_v37 }
 0xb35   :  { %v15335_v41 = vmul.f32 %v9482_v22, %v7091_v62  ;;  %7170 = vadd.xlane.f32.xlu1 %v7169_v53  ;;  %v7166_v30 = vsel %vm3574_vm6, %v7150_v59, 0.0 }
 0xb36   :  { %7167 = vadd.xlane.f32.xlu0 %v7166_v30  ;;  %v7153_v61 = vmul.f32 %v15333_v38, %v15333_v38 }
 0xb37   :  { %v7152_v9 = vmul.f32 %v15335_v41, %v15335_v41 }
 0xb38   :  { %v7175_v11 = vsel %vm3574_vm6, %v7153_v61, 0.0  ;;  %v7111_v61 = vpop.permute.xlu0 %7110 }
 0xb39   :  { %v7172_v50 = vsel %vm3574_vm6, %v7152_v9, 0.0 }
 0xb3a   :  { %7173 = vadd.xlane.f32.xlu0 %v7172_v50 }
 0xb3b   :  { %v8886_v43 = vpop.f32.mrb[70].mxu1 }
 0xb3c   :  { %v9483_v25 = vadd.f32 %v8886_v43, %v5311_v55  ;;  %v6899_v45 = vpop.f32.mrb[71].mxu1 }
 0xb3d   :  { %v9484_v58 = vadd.f32 %v6899_v45, %v5310_v42  ;;  %v5321_v45 = vmul.f32 %v15314_v2, %v16484_v56 }
 0xb3e   :  { %v15348_v31 = vmul.f32 %v9483_v25, %v7097_v19  ;;  %7176 = vadd.xlane.f32.xlu0 %v7175_v11 }
 0xb3f   :  { %v15352_v51 = vmul.f32 %v9484_v58, %v7095_v28  ;;  %v8889_v47 = vpop.f32.mrb[72].mxu1  ;;  %v5319_v28 = vmul.f32 %v15314_v2, %v16481_v12 }
 0xb40   :  { %v9485_v20 = vadd.f32 %v8889_v47, %v5313_v34  ;;  %v6909_v54 = vpop.f32.mrb[73].mxu1  ;;  %v7155_v32 = vmul.f32 %v15348_v31, %v15348_v31  ;;  %v5320_v34 = vmul.f32 %v15314_v2, %v16483_v46 }
 0xb41   :  { %v9486_v5 = vadd.f32 %v6909_v54, %v5312_v44  ;;  %v7154_v26 = vmul.f32 %v15352_v51, %v15352_v51 }
 0xb42   :  { %v15360_v17 = vmul.f32 %v9485_v20, %v7101_v15  ;;  %v7181_v40 = vsel %vm3574_vm6, %v7155_v32, 0.0  ;;  %v5318_v15 = vmul.f32 %v15314_v2, %v16479_v29  ;;  %v7117_v20 = vpop.permute.xlu1 %7116  ;;  %v7115_v32 = vpop.permute.xlu0 %7114 }
 0xb43   :  { %v15365_v6 = vmul.f32 %v9486_v5, %v7099_v16  ;;  %v8892_v3 = vpop.f32.mrb[74].mxu1  ;;  %7182 = vadd.xlane.f32.xlu0 %v7181_v40  ;;  %v7178_v63 = vsel %vm3574_vm6, %v7154_v26, 0.0 }
 0xb44   :  { %v9487_v33 = vadd.f32 %v8892_v3, %v5315_v7  ;;  %v6919_v37 = vpop.f32.mrb[75].mxu1  ;;  %7179 = vadd.xlane.f32.xlu1 %v7178_v63  ;;  %v7157_v10 = vmul.f32 %v15360_v17, %v15360_v17  ;;  %v7566_v63 = vld [vmem:[%s15519_s10 + $0x10] sm:$0xff] }
 0xb45   :  { %v9488_v62 = vadd.f32 %v6919_v37, %v5314_v39  ;;  %v7156_v27 = vmul.f32 %v15365_v6, %v15365_v6  ;;  %8934 = vmatprep.mubr.msk.f32.mxu0 %vm3574_vm6, %v7566_v63 }
 0xb46   :  { %v15374_v48 = vmul.f32 %v9487_v33, %v7105_v21  ;;  %v7187_v57 = vsel %vm3574_vm6, %v7157_v10, 0.0 }
 0xb47   :  { %v15379_v8 = vmul.f32 %v9488_v62, %v7103_v4  ;;  %v8895_v0 = vpop.f32.mrb[76].mxu1  ;;  %7188 = vadd.xlane.f32.xlu0 %v7187_v57  ;;  %v7184_v36 = vsel %vm3574_vm6, %v7156_v27, 0.0 }
 0xb48   :  { %v9489_v18 = vadd.f32 %v8895_v0, %v5317_v1  ;;  %v6929_v14 = vpop.f32.mrb[77].mxu1  ;;  %7185 = vadd.xlane.f32.xlu1 %v7184_v36  ;;  %v7159_v19 = vmul.f32 %v15374_v48, %v15374_v48 }
 0xb49   :  { %v9490_v22 = vadd.f32 %v6929_v14, %v5316_v60  ;;  %v7158_v23 = vmul.f32 %v15379_v8, %v15379_v8 }
 0xb4a   :  { %v15388_v59 = vmul.f32 %v9489_v18, %v7109_v24  ;;  %v7193_v53 = vsel %vm3574_vm6, %v7159_v19, 0.0 }
 0xb4b   :  { %v15393_v30 = vmul.f32 %v9490_v22, %v7107_v13  ;;  %v8898_v9 = vpop.f32.mrb[78].mxu1  ;;  %7194 = vadd.xlane.f32.xlu0 %v7193_v53  ;;  %v7190_v50 = vsel %vm3574_vm6, %v7158_v23, 0.0  ;;  %v15435_v23 = vld [vmem:[%s15521_s9 + $0x1] ss:$0 sm:$0xff] }
 0xb4c   :  { %v9491_v16 = vadd.f32 %v8898_v9, %v5319_v28  ;;  %v6939_v55 = vpop.f32.mrb[79].mxu1  ;;  %7191 = vadd.xlane.f32.xlu1 %v7190_v50  ;;  %v7161_v43 = vmul.f32 %v15388_v59, %v15388_v59 }
 0xb4d   :  { %v9492_v12 = vadd.f32 %v6939_v55, %v5318_v15  ;;  %v7160_v42 = vmul.f32 %v15393_v30, %v15393_v30 }
 0xb4e   :  { %v15402_v25 = vmul.f32 %v9491_v16, %v7113_v35  ;;  %v7199_v29 = vsel %vm3574_vm6, %v7161_v43, 0.0 }
 0xb4f   :  { %v15407_v58 = vmul.f32 %v9492_v12, %v7111_v61  ;;  %v8901_v11 = vpop.f32.mrb[80].mxu1  ;;  %7200 = vadd.xlane.f32.xlu0 %v7199_v29  ;;  %v7196_v21 = vsel %vm3574_vm6, %v7160_v42, 0.0 }
 0xb50   :  { %v9493_v47 = vadd.f32 %v8901_v11, %v5321_v45  ;;  %v6949_v44 = vpop.f32.mrb[81].mxu1  ;;  %7197 = vadd.xlane.f32.xlu1 %v7196_v21  ;;  %v7163_v4 = vmul.f32 %v15402_v25, %v15402_v25 }
 0xb51   :  { %v9494_v54 = vadd.f32 %v6949_v44, %v5320_v34  ;;  %v7162_v56 = vmul.f32 %v15407_v58, %v15407_v58 }
 0xb52   :  { %v15416_v5 = vmul.f32 %v9493_v47, %v7117_v20  ;;  %v7205_v26 = vsel %vm3574_vm6, %v7163_v4, 0.0 }
 0xb53   :  { %v15419_v7 = vmul.f32 %v9494_v54, %v7115_v32  ;;  %7206 = vadd.xlane.f32.xlu0 %v7205_v26  ;;  %v7202_v46 = vsel %vm3574_vm6, %v7162_v56, 0.0 }
 0xb54   :  { %7203 = vadd.xlane.f32.xlu1 %v7202_v46  ;;  %v7165_v2 = vmul.f32 %v15416_v5, %v15416_v5 }
 0xb55   :  { %v7164_v40 = vmul.f32 %v15419_v7, %v15419_v7 }
 0xb56   :  { %v7211_v3 = vsel %vm3574_vm6, %v7165_v2, 0.0 }
 0xb57   :  { %7212 = vadd.xlane.f32.xlu0 %v7211_v3  ;;  %v7208_v39 = vsel %vm3574_vm6, %v7164_v40, 0.0 }
 0xb58   :  { %7209 = vadd.xlane.f32.xlu1 %v7208_v39 }
 0xbc2   :  { %v7171_v33 = vpop.xlane.xlu1 %7170 }
 0xbc3   :  { %v7215_v37 = vmul.f32 0.03125, %v7171_v33  ;;  %v7168_v10 = vpop.xlane.xlu0 %7167 }
 0xbc4   :  { %v7214_v24 = vmul.f32 0.03125, %v7168_v10 }
 0xbc5   :  { %v7231_v62 = vadd.f32 1e-05, %v7215_v37 }
 0xbc6   :  { %v7230_v27 = vadd.f32 1e-05, %v7214_v24 }
 0xbc7   :  { %10568 = vrsqrt.f32 %v7231_v62  ;;  %v7174_v13 = vpop.xlane.xlu0 %7173 }
 0xbc8   :  { %10570 = vrsqrt.f32 %v7230_v27  ;;  %v7216_v1 = vmul.f32 0.03125, %v7174_v13 }
 0xbca   :  { %v7232_v57 = vadd.f32 1e-05, %v7216_v1 }
 0xbcb   :  { %v7177_v0 = vpop.xlane.xlu0 %7176 }
 0xbcc   :  { %10572 = vrsqrt.f32 %v7232_v57  ;;  %v7217_v60 = vmul.f32 0.03125, %v7177_v0 }
 0xbce   :  { %v7233_v36 = vadd.f32 1e-05, %v7217_v60 }
 0xbd0   :  { %10574 = vrsqrt.f32 %v7233_v36  ;;  %v7183_v18 = vpop.xlane.xlu0 %7182 }
 0xbd1   :  { %v10569_v14 = vpop.eup %10568  ;;  %v7219_v19 = vmul.f32 0.03125, %v7183_v18  ;;  %v7180_v22 = vpop.xlane.xlu1 %7179 }
 0xbd2   :  { %v10571_v28 = vpop.eup %10570  ;;  %v7218_v53 = vmul.f32 0.03125, %v7180_v22  ;;  %v7263_v35 = vmul.f32 %v10569_v14, %v15320_v52 }
 0xbd3   :  { %v7235_v9 = vadd.f32 1e-05, %v7219_v19  ;;  %v7262_v15 = vmul.f32 %v10571_v28, %v15324_v49 }
 0xbd4   :  { %v7234_v50 = vadd.f32 1e-05, %v7218_v53  ;;  %v7189_v61 = vpop.xlane.xlu0 %7188  ;;  %v7284_v16 = vmul.f32 %v15435_v23, %v7263_v35 }
 0xbd5   :  { %10576 = vrsqrt.f32 %v7235_v9  ;;  %v7221_v55 = vmul.f32 0.03125, %v7189_v61  ;;  %v7186_v43 = vpop.xlane.xlu1 %7185  ;;  %v7283_v12 = vmul.f32 %v15435_v23, %v7262_v15 }
 0xbd6   :  { %v10573_v42 = vpop.eup %10572  ;;  %10578 = vrsqrt.f32 %v7234_v50  ;;  %v7220_v45 = vmul.f32 0.03125, %v7186_v43 }
 0xbd7   :  { %v7237_v29 = vadd.f32 1e-05, %v7221_v55  ;;  %v9415_v11 = vpack.c.bf16 %v7284_v16, %v7283_v12  ;;  %v7264_v44 = vmul.f32 %v10573_v42, %v15335_v41 }
 0xbd8   :  { %v7236_v34 = vadd.f32 1e-05, %v7220_v45  ;;  %v7195_v21 = vpop.xlane.xlu0 %7194 }
 0xbd9   :  { %10580 = vrsqrt.f32 %v7237_v29  ;;  %v7223_v52 = vmul.f32 0.03125, %v7195_v21  ;;  %v7192_v47 = vpop.xlane.xlu1 %7191  ;;  %9417 = vmatprep.subr.msk.bf16.mxu0 %vm13102_vm7, %v9415_v11  ;;  %v7285_v40 = vmul.f32 %v15435_v23, %v7264_v44 }
 0xbda   :  { %v10575_v4 = vpop.eup %10574  ;;  %10582 = vrsqrt.f32 %v7236_v34  ;;  %v7222_v20 = vmul.f32 0.03125, %v7192_v47  ;;  %9420 = vmatpush3.bf16.xpose.msk.msra.mxu0 %vm13102_vm7, %v9415_v11 }
 0xbdb   :  { %v7239_v54 = vadd.f32 1e-05, %v7223_v52  ;;  %v7265_v56 = vmul.f32 %v10575_v4, %v15333_v38 }
 0xbdc   :  { %v7238_v32 = vadd.f32 1e-05, %v7222_v20  ;;  %v7201_v26 = vpop.xlane.xlu0 %7200 }
 0xbdd   :  { %10584 = vrsqrt.f32 %v7239_v54  ;;  %v7225_v46 = vmul.f32 0.03125, %v7201_v26  ;;  %v7198_v2 = vpop.xlane.xlu1 %7197  ;;  %v7286_v3 = vmul.f32 %v15435_v23, %v7265_v56 }
 0xbde   :  { %10586 = vrsqrt.f32 %v7238_v32  ;;  %v7224_v41 = vmul.f32 0.03125, %v7198_v2 }
 0xbdf   :  { %v10577_v39 = vpop.eup %10576  ;;  %v7241_v63 = vadd.f32 1e-05, %v7225_v46  ;;  %v9421_v33 = vpack.c.bf16 %v7286_v3, %v7285_v40 }
 0xbe0   :  { %v10579_v37 = vpop.eup %10578  ;;  %v7240_v10 = vadd.f32 1e-05, %v7224_v41  ;;  %v7207_v24 = vpop.xlane.xlu0 %7206  ;;  %v7267_v62 = vmul.f32 %v10577_v39, %v15348_v31 }
 0xbe1   :  { %v7204_v38 = vpop.xlane.xlu1 %7203  ;;  %9423 = vmatprep.subr.msk.bf16.mxu0 %vm13102_vm7, %v9421_v33  ;;  %v7266_v27 = vmul.f32 %v10579_v37, %v15352_v51  ;;  %10588 = vrsqrt.f32 %v7241_v63  ;;  %v7227_v57 = vmul.f32 0.03125, %v7207_v24 }
 0xbe2   :  { %9426 = vmatpush3.bf16.xpose.msk.msra.mxu0 %vm13102_vm7, %v9421_v33  ;;  %v7288_v13 = vmul.f32 %v15435_v23, %v7267_v62  ;;  %10590 = vrsqrt.f32 %v7240_v10  ;;  %v7226_v36 = vmul.f32 0.03125, %v7204_v38 }
 0xbe3   :  { %v10581_v1 = vpop.eup %10580  ;;  %v7287_v0 = vmul.f32 %v15435_v23, %v7266_v27  ;;  %v7243_v22 = vadd.f32 1e-05, %v7227_v57 }
 0xbe4   :  { %v10583_v60 = vpop.eup %10582  ;;  %v7269_v31 = vmul.f32 %v10581_v1, %v15360_v17  ;;  %v7242_v35 = vadd.f32 1e-05, %v7226_v36  ;;  %v7213_v9 = vpop.xlane.xlu0 %7212 }
 0xbe5   :  { %v9427_v18 = vpack.c.bf16 %v7288_v13, %v7287_v0  ;;  %v7268_v14 = vmul.f32 %v10583_v60, %v15365_v6  ;;  %v7210_v15 = vpop.xlane.xlu1 %7209  ;;  %10592 = vrsqrt.f32 %v7243_v22  ;;  %v7229_v6 = vmul.f32 0.03125, %v7213_v9 }
 0xbe6   :  { %v7290_v51 = vmul.f32 %v15435_v23, %v7269_v31  ;;  %10594 = vrsqrt.f32 %v7242_v35  ;;  %v7228_v16 = vmul.f32 0.03125, %v7210_v15 }
 0xbe7   :  { %v10585_v19 = vpop.eup %10584  ;;  %9429 = vmatprep.subr.msk.bf16.mxu0 %vm13102_vm7, %v9427_v18  ;;  %v7289_v28 = vmul.f32 %v15435_v23, %v7268_v14  ;;  %v7245_v45 = vadd.f32 1e-05, %v7229_v6 }
 0xbe8   :  { %v10587_v53 = vpop.eup %10586  ;;  %v7271_v17 = vmul.f32 %v10585_v19, %v15374_v48 }
 0xbe9   :  { %v9433_v50 = vpack.c.bf16 %v7290_v51, %v7289_v28  ;;  %v7270_v61 = vmul.f32 %v10587_v53, %v15379_v8  ;;  %v7244_v8 = vadd.f32 1e-05, %v7228_v16  ;;  %10596 = vrsqrt.f32 %v7245_v45 }
 0xbea   :  { %9432 = vmatpush3.bf16.xpose.msk.msra.mxu0 %vm13102_vm7, %v9427_v18  ;;  %v7292_v12 = vmul.f32 %v15435_v23, %v7271_v17 }
 0xbeb   :  { %9435 = vmatprep.subr.msk.bf16.mxu0 %vm13102_vm7, %v9433_v50  ;;  %v10589_v55 = vpop.eup %10588  ;;  %v7291_v43 = vmul.f32 %v15435_v23, %v7270_v61  ;;  %10598 = vrsqrt.f32 %v7244_v8 }
 0xbec   :  { %v10591_v42 = vpop.eup %10590  ;;  %v7273_v11 = vmul.f32 %v10589_v55, %v15388_v59 }
 0xbed   :  { %v9439_v29 = vpack.c.bf16 %v7292_v12, %v7291_v43  ;;  %v7272_v48 = vmul.f32 %v10591_v42, %v15393_v30 }
 0xbee   :  { %v7294_v52 = vmul.f32 %v15435_v23, %v7273_v11 }
 0xbef   :  { %v10593_v34 = vpop.eup %10592  ;;  %v7293_v21 = vmul.f32 %v15435_v23, %v7272_v48 }
 0xbf0   :  { %v10595_v47 = vpop.eup %10594  ;;  %v7275_v30 = vmul.f32 %v10593_v34, %v15402_v25 }
 0xbf1   :  { %v9445_v44 = vpack.c.bf16 %v7294_v52, %v7293_v21  ;;  %v7274_v4 = vmul.f32 %v10595_v47, %v15407_v58 }
 0xbf2   :  { %9438 = vmatpush3.bf16.xpose.msk.msra.mxu0 %vm13102_vm7, %v9433_v50  ;;  %v7296_v54 = vmul.f32 %v15435_v23, %v7275_v30 }
 0xbf3   :  { %9441 = vmatprep.subr.msk.bf16.mxu0 %vm13102_vm7, %v9439_v29  ;;  %v10597_v59 = vpop.eup %10596  ;;  %v7295_v20 = vmul.f32 %v15435_v23, %v7274_v4 }
 0xbf4   :  { %v7277_v46 = vmul.f32 %v10597_v59, %v15416_v5  ;;  %v7567_v5 = vld [vmem:[%s15519_s10 + $0x18] sm:$0xff] }
 0xbf5   :  { %v10599_v56 = vpop.eup %10598  ;;  %v9451_v32 = vpack.c.bf16 %v7296_v54, %v7295_v20 }
 0xbf6   :  { %v7276_v26 = vmul.f32 %v10599_v56, %v15419_v7  ;;  %v7298_v58 = vmul.f32 %v15435_v23, %v7277_v46 }
 0xbf8   :  { %v7297_v25 = vmul.f32 %v15435_v23, %v7276_v26 }
 0xbfa   :  { %9444 = vmatpush3.bf16.xpose.msk.msra.mxu0 %vm13102_vm7, %v9439_v29  ;;  %v9457_v2 = vpack.c.bf16 %v7298_v58, %v7297_v25 }
 0xbfb   :  { %9447 = vmatprep.subr.msk.bf16.mxu0 %vm13102_vm7, %v9445_v44 }
 0xc02   :  { %9450 = vmatpush3.bf16.xpose.msk.msra.mxu0 %vm13102_vm7, %v9445_v44 }
 0xc03   :  { %9453 = vmatprep.subr.msk.bf16.mxu0 %vm13102_vm7, %v9451_v32 }
 0xc0a   :  { %9456 = vmatpush3.bf16.xpose.msk.msra.mxu0 %vm13102_vm7, %v9451_v32 }
 0xc0b   :  { %9459 = vmatprep.subr.msk.bf16.mxu0 %vm13102_vm7, %v9457_v2 }
 0xc12   :  { %9462 = vmatpush3.bf16.xpose.msk.msra.mxu0 %vm13102_vm7, %v9457_v2 }
 0xc19   :  { %8935 = vmatmul.mubr.msk.f32.vlgmr.msra.gmra.mrb[66].mxu0 %vm3574_vm6, %v7567_v5 }
 0xcec   :  { %v8936_v7 = vpop.f32.mrb[66].mxu0 }
 0xced   :  { %7432 = vst [vmem:[%s15522_s11 + $0x8] sm:$0xff] %v8936_v7  ;;  %v7422_v23 = vpop.f32.mrb[67].mxu0 }
 0xcee   :  { %7431 = vst [vmem:[%s15522_s11] sm:$0xff] %v7422_v23 }

</bundles_post_ra>
